<compile_context>
chip_gen: v7x
topology: tpu7x:2x2x1
jax: 0.10.0
libtpu: 0.0.40
codegen_flags: <defaults>
</compile_context>

<pallas_src>
import jax
import jax.numpy as jnp
from jax.experimental import pallas as pl
from jax.experimental.pallas import tpu as pltpu  # noqa: F401 (imported per harness contract)

F32 = jnp.float32
BF16 = jnp.bfloat16

# Small, self-consistent config: D = (C // 8) * H * W
CFG = dict(N=8, C=8, H=8, W=8, K=5, D=64, heads=4, dim_head=16, mlp_dim=64,
           depth1=2, depth2=2, depth3=2, lstm_layers=2)


# ----------------------------------------------------------------------------- helpers
def _gelu(x):
    # exact (erf-based) GELU, matching PyTorch nn.GELU() default
    return 0.5 * x * (1.0 + jax.lax.erf(x * 0.7071067811865476))


def _full_spec(shape):
    n = len(shape)
    return pl.BlockSpec(shape, lambda *_: (0,) * n)


def _call(kernel, out_shape, *args):
    """Single-invocation pallas_call with whole-array BlockSpecs (grid=())."""
    return pl.pallas_call(
        kernel,
        out_shape=out_shape,
        in_specs=[_full_spec(a.shape) for a in args],
        out_specs=_full_spec(out_shape.shape),
    )(*args)


def _bn_affine(p):
    # eval-mode BatchNorm folded into scale/shift
    sc = p['gamma'] / jnp.sqrt(p['var'] + 1e-5)
    sh = p['beta'] - p['mean'] * sc
    return sc, sh


# ----------------------------------------------------------------------------- table prep (runs ONCE per weight set)
def prepare_vit_tables(params, cfg=CFG):
    """Build all operator tables once, outside the per-forward jit path."""
    C, H, W, K = cfg['C'], cfg['H'], cfg['W'], cfg['K']
    HW = H * W
    P = K // 2
    heads, dh = cfg['heads'], cfg['dim_head']
    inner = heads * dh

    pos = jnp.arange(HW)
    hh, ww = pos // W, pos % W
    dy = hh[:, None] - hh[None, :] + P          # (q_in, p_out) tap offsets
    dx = ww[:, None] - ww[None, :] + P
    valid = (dy >= 0) & (dy < K) & (dx >= 0) & (dx < K)
    dyc = jnp.clip(dy, 0, K - 1)
    dxc = jnp.clip(dx, 0, K - 1)

    def dw_op(p):
        # channel-stacked spatial operator (C, HW, HW); eval-mode BN folded in.
        sc, sh = _bn_affine(p)                                        # (1, C)
        M = jnp.where(valid[..., None], p['w'][dyc, dxc, :], 0.0)     # (HW, HW, C)
        M = jnp.transpose(M, (2, 0, 1)) * sc.reshape(C, 1, 1)         # (C, HW, HW)
        b = (p['b'] * sc + sh).reshape(C, 1, 1)
        return [M.astype(BF16), b.astype(F32)]

    tables = []
    for blk in params['convmixer']:
        tables += dw_op(blk['dw1'])
        tables += dw_op(blk['dw2'])
        pw = blk['pw']
        scp, shp = _bn_affine(pw)
        tables += [pw['w'].reshape(C, C, 1, 1).astype(F32),           # (c_in, c_out, 1, 1)
                   pw['b'].reshape(C, 1, 1).astype(F32),
                   scp.reshape(C, 1, 1).astype(F32),
                   shp.reshape(C, 1, 1).astype(F32)]

    down = params['down']
    Co = down['w'].shape[1]
    tables += [down['w'].reshape(C, Co, 1, 1).astype(F32),
               down['b'].reshape(Co, 1, 1).astype(F32)]

    scale = dh ** -0.5
    for p in params['attn']:
        wqkv = p['wqkv'].at[:, :inner].multiply(scale)   # fold 1/sqrt(dh) into Wq
        tables += [p['ln1g'], p['ln1b'], wqkv, p['wout'], p['bout'],
                   p['ln2g'], p['ln2b'], p['w1'], p['b1'], p['w2'], p['b2']]
    for p in params['gs']:
        tables.append(p['wT'])
    for p in params['lstm']:
        tables.append(jnp.concatenate([p['wih'], p['whh']], axis=0))   # (2D, 4D)
        tables.append(p['b'])
    return tables


# ----------------------------------------------------------------------------- fused kernel
def make_vit_kernel(*, C, N, HW, Co, depth1, depth2, depth3, heads, dh, lstm_layers):
    D = Co * HW
    inner = heads * dh

    def kernel(*refs):
        x_ref, ct_ref, adj_ref = refs[0], refs[1], refs[2]
        o_ref = refs[-1]
        it = iter(refs[3:-1])

        def nxt():
            return next(it)[...]

        # ------------- conv stage: layer1 (convmixer blocks) + down -------------
        h = x_ref[...]                                          # (C, N, HW) f32
        for _ in range(depth1):
            Mdw1, bdw1 = nxt(), nxt()
            Mdw2, bdw2 = nxt(), nxt()
            Wpw, bpw, scp, shp = nxt(), nxt(), nxt(), nxt()
            # dw: conv+BN+GELU, conv+BN+GELU, residual (bf16 MXU operands, f32 acc)
            t = jnp.einsum('cnq,cqp->cnp', h.astype(BF16), Mdw1,
                           preferred_element_type=F32)
            t = _gelu(t + bdw1)
            t = jnp.einsum('cnq,cqp->cnp', t.astype(BF16), Mdw2,
                           preferred_element_type=F32)
            t = _gelu(t + bdw2) + h
            # pw: 1x1 conv (channel mix via broadcast FMA) -> GELU -> BN
            y = jnp.sum(t[:, None, :, :] * Wpw, axis=0) + bpw   # (C, N, HW)
            h = _gelu(y) * scp + shp

        Wd, bd = nxt(), nxt()
        xd = jnp.sum(h[:, None, :, :] * Wd, axis=0) + bd        # (Co, N, HW)
        if Co == 1:
            g = xd[0]                                           # (N, HW) == (N, D)
        else:
            g = jnp.transpose(xd, (1, 0, 2)).reshape(N, D)      # NCHW flatten order
        g = g + ct_ref[...]                                     # g = x + ct

        def ln(v, gamma, beta):
            mu = jnp.mean(v, axis=-1, keepdims=True)
            var = jnp.mean(jnp.square(v - mu), axis=-1, keepdims=True)
            return (v - mu) * jax.lax.rsqrt(var + 1e-5) * gamma + beta

        # ------------- layer2: attention blocks (fused qkv / out projections) -------------
        for _ in range(depth2):
            ln1g, ln1b = nxt(), nxt()
            Wqkv, Wout, bo = nxt(), nxt(), nxt()
            ln2g, ln2b = nxt(), nxt()
            W1, b1, W2, b2 = nxt(), nxt(), nxt(), nxt()

            xn = ln(g, ln1g, ln1b)
            qkv = jnp.dot(xn, Wqkv, preferred_element_type=F32)     # (N, 3*inner)
            q = qkv[:, 0:inner]
            k = qkv[:, inner:2 * inner]
            v = qkv[:, 2 * inner:3 * inner]
            head_outs = []
            for hidx in range(heads):
                sl = slice(hidx * dh, (hidx + 1) * dh)
                s = jnp.einsum('ik,jk->ij', q[:, sl], k[:, sl],
                               preferred_element_type=F32)           # (N, N)
                s = s - jnp.max(s, axis=-1, keepdims=True)
                e = jnp.exp(s)
                p = e * pl.reciprocal(jnp.sum(e, axis=-1, keepdims=True), approx=True)
                head_outs.append(jnp.dot(p, v[:, sl], preferred_element_type=F32))
            o = jnp.concatenate(head_outs, axis=-1)                  # (N, inner)
            g = g + jnp.dot(o, Wout, preferred_element_type=F32) + bo

            xn2 = ln(g, ln2g, ln2b)
            hmid = _gelu(jnp.dot(xn2, W1, preferred_element_type=F32) + b1)
            g = g + jnp.dot(hmid, W2, preferred_element_type=F32) + b2

        # ------------- layer3: gs blocks (mean aggregate, gcn=True) + jumping knowledge -------------
        adj = adj_ref[...]
        adjn = adj / jnp.sum(adj, axis=1, keepdims=True)             # (N, N), once
        jk = []
        for _ in range(depth3):
            WT = nxt()
            neigh = jnp.dot(adjn, g, preferred_element_type=F32)
            comb = jnp.maximum(jnp.dot(neigh, WT, preferred_element_type=F32), 0.0)
            ss = jnp.sum(comb * comb, axis=1, keepdims=True)
            g = comb * jax.lax.rsqrt(jnp.maximum(ss, 1e-24))         # row L2 normalize
            jk.append(g)

        # ------------- jknet: 2-layer LSTM over jk sequence, then mean -------------
        lane = jax.lax.broadcasted_iota(jnp.int32, (N, 4 * D), 1)    # hoisted mask
        g_is_tanh = (lane >= 2 * D) & (lane < 3 * D)
        layer_in = jk
        for _ in range(lstm_layers):
            Wcat, bl = nxt(), nxt()                                  # (2D, 4D), (1, 4D)
            hstate = jnp.zeros((N, D), F32)
            cstate = jnp.zeros((N, D), F32)
            outs = []
            for tt in range(depth3):
                xcat = jnp.concatenate([layer_in[tt], hstate], axis=-1)      # (N, 2D)
                gates = jnp.dot(xcat, Wcat, preferred_element_type=F32) + bl  # (N, 4D)
                act = jnp.where(g_is_tanh, jnp.tanh(gates), jax.nn.sigmoid(gates))
                ig, fg = act[:, 0:D], act[:, D:2 * D]
                gg, og = act[:, 2 * D:3 * D], act[:, 3 * D:4 * D]
                cstate = fg * cstate + ig * gg
                hstate = og * jnp.tanh(cstate)
                outs.append(hstate)
            layer_in = outs
        acc = layer_in[0]
        for tt in range(1, depth3):
            acc = acc + layer_in[tt]
        o_ref[...] = acc * (1.0 / depth3)                            # mean over sequence

    return kernel


# ----------------------------------------------------------------------------- forward
def vit_forward(x_nchw, ct, adj, tables):
    # ViT.forward: dropout(p=0.0) is identity, then mixer_transformer.
    N, C, H, W = x_nchw.shape
    HW = H * W
    D = ct.shape[-1]
    Co = D // HW
    x_cnp = jnp.transpose(x_nchw.reshape(N, C, HW), (1, 0, 2))       # (C, N, HW)
    ct2 = ct.reshape(N, D)
    kern = make_vit_kernel(C=C, N=N, HW=HW, Co=Co,
                           depth1=CFG['depth1'], depth2=CFG['depth2'],
                           depth3=CFG['depth3'], heads=CFG['heads'],
                           dh=CFG['dim_head'], lstm_layers=CFG['lstm_layers'])
    return _call(kern, jax.ShapeDtypeStruct((N, D), F32), x_cnp, ct2, adj, *tables)


# ----------------------------------------------------------------------------- params
def init_params(key):
    C, K, D = CFG['C'], CFG['K'], CFG['D']
    heads, dh, mlp = CFG['heads'], CFG['dim_head'], CFG['mlp_dim']
    inner = heads * dh
    ks = iter(jax.random.split(key, 512))

    def nrm(shape, s=0.1):
        return jax.random.normal(next(ks), shape, F32) * s

    def bn_p():
        return dict(gamma=1.0 + nrm((1, C), 0.05), beta=nrm((1, C), 0.05),
                    mean=nrm((1, C), 0.05), var=1.0 + jnp.abs(nrm((1, C), 0.05)))

    convmixer = []
    for _ in range(CFG['depth1']):
        convmixer.append(dict(
            dw1=dict(w=nrm((K, K, C), 0.2), b=nrm((1, C), 0.05), **bn_p()),
            dw2=dict(w=nrm((K, K, C), 0.2), b=nrm((1, C), 0.05), **bn_p()),
            pw=dict(w=nrm((C, C), 0.2), b=nrm((1, C), 0.05), **bn_p()),
        ))

    down = dict(w=nrm((C, C // 8), 0.2), b=nrm((1, C // 8), 0.05))

    attn = []
    for _ in range(CFG['depth2']):
        attn.append(dict(
            ln1g=1.0 + nrm((1, D), 0.05), ln1b=nrm((1, D), 0.05),
            wqkv=nrm((D, 3 * inner), 0.05),
            wout=nrm((inner, D), 0.05), bout=nrm((1, D), 0.05),
            ln2g=1.0 + nrm((1, D), 0.05), ln2b=nrm((1, D), 0.05),
            w1=nrm((D, mlp), 0.05), b1=nrm((1, mlp), 0.05),
            w2=nrm((mlp, D), 0.05), b2=nrm((1, D), 0.05),
        ))

    gs = [dict(wT=nrm((D, D), 0.1)) for _ in range(CFG['depth3'])]

    lstm = [dict(wih=nrm((D, 4 * D), 0.1), whh=nrm((D, 4 * D), 0.1),
                 b=nrm((1, 4 * D), 0.05)) for _ in range(CFG['lstm_layers'])]

    return dict(convmixer=convmixer, down=down, attn=attn, gs=gs, lstm=lstm)


# ----------------------------------------------------------------------------- main
if __name__ == "__main__":
    key = jax.random.PRNGKey(0)
    kx, kc, kp = jax.random.split(key, 3)
    N, C, H, W, D = CFG['N'], CFG['C'], CFG['H'], CFG['W'], CFG['D']

    x = jax.random.normal(kx, (N, C, H, W), F32)                   # NCHW, like PyTorch
    ct = jax.random.normal(kc, (1, N, D), F32) * 0.1               # position/centroid embedding
    idx = jnp.arange(N)
    adj = (jnp.abs(idx[:, None] - idx[None, :]) <= 1).astype(F32)  # adjacency w/ self-loops

    params = init_params(kp)
    tables = prepare_vit_tables(params)                            # built ONCE per weight set
    tables = jax.block_until_ready(tables)

    fwd = jax.jit(vit_forward)
    out = jax.block_until_ready(fwd(x, ct, adj, tables))

    assert out.shape == (N, D), out.shape
    assert bool(jnp.all(jnp.isfinite(out)))
    print("KERNEL_OK")
</pallas_src>

<mosaic_0001>
module attributes {stable_mosaic.version = 11 : i64} {
  func.func @kernel(%arg0: memref<8x8x64xf32, #tpu.memory_space<vmem>>, %arg1: memref<8x64xf32, #tpu.memory_space<vmem>>, %arg2: memref<8x8xf32, #tpu.memory_space<vmem>>, %arg3: memref<8x64x64xbf16, #tpu.memory_space<vmem>>, %arg4: memref<8x1x1xf32, #tpu.memory_space<vmem>>, %arg5: memref<8x64x64xbf16, #tpu.memory_space<vmem>>, %arg6: memref<8x1x1xf32, #tpu.memory_space<vmem>>, %arg7: memref<8x8x1x1xf32, #tpu.memory_space<vmem>>, %arg8: memref<8x1x1xf32, #tpu.memory_space<vmem>>, %arg9: memref<8x1x1xf32, #tpu.memory_space<vmem>>, %arg10: memref<8x1x1xf32, #tpu.memory_space<vmem>>, %arg11: memref<8x64x64xbf16, #tpu.memory_space<vmem>>, %arg12: memref<8x1x1xf32, #tpu.memory_space<vmem>>, %arg13: memref<8x64x64xbf16, #tpu.memory_space<vmem>>, %arg14: memref<8x1x1xf32, #tpu.memory_space<vmem>>, %arg15: memref<8x8x1x1xf32, #tpu.memory_space<vmem>>, %arg16: memref<8x1x1xf32, #tpu.memory_space<vmem>>, %arg17: memref<8x1x1xf32, #tpu.memory_space<vmem>>, %arg18: memref<8x1x1xf32, #tpu.memory_space<vmem>>, %arg19: memref<8x1x1x1xf32, #tpu.memory_space<vmem>>, %arg20: memref<1x1x1xf32, #tpu.memory_space<vmem>>, %arg21: memref<1x64xf32, #tpu.memory_space<vmem>>, %arg22: memref<1x64xf32, #tpu.memory_space<vmem>>, %arg23: memref<64x192xf32, #tpu.memory_space<vmem>>, %arg24: memref<64x64xf32, #tpu.memory_space<vmem>>, %arg25: memref<1x64xf32, #tpu.memory_space<vmem>>, %arg26: memref<1x64xf32, #tpu.memory_space<vmem>>, %arg27: memref<1x64xf32, #tpu.memory_space<vmem>>, %arg28: memref<64x64xf32, #tpu.memory_space<vmem>>, %arg29: memref<1x64xf32, #tpu.memory_space<vmem>>, %arg30: memref<64x64xf32, #tpu.memory_space<vmem>>, %arg31: memref<1x64xf32, #tpu.memory_space<vmem>>, %arg32: memref<1x64xf32, #tpu.memory_space<vmem>>, %arg33: memref<1x64xf32, #tpu.memory_space<vmem>>, %arg34: memref<64x192xf32, #tpu.memory_space<vmem>>, %arg35: memref<64x64xf32, #tpu.memory_space<vmem>>, %arg36: memref<1x64xf32, #tpu.memory_space<vmem>>, %arg37: memref<1x64xf32, #tpu.memory_space<vmem>>, %arg38: memref<1x64xf32, #tpu.memory_space<vmem>>, %arg39: memref<64x64xf32, #tpu.memory_space<vmem>>, %arg40: memref<1x64xf32, #tpu.memory_space<vmem>>, %arg41: memref<64x64xf32, #tpu.memory_space<vmem>>, %arg42: memref<1x64xf32, #tpu.memory_space<vmem>>, %arg43: memref<64x64xf32, #tpu.memory_space<vmem>>, %arg44: memref<64x64xf32, #tpu.memory_space<vmem>>, %arg45: memref<128x256xf32, #tpu.memory_space<vmem>>, %arg46: memref<1x256xf32, #tpu.memory_space<vmem>>, %arg47: memref<128x256xf32, #tpu.memory_space<vmem>>, %arg48: memref<1x256xf32, #tpu.memory_space<vmem>>, %arg49: memref<8x64xf32, #tpu.memory_space<vmem>>) attributes {dimension_semantics = [], scalar_prefetch = 0 : i64, scratch_operands = 0 : i64, tpu.core_type = #tpu.core_type<tc>} {
    %c0 = arith.constant 0 : index
    %c0_0 = arith.constant 0 : index
    %c0_1 = arith.constant 0 : index
    %0 = vector.load %arg0[%c0, %c0_0, %c0_1] : memref<8x8x64xf32, #tpu.memory_space<vmem>>, vector<8x8x64xf32>
    %c0_2 = arith.constant 0 : index
    %c0_3 = arith.constant 0 : index
    %c0_4 = arith.constant 0 : index
    %1 = vector.load %arg3[%c0_2, %c0_3, %c0_4] : memref<8x64x64xbf16, #tpu.memory_space<vmem>>, vector<8x64x64xbf16>
    %c0_5 = arith.constant 0 : index
    %c0_6 = arith.constant 0 : index
    %c0_7 = arith.constant 0 : index
    %2 = vector.load %arg4[%c0_5, %c0_6, %c0_7] : memref<8x1x1xf32, #tpu.memory_space<vmem>>, vector<8x1x1xf32>
    %c0_8 = arith.constant 0 : index
    %c0_9 = arith.constant 0 : index
    %c0_10 = arith.constant 0 : index
    %3 = vector.load %arg5[%c0_8, %c0_9, %c0_10] : memref<8x64x64xbf16, #tpu.memory_space<vmem>>, vector<8x64x64xbf16>
    %c0_11 = arith.constant 0 : index
    %c0_12 = arith.constant 0 : index
    %c0_13 = arith.constant 0 : index
    %4 = vector.load %arg6[%c0_11, %c0_12, %c0_13] : memref<8x1x1xf32, #tpu.memory_space<vmem>>, vector<8x1x1xf32>
    %c0_14 = arith.constant 0 : index
    %c0_15 = arith.constant 0 : index
    %c0_16 = arith.constant 0 : index
    %c0_17 = arith.constant 0 : index
    %5 = vector.load %arg7[%c0_14, %c0_15, %c0_16, %c0_17] : memref<8x8x1x1xf32, #tpu.memory_space<vmem>>, vector<8x8x1x1xf32>
    %c0_18 = arith.constant 0 : index
    %c0_19 = arith.constant 0 : index
    %c0_20 = arith.constant 0 : index
    %6 = vector.load %arg8[%c0_18, %c0_19, %c0_20] : memref<8x1x1xf32, #tpu.memory_space<vmem>>, vector<8x1x1xf32>
    %c0_21 = arith.constant 0 : index
    %c0_22 = arith.constant 0 : index
    %c0_23 = arith.constant 0 : index
    %7 = vector.load %arg9[%c0_21, %c0_22, %c0_23] : memref<8x1x1xf32, #tpu.memory_space<vmem>>, vector<8x1x1xf32>
    %c0_24 = arith.constant 0 : index
    %c0_25 = arith.constant 0 : index
    %c0_26 = arith.constant 0 : index
    %8 = vector.load %arg10[%c0_24, %c0_25, %c0_26] : memref<8x1x1xf32, #tpu.memory_space<vmem>>, vector<8x1x1xf32>
    %9 = arith.truncf %0 : vector<8x8x64xf32> to vector<8x8x64xbf16>
    "tpu.trace_start"() <{level = 10 : i32, message = "cnq,cqp->cnp"}> : () -> ()
    %cst = arith.constant dense<0.000000e+00> : vector<8x8x64xf32>
    %10 = tpu.matmul %9, %1, %cst {dimension_numbers = #tpu.dot_dimension_numbers<[2], [1], [1], [2], [0, 0, 0, 1, 1, 2], [0], [0]>} : vector<8x8x64xbf16>, vector<8x64x64xbf16>, vector<8x8x64xf32> -> vector<8x8x64xf32>
    "tpu.trace_stop"() : () -> ()
    %11 = vector.broadcast %2 : vector<8x1x1xf32> to vector<8x8x64xf32>
    %12 = arith.addf %10, %11 : vector<8x8x64xf32>
    %cst_27 = arith.constant 5.000000e-01 : f32
    %13 = vector.broadcast %cst_27 : f32 to vector<8x8x64xf32>
    %14 = arith.mulf %13, %12 : vector<8x8x64xf32>
    %cst_28 = arith.constant 0.707106769 : f32
    %15 = vector.broadcast %cst_28 : f32 to vector<8x8x64xf32>
    %16 = arith.mulf %12, %15 : vector<8x8x64xf32>
    %17 = math.erf %16 : vector<8x8x64xf32>
    %cst_29 = arith.constant 1.000000e+00 : f32
    %18 = vector.broadcast %cst_29 : f32 to vector<8x8x64xf32>
    %19 = arith.addf %18, %17 : vector<8x8x64xf32>
    %20 = arith.mulf %14, %19 : vector<8x8x64xf32>
    %21 = arith.truncf %20 : vector<8x8x64xf32> to vector<8x8x64xbf16>
    "tpu.trace_start"() <{level = 10 : i32, message = "cnq,cqp->cnp"}> : () -> ()
    %cst_30 = arith.constant dense<0.000000e+00> : vector<8x8x64xf32>
    %22 = tpu.matmul %21, %3, %cst_30 {dimension_numbers = #tpu.dot_dimension_numbers<[2], [1], [1], [2], [0, 0, 0, 1, 1, 2], [0], [0]>} : vector<8x8x64xbf16>, vector<8x64x64xbf16>, vector<8x8x64xf32> -> vector<8x8x64xf32>
    "tpu.trace_stop"() : () -> ()
    %23 = vector.broadcast %4 : vector<8x1x1xf32> to vector<8x8x64xf32>
    %24 = arith.addf %22, %23 : vector<8x8x64xf32>
    %cst_31 = arith.constant 5.000000e-01 : f32
    %25 = vector.broadcast %cst_31 : f32 to vector<8x8x64xf32>
    %26 = arith.mulf %25, %24 : vector<8x8x64xf32>
    %cst_32 = arith.constant 0.707106769 : f32
    %27 = vector.broadcast %cst_32 : f32 to vector<8x8x64xf32>
    %28 = arith.mulf %24, %27 : vector<8x8x64xf32>
    %29 = math.erf %28 : vector<8x8x64xf32>
    %cst_33 = arith.constant 1.000000e+00 : f32
    %30 = vector.broadcast %cst_33 : f32 to vector<8x8x64xf32>
    %31 = arith.addf %30, %29 : vector<8x8x64xf32>
    %32 = arith.mulf %26, %31 : vector<8x8x64xf32>
    %33 = arith.addf %32, %0 : vector<8x8x64xf32>
    %34 = vector.shape_cast %33 : vector<8x8x64xf32> to vector<8x1x8x64xf32>
    %35 = vector.broadcast %34 : vector<8x1x8x64xf32> to vector<8x8x8x64xf32>
    %36 = vector.broadcast %5 : vector<8x8x1x1xf32> to vector<8x8x8x64xf32>
    %37 = arith.mulf %35, %36 : vector<8x8x8x64xf32>
    %cst_34 = arith.constant dense<0.000000e+00> : vector<8x8x64xf32>
    %38 = vector.multi_reduction <add>, %37, %cst_34 [0] : vector<8x8x8x64xf32> to vector<8x8x64xf32>
    %39 = vector.broadcast %6 : vector<8x1x1xf32> to vector<8x8x64xf32>
    %40 = arith.addf %38, %39 : vector<8x8x64xf32>
    %cst_35 = arith.constant 5.000000e-01 : f32
    %41 = vector.broadcast %cst_35 : f32 to vector<8x8x64xf32>
    %42 = arith.mulf %41, %40 : vector<8x8x64xf32>
    %cst_36 = arith.constant 0.707106769 : f32
    %43 = vector.broadcast %cst_36 : f32 to vector<8x8x64xf32>
    %44 = arith.mulf %40, %43 : vector<8x8x64xf32>
    %45 = math.erf %44 : vector<8x8x64xf32>
    %cst_37 = arith.constant 1.000000e+00 : f32
    %46 = vector.broadcast %cst_37 : f32 to vector<8x8x64xf32>
    %47 = arith.addf %46, %45 : vector<8x8x64xf32>
    %48 = arith.mulf %42, %47 : vector<8x8x64xf32>
    %49 = vector.broadcast %7 : vector<8x1x1xf32> to vector<8x8x64xf32>
    %50 = arith.mulf %48, %49 : vector<8x8x64xf32>
    %51 = vector.broadcast %8 : vector<8x1x1xf32> to vector<8x8x64xf32>
    %52 = arith.addf %50, %51 : vector<8x8x64xf32>
    %c0_38 = arith.constant 0 : index
    %c0_39 = arith.constant 0 : index
    %c0_40 = arith.constant 0 : index
    %53 = vector.load %arg11[%c0_38, %c0_39, %c0_40] : memref<8x64x64xbf16, #tpu.memory_space<vmem>>, vector<8x64x64xbf16>
    %c0_41 = arith.constant 0 : index
    %c0_42 = arith.constant 0 : index
    %c0_43 = arith.constant 0 : index
    %54 = vector.load %arg12[%c0_41, %c0_42, %c0_43] : memref<8x1x1xf32, #tpu.memory_space<vmem>>, vector<8x1x1xf32>
    %c0_44 = arith.constant 0 : index
    %c0_45 = arith.constant 0 : index
    %c0_46 = arith.constant 0 : index
    %55 = vector.load %arg13[%c0_44, %c0_45, %c0_46] : memref<8x64x64xbf16, #tpu.memory_space<vmem>>, vector<8x64x64xbf16>
    %c0_47 = arith.constant 0 : index
    %c0_48 = arith.constant 0 : index
    %c0_49 = arith.constant 0 : index
    %56 = vector.load %arg14[%c0_47, %c0_48, %c0_49] : memref<8x1x1xf32, #tpu.memory_space<vmem>>, vector<8x1x1xf32>
    %c0_50 = arith.constant 0 : index
    %c0_51 = arith.constant 0 : index
    %c0_52 = arith.constant 0 : index
    %c0_53 = arith.constant 0 : index
    %57 = vector.load %arg15[%c0_50, %c0_51, %c0_52, %c0_53] : memref<8x8x1x1xf32, #tpu.memory_space<vmem>>, vector<8x8x1x1xf32>
    %c0_54 = arith.constant 0 : index
    %c0_55 = arith.constant 0 : index
    %c0_56 = arith.constant 0 : index
    %58 = vector.load %arg16[%c0_54, %c0_55, %c0_56] : memref<8x1x1xf32, #tpu.memory_space<vmem>>, vector<8x1x1xf32>
    %c0_57 = arith.constant 0 : index
    %c0_58 = arith.constant 0 : index
    %c0_59 = arith.constant 0 : index
    %59 = vector.load %arg17[%c0_57, %c0_58, %c0_59] : memref<8x1x1xf32, #tpu.memory_space<vmem>>, vector<8x1x1xf32>
    %c0_60 = arith.constant 0 : index
    %c0_61 = arith.constant 0 : index
    %c0_62 = arith.constant 0 : index
    %60 = vector.load %arg18[%c0_60, %c0_61, %c0_62] : memref<8x1x1xf32, #tpu.memory_space<vmem>>, vector<8x1x1xf32>
    %61 = arith.truncf %52 : vector<8x8x64xf32> to vector<8x8x64xbf16>
    "tpu.trace_start"() <{level = 10 : i32, message = "cnq,cqp->cnp"}> : () -> ()
    %cst_63 = arith.constant dense<0.000000e+00> : vector<8x8x64xf32>
    %62 = tpu.matmul %61, %53, %cst_63 {dimension_numbers = #tpu.dot_dimension_numbers<[2], [1], [1], [2], [0, 0, 0, 1, 1, 2], [0], [0]>} : vector<8x8x64xbf16>, vector<8x64x64xbf16>, vector<8x8x64xf32> -> vector<8x8x64xf32>
    "tpu.trace_stop"() : () -> ()
    %63 = vector.broadcast %54 : vector<8x1x1xf32> to vector<8x8x64xf32>
    %64 = arith.addf %62, %63 : vector<8x8x64xf32>
    %cst_64 = arith.constant 5.000000e-01 : f32
    %65 = vector.broadcast %cst_64 : f32 to vector<8x8x64xf32>
    %66 = arith.mulf %65, %64 : vector<8x8x64xf32>
    %cst_65 = arith.constant 0.707106769 : f32
    %67 = vector.broadcast %cst_65 : f32 to vector<8x8x64xf32>
    %68 = arith.mulf %64, %67 : vector<8x8x64xf32>
    %69 = math.erf %68 : vector<8x8x64xf32>
    %cst_66 = arith.constant 1.000000e+00 : f32
    %70 = vector.broadcast %cst_66 : f32 to vector<8x8x64xf32>
    %71 = arith.addf %70, %69 : vector<8x8x64xf32>
    %72 = arith.mulf %66, %71 : vector<8x8x64xf32>
    %73 = arith.truncf %72 : vector<8x8x64xf32> to vector<8x8x64xbf16>
    "tpu.trace_start"() <{level = 10 : i32, message = "cnq,cqp->cnp"}> : () -> ()
    %cst_67 = arith.constant dense<0.000000e+00> : vector<8x8x64xf32>
    %74 = tpu.matmul %73, %55, %cst_67 {dimension_numbers = #tpu.dot_dimension_numbers<[2], [1], [1], [2], [0, 0, 0, 1, 1, 2], [0], [0]>} : vector<8x8x64xbf16>, vector<8x64x64xbf16>, vector<8x8x64xf32> -> vector<8x8x64xf32>
    "tpu.trace_stop"() : () -> ()
    %75 = vector.broadcast %56 : vector<8x1x1xf32> to vector<8x8x64xf32>
    %76 = arith.addf %74, %75 : vector<8x8x64xf32>
    %cst_68 = arith.constant 5.000000e-01 : f32
    %77 = vector.broadcast %cst_68 : f32 to vector<8x8x64xf32>
    %78 = arith.mulf %77, %76 : vector<8x8x64xf32>
    %cst_69 = arith.constant 0.707106769 : f32
    %79 = vector.broadcast %cst_69 : f32 to vector<8x8x64xf32>
    %80 = arith.mulf %76, %79 : vector<8x8x64xf32>
    %81 = math.erf %80 : vector<8x8x64xf32>
    %cst_70 = arith.constant 1.000000e+00 : f32
    %82 = vector.broadcast %cst_70 : f32 to vector<8x8x64xf32>
    %83 = arith.addf %82, %81 : vector<8x8x64xf32>
    %84 = arith.mulf %78, %83 : vector<8x8x64xf32>
    %85 = arith.addf %84, %52 : vector<8x8x64xf32>
    %86 = vector.shape_cast %85 : vector<8x8x64xf32> to vector<8x1x8x64xf32>
    %87 = vector.broadcast %86 : vector<8x1x8x64xf32> to vector<8x8x8x64xf32>
    %88 = vector.broadcast %57 : vector<8x8x1x1xf32> to vector<8x8x8x64xf32>
    %89 = arith.mulf %87, %88 : vector<8x8x8x64xf32>
    %cst_71 = arith.constant dense<0.000000e+00> : vector<8x8x64xf32>
    %90 = vector.multi_reduction <add>, %89, %cst_71 [0] : vector<8x8x8x64xf32> to vector<8x8x64xf32>
    %91 = vector.broadcast %58 : vector<8x1x1xf32> to vector<8x8x64xf32>
    %92 = arith.addf %90, %91 : vector<8x8x64xf32>
    %cst_72 = arith.constant 5.000000e-01 : f32
    %93 = vector.broadcast %cst_72 : f32 to vector<8x8x64xf32>
    %94 = arith.mulf %93, %92 : vector<8x8x64xf32>
    %cst_73 = arith.constant 0.707106769 : f32
    %95 = vector.broadcast %cst_73 : f32 to vector<8x8x64xf32>
    %96 = arith.mulf %92, %95 : vector<8x8x64xf32>
    %97 = math.erf %96 : vector<8x8x64xf32>
    %cst_74 = arith.constant 1.000000e+00 : f32
    %98 = vector.broadcast %cst_74 : f32 to vector<8x8x64xf32>
    %99 = arith.addf %98, %97 : vector<8x8x64xf32>
    %100 = arith.mulf %94, %99 : vector<8x8x64xf32>
    %101 = vector.broadcast %59 : vector<8x1x1xf32> to vector<8x8x64xf32>
    %102 = arith.mulf %100, %101 : vector<8x8x64xf32>
    %103 = vector.broadcast %60 : vector<8x1x1xf32> to vector<8x8x64xf32>
    %104 = arith.addf %102, %103 : vector<8x8x64xf32>
    %c0_75 = arith.constant 0 : index
    %c0_76 = arith.constant 0 : index
    %c0_77 = arith.constant 0 : index
    %c0_78 = arith.constant 0 : index
    %105 = vector.load %arg19[%c0_75, %c0_76, %c0_77, %c0_78] : memref<8x1x1x1xf32, #tpu.memory_space<vmem>>, vector<8x1x1x1xf32>
    %c0_79 = arith.constant 0 : index
    %c0_80 = arith.constant 0 : index
    %c0_81 = arith.constant 0 : index
    %106 = vector.load %arg20[%c0_79, %c0_80, %c0_81] : memref<1x1x1xf32, #tpu.memory_space<vmem>>, vector<1x1x1xf32>
    %107 = vector.shape_cast %104 : vector<8x8x64xf32> to vector<8x1x8x64xf32>
    %108 = vector.broadcast %105 : vector<8x1x1x1xf32> to vector<8x1x8x64xf32>
    %109 = arith.mulf %107, %108 : vector<8x1x8x64xf32>
    %cst_82 = arith.constant dense<0.000000e+00> : vector<1x8x64xf32>
    %110 = vector.multi_reduction <add>, %109, %cst_82 [0] : vector<8x1x8x64xf32> to vector<1x8x64xf32>
    %111 = vector.broadcast %106 : vector<1x1x1xf32> to vector<1x8x64xf32>
    %112 = arith.addf %110, %111 : vector<1x8x64xf32>
    %113 = vector.shape_cast %112 : vector<1x8x64xf32> to vector<8x64xf32>
    %c0_83 = arith.constant 0 : index
    %c0_84 = arith.constant 0 : index
    %114 = vector.load %arg1[%c0_83, %c0_84] : memref<8x64xf32, #tpu.memory_space<vmem>>, vector<8x64xf32>
    %115 = arith.addf %113, %114 : vector<8x64xf32>
    %c0_85 = arith.constant 0 : index
    %c0_86 = arith.constant 0 : index
    %116 = vector.load %arg21[%c0_85, %c0_86] : memref<1x64xf32, #tpu.memory_space<vmem>>, vector<1x64xf32>
    %c0_87 = arith.constant 0 : index
    %c0_88 = arith.constant 0 : index
    %117 = vector.load %arg22[%c0_87, %c0_88] : memref<1x64xf32, #tpu.memory_space<vmem>>, vector<1x64xf32>
    %c0_89 = arith.constant 0 : index
    %c0_90 = arith.constant 0 : index
    %118 = vector.load %arg23[%c0_89, %c0_90] : memref<64x192xf32, #tpu.memory_space<vmem>>, vector<64x192xf32>
    %c0_91 = arith.constant 0 : index
    %c0_92 = arith.constant 0 : index
    %119 = vector.load %arg24[%c0_91, %c0_92] : memref<64x64xf32, #tpu.memory_space<vmem>>, vector<64x64xf32>
    %c0_93 = arith.constant 0 : index
    %c0_94 = arith.constant 0 : index
    %120 = vector.load %arg25[%c0_93, %c0_94] : memref<1x64xf32, #tpu.memory_space<vmem>>, vector<1x64xf32>
    %c0_95 = arith.constant 0 : index
    %c0_96 = arith.constant 0 : index
    %121 = vector.load %arg26[%c0_95, %c0_96] : memref<1x64xf32, #tpu.memory_space<vmem>>, vector<1x64xf32>
    %c0_97 = arith.constant 0 : index
    %c0_98 = arith.constant 0 : index
    %122 = vector.load %arg27[%c0_97, %c0_98] : memref<1x64xf32, #tpu.memory_space<vmem>>, vector<1x64xf32>
    %c0_99 = arith.constant 0 : index
    %c0_100 = arith.constant 0 : index
    %123 = vector.load %arg28[%c0_99, %c0_100] : memref<64x64xf32, #tpu.memory_space<vmem>>, vector<64x64xf32>
    %c0_101 = arith.constant 0 : index
    %c0_102 = arith.constant 0 : index
    %124 = vector.load %arg29[%c0_101, %c0_102] : memref<1x64xf32, #tpu.memory_space<vmem>>, vector<1x64xf32>
    %c0_103 = arith.constant 0 : index
    %c0_104 = arith.constant 0 : index
    %125 = vector.load %arg30[%c0_103, %c0_104] : memref<64x64xf32, #tpu.memory_space<vmem>>, vector<64x64xf32>
    %c0_105 = arith.constant 0 : index
    %c0_106 = arith.constant 0 : index
    %126 = vector.load %arg31[%c0_105, %c0_106] : memref<1x64xf32, #tpu.memory_space<vmem>>, vector<1x64xf32>
    %cst_107 = arith.constant dense<0.000000e+00> : vector<8xf32>
    %127 = vector.multi_reduction <add>, %115, %cst_107 [1] : vector<8x64xf32> to vector<8xf32>
    %128 = vector.shape_cast %127 : vector<8xf32> to vector<8x1xf32>
    %cst_108 = arith.constant 6.400000e+01 : f32
    %129 = vector.broadcast %cst_108 : f32 to vector<8x1xf32>
    %130 = arith.divf %128, %129 : vector<8x1xf32>
    %131 = vector.broadcast %130 : vector<8x1xf32> to vector<8x64xf32>
    %132 = arith.subf %115, %131 : vector<8x64xf32>
    %133 = arith.mulf %132, %132 : vector<8x64xf32>
    %cst_109 = arith.constant dense<0.000000e+00> : vector<8xf32>
    %134 = vector.multi_reduction <add>, %133, %cst_109 [1] : vector<8x64xf32> to vector<8xf32>
    %135 = vector.shape_cast %134 : vector<8xf32> to vector<8x1xf32>
    %cst_110 = arith.constant 6.400000e+01 : f32
    %136 = vector.broadcast %cst_110 : f32 to vector<8x1xf32>
    %137 = arith.divf %135, %136 : vector<8x1xf32>
    %138 = vector.broadcast %130 : vector<8x1xf32> to vector<8x64xf32>
    %139 = arith.subf %115, %138 : vector<8x64xf32>
    %cst_111 = arith.constant 9.99999974E-6 : f32
    %140 = vector.broadcast %cst_111 : f32 to vector<8x1xf32>
    %141 = arith.addf %137, %140 : vector<8x1xf32>
    %142 = math.rsqrt %141 : vector<8x1xf32>
    %143 = vector.broadcast %142 : vector<8x1xf32> to vector<8x64xf32>
    %144 = arith.mulf %139, %143 : vector<8x64xf32>
    %145 = vector.broadcast %116 : vector<1x64xf32> to vector<8x64xf32>
    %146 = arith.mulf %144, %145 : vector<8x64xf32>
    %147 = vector.broadcast %117 : vector<1x64xf32> to vector<8x64xf32>
    %148 = arith.addf %146, %147 : vector<8x64xf32>
    %cst_112 = arith.constant dense<0.000000e+00> : vector<8x192xf32>
    %149 = tpu.matmul %148, %118, %cst_112 {dimension_numbers = #tpu.dot_dimension_numbers<[1], [0], [0], [1], [0, 0, 1, 1], [], []>} : vector<8x64xf32>, vector<64x192xf32>, vector<8x192xf32> -> vector<8x192xf32>
    %150 = vector.extract_strided_slice %149 {offsets = [0, 0], sizes = [8, 64], strides = [1, 1]} : vector<8x192xf32> to vector<8x64xf32>
    %151 = vector.extract_strided_slice %149 {offsets = [0, 64], sizes = [8, 64], strides = [1, 1]} : vector<8x192xf32> to vector<8x64xf32>
    %152 = vector.extract_strided_slice %149 {offsets = [0, 128], sizes = [8, 64], strides = [1, 1]} : vector<8x192xf32> to vector<8x64xf32>
    %153 = vector.extract_strided_slice %150 {offsets = [0, 0], sizes = [8, 16], strides = [1, 1]} : vector<8x64xf32> to vector<8x16xf32>
    %154 = vector.extract_strided_slice %151 {offsets = [0, 0], sizes = [8, 16], strides = [1, 1]} : vector<8x64xf32> to vector<8x16xf32>
    "tpu.trace_start"() <{level = 10 : i32, message = "ik,jk->ij"}> : () -> ()
    %cst_113 = arith.constant dense<0.000000e+00> : vector<8x8xf32>
    %155 = tpu.matmul %153, %154, %cst_113 {dimension_numbers = #tpu.dot_dimension_numbers<[1], [1], [0], [0], [0, 0, 1, 0], [], []>} : vector<8x16xf32>, vector<8x16xf32>, vector<8x8xf32> -> vector<8x8xf32>
    "tpu.trace_stop"() : () -> ()
    %cst_114 = arith.constant dense<0xFF800000> : vector<8xf32>
    %156 = vector.multi_reduction <maximumf>, %155, %cst_114 [1] : vector<8x8xf32> to vector<8xf32>
    %157 = vector.shape_cast %156 : vector<8xf32> to vector<8x1xf32>
    %158 = vector.broadcast %157 : vector<8x1xf32> to vector<8x8xf32>
    %159 = arith.subf %155, %158 : vector<8x8xf32>
    %160 = math.exp %159 : vector<8x8xf32>
    %cst_115 = arith.constant dense<0.000000e+00> : vector<8xf32>
    %161 = vector.multi_reduction <add>, %160, %cst_115 [1] : vector<8x8xf32> to vector<8xf32>
    %162 = vector.shape_cast %161 : vector<8xf32> to vector<8x1xf32>
    %163 = tpu.reciprocal %162 {approx = true} : vector<8x1xf32> -> vector<8x1xf32>
    %164 = vector.broadcast %163 : vector<8x1xf32> to vector<8x8xf32>
    %165 = arith.mulf %160, %164 : vector<8x8xf32>
    %166 = vector.extract_strided_slice %152 {offsets = [0, 0], sizes = [8, 16], strides = [1, 1]} : vector<8x64xf32> to vector<8x16xf32>
    %cst_116 = arith.constant dense<0.000000e+00> : vector<8x16xf32>
    %167 = tpu.matmul %165, %166, %cst_116 {dimension_numbers = #tpu.dot_dimension_numbers<[1], [0], [0], [1], [0, 0, 1, 1], [], []>} : vector<8x8xf32>, vector<8x16xf32>, vector<8x16xf32> -> vector<8x16xf32>
    %168 = vector.extract_strided_slice %150 {offsets = [0, 16], sizes = [8, 16], strides = [1, 1]} : vector<8x64xf32> to vector<8x16xf32>
    %169 = vector.extract_strided_slice %151 {offsets = [0, 16], sizes = [8, 16], strides = [1, 1]} : vector<8x64xf32> to vector<8x16xf32>
    "tpu.trace_start"() <{level = 10 : i32, message = "ik,jk->ij"}> : () -> ()
    %cst_117 = arith.constant dense<0.000000e+00> : vector<8x8xf32>
    %170 = tpu.matmul %168, %169, %cst_117 {dimension_numbers = #tpu.dot_dimension_numbers<[1], [1], [0], [0], [0, 0, 1, 0], [], []>} : vector<8x16xf32>, vector<8x16xf32>, vector<8x8xf32> -> vector<8x8xf32>
    "tpu.trace_stop"() : () -> ()
    %cst_118 = arith.constant dense<0xFF800000> : vector<8xf32>
    %171 = vector.multi_reduction <maximumf>, %170, %cst_118 [1] : vector<8x8xf32> to vector<8xf32>
    %172 = vector.shape_cast %171 : vector<8xf32> to vector<8x1xf32>
    %173 = vector.broadcast %172 : vector<8x1xf32> to vector<8x8xf32>
    %174 = arith.subf %170, %173 : vector<8x8xf32>
    %175 = math.exp %174 : vector<8x8xf32>
    %cst_119 = arith.constant dense<0.000000e+00> : vector<8xf32>
    %176 = vector.multi_reduction <add>, %175, %cst_119 [1] : vector<8x8xf32> to vector<8xf32>
    %177 = vector.shape_cast %176 : vector<8xf32> to vector<8x1xf32>
    %178 = tpu.reciprocal %177 {approx = true} : vector<8x1xf32> -> vector<8x1xf32>
    %179 = vector.broadcast %178 : vector<8x1xf32> to vector<8x8xf32>
    %180 = arith.mulf %175, %179 : vector<8x8xf32>
    %181 = vector.extract_strided_slice %152 {offsets = [0, 16], sizes = [8, 16], strides = [1, 1]} : vector<8x64xf32> to vector<8x16xf32>
    %cst_120 = arith.constant dense<0.000000e+00> : vector<8x16xf32>
    %182 = tpu.matmul %180, %181, %cst_120 {dimension_numbers = #tpu.dot_dimension_numbers<[1], [0], [0], [1], [0, 0, 1, 1], [], []>} : vector<8x8xf32>, vector<8x16xf32>, vector<8x16xf32> -> vector<8x16xf32>
    %183 = vector.extract_strided_slice %150 {offsets = [0, 32], sizes = [8, 16], strides = [1, 1]} : vector<8x64xf32> to vector<8x16xf32>
    %184 = vector.extract_strided_slice %151 {offsets = [0, 32], sizes = [8, 16], strides = [1, 1]} : vector<8x64xf32> to vector<8x16xf32>
    "tpu.trace_start"() <{level = 10 : i32, message = "ik,jk->ij"}> : () -> ()
    %cst_121 = arith.constant dense<0.000000e+00> : vector<8x8xf32>
    %185 = tpu.matmul %183, %184, %cst_121 {dimension_numbers = #tpu.dot_dimension_numbers<[1], [1], [0], [0], [0, 0, 1, 0], [], []>} : vector<8x16xf32>, vector<8x16xf32>, vector<8x8xf32> -> vector<8x8xf32>
    "tpu.trace_stop"() : () -> ()
    %cst_122 = arith.constant dense<0xFF800000> : vector<8xf32>
    %186 = vector.multi_reduction <maximumf>, %185, %cst_122 [1] : vector<8x8xf32> to vector<8xf32>
    %187 = vector.shape_cast %186 : vector<8xf32> to vector<8x1xf32>
    %188 = vector.broadcast %187 : vector<8x1xf32> to vector<8x8xf32>
    %189 = arith.subf %185, %188 : vector<8x8xf32>
    %190 = math.exp %189 : vector<8x8xf32>
    %cst_123 = arith.constant dense<0.000000e+00> : vector<8xf32>
    %191 = vector.multi_reduction <add>, %190, %cst_123 [1] : vector<8x8xf32> to vector<8xf32>
    %192 = vector.shape_cast %191 : vector<8xf32> to vector<8x1xf32>
    %193 = tpu.reciprocal %192 {approx = true} : vector<8x1xf32> -> vector<8x1xf32>
    %194 = vector.broadcast %193 : vector<8x1xf32> to vector<8x8xf32>
    %195 = arith.mulf %190, %194 : vector<8x8xf32>
    %196 = vector.extract_strided_slice %152 {offsets = [0, 32], sizes = [8, 16], strides = [1, 1]} : vector<8x64xf32> to vector<8x16xf32>
    %cst_124 = arith.constant dense<0.000000e+00> : vector<8x16xf32>
    %197 = tpu.matmul %195, %196, %cst_124 {dimension_numbers = #tpu.dot_dimension_numbers<[1], [0], [0], [1], [0, 0, 1, 1], [], []>} : vector<8x8xf32>, vector<8x16xf32>, vector<8x16xf32> -> vector<8x16xf32>
    %198 = vector.extract_strided_slice %150 {offsets = [0, 48], sizes = [8, 16], strides = [1, 1]} : vector<8x64xf32> to vector<8x16xf32>
    %199 = vector.extract_strided_slice %151 {offsets = [0, 48], sizes = [8, 16], strides = [1, 1]} : vector<8x64xf32> to vector<8x16xf32>
    "tpu.trace_start"() <{level = 10 : i32, message = "ik,jk->ij"}> : () -> ()
    %cst_125 = arith.constant dense<0.000000e+00> : vector<8x8xf32>
    %200 = tpu.matmul %198, %199, %cst_125 {dimension_numbers = #tpu.dot_dimension_numbers<[1], [1], [0], [0], [0, 0, 1, 0], [], []>} : vector<8x16xf32>, vector<8x16xf32>, vector<8x8xf32> -> vector<8x8xf32>
    "tpu.trace_stop"() : () -> ()
    %cst_126 = arith.constant dense<0xFF800000> : vector<8xf32>
    %201 = vector.multi_reduction <maximumf>, %200, %cst_126 [1] : vector<8x8xf32> to vector<8xf32>
    %202 = vector.shape_cast %201 : vector<8xf32> to vector<8x1xf32>
    %203 = vector.broadcast %202 : vector<8x1xf32> to vector<8x8xf32>
    %204 = arith.subf %200, %203 : vector<8x8xf32>
    %205 = math.exp %204 : vector<8x8xf32>
    %cst_127 = arith.constant dense<0.000000e+00> : vector<8xf32>
    %206 = vector.multi_reduction <add>, %205, %cst_127 [1] : vector<8x8xf32> to vector<8xf32>
    %207 = vector.shape_cast %206 : vector<8xf32> to vector<8x1xf32>
    %208 = tpu.reciprocal %207 {approx = true} : vector<8x1xf32> -> vector<8x1xf32>
    %209 = vector.broadcast %208 : vector<8x1xf32> to vector<8x8xf32>
    %210 = arith.mulf %205, %209 : vector<8x8xf32>
    %211 = vector.extract_strided_slice %152 {offsets = [0, 48], sizes = [8, 16], strides = [1, 1]} : vector<8x64xf32> to vector<8x16xf32>
    %cst_128 = arith.constant dense<0.000000e+00> : vector<8x16xf32>
    %212 = tpu.matmul %210, %211, %cst_128 {dimension_numbers = #tpu.dot_dimension_numbers<[1], [0], [0], [1], [0, 0, 1, 1], [], []>} : vector<8x8xf32>, vector<8x16xf32>, vector<8x16xf32> -> vector<8x16xf32>
    %213 = tpu.concatenate %167, %182, %197, %212 in 1 : vector<8x16xf32>, vector<8x16xf32>, vector<8x16xf32>, vector<8x16xf32> -> vector<8x64xf32>
    %cst_129 = arith.constant dense<0.000000e+00> : vector<8x64xf32>
    %214 = tpu.matmul %213, %119, %cst_129 {dimension_numbers = #tpu.dot_dimension_numbers<[1], [0], [0], [1], [0, 0, 1, 1], [], []>} : vector<8x64xf32>, vector<64x64xf32>, vector<8x64xf32> -> vector<8x64xf32>
    %215 = arith.addf %115, %214 : vector<8x64xf32>
    %216 = vector.broadcast %120 : vector<1x64xf32> to vector<8x64xf32>
    %217 = arith.addf %215, %216 : vector<8x64xf32>
    %cst_130 = arith.constant dense<0.000000e+00> : vector<8xf32>
    %218 = vector.multi_reduction <add>, %217, %cst_130 [1] : vector<8x64xf32> to vector<8xf32>
    %219 = vector.shape_cast %218 : vector<8xf32> to vector<8x1xf32>
    %cst_131 = arith.constant 6.400000e+01 : f32
    %220 = vector.broadcast %cst_131 : f32 to vector<8x1xf32>
    %221 = arith.divf %219, %220 : vector<8x1xf32>
    %222 = vector.broadcast %221 : vector<8x1xf32> to vector<8x64xf32>
    %223 = arith.subf %217, %222 : vector<8x64xf32>
    %224 = arith.mulf %223, %223 : vector<8x64xf32>
    %cst_132 = arith.constant dense<0.000000e+00> : vector<8xf32>
    %225 = vector.multi_reduction <add>, %224, %cst_132 [1] : vector<8x64xf32> to vector<8xf32>
    %226 = vector.shape_cast %225 : vector<8xf32> to vector<8x1xf32>
    %cst_133 = arith.constant 6.400000e+01 : f32
    %227 = vector.broadcast %cst_133 : f32 to vector<8x1xf32>
    %228 = arith.divf %226, %227 : vector<8x1xf32>
    %229 = vector.broadcast %221 : vector<8x1xf32> to vector<8x64xf32>
    %230 = arith.subf %217, %229 : vector<8x64xf32>
    %cst_134 = arith.constant 9.99999974E-6 : f32
    %231 = vector.broadcast %cst_134 : f32 to vector<8x1xf32>
    %232 = arith.addf %228, %231 : vector<8x1xf32>
    %233 = math.rsqrt %232 : vector<8x1xf32>
    %234 = vector.broadcast %233 : vector<8x1xf32> to vector<8x64xf32>
    %235 = arith.mulf %230, %234 : vector<8x64xf32>
    %236 = vector.broadcast %121 : vector<1x64xf32> to vector<8x64xf32>
    %237 = arith.mulf %235, %236 : vector<8x64xf32>
    %238 = vector.broadcast %122 : vector<1x64xf32> to vector<8x64xf32>
    %239 = arith.addf %237, %238 : vector<8x64xf32>
    %cst_135 = arith.constant dense<0.000000e+00> : vector<8x64xf32>
    %240 = tpu.matmul %239, %123, %cst_135 {dimension_numbers = #tpu.dot_dimension_numbers<[1], [0], [0], [1], [0, 0, 1, 1], [], []>} : vector<8x64xf32>, vector<64x64xf32>, vector<8x64xf32> -> vector<8x64xf32>
    %241 = vector.broadcast %124 : vector<1x64xf32> to vector<8x64xf32>
    %242 = arith.addf %240, %241 : vector<8x64xf32>
    %cst_136 = arith.constant 5.000000e-01 : f32
    %243 = vector.broadcast %cst_136 : f32 to vector<8x64xf32>
    %244 = arith.mulf %243, %242 : vector<8x64xf32>
    %cst_137 = arith.constant 0.707106769 : f32
    %245 = vector.broadcast %cst_137 : f32 to vector<8x64xf32>
    %246 = arith.mulf %242, %245 : vector<8x64xf32>
    %247 = math.erf %246 : vector<8x64xf32>
    %cst_138 = arith.constant 1.000000e+00 : f32
    %248 = vector.broadcast %cst_138 : f32 to vector<8x64xf32>
    %249 = arith.addf %248, %247 : vector<8x64xf32>
    %250 = arith.mulf %244, %249 : vector<8x64xf32>
    %cst_139 = arith.constant dense<0.000000e+00> : vector<8x64xf32>
    %251 = tpu.matmul %250, %125, %cst_139 {dimension_numbers = #tpu.dot_dimension_numbers<[1], [0], [0], [1], [0, 0, 1, 1], [], []>} : vector<8x64xf32>, vector<64x64xf32>, vector<8x64xf32> -> vector<8x64xf32>
    %252 = arith.addf %217, %251 : vector<8x64xf32>
    %253 = vector.broadcast %126 : vector<1x64xf32> to vector<8x64xf32>
    %254 = arith.addf %252, %253 : vector<8x64xf32>
    %c0_140 = arith.constant 0 : index
    %c0_141 = arith.constant 0 : index
    %255 = vector.load %arg32[%c0_140, %c0_141] : memref<1x64xf32, #tpu.memory_space<vmem>>, vector<1x64xf32>
    %c0_142 = arith.constant 0 : index
    %c0_143 = arith.constant 0 : index
    %256 = vector.load %arg33[%c0_142, %c0_143] : memref<1x64xf32, #tpu.memory_space<vmem>>, vector<1x64xf32>
    %c0_144 = arith.constant 0 : index
    %c0_145 = arith.constant 0 : index
    %257 = vector.load %arg34[%c0_144, %c0_145] : memref<64x192xf32, #tpu.memory_space<vmem>>, vector<64x192xf32>
    %c0_146 = arith.constant 0 : index
    %c0_147 = arith.constant 0 : index
    %258 = vector.load %arg35[%c0_146, %c0_147] : memref<64x64xf32, #tpu.memory_space<vmem>>, vector<64x64xf32>
    %c0_148 = arith.constant 0 : index
    %c0_149 = arith.constant 0 : index
    %259 = vector.load %arg36[%c0_148, %c0_149] : memref<1x64xf32, #tpu.memory_space<vmem>>, vector<1x64xf32>
    %c0_150 = arith.constant 0 : index
    %c0_151 = arith.constant 0 : index
    %260 = vector.load %arg37[%c0_150, %c0_151] : memref<1x64xf32, #tpu.memory_space<vmem>>, vector<1x64xf32>
    %c0_152 = arith.constant 0 : index
    %c0_153 = arith.constant 0 : index
    %261 = vector.load %arg38[%c0_152, %c0_153] : memref<1x64xf32, #tpu.memory_space<vmem>>, vector<1x64xf32>
    %c0_154 = arith.constant 0 : index
    %c0_155 = arith.constant 0 : index
    %262 = vector.load %arg39[%c0_154, %c0_155] : memref<64x64xf32, #tpu.memory_space<vmem>>, vector<64x64xf32>
    %c0_156 = arith.constant 0 : index
    %c0_157 = arith.constant 0 : index
    %263 = vector.load %arg40[%c0_156, %c0_157] : memref<1x64xf32, #tpu.memory_space<vmem>>, vector<1x64xf32>
    %c0_158 = arith.constant 0 : index
    %c0_159 = arith.constant 0 : index
    %264 = vector.load %arg41[%c0_158, %c0_159] : memref<64x64xf32, #tpu.memory_space<vmem>>, vector<64x64xf32>
    %c0_160 = arith.constant 0 : index
    %c0_161 = arith.constant 0 : index
    %265 = vector.load %arg42[%c0_160, %c0_161] : memref<1x64xf32, #tpu.memory_space<vmem>>, vector<1x64xf32>
    %cst_162 = arith.constant dense<0.000000e+00> : vector<8xf32>
    %266 = vector.multi_reduction <add>, %254, %cst_162 [1] : vector<8x64xf32> to vector<8xf32>
    %267 = vector.shape_cast %266 : vector<8xf32> to vector<8x1xf32>
    %cst_163 = arith.constant 6.400000e+01 : f32
    %268 = vector.broadcast %cst_163 : f32 to vector<8x1xf32>
    %269 = arith.divf %267, %268 : vector<8x1xf32>
    %270 = vector.broadcast %269 : vector<8x1xf32> to vector<8x64xf32>
    %271 = arith.subf %254, %270 : vector<8x64xf32>
    %272 = arith.mulf %271, %271 : vector<8x64xf32>
    %cst_164 = arith.constant dense<0.000000e+00> : vector<8xf32>
    %273 = vector.multi_reduction <add>, %272, %cst_164 [1] : vector<8x64xf32> to vector<8xf32>
    %274 = vector.shape_cast %273 : vector<8xf32> to vector<8x1xf32>
    %cst_165 = arith.constant 6.400000e+01 : f32
    %275 = vector.broadcast %cst_165 : f32 to vector<8x1xf32>
    %276 = arith.divf %274, %275 : vector<8x1xf32>
    %277 = vector.broadcast %269 : vector<8x1xf32> to vector<8x64xf32>
    %278 = arith.subf %254, %277 : vector<8x64xf32>
    %cst_166 = arith.constant 9.99999974E-6 : f32
    %279 = vector.broadcast %cst_166 : f32 to vector<8x1xf32>
    %280 = arith.addf %276, %279 : vector<8x1xf32>
    %281 = math.rsqrt %280 : vector<8x1xf32>
    %282 = vector.broadcast %281 : vector<8x1xf32> to vector<8x64xf32>
    %283 = arith.mulf %278, %282 : vector<8x64xf32>
    %284 = vector.broadcast %255 : vector<1x64xf32> to vector<8x64xf32>
    %285 = arith.mulf %283, %284 : vector<8x64xf32>
    %286 = vector.broadcast %256 : vector<1x64xf32> to vector<8x64xf32>
    %287 = arith.addf %285, %286 : vector<8x64xf32>
    %cst_167 = arith.constant dense<0.000000e+00> : vector<8x192xf32>
    %288 = tpu.matmul %287, %257, %cst_167 {dimension_numbers = #tpu.dot_dimension_numbers<[1], [0], [0], [1], [0, 0, 1, 1], [], []>} : vector<8x64xf32>, vector<64x192xf32>, vector<8x192xf32> -> vector<8x192xf32>
    %289 = vector.extract_strided_slice %288 {offsets = [0, 0], sizes = [8, 64], strides = [1, 1]} : vector<8x192xf32> to vector<8x64xf32>
    %290 = vector.extract_strided_slice %288 {offsets = [0, 64], sizes = [8, 64], strides = [1, 1]} : vector<8x192xf32> to vector<8x64xf32>
    %291 = vector.extract_strided_slice %288 {offsets = [0, 128], sizes = [8, 64], strides = [1, 1]} : vector<8x192xf32> to vector<8x64xf32>
    %292 = vector.extract_strided_slice %289 {offsets = [0, 0], sizes = [8, 16], strides = [1, 1]} : vector<8x64xf32> to vector<8x16xf32>
    %293 = vector.extract_strided_slice %290 {offsets = [0, 0], sizes = [8, 16], strides = [1, 1]} : vector<8x64xf32> to vector<8x16xf32>
    "tpu.trace_start"() <{level = 10 : i32, message = "ik,jk->ij"}> : () -> ()
    %cst_168 = arith.constant dense<0.000000e+00> : vector<8x8xf32>
    %294 = tpu.matmul %292, %293, %cst_168 {dimension_numbers = #tpu.dot_dimension_numbers<[1], [1], [0], [0], [0, 0, 1, 0], [], []>} : vector<8x16xf32>, vector<8x16xf32>, vector<8x8xf32> -> vector<8x8xf32>
    "tpu.trace_stop"() : () -> ()
    %cst_169 = arith.constant dense<0xFF800000> : vector<8xf32>
    %295 = vector.multi_reduction <maximumf>, %294, %cst_169 [1] : vector<8x8xf32> to vector<8xf32>
    %296 = vector.shape_cast %295 : vector<8xf32> to vector<8x1xf32>
    %297 = vector.broadcast %296 : vector<8x1xf32> to vector<8x8xf32>
    %298 = arith.subf %294, %297 : vector<8x8xf32>
    %299 = math.exp %298 : vector<8x8xf32>
    %cst_170 = arith.constant dense<0.000000e+00> : vector<8xf32>
    %300 = vector.multi_reduction <add>, %299, %cst_170 [1] : vector<8x8xf32> to vector<8xf32>
    %301 = vector.shape_cast %300 : vector<8xf32> to vector<8x1xf32>
    %302 = tpu.reciprocal %301 {approx = true} : vector<8x1xf32> -> vector<8x1xf32>
    %303 = vector.broadcast %302 : vector<8x1xf32> to vector<8x8xf32>
    %304 = arith.mulf %299, %303 : vector<8x8xf32>
    %305 = vector.extract_strided_slice %291 {offsets = [0, 0], sizes = [8, 16], strides = [1, 1]} : vector<8x64xf32> to vector<8x16xf32>
    %cst_171 = arith.constant dense<0.000000e+00> : vector<8x16xf32>
    %306 = tpu.matmul %304, %305, %cst_171 {dimension_numbers = #tpu.dot_dimension_numbers<[1], [0], [0], [1], [0, 0, 1, 1], [], []>} : vector<8x8xf32>, vector<8x16xf32>, vector<8x16xf32> -> vector<8x16xf32>
    %307 = vector.extract_strided_slice %289 {offsets = [0, 16], sizes = [8, 16], strides = [1, 1]} : vector<8x64xf32> to vector<8x16xf32>
    %308 = vector.extract_strided_slice %290 {offsets = [0, 16], sizes = [8, 16], strides = [1, 1]} : vector<8x64xf32> to vector<8x16xf32>
    "tpu.trace_start"() <{level = 10 : i32, message = "ik,jk->ij"}> : () -> ()
    %cst_172 = arith.constant dense<0.000000e+00> : vector<8x8xf32>
    %309 = tpu.matmul %307, %308, %cst_172 {dimension_numbers = #tpu.dot_dimension_numbers<[1], [1], [0], [0], [0, 0, 1, 0], [], []>} : vector<8x16xf32>, vector<8x16xf32>, vector<8x8xf32> -> vector<8x8xf32>
    "tpu.trace_stop"() : () -> ()
    %cst_173 = arith.constant dense<0xFF800000> : vector<8xf32>
    %310 = vector.multi_reduction <maximumf>, %309, %cst_173 [1] : vector<8x8xf32> to vector<8xf32>
    %311 = vector.shape_cast %310 : vector<8xf32> to vector<8x1xf32>
    %312 = vector.broadcast %311 : vector<8x1xf32> to vector<8x8xf32>
    %313 = arith.subf %309, %312 : vector<8x8xf32>
    %314 = math.exp %313 : vector<8x8xf32>
    %cst_174 = arith.constant dense<0.000000e+00> : vector<8xf32>
    %315 = vector.multi_reduction <add>, %314, %cst_174 [1] : vector<8x8xf32> to vector<8xf32>
    %316 = vector.shape_cast %315 : vector<8xf32> to vector<8x1xf32>
    %317 = tpu.reciprocal %316 {approx = true} : vector<8x1xf32> -> vector<8x1xf32>
    %318 = vector.broadcast %317 : vector<8x1xf32> to vector<8x8xf32>
    %319 = arith.mulf %314, %318 : vector<8x8xf32>
    %320 = vector.extract_strided_slice %291 {offsets = [0, 16], sizes = [8, 16], strides = [1, 1]} : vector<8x64xf32> to vector<8x16xf32>
    %cst_175 = arith.constant dense<0.000000e+00> : vector<8x16xf32>
    %321 = tpu.matmul %319, %320, %cst_175 {dimension_numbers = #tpu.dot_dimension_numbers<[1], [0], [0], [1], [0, 0, 1, 1], [], []>} : vector<8x8xf32>, vector<8x16xf32>, vector<8x16xf32> -> vector<8x16xf32>
    %322 = vector.extract_strided_slice %289 {offsets = [0, 32], sizes = [8, 16], strides = [1, 1]} : vector<8x64xf32> to vector<8x16xf32>
    %323 = vector.extract_strided_slice %290 {offsets = [0, 32], sizes = [8, 16], strides = [1, 1]} : vector<8x64xf32> to vector<8x16xf32>
    "tpu.trace_start"() <{level = 10 : i32, message = "ik,jk->ij"}> : () -> ()
    %cst_176 = arith.constant dense<0.000000e+00> : vector<8x8xf32>
    %324 = tpu.matmul %322, %323, %cst_176 {dimension_numbers = #tpu.dot_dimension_numbers<[1], [1], [0], [0], [0, 0, 1, 0], [], []>} : vector<8x16xf32>, vector<8x16xf32>, vector<8x8xf32> -> vector<8x8xf32>
    "tpu.trace_stop"() : () -> ()
    %cst_177 = arith.constant dense<0xFF800000> : vector<8xf32>
    %325 = vector.multi_reduction <maximumf>, %324, %cst_177 [1] : vector<8x8xf32> to vector<8xf32>
    %326 = vector.shape_cast %325 : vector<8xf32> to vector<8x1xf32>
    %327 = vector.broadcast %326 : vector<8x1xf32> to vector<8x8xf32>
    %328 = arith.subf %324, %327 : vector<8x8xf32>
    %329 = math.exp %328 : vector<8x8xf32>
    %cst_178 = arith.constant dense<0.000000e+00> : vector<8xf32>
    %330 = vector.multi_reduction <add>, %329, %cst_178 [1] : vector<8x8xf32> to vector<8xf32>
    %331 = vector.shape_cast %330 : vector<8xf32> to vector<8x1xf32>
    %332 = tpu.reciprocal %331 {approx = true} : vector<8x1xf32> -> vector<8x1xf32>
    %333 = vector.broadcast %332 : vector<8x1xf32> to vector<8x8xf32>
    %334 = arith.mulf %329, %333 : vector<8x8xf32>
    %335 = vector.extract_strided_slice %291 {offsets = [0, 32], sizes = [8, 16], strides = [1, 1]} : vector<8x64xf32> to vector<8x16xf32>
    %cst_179 = arith.constant dense<0.000000e+00> : vector<8x16xf32>
    %336 = tpu.matmul %334, %335, %cst_179 {dimension_numbers = #tpu.dot_dimension_numbers<[1], [0], [0], [1], [0, 0, 1, 1], [], []>} : vector<8x8xf32>, vector<8x16xf32>, vector<8x16xf32> -> vector<8x16xf32>
    %337 = vector.extract_strided_slice %289 {offsets = [0, 48], sizes = [8, 16], strides = [1, 1]} : vector<8x64xf32> to vector<8x16xf32>
    %338 = vector.extract_strided_slice %290 {offsets = [0, 48], sizes = [8, 16], strides = [1, 1]} : vector<8x64xf32> to vector<8x16xf32>
    "tpu.trace_start"() <{level = 10 : i32, message = "ik,jk->ij"}> : () -> ()
    %cst_180 = arith.constant dense<0.000000e+00> : vector<8x8xf32>
    %339 = tpu.matmul %337, %338, %cst_180 {dimension_numbers = #tpu.dot_dimension_numbers<[1], [1], [0], [0], [0, 0, 1, 0], [], []>} : vector<8x16xf32>, vector<8x16xf32>, vector<8x8xf32> -> vector<8x8xf32>
    "tpu.trace_stop"() : () -> ()
    %cst_181 = arith.constant dense<0xFF800000> : vector<8xf32>
    %340 = vector.multi_reduction <maximumf>, %339, %cst_181 [1] : vector<8x8xf32> to vector<8xf32>
    %341 = vector.shape_cast %340 : vector<8xf32> to vector<8x1xf32>
    %342 = vector.broadcast %341 : vector<8x1xf32> to vector<8x8xf32>
    %343 = arith.subf %339, %342 : vector<8x8xf32>
    %344 = math.exp %343 : vector<8x8xf32>
    %cst_182 = arith.constant dense<0.000000e+00> : vector<8xf32>
    %345 = vector.multi_reduction <add>, %344, %cst_182 [1] : vector<8x8xf32> to vector<8xf32>
    %346 = vector.shape_cast %345 : vector<8xf32> to vector<8x1xf32>
    %347 = tpu.reciprocal %346 {approx = true} : vector<8x1xf32> -> vector<8x1xf32>
    %348 = vector.broadcast %347 : vector<8x1xf32> to vector<8x8xf32>
    %349 = arith.mulf %344, %348 : vector<8x8xf32>
    %350 = vector.extract_strided_slice %291 {offsets = [0, 48], sizes = [8, 16], strides = [1, 1]} : vector<8x64xf32> to vector<8x16xf32>
    %cst_183 = arith.constant dense<0.000000e+00> : vector<8x16xf32>
    %351 = tpu.matmul %349, %350, %cst_183 {dimension_numbers = #tpu.dot_dimension_numbers<[1], [0], [0], [1], [0, 0, 1, 1], [], []>} : vector<8x8xf32>, vector<8x16xf32>, vector<8x16xf32> -> vector<8x16xf32>
    %352 = tpu.concatenate %306, %321, %336, %351 in 1 : vector<8x16xf32>, vector<8x16xf32>, vector<8x16xf32>, vector<8x16xf32> -> vector<8x64xf32>
    %cst_184 = arith.constant dense<0.000000e+00> : vector<8x64xf32>
    %353 = tpu.matmul %352, %258, %cst_184 {dimension_numbers = #tpu.dot_dimension_numbers<[1], [0], [0], [1], [0, 0, 1, 1], [], []>} : vector<8x64xf32>, vector<64x64xf32>, vector<8x64xf32> -> vector<8x64xf32>
    %354 = arith.addf %254, %353 : vector<8x64xf32>
    %355 = vector.broadcast %259 : vector<1x64xf32> to vector<8x64xf32>
    %356 = arith.addf %354, %355 : vector<8x64xf32>
    %cst_185 = arith.constant dense<0.000000e+00> : vector<8xf32>
    %357 = vector.multi_reduction <add>, %356, %cst_185 [1] : vector<8x64xf32> to vector<8xf32>
    %358 = vector.shape_cast %357 : vector<8xf32> to vector<8x1xf32>
    %cst_186 = arith.constant 6.400000e+01 : f32
    %359 = vector.broadcast %cst_186 : f32 to vector<8x1xf32>
    %360 = arith.divf %358, %359 : vector<8x1xf32>
    %361 = vector.broadcast %360 : vector<8x1xf32> to vector<8x64xf32>
    %362 = arith.subf %356, %361 : vector<8x64xf32>
    %363 = arith.mulf %362, %362 : vector<8x64xf32>
    %cst_187 = arith.constant dense<0.000000e+00> : vector<8xf32>
    %364 = vector.multi_reduction <add>, %363, %cst_187 [1] : vector<8x64xf32> to vector<8xf32>
    %365 = vector.shape_cast %364 : vector<8xf32> to vector<8x1xf32>
    %cst_188 = arith.constant 6.400000e+01 : f32
    %366 = vector.broadcast %cst_188 : f32 to vector<8x1xf32>
    %367 = arith.divf %365, %366 : vector<8x1xf32>
    %368 = vector.broadcast %360 : vector<8x1xf32> to vector<8x64xf32>
    %369 = arith.subf %356, %368 : vector<8x64xf32>
    %cst_189 = arith.constant 9.99999974E-6 : f32
    %370 = vector.broadcast %cst_189 : f32 to vector<8x1xf32>
    %371 = arith.addf %367, %370 : vector<8x1xf32>
    %372 = math.rsqrt %371 : vector<8x1xf32>
    %373 = vector.broadcast %372 : vector<8x1xf32> to vector<8x64xf32>
    %374 = arith.mulf %369, %373 : vector<8x64xf32>
    %375 = vector.broadcast %260 : vector<1x64xf32> to vector<8x64xf32>
    %376 = arith.mulf %374, %375 : vector<8x64xf32>
    %377 = vector.broadcast %261 : vector<1x64xf32> to vector<8x64xf32>
    %378 = arith.addf %376, %377 : vector<8x64xf32>
    %cst_190 = arith.constant dense<0.000000e+00> : vector<8x64xf32>
    %379 = tpu.matmul %378, %262, %cst_190 {dimension_numbers = #tpu.dot_dimension_numbers<[1], [0], [0], [1], [0, 0, 1, 1], [], []>} : vector<8x64xf32>, vector<64x64xf32>, vector<8x64xf32> -> vector<8x64xf32>
    %380 = vector.broadcast %263 : vector<1x64xf32> to vector<8x64xf32>
    %381 = arith.addf %379, %380 : vector<8x64xf32>
    %cst_191 = arith.constant 5.000000e-01 : f32
    %382 = vector.broadcast %cst_191 : f32 to vector<8x64xf32>
    %383 = arith.mulf %382, %381 : vector<8x64xf32>
    %cst_192 = arith.constant 0.707106769 : f32
    %384 = vector.broadcast %cst_192 : f32 to vector<8x64xf32>
    %385 = arith.mulf %381, %384 : vector<8x64xf32>
    %386 = math.erf %385 : vector<8x64xf32>
    %cst_193 = arith.constant 1.000000e+00 : f32
    %387 = vector.broadcast %cst_193 : f32 to vector<8x64xf32>
    %388 = arith.addf %387, %386 : vector<8x64xf32>
    %389 = arith.mulf %383, %388 : vector<8x64xf32>
    %cst_194 = arith.constant dense<0.000000e+00> : vector<8x64xf32>
    %390 = tpu.matmul %389, %264, %cst_194 {dimension_numbers = #tpu.dot_dimension_numbers<[1], [0], [0], [1], [0, 0, 1, 1], [], []>} : vector<8x64xf32>, vector<64x64xf32>, vector<8x64xf32> -> vector<8x64xf32>
    %391 = arith.addf %356, %390 : vector<8x64xf32>
    %392 = vector.broadcast %265 : vector<1x64xf32> to vector<8x64xf32>
    %393 = arith.addf %391, %392 : vector<8x64xf32>
    %c0_195 = arith.constant 0 : index
    %c0_196 = arith.constant 0 : index
    %394 = vector.load %arg2[%c0_195, %c0_196] : memref<8x8xf32, #tpu.memory_space<vmem>>, vector<8x8xf32>
    %cst_197 = arith.constant dense<0.000000e+00> : vector<8xf32>
    %395 = vector.multi_reduction <add>, %394, %cst_197 [1] : vector<8x8xf32> to vector<8xf32>
    %396 = vector.shape_cast %395 : vector<8xf32> to vector<8x1xf32>
    %397 = vector.broadcast %396 : vector<8x1xf32> to vector<8x8xf32>
    %398 = arith.divf %394, %397 : vector<8x8xf32>
    %c0_198 = arith.constant 0 : index
    %c0_199 = arith.constant 0 : index
    %399 = vector.load %arg43[%c0_198, %c0_199] : memref<64x64xf32, #tpu.memory_space<vmem>>, vector<64x64xf32>
    %cst_200 = arith.constant dense<0.000000e+00> : vector<8x64xf32>
    %400 = tpu.matmul %398, %393, %cst_200 {dimension_numbers = #tpu.dot_dimension_numbers<[1], [0], [0], [1], [0, 0, 1, 1], [], []>} : vector<8x8xf32>, vector<8x64xf32>, vector<8x64xf32> -> vector<8x64xf32>
    %cst_201 = arith.constant dense<0.000000e+00> : vector<8x64xf32>
    %401 = tpu.matmul %400, %399, %cst_201 {dimension_numbers = #tpu.dot_dimension_numbers<[1], [0], [0], [1], [0, 0, 1, 1], [], []>} : vector<8x64xf32>, vector<64x64xf32>, vector<8x64xf32> -> vector<8x64xf32>
    %cst_202 = arith.constant 0.000000e+00 : f32
    %402 = vector.broadcast %cst_202 : f32 to vector<8x64xf32>
    %403 = arith.maximumf %401, %402 : vector<8x64xf32>
    %404 = arith.mulf %403, %403 : vector<8x64xf32>
    %cst_203 = arith.constant dense<0.000000e+00> : vector<8xf32>
    %405 = vector.multi_reduction <add>, %404, %cst_203 [1] : vector<8x64xf32> to vector<8xf32>
    %406 = vector.shape_cast %405 : vector<8xf32> to vector<8x1xf32>
    %cst_204 = arith.constant 1.000000e-24 : f32
    %407 = vector.broadcast %cst_204 : f32 to vector<8x1xf32>
    %408 = arith.maximumf %406, %407 : vector<8x1xf32>
    %409 = math.rsqrt %408 : vector<8x1xf32>
    %410 = vector.broadcast %409 : vector<8x1xf32> to vector<8x64xf32>
    %411 = arith.mulf %403, %410 : vector<8x64xf32>
    %c0_205 = arith.constant 0 : index
    %c0_206 = arith.constant 0 : index
    %412 = vector.load %arg44[%c0_205, %c0_206] : memref<64x64xf32, #tpu.memory_space<vmem>>, vector<64x64xf32>
    %cst_207 = arith.constant dense<0.000000e+00> : vector<8x64xf32>
    %413 = tpu.matmul %398, %411, %cst_207 {dimension_numbers = #tpu.dot_dimension_numbers<[1], [0], [0], [1], [0, 0, 1, 1], [], []>} : vector<8x8xf32>, vector<8x64xf32>, vector<8x64xf32> -> vector<8x64xf32>
    %cst_208 = arith.constant dense<0.000000e+00> : vector<8x64xf32>
    %414 = tpu.matmul %413, %412, %cst_208 {dimension_numbers = #tpu.dot_dimension_numbers<[1], [0], [0], [1], [0, 0, 1, 1], [], []>} : vector<8x64xf32>, vector<64x64xf32>, vector<8x64xf32> -> vector<8x64xf32>
    %cst_209 = arith.constant 0.000000e+00 : f32
    %415 = vector.broadcast %cst_209 : f32 to vector<8x64xf32>
    %416 = arith.maximumf %414, %415 : vector<8x64xf32>
    %417 = arith.mulf %416, %416 : vector<8x64xf32>
    %cst_210 = arith.constant dense<0.000000e+00> : vector<8xf32>
    %418 = vector.multi_reduction <add>, %417, %cst_210 [1] : vector<8x64xf32> to vector<8xf32>
    %419 = vector.shape_cast %418 : vector<8xf32> to vector<8x1xf32>
    %cst_211 = arith.constant 1.000000e-24 : f32
    %420 = vector.broadcast %cst_211 : f32 to vector<8x1xf32>
    %421 = arith.maximumf %419, %420 : vector<8x1xf32>
    %422 = math.rsqrt %421 : vector<8x1xf32>
    %423 = vector.broadcast %422 : vector<8x1xf32> to vector<8x64xf32>
    %424 = arith.mulf %416, %423 : vector<8x64xf32>
    %425 = tpu.iota {dimensions = array<i32: 1>} : vector<8x256xi32>
    %c128_i32 = arith.constant 128 : i32
    %426 = vector.broadcast %c128_i32 : i32 to vector<8x256xi32>
    %427 = arith.cmpi sge, %425, %426 : vector<8x256xi32>
    %c192_i32 = arith.constant 192 : i32
    %428 = vector.broadcast %c192_i32 : i32 to vector<8x256xi32>
    %429 = arith.cmpi slt, %425, %428 : vector<8x256xi32>
    %430 = arith.andi %427, %429 : vector<8x256xi1>
    %c0_212 = arith.constant 0 : index
    %c0_213 = arith.constant 0 : index
    %431 = vector.load %arg45[%c0_212, %c0_213] : memref<128x256xf32, #tpu.memory_space<vmem>>, vector<128x256xf32>
    %c0_214 = arith.constant 0 : index
    %c0_215 = arith.constant 0 : index
    %432 = vector.load %arg46[%c0_214, %c0_215] : memref<1x256xf32, #tpu.memory_space<vmem>>, vector<1x256xf32>
    %cst_216 = arith.constant 0.000000e+00 : f32
    %433 = vector.broadcast %cst_216 : f32 to vector<8x64xf32>
    %cst_217 = arith.constant 0.000000e+00 : f32
    %434 = vector.broadcast %cst_217 : f32 to vector<8x64xf32>
    %435 = tpu.concatenate %411, %433 in 1 : vector<8x64xf32>, vector<8x64xf32> -> vector<8x128xf32>
    %cst_218 = arith.constant dense<0.000000e+00> : vector<8x256xf32>
    %436 = tpu.matmul %435, %431, %cst_218 {dimension_numbers = #tpu.dot_dimension_numbers<[1], [0], [0], [1], [0, 0, 1, 1], [], []>} : vector<8x128xf32>, vector<128x256xf32>, vector<8x256xf32> -> vector<8x256xf32>
    %437 = vector.broadcast %432 : vector<1x256xf32> to vector<8x256xf32>
    %438 = arith.addf %436, %437 : vector<8x256xf32>
    %439 = math.tanh %438 : vector<8x256xf32>
    %440 = arith.negf %438 : vector<8x256xf32>
    %441 = math.exp %440 : vector<8x256xf32>
    %cst_219 = arith.constant 1.000000e+00 : f32
    %442 = vector.broadcast %cst_219 : f32 to vector<8x256xf32>
    %443 = arith.addf %442, %441 : vector<8x256xf32>
    %444 = arith.divf %442, %443 : vector<8x256xf32>
    %445 = arith.select %430, %439, %444 : vector<8x256xi1>, vector<8x256xf32>
    %446 = vector.extract_strided_slice %445 {offsets = [0, 0], sizes = [8, 64], strides = [1, 1]} : vector<8x256xf32> to vector<8x64xf32>
    %447 = vector.extract_strided_slice %445 {offsets = [0, 64], sizes = [8, 64], strides = [1, 1]} : vector<8x256xf32> to vector<8x64xf32>
    %448 = vector.extract_strided_slice %445 {offsets = [0, 128], sizes = [8, 64], strides = [1, 1]} : vector<8x256xf32> to vector<8x64xf32>
    %449 = vector.extract_strided_slice %445 {offsets = [0, 192], sizes = [8, 64], strides = [1, 1]} : vector<8x256xf32> to vector<8x64xf32>
    %450 = arith.mulf %447, %434 : vector<8x64xf32>
    %451 = arith.mulf %446, %448 : vector<8x64xf32>
    %452 = arith.addf %450, %451 : vector<8x64xf32>
    %453 = math.tanh %452 : vector<8x64xf32>
    %454 = arith.mulf %449, %453 : vector<8x64xf32>
    %455 = tpu.concatenate %424, %454 in 1 : vector<8x64xf32>, vector<8x64xf32> -> vector<8x128xf32>
    %cst_220 = arith.constant dense<0.000000e+00> : vector<8x256xf32>
    %456 = tpu.matmul %455, %431, %cst_220 {dimension_numbers = #tpu.dot_dimension_numbers<[1], [0], [0], [1], [0, 0, 1, 1], [], []>} : vector<8x128xf32>, vector<128x256xf32>, vector<8x256xf32> -> vector<8x256xf32>
    %457 = vector.broadcast %432 : vector<1x256xf32> to vector<8x256xf32>
    %458 = arith.addf %456, %457 : vector<8x256xf32>
    %459 = math.tanh %458 : vector<8x256xf32>
    %460 = arith.negf %458 : vector<8x256xf32>
    %461 = math.exp %460 : vector<8x256xf32>
    %cst_221 = arith.constant 1.000000e+00 : f32
    %462 = vector.broadcast %cst_221 : f32 to vector<8x256xf32>
    %463 = arith.addf %462, %461 : vector<8x256xf32>
    %464 = arith.divf %462, %463 : vector<8x256xf32>
    %465 = arith.select %430, %459, %464 : vector<8x256xi1>, vector<8x256xf32>
    %466 = vector.extract_strided_slice %465 {offsets = [0, 0], sizes = [8, 64], strides = [1, 1]} : vector<8x256xf32> to vector<8x64xf32>
    %467 = vector.extract_strided_slice %465 {offsets = [0, 64], sizes = [8, 64], strides = [1, 1]} : vector<8x256xf32> to vector<8x64xf32>
    %468 = vector.extract_strided_slice %465 {offsets = [0, 128], sizes = [8, 64], strides = [1, 1]} : vector<8x256xf32> to vector<8x64xf32>
    %469 = vector.extract_strided_slice %465 {offsets = [0, 192], sizes = [8, 64], strides = [1, 1]} : vector<8x256xf32> to vector<8x64xf32>
    %470 = arith.mulf %467, %452 : vector<8x64xf32>
    %471 = arith.mulf %466, %468 : vector<8x64xf32>
    %472 = arith.addf %470, %471 : vector<8x64xf32>
    %473 = math.tanh %472 : vector<8x64xf32>
    %474 = arith.mulf %469, %473 : vector<8x64xf32>
    %c0_222 = arith.constant 0 : index
    %c0_223 = arith.constant 0 : index
    %475 = vector.load %arg47[%c0_222, %c0_223] : memref<128x256xf32, #tpu.memory_space<vmem>>, vector<128x256xf32>
    %c0_224 = arith.constant 0 : index
    %c0_225 = arith.constant 0 : index
    %476 = vector.load %arg48[%c0_224, %c0_225] : memref<1x256xf32, #tpu.memory_space<vmem>>, vector<1x256xf32>
    %cst_226 = arith.constant 0.000000e+00 : f32
    %477 = vector.broadcast %cst_226 : f32 to vector<8x64xf32>
    %cst_227 = arith.constant 0.000000e+00 : f32
    %478 = vector.broadcast %cst_227 : f32 to vector<8x64xf32>
    %479 = tpu.concatenate %454, %477 in 1 : vector<8x64xf32>, vector<8x64xf32> -> vector<8x128xf32>
    %cst_228 = arith.constant dense<0.000000e+00> : vector<8x256xf32>
    %480 = tpu.matmul %479, %475, %cst_228 {dimension_numbers = #tpu.dot_dimension_numbers<[1], [0], [0], [1], [0, 0, 1, 1], [], []>} : vector<8x128xf32>, vector<128x256xf32>, vector<8x256xf32> -> vector<8x256xf32>
    %481 = vector.broadcast %476 : vector<1x256xf32> to vector<8x256xf32>
    %482 = arith.addf %480, %481 : vector<8x256xf32>
    %483 = math.tanh %482 : vector<8x256xf32>
    %484 = arith.negf %482 : vector<8x256xf32>
    %485 = math.exp %484 : vector<8x256xf32>
    %cst_229 = arith.constant 1.000000e+00 : f32
    %486 = vector.broadcast %cst_229 : f32 to vector<8x256xf32>
    %487 = arith.addf %486, %485 : vector<8x256xf32>
    %488 = arith.divf %486, %487 : vector<8x256xf32>
    %489 = arith.select %430, %483, %488 : vector<8x256xi1>, vector<8x256xf32>
    %490 = vector.extract_strided_slice %489 {offsets = [0, 0], sizes = [8, 64], strides = [1, 1]} : vector<8x256xf32> to vector<8x64xf32>
    %491 = vector.extract_strided_slice %489 {offsets = [0, 64], sizes = [8, 64], strides = [1, 1]} : vector<8x256xf32> to vector<8x64xf32>
    %492 = vector.extract_strided_slice %489 {offsets = [0, 128], sizes = [8, 64], strides = [1, 1]} : vector<8x256xf32> to vector<8x64xf32>
    %493 = vector.extract_strided_slice %489 {offsets = [0, 192], sizes = [8, 64], strides = [1, 1]} : vector<8x256xf32> to vector<8x64xf32>
    %494 = arith.mulf %491, %478 : vector<8x64xf32>
    %495 = arith.mulf %490, %492 : vector<8x64xf32>
    %496 = arith.addf %494, %495 : vector<8x64xf32>
    %497 = math.tanh %496 : vector<8x64xf32>
    %498 = arith.mulf %493, %497 : vector<8x64xf32>
    %499 = tpu.concatenate %474, %498 in 1 : vector<8x64xf32>, vector<8x64xf32> -> vector<8x128xf32>
    %cst_230 = arith.constant dense<0.000000e+00> : vector<8x256xf32>
    %500 = tpu.matmul %499, %475, %cst_230 {dimension_numbers = #tpu.dot_dimension_numbers<[1], [0], [0], [1], [0, 0, 1, 1], [], []>} : vector<8x128xf32>, vector<128x256xf32>, vector<8x256xf32> -> vector<8x256xf32>
    %501 = vector.broadcast %476 : vector<1x256xf32> to vector<8x256xf32>
    %502 = arith.addf %500, %501 : vector<8x256xf32>
    %503 = math.tanh %502 : vector<8x256xf32>
    %504 = arith.negf %502 : vector<8x256xf32>
    %505 = math.exp %504 : vector<8x256xf32>
    %cst_231 = arith.constant 1.000000e+00 : f32
    %506 = vector.broadcast %cst_231 : f32 to vector<8x256xf32>
    %507 = arith.addf %506, %505 : vector<8x256xf32>
    %508 = arith.divf %506, %507 : vector<8x256xf32>
    %509 = arith.select %430, %503, %508 : vector<8x256xi1>, vector<8x256xf32>
    %510 = vector.extract_strided_slice %509 {offsets = [0, 0], sizes = [8, 64], strides = [1, 1]} : vector<8x256xf32> to vector<8x64xf32>
    %511 = vector.extract_strided_slice %509 {offsets = [0, 64], sizes = [8, 64], strides = [1, 1]} : vector<8x256xf32> to vector<8x64xf32>
    %512 = vector.extract_strided_slice %509 {offsets = [0, 128], sizes = [8, 64], strides = [1, 1]} : vector<8x256xf32> to vector<8x64xf32>
    %513 = vector.extract_strided_slice %509 {offsets = [0, 192], sizes = [8, 64], strides = [1, 1]} : vector<8x256xf32> to vector<8x64xf32>
    %514 = arith.mulf %511, %496 : vector<8x64xf32>
    %515 = arith.mulf %510, %512 : vector<8x64xf32>
    %516 = arith.addf %514, %515 : vector<8x64xf32>
    %517 = math.tanh %516 : vector<8x64xf32>
    %518 = arith.mulf %513, %517 : vector<8x64xf32>
    %519 = arith.addf %498, %518 : vector<8x64xf32>
    %cst_232 = arith.constant 5.000000e-01 : f32
    %520 = vector.broadcast %cst_232 : f32 to vector<8x64xf32>
    %521 = arith.mulf %519, %520 : vector<8x64xf32>
    %c0_233 = arith.constant 0 : index
    %c0_234 = arith.constant 0 : index
    %522 = vector.load %arg49[%c0_233, %c0_234] : memref<8x64xf32, #tpu.memory_space<vmem>>, vector<8x64xf32>
    tpu.vector_store %arg49[%c0_233, %c0_234], %521 {strides = array<i32>} : memref<8x64xf32, #tpu.memory_space<vmem>>, vector<8x64xf32>,
    return
  }
}

</mosaic_0001>

<bundles_post_ra>
// kernel: vit_forward.1
= control target key start
LH: loop header
LB: loop body
LE: loop exit
PB: predicated region body
PF: predicated region fallthrough
CT: control target
= control target key end

     0   :  { %s11350_s6 = smov 1   ;;  %s11351_s10 = smov 2   ;;  %s13674_s0 = inlined_call_operand.smem [shape: u32[50], index: -1, kind: input, shape index: {}] }
   0x1   :  { %s11443_s5 = sld [smem:[%s13674_s0]]   ;;  %s11352_s14 = smov 3  }
   0x2   :  { %s11448_s9 = sld [smem:[%s13674_s0 + %s11350_s6]]   ;;  %s11353_s18 = smov 4  }
   0x3   :  { %s11453_s13 = sld [smem:[%s13674_s0 + %s11351_s10]]   ;;  %s11354_s22 = smov 5  }
   0x4   :  { %s11458_s17 = sld [smem:[%s13674_s0 + %s11352_s14]]   ;;  %s11355_s26 = smov 6  }
   0x5   :  { %s11463_s21 = sld [smem:[%s13674_s0 + %s11353_s18]]   ;;  %s11356_s30 = smov 7  }
   0x6   :  { %s11468_s25 = sld [smem:[%s13674_s0 + %s11354_s22]]   ;;  %s11357_s4 = smov 8  }
   0x7   :  { %13706 = sst [smem:[#allocation48_spill]] %s11443_s5  ;;  %s11358_s10 = smov 9  }
   0x8   :  { %s11473_s29 = sld [smem:[%s13674_s0 + %s11355_s26]]   ;;  %s11359_s15 = smov 10  }
   0x9   :  { %s11478_s3 = sld [smem:[%s13674_s0 + %s11356_s30]]   ;;  %s11360_s20 = smov 11  }
   0xa   :  { %13707 = sst [smem:[#allocation49_spill]] %s11458_s17  ;;  %s11361_s26 = smov 12  }
   0xb   :  { %13708 = sst [smem:[#allocation50_spill]] %s11463_s21  ;;  %s11362_s1 = smov 13  }
   0xc   :  { %13709 = sst [smem:[#allocation51_spill]] %s11468_s25  ;;  %s11363_s7 = smov 14  }
   0xd   :  { %s11483_s8 = sld [smem:[%s13674_s0 + %s11357_s4]]   ;;  %s11365_s22 = smov 16  }
   0xe   :  { %13710 = sst [smem:[#allocation52_spill]] %s11473_s29  ;;  %s11366_s28 = smov 17  }
   0xf   :  { %13711 = sst [smem:[#allocation53_spill]] %s11478_s3  ;;  %s11372_s16 = smov 23  }
  0x10   :  { %s11488_s14 = sld [smem:[%s13674_s0 + %s11358_s10]]   ;;  %s11371_s10 = smov 22  }
  0x11   :  { %s11493_s19 = sld [smem:[%s13674_s0 + %s11359_s15]]   ;;  %s11364_s15 = smov 15  }
  0x12   :  { %s11498_s24 = sld [smem:[%s13674_s0 + %s11360_s20]]   ;;  %s11373_s23 = smov 24  }
  0x13   :  { %13712 = sst [smem:[#allocation54_spill]] %s11483_s8 }
  0x14   :  { %s11503_s30 = sld [smem:[%s13674_s0 + %s11361_s26]]  }
  0x15   :  { %s11508_s6 = sld [smem:[%s13674_s0 + %s11362_s1]]   ;;  %s11370_s1 = smov 21  }
  0x16   :  { %13713 = sst [smem:[#allocation55_spill]] %s11488_s14 }
  0x17   :  { %13714 = sst [smem:[#allocation56_spill]] %s11493_s19 }
  0x18   :  { %13715 = sst [smem:[#allocation57_spill]] %s11498_s24 }
  0x19   :  { %s11513_s12 = sld [smem:[%s13674_s0 + %s11363_s7]]   ;;  %s11367_s7 = smov 18  }
  0x1a   :  { %13716 = sst [smem:[#allocation58_spill]] %s11503_s30  ;;  %s11381_s30 = smov 32  }
  0x1b   :  { %s11518_s20 = sld [smem:[%s13674_s0 + %s11364_s15]]   ;;  %s11368_s15 = smov 19  }
  0x1c   :  { %s11523_s27 = sld [smem:[%s13674_s0 + %s11365_s22]]   ;;  %s11369_s22 = smov 20  }
  0x1d   :  { %s11528_s4 = sld [smem:[%s13674_s0 + %s11366_s28]]   ;;  %s11378_s28 = smov 29  }
  0x1e   :  { %s11533_s24 = sld [smem:[%s13674_s0 + %s11367_s7]]  }
  0x1f   :  { %13717 = sst [smem:[#allocation59_spill]] %s11513_s12 }
  0x20   :  { %s11561_s12 = sld [smem:[%s13674_s0 + %s11373_s23]]   ;;  %s11377_s23 = smov 28  }
  0x21   :  { %13718 = sst [smem:[#allocation60_spill]] %s11518_s20 }
  0x22   :  { %13719 = sst [smem:[#allocation61_spill]] %s11523_s27 }
  0x23   :  { %13720 = sst [smem:[#allocation62_spill]] %s11528_s4 }
  0x24   :  { %13721 = sst [smem:[#allocation63_spill]] %s11533_s24 }
  0x25   :  { %s11538_s20 = sld [smem:[%s13674_s0 + %s11368_s15]]  }
  0x26   :  { %s8830_s27 = sld [smem:[%s13674_s0 + %s11369_s22]]  }
  0x27   :  { %s11546_s4 = sld [smem:[%s13674_s0 + %s11370_s1]]   ;;  %s11374_s1 = smov 25  }
  0x28   :  { %s11551_s24 = sld [smem:[%s13674_s0 + %s11371_s10]]   ;;  %s11375_s10 = smov 26  }
  0x29   :  { %s11601_s19 = sld [smem:[%s13674_s0 + %s11381_s30]]   ;;  %s11385_s30 = smov 36  }
  0x2a   :  { %s11621_s8 = sld [smem:[%s13674_s0 + %s11385_s30]]   ;;  %s11389_s30 = smov 40  }
  0x2b   :  { %13722 = sst [smem:[#allocation64_spill]] %s11538_s20 }
  0x2c   :  { %s11556_s20 = sld [smem:[%s13674_s0 + %s11372_s16]]   ;;  %v104_v0 = vstv %s8830_s27  ;;  %s11376_s16 = smov 27  }
  0x2d   :  { %13723 = sst [smem:[#allocation65_spill]] %s11546_s4  ;;  %105 = vst [vmem:[#allocation2] sm:$0x1] %v104_v0  ;;  %s11379_s27 = smov 30  }
  0x2e   :  { %13724 = sst [smem:[#allocation66_spill]] %s11551_s24 }
  0x2f   :  { %s11566_s4 = sld [smem:[%s13674_s0 + %s11374_s1]]  }
  0x30   :  { %s11571_s24 = sld [smem:[%s13674_s0 + %s11375_s10]]  }
  0x31   :  { %s11576_s22 = sld [smem:[%s13674_s0 + %s11376_s16]]   ;;  %s11380_s16 = smov 31  }
  0x32   :  { %s11581_s1 = sld [smem:[%s13674_s0 + %s11377_s23]]  }
  0x33   :  { %s11586_s10 = sld [smem:[%s13674_s0 + %s11378_s28]]  }
  0x34   :  { %s11591_s15 = sld [smem:[%s13674_s0 + %s11379_s27]]   ;;  %s11383_s27 = smov 34  }
  0x35   :  { %13725 = sst [smem:[#allocation67_spill]] %s11566_s4  ;;  %s11382_s4 = smov 33  }
  0x36   :  { %13726 = sst [smem:[#allocation68_spill]] %s11571_s24 }
  0x37   :  { %13727 = sst [smem:[#allocation69_spill]] %s11576_s22  ;;  %s11384_s22 = smov 35  }
  0x38   :  { %s11596_s24 = sld [smem:[%s13674_s0 + %s11380_s16]]  }
  0x39   :  { %13728 = sst [smem:[#allocation70_spill]] %s11586_s10 }
  0x3a   :  { %s11606_s10 = sld [smem:[%s13674_s0 + %s11382_s4]]   ;;  %s11386_s4 = smov 37  }
  0x3b   :  { %s11611_s14 = sld [smem:[%s13674_s0 + %s11383_s27]]   ;;  %s11387_s27 = smov 38  }
  0x3c   :  { %s11616_s25 = sld [smem:[%s13674_s0 + %s11384_s22]]   ;;  %s11388_s22 = smov 39  }
  0x3d   :  { %13730 = sst [smem:[#allocation72_spill]] %s11621_s8 }
  0x3e   :  { %s11626_s3 = sld [smem:[%s13674_s0 + %s11386_s4]]   ;;  %s11390_s4 = smov 41  }
  0x3f   :  { %s11631_s29 = sld [smem:[%s13674_s0 + %s11387_s27]]   ;;  %s11391_s27 = smov 42  }
  0x40   :  { %s11636_s5 = sld [smem:[%s13674_s0 + %s11388_s22]]   ;;  %s11392_s22 = smov 43  }
  0x41   :  { %13729 = sst [smem:[#allocation71_spill]] %s11611_s14 }
  0x42   :  { %s11641_s17 = sld [smem:[%s13674_s0 + %s11389_s30]]   ;;  %s11393_s30 = smov 44  }
  0x43   :  { %s11646_s21 = sld [smem:[%s13674_s0 + %s11390_s4]]   ;;  %s11394_s4 = smov 45  }
  0x44   :  { %s11661_s8 = sld [smem:[%s13674_s0 + %s11393_s30]]   ;;  %s11397_s30 = smov 48  }
  0x45   :  { %13731 = sst [smem:[#allocation73_spill]] %s11631_s29 }
  0x46   :  { %13732 = sst [smem:[#allocation74_spill]] %s11636_s5 }
  0x47   :  { %s11651_s29 = sld [smem:[%s13674_s0 + %s11391_s27]]   ;;  %s11395_s27 = smov 46  }
  0x48   :  { %s11656_s5 = sld [smem:[%s13674_s0 + %s11392_s22]]   ;;  %s11396_s22 = smov 47  }
  0x49   :  { %13733 = sst [smem:[#allocation75_spill]] %s11646_s21 }
  0x4a   :  { %13735 = sst [smem:[#allocation77_spill]] %s11661_s8 }
  0x4b   :  { %s11666_s21 = sld [smem:[%s13674_s0 + %s11394_s4]]   ;;  %s11398_s4 = smov 49  }
  0x4c   :  { %s11676_s14 = sld [smem:[%s13674_s0 + %s11396_s22]]  }
  0x4d   :  { %13734 = sst [smem:[#allocation76_spill]] %s11651_s29 }
  0x4e   :  { %s11671_s29 = sld [smem:[%s13674_s0 + %s11395_s27]]  }
  0x4f   :  { %s11681_s8 = sld [smem:[%s13674_s0 + %s11397_s30]]  }
  0x51   :  { %13736 = sst [smem:[#allocation78_spill]] %s11666_s21 }
  0x52   :  { %s11686_s21 = sld [smem:[%s13674_s0 + %s11398_s4]]  }
  0x53   :  { %106 = vsyncpa [#allocation4], 0 }
  0x54   :  { %107 = vsyncpa [#allocation7], 0 }
  0x55   :  { %108 = vsyncpa [#allocation10], 0 }
  0x56   :  { %109 = vsyncpa [#allocation13], 0 }
  0x57   :  { %110 = vsyncpa [#allocation16], 0 }
  0x58   :  { %111 = vsyncpa [#allocation19], 0 }
  0x59   :  { %112 = vsyncpa [#allocation22], 0 }
  0x5a   :  { %113 = vsyncpa [#allocation25], 0 }
  0x5b   :  { %114 = vsyncpa [#allocation28], 0 }
  0x5c   :  { %115 = vsyncpa [#allocation31], 0 }
  0x5d   :  { %116 = vsyncpa [#allocation34], 0 }
  0x5e   :  { %117 = vsyncpa [#allocation5], 0  ;;  %s11399_s27 = smov [#allocation6]   ;;  %s11400_s11 = smov [#allocation9]  }
  0x5f   :  { %s136_s7 = sshll.u32 %s11399_s27, 4  ;;  %s195_s0 = sshll.u32 %s11400_s11, 4  ;;  %s137_s7 = int_to_ptr.vmem [resolvable:$true] %s136_s7  ;;  %s11688_s0 = int_to_ptr.vmem [resolvable:$true] %s195_s0 }
  0x60   :  { %s10864_s22 = scalar_lea.hbm %s11453_s13, 128 }
  0x61   :  { %p10865_p0 = scmp.ne.s32.totalorder %s11453_s13, %s10864_s22  ;;  %p10868_p1 = scmp.lt.u32.totalorder %s10864_s22, %s11453_s13 }
  0x63   :  { %p10870_p2 = pnand %p10868_p1, %p10865_p0 }
  0x65   :  { %10873 = shalt.err (!%p10870_p2)
}
  0x66   :  { %s10874_s16 = scalar_lea.vmem %s137_s7, 128  ;;  %p10879_p4 = scmp.lt.s32.totalorder %s137_s7, %s137_s7 }
  0x67   :  { %p10875_p3 = scmp.ne.s32.totalorder %s137_s7, %s10874_s16  ;;  %p10880_p5 = scmp.lt.s32.totalorder %s10874_s16, %s10874_s16 }
  0x69   :  { %p10881_p6 = por %p10880_p5, %p10879_p4 }
  0x6b   :  { %p10882_p7 = pnand %p10881_p6, %p10875_p3 }
  0x6d   :  { %10885 = shalt.err (!%p10882_p7)
}
  0x6e   :  { %139 = dma.hbm_to_vmem [thread:$0]  %s11453_s13, 128, %s137_s7, [#allocation7]  }
  0x6f   :  { %s10886_s18 = scalar_lea.hbm %s11556_s20, 2048 }
  0x70   :  { %p10887_p8 = scmp.ne.s32.totalorder %s11556_s20, %s10886_s18  ;;  %p10890_p9 = scmp.lt.u32.totalorder %s10886_s18, %s11556_s20 }
  0x72   :  { %p10892_p10 = pnand %p10890_p9, %p10887_p8 }
  0x74   :  { %10895 = shalt.err (!%p10892_p10)
}
  0x75   :  { %s10896_s30 = scalar_lea.vmem %s11688_s0, 2048  ;;  %p10901_p12 = scmp.lt.s32.totalorder %s11688_s0, %s11688_s0 }
  0x76   :  { %p10897_p11 = scmp.ne.s32.totalorder %s11688_s0, %s10896_s30  ;;  %p10902_p13 = scmp.lt.s32.totalorder %s10896_s30, %s10896_s30 }
  0x78   :  { %p10903_p0 = por %p10902_p13, %p10901_p12 }
  0x7a   :  { %p10904_p1 = pnand %p10903_p0, %p10897_p11 }
  0x7c   :  { %10907 = shalt.err (!%p10904_p1)
}
  0x7d   :  { %s11401_s23 = smov 256   ;;  %s11402_s13 = smov 16  }
  0x7e   :  { %201 = dma.hbm_to_vmem [thread:$0]  %s11556_s20, 2048, %s11688_s0, [#allocation10], %s11401_s23, %s11401_s23, %s11402_s13  }
  0x7f   :  { %s11403_s26 = smov [#allocation12]   ;;  %s11404_s28 = smov [#allocation15]  }
  0x80   :  { %s225_s4 = sshll.u32 %s11403_s26, 4  ;;  %s252_s2 = sshll.u32 %s11404_s28, 4  ;;  %s226_s4 = int_to_ptr.vmem [resolvable:$true] %s225_s4  ;;  %s11706_s2 = int_to_ptr.vmem [resolvable:$true] %s252_s2 }
  0x81   :  { %s10908_s27 = scalar_lea.hbm %s11581_s1, 1024 }
  0x82   :  { %p10909_p2 = scmp.ne.s32.totalorder %s11581_s1, %s10908_s27  ;;  %p10912_p3 = scmp.lt.u32.totalorder %s10908_s27, %s11581_s1 }
  0x84   :  { %p10914_p4 = pnand %p10912_p3, %p10909_p2 }
  0x86   :  { %10917 = shalt.err (!%p10914_p4)
}
  0x87   :  { %s10918_s7 = scalar_lea.vmem %s226_s4, 1024  ;;  %p10923_p6 = scmp.lt.s32.totalorder %s226_s4, %s226_s4 }
  0x88   :  { %p10919_p5 = scmp.ne.s32.totalorder %s226_s4, %s10918_s7  ;;  %p10924_p7 = scmp.lt.s32.totalorder %s10918_s7, %s10918_s7 }
  0x8a   :  { %p10925_p8 = por %p10924_p7, %p10923_p6 }
  0x8c   :  { %p10926_p9 = pnand %p10925_p8, %p10919_p5 }
  0x8e   :  { %10929 = shalt.err (!%p10926_p9)
}
  0x8f   :  { %s11405_s20 = smov 128   ;;  %s11406_s11 = smov 8  }
  0x90   :  { %231 = dma.hbm_to_vmem [thread:$0]  %s11581_s1, 1024, %s226_s4, [#allocation13], %s11405_s20, %s11405_s20, %s11406_s11  }
  0x91   :  { %s10930_s0 = scalar_lea.hbm %s11596_s24, 16 }
  0x92   :  { %p10931_p10 = scmp.ne.s32.totalorder %s11596_s24, %s10930_s0  ;;  %p10934_p11 = scmp.lt.u32.totalorder %s10930_s0, %s11596_s24 }
  0x94   :  { %p10936_p12 = pnand %p10934_p11, %p10931_p10 }
  0x96   :  { %10939 = shalt.err (!%p10936_p12)
}
  0x97   :  { %s10940_s22 = scalar_lea.vmem %s11706_s2, 16  ;;  %s10944_s16 = scalar_lea.vmem %s11706_s2, 32 }
  0x98   :  { %p10941_p13 = scmp.ne.s32.totalorder %s11706_s2, %s10940_s22  ;;  %p10945_p0 = scmp.lt.s32.totalorder %s11706_s2, %s11706_s2 }
  0x99   :  { %p10946_p1 = scmp.lt.s32.totalorder %s10944_s16, %s10940_s22 }
  0x9b   :  { %p10947_p2 = por %p10946_p1, %p10945_p0 }
  0x9d   :  { %p10948_p3 = pnand %p10947_p2, %p10941_p13 }
  0x9f   :  { %10951 = shalt.err (!%p10948_p3)
}
  0xa0   :  { %255 = dma.hbm_to_vmem [thread:$0]  %s11596_s24, 16, %s11706_s2, [#allocation16]  }
  0xa1   :  { %s11407_s1 = smov [#allocation18]   ;;  %s11408_s30 = smov [#allocation21]  }
  0xa2   :  { %s272_s18 = sshll.u32 %s11407_s1, 4  ;;  %s293_s26 = sshll.u32 %s11408_s30, 4  ;;  %s273_s18 = int_to_ptr.vmem [resolvable:$true] %s272_s18  ;;  %s11725_s26 = int_to_ptr.vmem [resolvable:$true] %s293_s26 }
  0xa3   :  { %s10952_s4 = scalar_lea.hbm %s11606_s10, 16 }
  0xa4   :  { %p10953_p4 = scmp.ne.s32.totalorder %s11606_s10, %s10952_s4  ;;  %p10956_p5 = scmp.lt.u32.totalorder %s10952_s4, %s11606_s10 }
  0xa6   :  { %p10958_p6 = pnand %p10956_p5, %p10953_p4 }
  0xa8   :  { %10961 = shalt.err (!%p10958_p6)
}
  0xa9   :  { %s10962_s28 = scalar_lea.vmem %s273_s18, 16  ;;  %s10966_s27 = scalar_lea.vmem %s273_s18, 32 }
  0xaa   :  { %p10963_p7 = scmp.ne.s32.totalorder %s273_s18, %s10962_s28  ;;  %p10967_p8 = scmp.lt.s32.totalorder %s273_s18, %s273_s18 }
  0xab   :  { %p10968_p9 = scmp.lt.s32.totalorder %s10966_s27, %s10962_s28 }
  0xad   :  { %p10969_p10 = por %p10968_p9, %p10967_p8 }
  0xaf   :  { %p10970_p11 = pnand %p10969_p10, %p10963_p7 }
  0xb1   :  { %10973 = shalt.err (!%p10970_p11)
}
  0xb2   :  { %275 = dma.hbm_to_vmem [thread:$0]  %s11606_s10, 16, %s273_s18, [#allocation19]  }
  0xb3   :  { %s10974_s24 = scalar_lea.hbm %s11616_s25, 1024 }
  0xb4   :  { %p10975_p12 = scmp.ne.s32.totalorder %s11616_s25, %s10974_s24  ;;  %p10978_p13 = scmp.lt.u32.totalorder %s10974_s24, %s11616_s25 }
  0xb6   :  { %p10980_p0 = pnand %p10978_p13, %p10975_p12 }
  0xb8   :  { %10983 = shalt.err (!%p10980_p0)
}
  0xb9   :  { %s10984_s2 = scalar_lea.vmem %s11725_s26, 1024  ;;  %p10989_p2 = scmp.lt.s32.totalorder %s11725_s26, %s11725_s26 }
  0xba   :  { %p10985_p1 = scmp.ne.s32.totalorder %s11725_s26, %s10984_s2  ;;  %p10990_p3 = scmp.lt.s32.totalorder %s10984_s2, %s10984_s2 }
  0xbc   :  { %p10991_p4 = por %p10990_p3, %p10989_p2 }
  0xbe   :  { %p10992_p5 = pnand %p10991_p4, %p10985_p1 }
  0xc0   :  { %10995 = shalt.err (!%p10992_p5)
}
  0xc1   :  { %299 = dma.hbm_to_vmem [thread:$0]  %s11616_s25, 1024, %s11725_s26, [#allocation22], %s11405_s20, %s11405_s20, %s11406_s11  }
  0xc2   :  { %s11409_s10 = smov [#allocation24]   ;;  %s11410_s0 = smov [#allocation27]  }
  0xc3   :  { %s316_s7 = sshll.u32 %s11409_s10, 4  ;;  %s338_s22 = sshll.u32 %s11410_s0, 4  ;;  %s317_s7 = int_to_ptr.vmem [resolvable:$true] %s316_s7  ;;  %s339_s22 = int_to_ptr.vmem [resolvable:$true] %s338_s22 }
  0xc4   :  { %s10996_s16 = scalar_lea.hbm %s11626_s3, 16 }
  0xc5   :  { %p10997_p6 = scmp.ne.s32.totalorder %s11626_s3, %s10996_s16  ;;  %p11000_p7 = scmp.lt.u32.totalorder %s10996_s16, %s11626_s3 }
  0xc7   :  { %p11002_p8 = pnand %p11000_p7, %p10997_p6 }
  0xc9   :  { %11005 = shalt.err (!%p11002_p8)
}
  0xca   :  { %s11006_s1 = scalar_lea.vmem %s317_s7, 16  ;;  %s11010_s18 = scalar_lea.vmem %s317_s7, 32 }
  0xcb   :  { %p11007_p9 = scmp.ne.s32.totalorder %s317_s7, %s11006_s1  ;;  %p11011_p10 = scmp.lt.s32.totalorder %s317_s7, %s317_s7 }
  0xcc   :  { %p11012_p11 = scmp.lt.s32.totalorder %s11010_s18, %s11006_s1 }
  0xce   :  { %p11013_p12 = por %p11012_p11, %p11011_p10 }
  0xd0   :  { %p11014_p13 = pnand %p11013_p12, %p11007_p9 }
  0xd2   :  { %11017 = shalt.err (!%p11014_p13)
}
  0xd3   :  { %319 = dma.hbm_to_vmem [thread:$0]  %s11626_s3, 16, %s317_s7, [#allocation25]  }
  0xd4   :  { %s11018_s25 = scalar_lea.hbm %s11641_s17, 16 }
  0xd5   :  { %p11019_p0 = scmp.ne.s32.totalorder %s11641_s17, %s11018_s25  ;;  %p11022_p1 = scmp.lt.u32.totalorder %s11018_s25, %s11641_s17 }
  0xd7   :  { %p11024_p2 = pnand %p11022_p1, %p11019_p0 }
  0xd9   :  { %11027 = shalt.err (!%p11024_p2)
}
  0xda   :  { %s11028_s30 = scalar_lea.vmem %s339_s22, 16  ;;  %s11032_s26 = scalar_lea.vmem %s339_s22, 32 }
  0xdb   :  { %p11029_p3 = scmp.ne.s32.totalorder %s339_s22, %s11028_s30  ;;  %p11033_p4 = scmp.lt.s32.totalorder %s339_s22, %s339_s22 }
  0xdc   :  { %p11034_p5 = scmp.lt.s32.totalorder %s11032_s26, %s11028_s30 }
  0xde   :  { %p11035_p6 = por %p11034_p5, %p11033_p4 }
  0xe0   :  { %p11036_p7 = pnand %p11035_p6, %p11029_p3 }
  0xe2   :  { %11039 = shalt.err (!%p11036_p7)
}
  0xe3   :  { %341 = dma.hbm_to_vmem [thread:$0]  %s11641_s17, 16, %s339_s22, [#allocation28]  }
  0xe4   :  { %s11411_s4 = smov [#allocation30]   ;;  %s11412_s28 = smov [#allocation3]  }
  0xe5   :  { %s361_s3 = sshll.u32 %s11411_s4, 4  ;;  %s126_s27 = sshll.u32 %s11412_s28, 4  ;;  %s362_s3 = int_to_ptr.vmem [resolvable:$true] %s361_s3  ;;  %s127_s27 = int_to_ptr.vmem [resolvable:$true] %s126_s27 }
  0xe6   :  { %s11040_s24 = scalar_lea.hbm %s11656_s5, 1024 }
  0xe7   :  { %p11041_p8 = scmp.ne.s32.totalorder %s11656_s5, %s11040_s24  ;;  %p11044_p9 = scmp.lt.u32.totalorder %s11040_s24, %s11656_s5 }
  0xe9   :  { %p11046_p10 = pnand %p11044_p9, %p11041_p8 }
  0xeb   :  { %11049 = shalt.err (!%p11046_p10)
}
  0xec   :  { %s11050_s2 = scalar_lea.vmem %s362_s3, 1024  ;;  %p11055_p12 = scmp.lt.s32.totalorder %s362_s3, %s362_s3 }
  0xed   :  { %p11051_p11 = scmp.ne.s32.totalorder %s362_s3, %s11050_s2  ;;  %p11056_p13 = scmp.lt.s32.totalorder %s11050_s2, %s11050_s2 }
  0xef   :  { %p11057_p0 = por %p11056_p13, %p11055_p12 }
  0xf1   :  { %p11058_p1 = pnand %p11057_p0, %p11051_p11 }
  0xf3   :  { %11061 = shalt.err (!%p11058_p1)
}
  0xf4   :  { %367 = dma.hbm_to_vmem [thread:$0]  %s11656_s5, 1024, %s362_s3, [#allocation31], %s11405_s20, %s11405_s20, %s11406_s11  }
  0xf5   :  { %s11062_s17 = scalar_lea.hbm %s11448_s9, 128 }
  0xf6   :  { %p11063_p2 = scmp.ne.s32.totalorder %s11448_s9, %s11062_s17  ;;  %p11066_p3 = scmp.lt.u32.totalorder %s11062_s17, %s11448_s9 }
  0xf8   :  { %p11068_p4 = pnand %p11066_p3, %p11063_p2 }
  0xfa   :  { %11071 = shalt.err (!%p11068_p4)
}
  0xfb   :  { %s11072_s10 = scalar_lea.vmem %s127_s27, 128  ;;  %p11077_p6 = scmp.lt.s32.totalorder %s127_s27, %s127_s27 }
  0xfc   :  { %p11073_p5 = scmp.ne.s32.totalorder %s127_s27, %s11072_s10  ;;  %p11078_p7 = scmp.lt.s32.totalorder %s11072_s10, %s11072_s10 }
  0xfe   :  { %p11079_p8 = por %p11078_p7, %p11077_p6 }
 0x100   :  { %p11080_p9 = pnand %p11079_p8, %p11073_p5 }
 0x102   :  { %11083 = shalt.err (!%p11080_p9)
}
 0x103   :  { %129 = dma.hbm_to_vmem [thread:$0]  %s11448_s9, 128, %s127_s27, [#allocation4]  }
 0x104   :  { %s11413_s7 = smov [#allocation8]   ;;  %s11084_s5 = scalar_lea.hbm %s11508_s6, 4096 }
 0x105   :  { %s165_s0 = sshll.u32 %s11413_s7, 4  ;;  %p11085_p10 = scmp.ne.s32.totalorder %s11508_s6, %s11084_s5  ;;  %s166_s0 = int_to_ptr.vmem [resolvable:$true] %s165_s0 }
 0x106   :  { %p11088_p11 = scmp.lt.u32.totalorder %s11084_s5, %s11508_s6 }
 0x108   :  { %p11090_p12 = pnand %p11088_p11, %p11085_p10 }
 0x10a   :  { %11093 = shalt.err (!%p11090_p12)
}
 0x10b   :  { %s11094_s22 = scalar_lea.vmem %s166_s0, 4096  ;;  %p11099_p0 = scmp.lt.s32.totalorder %s166_s0, %s166_s0 }
 0x10c   :  { %p11095_p13 = scmp.ne.s32.totalorder %s166_s0, %s11094_s22  ;;  %p11100_p1 = scmp.lt.s32.totalorder %s11094_s22, %s11094_s22 }
 0x10e   :  { %p11101_p2 = por %p11100_p1, %p11099_p0 }
 0x110   :  { %p11102_p3 = pnand %p11101_p2, %p11095_p13 }
 0x112   :  { %11105 = shalt.err (!%p11102_p3)
}
 0x113   :  { %s11414_s16 = smov 64   ;;  %s11415_s9 = smov 4  }
 0x114   :  { %171 = dma.hbm_to_vmem [thread:$0]  %s11508_s6, 4096, %s166_s0, [#allocation7], %s11414_s16, %s11414_s16, %s11415_s9  }
 0x115   :  { %s11416_s1 = smov [#allocation11]   ;;  %s11417_s25 = smov [#allocation14]  }
 0x116   :  { %s207_s18 = sshll.u32 %s11416_s1, 4  ;;  %s239_s30 = sshll.u32 %s11417_s25, 4  ;;  %s208_s18 = int_to_ptr.vmem [resolvable:$true] %s207_s18  ;;  %s240_s30 = int_to_ptr.vmem [resolvable:$true] %s239_s30 }
 0x117   :  { %s11106_s26 = scalar_lea.hbm %s11561_s12, 1024 }
 0x118   :  { %p11107_p4 = scmp.ne.s32.totalorder %s11561_s12, %s11106_s26  ;;  %p11110_p5 = scmp.lt.u32.totalorder %s11106_s26, %s11561_s12 }
 0x11a   :  { %p11112_p6 = pnand %p11110_p5, %p11107_p4 }
 0x11c   :  { %11115 = shalt.err (!%p11112_p6)
}
 0x11d   :  { %s11116_s4 = scalar_lea.vmem %s208_s18, 1024  ;;  %p11121_p8 = scmp.lt.s32.totalorder %s208_s18, %s208_s18 }
 0x11e   :  { %p11117_p7 = scmp.ne.s32.totalorder %s208_s18, %s11116_s4  ;;  %p11122_p9 = scmp.lt.s32.totalorder %s11116_s4, %s11116_s4 }
 0x120   :  { %p11123_p10 = por %p11122_p9, %p11121_p8 }
 0x122   :  { %p11124_p11 = pnand %p11123_p10, %p11117_p7 }
 0x124   :  { %11127 = shalt.err (!%p11124_p11)
}
 0x125   :  { %213 = dma.hbm_to_vmem [thread:$0]  %s11561_s12, 1024, %s208_s18, [#allocation10], %s11405_s20, %s11405_s20, %s11406_s11  }
 0x126   :  { %s11128_s6 = scalar_lea.hbm %s11591_s15, 1024 }
 0x127   :  { %p11129_p12 = scmp.ne.s32.totalorder %s11591_s15, %s11128_s6  ;;  %p11132_p13 = scmp.lt.u32.totalorder %s11128_s6, %s11591_s15 }
 0x129   :  { %p11134_p0 = pnand %p11132_p13, %p11129_p12 }
 0x12b   :  { %11137 = shalt.err (!%p11134_p0)
}
 0x12c   :  { %s11138_s3 = scalar_lea.vmem %s240_s30, 1024  ;;  %p11143_p2 = scmp.lt.s32.totalorder %s240_s30, %s240_s30 }
 0x12d   :  { %p11139_p1 = scmp.ne.s32.totalorder %s240_s30, %s11138_s3  ;;  %p11144_p3 = scmp.lt.s32.totalorder %s11138_s3, %s11138_s3 }
 0x12f   :  { %p11145_p4 = por %p11144_p3, %p11143_p2 }
 0x131   :  { %p11146_p5 = pnand %p11145_p4, %p11139_p1 }
 0x133   :  { %11149 = shalt.err (!%p11146_p5)
}
 0x134   :  { %245 = dma.hbm_to_vmem [thread:$0]  %s11591_s15, 1024, %s240_s30, [#allocation13], %s11405_s20, %s11405_s20, %s11406_s11  }
 0x135   :  { %s11418_s12 = smov [#allocation17]   ;;  %s11419_s27 = smov [#allocation20]  }
 0x136   :  { %s262_s28 = sshll.u32 %s11418_s12, 4  ;;  %s281_s24 = sshll.u32 %s11419_s27, 4  ;;  %s263_s28 = int_to_ptr.vmem [resolvable:$true] %s262_s28  ;;  %s282_s24 = int_to_ptr.vmem [resolvable:$true] %s281_s24 }
 0x137   :  { %s11150_s2 = scalar_lea.hbm %s11601_s19, 16 }
 0x138   :  { %p11151_p6 = scmp.ne.s32.totalorder %s11601_s19, %s11150_s2  ;;  %p11154_p7 = scmp.lt.u32.totalorder %s11150_s2, %s11601_s19 }
 0x13a   :  { %p11156_p8 = pnand %p11154_p7, %p11151_p6 }
 0x13c   :  { %11159 = shalt.err (!%p11156_p8)
}
 0x13d   :  { %s11160_s17 = scalar_lea.vmem %s263_s28, 16  ;;  %s11164_s10 = scalar_lea.vmem %s263_s28, 32 }
 0x13e   :  { %p11161_p9 = scmp.ne.s32.totalorder %s263_s28, %s11160_s17  ;;  %p11165_p10 = scmp.lt.s32.totalorder %s263_s28, %s263_s28 }
 0x13f   :  { %p11166_p11 = scmp.lt.s32.totalorder %s11164_s10, %s11160_s17 }
 0x141   :  { %p11167_p12 = por %p11166_p11, %p11165_p10 }
 0x143   :  { %p11168_p13 = pnand %p11167_p12, %p11161_p9 }
 0x145   :  { %11171 = shalt.err (!%p11168_p13)
}
 0x146   :  { %s13737_s15 = sld [smem:[#allocation71_spill]] }
 0x147   :  { %265 = dma.hbm_to_vmem [thread:$0]  %s11601_s19, 16, %s263_s28, [#allocation16]  }
 0x14c   :  { %s11172_s7 = scalar_lea.hbm %s13737_s15, 2048 }
 0x14d   :  { %p11173_p0 = scmp.ne.s32.totalorder %s13737_s15, %s11172_s7  ;;  %p11176_p1 = scmp.lt.u32.totalorder %s11172_s7, %s13737_s15 }
 0x14f   :  { %p11178_p2 = pnand %p11176_p1, %p11173_p0 }
 0x151   :  { %11181 = shalt.err (!%p11178_p2)
}
 0x152   :  { %s11182_s0 = scalar_lea.vmem %s282_s24, 2048  ;;  %p11187_p4 = scmp.lt.s32.totalorder %s282_s24, %s282_s24 }
 0x153   :  { %p11183_p3 = scmp.ne.s32.totalorder %s282_s24, %s11182_s0  ;;  %p11188_p5 = scmp.lt.s32.totalorder %s11182_s0, %s11182_s0 }
 0x155   :  { %p11189_p6 = por %p11188_p5, %p11187_p4 }
 0x157   :  { %p11190_p7 = pnand %p11189_p6, %p11183_p3 }
 0x159   :  { %11193 = shalt.err (!%p11190_p7)
}
 0x15a   :  { %s13738_s5 = sld [smem:[#allocation72_spill]]  ;;  %s11420_s19 = smov [#allocation23]  }
 0x15b   :  { %287 = dma.hbm_to_vmem [thread:$0]  %s13737_s15, 2048, %s282_s24, [#allocation19], %s11401_s23, %s11401_s23, %s11402_s13  }
 0x15c   :  { %s306_s22 = sshll.u32 %s11420_s19, 4  ;;  %s11421_s9 = smov [#allocation26]   ;;  %s307_s22 = int_to_ptr.vmem [resolvable:$true] %s306_s22 }
 0x15d   :  { %s326_s1 = sshll.u32 %s11421_s9, 4  ;;  %s327_s1 = int_to_ptr.vmem [resolvable:$true] %s326_s1 }
 0x160   :  { %s11194_s18 = scalar_lea.hbm %s13738_s5, 16 }
 0x161   :  { %p11195_p8 = scmp.ne.s32.totalorder %s13738_s5, %s11194_s18  ;;  %p11198_p9 = scmp.lt.u32.totalorder %s11194_s18, %s13738_s5 }
 0x163   :  { %p11200_p10 = pnand %p11198_p9, %p11195_p8 }
 0x165   :  { %11203 = shalt.err (!%p11200_p10)
}
 0x166   :  { %s11204_s25 = scalar_lea.vmem %s307_s22, 16  ;;  %s11208_s30 = scalar_lea.vmem %s307_s22, 32 }
 0x167   :  { %p11205_p11 = scmp.ne.s32.totalorder %s307_s22, %s11204_s25  ;;  %p11209_p12 = scmp.lt.s32.totalorder %s307_s22, %s307_s22 }
 0x168   :  { %p11210_p13 = scmp.lt.s32.totalorder %s11208_s30, %s11204_s25 }
 0x16a   :  { %p11211_p0 = por %p11210_p13, %p11209_p12 }
 0x16c   :  { %p11212_p1 = pnand %p11211_p0, %p11205_p11 }
 0x16e   :  { %11215 = shalt.err (!%p11212_p1)
}
 0x16f   :  { %s13739_s26 = sld [smem:[#allocation73_spill]] }
 0x170   :  { %309 = dma.hbm_to_vmem [thread:$0]  %s13738_s5, 16, %s307_s22, [#allocation22]  }
 0x175   :  { %s11216_s4 = scalar_lea.hbm %s13739_s26, 16 }
 0x176   :  { %p11217_p2 = scmp.ne.s32.totalorder %s13739_s26, %s11216_s4  ;;  %p11220_p3 = scmp.lt.u32.totalorder %s11216_s4, %s13739_s26 }
 0x178   :  { %p11222_p4 = pnand %p11220_p3, %p11217_p2 }
 0x17a   :  { %11225 = shalt.err (!%p11222_p4)
}
 0x17b   :  { %s11226_s6 = scalar_lea.vmem %s327_s1, 16  ;;  %s11230_s3 = scalar_lea.vmem %s327_s1, 32 }
 0x17c   :  { %p11227_p5 = scmp.ne.s32.totalorder %s327_s1, %s11226_s6  ;;  %p11231_p6 = scmp.lt.s32.totalorder %s327_s1, %s327_s1 }
 0x17d   :  { %p11232_p7 = scmp.lt.s32.totalorder %s11230_s3, %s11226_s6 }
 0x17f   :  { %p11233_p8 = por %p11232_p7, %p11231_p6 }
 0x181   :  { %p11234_p9 = pnand %p11233_p8, %p11227_p5 }
 0x183   :  { %11237 = shalt.err (!%p11234_p9)
}
 0x184   :  { %s13740_s12 = sld [smem:[#allocation75_spill]]  ;;  %s11422_s28 = smov [#allocation29]  }
 0x185   :  { %329 = dma.hbm_to_vmem [thread:$0]  %s13739_s26, 16, %s327_s1, [#allocation25]  }
 0x186   :  { %s347_s27 = sshll.u32 %s11422_s28, 4  ;;  %s11423_s24 = smov [#allocation32]   ;;  %s348_s27 = int_to_ptr.vmem [resolvable:$true] %s347_s27 }
 0x187   :  { %s373_s2 = sshll.u32 %s11423_s24, 4  ;;  %s374_s2 = int_to_ptr.vmem [resolvable:$true] %s373_s2 }
 0x18a   :  { %s11238_s17 = scalar_lea.hbm %s13740_s12, 1024 }
 0x18b   :  { %p11239_p10 = scmp.ne.s32.totalorder %s13740_s12, %s11238_s17  ;;  %p11242_p11 = scmp.lt.u32.totalorder %s11238_s17, %s13740_s12 }
 0x18d   :  { %p11244_p12 = pnand %p11242_p11, %p11239_p10 }
 0x18f   :  { %11247 = shalt.err (!%p11244_p12)
}
 0x190   :  { %s11248_s10 = scalar_lea.vmem %s348_s27, 1024  ;;  %p11253_p0 = scmp.lt.s32.totalorder %s348_s27, %s348_s27 }
 0x191   :  { %p11249_p13 = scmp.ne.s32.totalorder %s348_s27, %s11248_s10  ;;  %p11254_p1 = scmp.lt.s32.totalorder %s11248_s10, %s11248_s10 }
 0x193   :  { %p11255_p2 = por %p11254_p1, %p11253_p0 }
 0x195   :  { %p11256_p3 = pnand %p11255_p2, %p11249_p13 }
 0x197   :  { %11259 = shalt.err (!%p11256_p3)
}
 0x198   :  { %s13741_s15 = sld [smem:[#allocation77_spill]] }
 0x199   :  { %353 = dma.hbm_to_vmem [thread:$0]  %s13740_s12, 1024, %s348_s27, [#allocation28], %s11405_s20, %s11405_s20, %s11406_s11  }
 0x19e   :  { %s11260_s7 = scalar_lea.hbm %s13741_s15, 1024 }
 0x19f   :  { %p11261_p4 = scmp.ne.s32.totalorder %s13741_s15, %s11260_s7  ;;  %p11264_p5 = scmp.lt.u32.totalorder %s11260_s7, %s13741_s15 }
 0x1a1   :  { %p11266_p6 = pnand %p11264_p5, %p11261_p4 }
 0x1a3   :  { %11269 = shalt.err (!%p11266_p6)
}
 0x1a4   :  { %s11270_s0 = scalar_lea.vmem %s374_s2, 1024  ;;  %p11275_p8 = scmp.lt.s32.totalorder %s374_s2, %s374_s2 }
 0x1a5   :  { %p11271_p7 = scmp.ne.s32.totalorder %s374_s2, %s11270_s0  ;;  %p11276_p9 = scmp.lt.s32.totalorder %s11270_s0, %s11270_s0 }
 0x1a7   :  { %p11277_p10 = por %p11276_p9, %p11275_p8 }
 0x1a9   :  { %p11278_p11 = pnand %p11277_p10, %p11271_p7 }
 0x1ab   :  { %11281 = shalt.err (!%p11278_p11)
}
 0x1ac   :  { %379 = dma.hbm_to_vmem [thread:$0]  %s13741_s15, 1024, %s374_s2, [#allocation31], %s11405_s20, %s11405_s20, %s11406_s11  }
 0x1ad   :  { %s11424_s5 = smov [#allocation33]   ;;  %s11282_s22 = scalar_lea.hbm %s11676_s14, 4096 }
 0x1ae   :  { %s389_s19 = sshll.u32 %s11424_s5, 4  ;;  %p11283_p12 = scmp.ne.s32.totalorder %s11676_s14, %s11282_s22  ;;  %s390_s19 = int_to_ptr.vmem [resolvable:$true] %s389_s19 }
 0x1af   :  { %p11286_p13 = scmp.lt.u32.totalorder %s11282_s22, %s11676_s14 }
 0x1b1   :  { %p11288_p0 = pnand %p11286_p13, %p11283_p12 }
 0x1b3   :  { %11291 = shalt.err (!%p11288_p0)
}
 0x1b4   :  { %s11292_s9 = scalar_lea.vmem %s390_s19, 4096  ;;  %p11297_p2 = scmp.lt.s32.totalorder %s390_s19, %s390_s19 }
 0x1b5   :  { %p11293_p1 = scmp.ne.s32.totalorder %s390_s19, %s11292_s9  ;;  %p11298_p3 = scmp.lt.s32.totalorder %s11292_s9, %s11292_s9 }
 0x1b7   :  { %p11299_p4 = por %p11298_p3, %p11297_p2 }
 0x1b9   :  { %p11300_p5 = pnand %p11299_p4, %p11293_p1 }
 0x1bb   :  { %11303 = shalt.err (!%p11300_p5)
}
 0x1bc   :  { %395 = dma.hbm_to_vmem [thread:$0]  %s11676_s14, 4096, %s390_s19, [#allocation34], %s11401_s23, %s11401_s23, %s11402_s13  }
 0x1bd   :  { %11326 = dma.done.wait [#allocation4], 128  }
 0x1be   :  { %11327 = vsyncadd [#allocation4], 4294967168 }
 0x1bf   :  { %11328 = dma.done.wait [#allocation7], 4224  }
 0x1c0   :  { %11329 = vsyncadd [#allocation7], 4294963072 }
 0x1c1   :  { %11330 = dma.done.wait [#allocation10], 3072  }
 0x1c2   :  { %11331 = vsyncadd [#allocation10], 4294964224 }
 0x1c3   :  { %11332 = dma.done.wait [#allocation13], 2048  }
 0x1c4   :  { %11333 = vsyncadd [#allocation13], 4294965248 }
 0x1c5   :  { %11334 = dma.done.wait [#allocation16], 32  }
 0x1c6   :  { %11335 = vsyncadd [#allocation16], 4294967264 }
 0x1c7   :  { %11336 = dma.done.wait [#allocation19], 2064  }
 0x1c8   :  { %11337 = vsyncadd [#allocation19], 4294965232 }
 0x1c9   :  { %11338 = dma.done.wait [#allocation22], 1040  }
 0x1ca   :  { %11339 = vsyncadd [#allocation22], 4294966256 }
 0x1cb   :  { %11340 = dma.done.wait [#allocation25], 32  }
 0x1cc   :  { %11341 = vsyncadd [#allocation25], 4294967264 }
 0x1cd   :  { %11342 = dma.done.wait [#allocation28], 1040  }
 0x1ce   :  { %11343 = vsyncadd [#allocation28], 4294966256 }
 0x1cf   :  { %11344 = dma.done.wait [#allocation31], 2048  }
 0x1d0   :  { %11345 = vsyncadd [#allocation31], 4294965248 }
 0x1d1   :  { %11346 = dma.done.wait [#allocation34], 4096  }
 0x1d2   :  { %11347 = vsyncadd [#allocation34], 4294963200  ;;  %s13742_s14 = sld [smem:[#allocation50_spill]]  ;;  %s13743_s23 = sld [smem:[#allocation49_spill]]  ;;  %v11425_v1 = vmov 0   ;;  %v13699_v2 = vmov 0.0  }
 0x1d3   :  { %10533 = vset.pattern.permute.xlu1 %v11425_v1  ;;  %10532 = vset.pattern.permute.xlu0 %v11425_v1  ;;  %vm11427_vm0 = vmmov 0   ;;  %s13744_s20 = sld [smem:[#allocation48_spill]]  ;;  %s13745_s11 = sld [smem:[#allocation52_spill]]  ;;  %vm803_vm1 = vcmask 523264   ;;  %vm5920_vm2 = vcmask 130048   ;;  %vm5995_vm3 = vcmask 64512  }
 0x1d4   :  { %9565 = vmatprep.subr.bf16.mxu0 %v13699_v2  ;;  %9577 = vmatprep.subr.bf16.mxu1 %v13699_v2  ;;  %s13746_s1 = sld [smem:[#allocation53_spill]]  ;;  %s13747_s18 = sld [smem:[#allocation54_spill]]  ;;  %vm6589_vm4 = vcmask 261120   ;;  %vm6591_vm5 = vcmask 392192  }
 0x1d5   :  { %9573 = vmatprep.mubr.msk.bf16.mxu0 %vm11427_vm0, %v13699_v2  ;;  %9585 = vmatprep.mubr.msk.bf16.mxu1 %vm11427_vm0, %v13699_v2  ;;  %s13748_s25 = sld [smem:[#allocation51_spill]]  ;;  %s13749_s30 = sld [smem:[#allocation55_spill]] }
 0x1d6   :  { %s13750_s26 = sld [smem:[#allocation56_spill]]  ;;  %s13756_s4 = sld [smem:[#allocation58_spill]] }
 0x1d7   :  { %s13760_s6 = sld [smem:[#allocation59_spill]]  ;;  %s13767_s3 = sld [smem:[#allocation60_spill]] }
 0x1d8   :  { %v8862_v3 = vld [vmem:[%s13742_s14 + $0x2] ss:$0 sm:$0xff]  ;;  %v8860_v4 = vld [vmem:[%s13742_s14] ss:$0 sm:$0xff]  ;;  %v8863_v7 = vld [vmem:[%s13742_s14 + $0x3] ss:$0 sm:$0xff] }
 0x1d9   :  { %756 = vperm.xlu1 %10533, %v8862_v3   ;;  %748 = vperm.xlu0 %10532, %v8860_v4   ;;  %v10534_v5 = vld [vmem:[%s13743_s23] sm:$0xff]   ;;  %v10536_v9 = vld [vmem:[%s13743_s23 + $0x8] sm:$0xff]   ;;  %v10538_v13 = vld [vmem:[%s13743_s23 + $0x10] sm:$0xff]   ;;  %s13789_s12 = sld [smem:[#allocation61_spill]]  ;;  %s13802_s28 = sld [smem:[#allocation62_spill]] }
 0x1da   :  { %v10535_v6 = vld [vmem:[%s13743_s23 + $0x20] sm:$0xff]   ;;  %9566 = vmatpush3.bf16.msra.mxu0 %v10534_v5  ;;  %v10537_v10 = vld [vmem:[%s13743_s23 + $0x28] sm:$0xff]   ;;  %v10539_v14 = vld [vmem:[%s13743_s23 + $0x30] sm:$0xff]   ;;  %s13804_s27 = sld [smem:[#allocation63_spill]]  ;;  %s13808_s24 = sld [smem:[#allocation64_spill]] }
 0x1db   :  { %v8861_v8 = vld [vmem:[%s13742_s14 + $0x1] ss:$0 sm:$0xff]  ;;  %9578 = vmatpush3.bf16.msra.mxu1 %v10535_v6  ;;  %9567 = vmatprep.subr.bf16.mxu0 %v13699_v2  ;;  %v8865_v11 = vld [vmem:[%s13742_s14 + $0x5] ss:$0 sm:$0xff]  ;;  %v8864_v12 = vld [vmem:[%s13742_s14 + $0x4] ss:$0 sm:$0xff] }
 0x1dc   :  { %9579 = vmatprep.subr.bf16.mxu1 %v13699_v2  ;;  %v8867_v15 = vld [vmem:[%s13742_s14 + $0x7] ss:$0 sm:$0xff]  ;;  %v8866_v16 = vld [vmem:[%s13742_s14 + $0x6] ss:$0 sm:$0xff]  ;;  %v10540_v17 = vld [vmem:[%s13743_s23 + $0x18] sm:$0xff]   ;;  %s13818_s2 = sld [smem:[#allocation57_spill]] }
 0x1dd   :  { %760 = vperm.xlu1 %10533, %v8863_v7   ;;  %752 = vperm.xlu0 %10532, %v8861_v8   ;;  %v10541_v18 = vld [vmem:[%s13743_s23 + $0x38] sm:$0xff]   ;;  %v459_v19 = vld [vmem:[%s13744_s20] sm:$0xff]  ;;  %v460_v20 = vld [vmem:[%s13744_s20 + $0x8] sm:$0xff]  ;;  %s13957_s17 = sld [smem:[#allocation65_spill]]  ;;  %s13958_s10 = sld [smem:[#allocation66_spill]] }
 0x1de   :  { %9568 = vmatpush3.bf16.msra.mxu0 %v10536_v9  ;;  %v8909_v21 = vld [vmem:[%s13745_s11 + $0x1] ss:$0 sm:$0xff]  ;;  %v8908_v22 = vld [vmem:[%s13745_s11] ss:$0 sm:$0xff]  ;;  %v699_v23 = vpack.c.bf16 %v459_v19, %v459_v19  ;;  %v700_v24 = vpack.c.bf16 %v460_v20, %v460_v20  ;;  %v8911_v27 = vld [vmem:[%s13745_s11 + $0x3] ss:$0 sm:$0xff] }
 0x1df   :  { %9580 = vmatpush3.bf16.msra.mxu1 %v10537_v10  ;;  %9569 = vmatprep.subr.bf16.mxu0 %v13699_v2  ;;  %v10542_v25 = vld [vmem:[%s13743_s23 + $0x40] sm:$0xff]   ;;  %v10544_v29 = vld [vmem:[%s13743_s23 + $0x48] sm:$0xff]   ;;  %v10546_v33 = vld [vmem:[%s13743_s23 + $0x50] sm:$0xff]   ;;  %s11428_s15 = smov 112   ;;  %s11429_s7 = smov 32  }
 0x1e0   :  { %9581 = vmatprep.subr.bf16.mxu1 %v13699_v2  ;;  %v10543_v26 = vld [vmem:[%s13743_s23 + $0x60] sm:$0xff]   ;;  %v10545_v30 = vld [vmem:[%s13743_s23 + $0x68] sm:$0xff]   ;;  %v10547_v34 = vld [vmem:[%s13743_s23 + $0x70] sm:$0xff]   ;;  %s11430_s0 = smov 48   ;;  %s11431_s5 = smov 96  }
 0x1e1   :  { %768 = vperm.xlu1 %10533, %v8865_v11   ;;  %764 = vperm.xlu0 %10532, %v8864_v12   ;;  %v8910_v28 = vld [vmem:[%s13745_s11 + $0x2] ss:$0 sm:$0xff]  ;;  %v8913_v31 = vld [vmem:[%s13745_s11 + $0x5] ss:$0 sm:$0xff]  ;;  %v8912_v32 = vld [vmem:[%s13745_s11 + $0x4] ss:$0 sm:$0xff] }
 0x1e2   :  { %9570 = vmatpush3.bf16.msra.mxu0 %v10538_v13  ;;  %v8915_v35 = vld [vmem:[%s13745_s11 + $0x7] ss:$0 sm:$0xff]  ;;  %v8914_v36 = vld [vmem:[%s13745_s11 + $0x6] ss:$0 sm:$0xff]  ;;  %v10548_v37 = vld [vmem:[%s13743_s23 + $0x58] sm:$0xff]   ;;  %s11432_s19 = smov 80  }
 0x1e3   :  { %9582 = vmatpush3.bf16.msra.mxu1 %v10539_v14  ;;  %9571 = vmatprep.subr.bf16.mxu0 %v13699_v2  ;;  %v461_v38 = vld [vmem:[%s13744_s20 + $0x10] sm:$0xff]  ;;  %v10549_v39 = vld [vmem:[%s13743_s23 + $0x78] sm:$0xff]   ;;  %v8964_v41 = vld [vmem:[%s13746_s1 + $0x8] ss:$0 sm:$0xff]  ;;  %s13960_s22 = sld [smem:[#allocation67_spill]]  ;;  %s13961_s9 = sld [smem:[#allocation68_spill]] }
 0x1e4   :  { %9583 = vmatprep.subr.bf16.mxu1 %v13699_v2  ;;  %v462_v40 = vld [vmem:[%s13744_s20 + $0x18] sm:$0xff]  ;;  %v8956_v42 = vld [vmem:[%s13746_s1] ss:$0 sm:$0xff]  ;;  %v701_v43 = vpack.c.bf16 %v461_v38, %v461_v38  ;;  %v8965_v47 = vld [vmem:[%s13746_s1 + $0x9] ss:$0 sm:$0xff]  ;;  %s13962_s14 = sld [smem:[#allocation69_spill]] }
 0x1e5   :  { %776 = vperm.xlu1 %10533, %v8867_v15   ;;  %772 = vperm.xlu0 %10532, %v8866_v16   ;;  %v702_v44 = vpack.c.bf16 %v462_v40, %v462_v40  ;;  %v10550_v45 = vld [vmem:[%s13743_s23 + $0x80] sm:$0xff]   ;;  %v10552_v49 = vld [vmem:[%s13743_s23 + $0x88] sm:$0xff]   ;;  %v8973_v51 = vld [vmem:[%s13746_s1 + $0x11] ss:$0 sm:$0xff]  ;;  %s13966_s11 = sld [smem:[#allocation78_spill]] }
 0x1e6   :  { %9572 = vmatpush3.bf16.msra.mxu0 %v10540_v17  ;;  %v10551_v46 = vld [vmem:[%s13743_s23 + $0xa0] sm:$0xff]   ;;  %v10553_v50 = vld [vmem:[%s13743_s23 + $0xa8] sm:$0xff]   ;;  %v8972_v52 = vld [vmem:[%s13746_s1 + $0x10] ss:$0 sm:$0xff] }
 0x1e7   :  { %9584 = vmatpush3.bf16.msra.mxu1 %v10541_v18  ;;  %9589 = vmatprep.subr.bf16.mxu0 %v13699_v2  ;;  %v8957_v48 = vld [vmem:[%s13746_s1 + $0x1] ss:$0 sm:$0xff]  ;;  %v10554_v53 = vld [vmem:[%s13743_s23 + $0x90] sm:$0xff]   ;;  %v8981_v55 = vld [vmem:[%s13746_s1 + $0x19] ss:$0 sm:$0xff] }
 0x1e8   :  { %9601 = vmatprep.subr.bf16.mxu1 %v13699_v2  ;;  %v10555_v54 = vld [vmem:[%s13743_s23 + $0xb0] sm:$0xff]   ;;  %v8980_v56 = vld [vmem:[%s13746_s1 + $0x18] ss:$0 sm:$0xff]  ;;  %v463_v58 = vld [vmem:[%s13744_s20 + $0x20] sm:$0xff] }
 0x1e9   :  { %1409 = vperm.xlu1 %10533, %v8909_v21   ;;  %1405 = vperm.xlu0 %10532, %v8908_v22   ;;  %v10556_v57 = vld [vmem:[%s13743_s23 + $0x98] sm:$0xff]   ;;  %v464_v60 = vld [vmem:[%s13744_s20 + $0x28] sm:$0xff]  ;;  %v8989_v61 = vld [vmem:[%s13746_s1 + $0x21] ss:$0 sm:$0xff]  ;;  %v703_v63 = vpack.c.bf16 %v463_v58, %v463_v58 }
 0x1ea   :  { %9574 = vmatmul.mubr.msk.bf16.vlgmr.msra.gmra.mrb[0].mxu0 %vm803_vm1, %v699_v23  ;;  %9586 = vmatmul.mubr.msk.bf16.vlgmr.msra.gmra.mrb[0].mxu1 %vm803_vm1, %v700_v24  ;;  %v10557_v59 = vld [vmem:[%s13743_s23 + $0xb8] sm:$0xff]   ;;  %v8988_v62 = vld [vmem:[%s13746_s1 + $0x20] ss:$0 sm:$0xff]  ;;  %v704_v0 = vpack.c.bf16 %v464_v60, %v464_v60  ;;  %v8997_v4 = vld [vmem:[%s13746_s1 + $0x29] ss:$0 sm:$0xff] }
 0x1eb   :  { %9590 = vmatpush3.bf16.msra.mxu0 %v10542_v25  ;;  %9602 = vmatpush3.bf16.msra.mxu1 %v10543_v26  ;;  %v10558_v1 = vld [vmem:[%s13743_s23 + $0xc0] sm:$0xff]   ;;  %v8996_v5 = vld [vmem:[%s13746_s1 + $0x28] ss:$0 sm:$0xff]  ;;  %v9005_v8 = vld [vmem:[%s13746_s1 + $0x31] ss:$0 sm:$0xff] }
 0x1ec   :  { %9591 = vmatprep.subr.bf16.mxu0 %v13699_v2  ;;  %9603 = vmatprep.subr.bf16.mxu1 %v13699_v2  ;;  %v10559_v3 = vld [vmem:[%s13743_s23 + $0xe0] sm:$0xff]   ;;  %v10560_v6 = vld [vmem:[%s13743_s23 + $0xc8] sm:$0xff]   ;;  %v9004_v9 = vld [vmem:[%s13746_s1 + $0x30] ss:$0 sm:$0xff] }
 0x1ed   :  { %1417 = vperm.xlu1 %10533, %v8911_v27   ;;  %1413 = vperm.xlu0 %10532, %v8910_v28   ;;  %v10561_v7 = vld [vmem:[%s13743_s23 + $0xe8] sm:$0xff]   ;;  %v10562_v10 = vld [vmem:[%s13743_s23 + $0xd0] sm:$0xff]   ;;  %v9013_v12 = vld [vmem:[%s13746_s1 + $0x39] ss:$0 sm:$0xff] }
 0x1ee   :  { %9597 = vmatprep.mubr.msk.bf16.mxu0 %vm11427_vm0, %v13699_v2  ;;  %9609 = vmatprep.mubr.msk.bf16.mxu1 %vm11427_vm0, %v13699_v2  ;;  %v10563_v11 = vld [vmem:[%s13743_s23 + $0xf0] sm:$0xff]   ;;  %v9012_v13 = vld [vmem:[%s13746_s1 + $0x38] ss:$0 sm:$0xff]  ;;  %v8966_v18 = vld [vmem:[%s13746_s1 + $0xa] ss:$0 sm:$0xff] }
 0x1ef   :  { %9592 = vmatpush3.bf16.msra.mxu0 %v10544_v29  ;;  %9604 = vmatpush3.bf16.msra.mxu1 %v10545_v30  ;;  %v10564_v14 = vld [vmem:[%s13743_s23 + $0xd8] sm:$0xff]   ;;  %v465_v15 = vld [vmem:[%s13744_s20 + $0x30] sm:$0xff]  ;;  %v8958_v19 = vld [vmem:[%s13746_s1 + $0x2] ss:$0 sm:$0xff] }
 0x1f0   :  { %9593 = vmatprep.subr.bf16.mxu0 %v13699_v2  ;;  %9605 = vmatprep.subr.bf16.mxu1 %v13699_v2  ;;  %v10565_v16 = vld [vmem:[%s13743_s23 + $0xf8] sm:$0xff]   ;;  %v705_v20 = vpack.c.bf16 %v465_v15, %v465_v15  ;;  %v8959_v22 = vld [vmem:[%s13746_s1 + $0x3] ss:$0 sm:$0xff]  ;;  %v9020_v23 = vld [vmem:[%s13747_s18] ss:$0 sm:$0xff]  ;;  %s13963_s23 = sld [smem:[#allocation70_spill]] }
 0x1f1   :  { %1425 = vperm.xlu1 %10533, %v8913_v31   ;;  %1421 = vperm.xlu0 %10532, %v8912_v32   ;;  %v466_v17 = vld [vmem:[%s13744_s20 + $0x38] sm:$0xff]  ;;  %v8974_v24 = vld [vmem:[%s13746_s1 + $0x12] ss:$0 sm:$0xff]  ;;  %v8967_v25 = vld [vmem:[%s13746_s1 + $0xb] ss:$0 sm:$0xff] }
 0x1f2   :  { %v706_v21 = vpack.c.bf16 %v466_v17, %v466_v17  ;;  %v8975_v26 = vld [vmem:[%s13746_s1 + $0x13] ss:$0 sm:$0xff]  ;;  %v9021_v27 = vld [vmem:[%s13747_s18 + $0x1] ss:$0 sm:$0xff]  ;;  %v8983_v28 = vld [vmem:[%s13746_s1 + $0x1b] ss:$0 sm:$0xff] }
 0x1f3   :  { %9594 = vmatpush3.bf16.msra.mxu0 %v10546_v33  ;;  %9606 = vmatpush3.bf16.msra.mxu1 %v10547_v34  ;;  %v8982_v29 = vld [vmem:[%s13746_s1 + $0x1a] ss:$0 sm:$0xff]  ;;  %v8991_v30 = vld [vmem:[%s13746_s1 + $0x23] ss:$0 sm:$0xff]  ;;  %v8990_v31 = vld [vmem:[%s13746_s1 + $0x22] ss:$0 sm:$0xff] }
 0x1f4   :  { %9595 = vmatprep.subr.bf16.mxu0 %v13699_v2  ;;  %9607 = vmatprep.subr.bf16.mxu1 %v13699_v2  ;;  %v8999_v32 = vld [vmem:[%s13746_s1 + $0x2b] ss:$0 sm:$0xff]  ;;  %v8998_v33 = vld [vmem:[%s13746_s1 + $0x2a] ss:$0 sm:$0xff]  ;;  %v9007_v34 = vld [vmem:[%s13746_s1 + $0x33] ss:$0 sm:$0xff] }
 0x1f5   :  { %1433 = vperm.xlu1 %10533, %v8915_v35   ;;  %1429 = vperm.xlu0 %10532, %v8914_v36   ;;  %v9006_v35 = vld [vmem:[%s13746_s1 + $0x32] ss:$0 sm:$0xff]  ;;  %v9015_v36 = vld [vmem:[%s13746_s1 + $0x3b] ss:$0 sm:$0xff]  ;;  %v8968_v38 = vld [vmem:[%s13746_s1 + $0xc] ss:$0 sm:$0xff] }
 0x1f6   :  { %v8961_v40 = vld [vmem:[%s13746_s1 + $0x5] ss:$0 sm:$0xff]  ;;  %v10572_v58 = vld [vmem:[%s13748_s25 + $0x18] sm:$0xff]   ;;  %v9000_v60 = vld [vmem:[%s13746_s1 + $0x2c] ss:$0 sm:$0xff] }
 0x1f7   :  { %9596 = vmatpush3.bf16.msra.mxu0 %v10548_v37  ;;  %9608 = vmatpush3.bf16.msra.mxu1 %v10549_v39  ;;  %v9014_v37 = vld [vmem:[%s13746_s1 + $0x3a] ss:$0 sm:$0xff]  ;;  %v8960_v39 = vld [vmem:[%s13746_s1 + $0x4] ss:$0 sm:$0xff]  ;;  %v8971_v17 = vld [vmem:[%s13746_s1 + $0xf] ss:$0 sm:$0xff] }
 0x1f8   :  { %9613 = vmatprep.subr.bf16.mxu0 %v13699_v2  ;;  %9625 = vmatprep.subr.bf16.mxu1 %v13699_v2 }
 0x1f9   :  { %2373 = vperm.xlu1 %10533, %v8964_v41   ;;  %2341 = vperm.xlu0 %10532, %v8956_v42   ;;  %v9022_v41 = vld [vmem:[%s13747_s18 + $0x2] ss:$0 sm:$0xff]  ;;  %v8976_v42 = vld [vmem:[%s13746_s1 + $0x14] ss:$0 sm:$0xff] }
 0x1fa   :  { %9598 = vmatmul.mubr.msk.bf16.vlgmr.msra.gmra.mrb[4].mxu0 %vm803_vm1, %v701_v43  ;;  %9610 = vmatmul.mubr.msk.bf16.vlgmr.msra.gmra.mrb[4].mxu1 %vm803_vm1, %v702_v44  ;;  %v8969_v43 = vld [vmem:[%s13746_s1 + $0xd] ss:$0 sm:$0xff]  ;;  %v8977_v44 = vld [vmem:[%s13746_s1 + $0x15] ss:$0 sm:$0xff] }
 0x1fb   :  { %9614 = vmatpush3.bf16.msra.mxu0 %v10550_v45  ;;  %9626 = vmatpush3.bf16.msra.mxu1 %v10551_v46  ;;  %v9023_v45 = vld [vmem:[%s13747_s18 + $0x3] ss:$0 sm:$0xff] }
 0x1fc   :  { %9615 = vmatprep.subr.bf16.mxu0 %v13699_v2  ;;  %9627 = vmatprep.subr.bf16.mxu1 %v13699_v2  ;;  %v10566_v46 = vld [vmem:[%s13748_s25] sm:$0xff]  }
 0x1fd   :  { %2377 = vperm.xlu1 %10533, %v8965_v47   ;;  %2345 = vperm.xlu0 %10532, %v8957_v48   ;;  %v10567_v47 = vld [vmem:[%s13748_s25 + $0x20] sm:$0xff]  }
 0x1fe   :  { %9621 = vmatprep.mubr.msk.bf16.mxu0 %vm11427_vm0, %v13699_v2  ;;  %9633 = vmatprep.mubr.msk.bf16.mxu1 %vm11427_vm0, %v13699_v2  ;;  %v9028_v48 = vld [vmem:[%s13749_s30] ss:$0 sm:$0xff] }
 0x1ff   :  { %9616 = vmatpush3.bf16.msra.mxu0 %v10552_v49  ;;  %9628 = vmatpush3.bf16.msra.mxu1 %v10553_v50  ;;  %v8984_v49 = vld [vmem:[%s13746_s1 + $0x1c] ss:$0 sm:$0xff]  ;;  %v10568_v50 = vld [vmem:[%s13748_s25 + $0x8] sm:$0xff]  }
 0x200   :  { %9617 = vmatprep.subr.bf16.mxu0 %v13699_v2  ;;  %9629 = vmatprep.subr.bf16.mxu1 %v13699_v2 }
 0x201   :  { %2409 = vperm.xlu1 %10533, %v8973_v51   ;;  %2405 = vperm.xlu0 %10532, %v8972_v52   ;;  %v10569_v51 = vld [vmem:[%s13748_s25 + $0x28] sm:$0xff]   ;;  %v8992_v52 = vld [vmem:[%s13746_s1 + $0x24] ss:$0 sm:$0xff] }
 0x203   :  { %9618 = vmatpush3.bf16.msra.mxu0 %v10554_v53  ;;  %9630 = vmatpush3.bf16.msra.mxu1 %v10555_v54  ;;  %v8985_v53 = vld [vmem:[%s13746_s1 + $0x1d] ss:$0 sm:$0xff]  ;;  %v10570_v54 = vld [vmem:[%s13748_s25 + $0x10] sm:$0xff]  }
 0x204   :  { %9619 = vmatprep.subr.bf16.mxu0 %v13699_v2  ;;  %9631 = vmatprep.subr.bf16.mxu1 %v13699_v2 }
 0x205   :  { %2441 = vperm.xlu1 %10533, %v8981_v55   ;;  %2437 = vperm.xlu0 %10532, %v8980_v56   ;;  %v10571_v55 = vld [vmem:[%s13748_s25 + $0x30] sm:$0xff]   ;;  %v9036_v56 = vld [vmem:[%s13750_s26] ss:$0 sm:$0xff] }
 0x207   :  { %9620 = vmatpush3.bf16.msra.mxu0 %v10556_v57  ;;  %9632 = vmatpush3.bf16.msra.mxu1 %v10557_v59  ;;  %v9029_v57 = vld [vmem:[%s13749_s30 + $0x1] ss:$0 sm:$0xff]  ;;  %v10573_v59 = vld [vmem:[%s13748_s25 + $0x38] sm:$0xff]  }
 0x208   :  { %9637 = vmatprep.subr.bf16.mxu0 %v13699_v2  ;;  %9649 = vmatprep.subr.bf16.mxu1 %v13699_v2 }
 0x209   :  { %2473 = vperm.xlu1 %10533, %v8989_v61   ;;  %2469 = vperm.xlu0 %10532, %v8988_v62   ;;  %v8993_v61 = vld [vmem:[%s13746_s1 + $0x25] ss:$0 sm:$0xff] }
 0x20a   :  { %9622 = vmatmul.mubr.msk.bf16.vlgmr.msra.gmra.mrb[8].mxu0 %vm803_vm1, %v703_v63  ;;  %9634 = vmatmul.mubr.msk.bf16.vlgmr.msra.gmra.mrb[8].mxu1 %vm803_vm1, %v704_v0  ;;  %v9001_v0 = vld [vmem:[%s13746_s1 + $0x2d] ss:$0 sm:$0xff] }
 0x20b   :  { %9638 = vmatpush3.bf16.msra.mxu0 %v10558_v1  ;;  %9650 = vmatpush3.bf16.msra.mxu1 %v10559_v3  ;;  %v9037_v1 = vld [vmem:[%s13750_s26 + $0x1] ss:$0 sm:$0xff] }
 0x20c   :  { %9639 = vmatprep.subr.bf16.mxu0 %v13699_v2  ;;  %9651 = vmatprep.subr.bf16.mxu1 %v13699_v2 }
 0x20d   :  { %2505 = vperm.xlu1 %10533, %v8997_v4   ;;  %2501 = vperm.xlu0 %10532, %v8996_v5   ;;  %v9009_v5 = vld [vmem:[%s13746_s1 + $0x35] ss:$0 sm:$0xff] }
 0x20e   :  { %9645 = vmatprep.mubr.msk.bf16.mxu0 %vm11427_vm0, %v13699_v2  ;;  %9657 = vmatprep.mubr.msk.bf16.mxu1 %vm11427_vm0, %v13699_v2 }
 0x20f   :  { %9640 = vmatpush3.bf16.msra.mxu0 %v10560_v6  ;;  %9652 = vmatpush3.bf16.msra.mxu1 %v10561_v7  ;;  %v9008_v6 = vld [vmem:[%s13746_s1 + $0x34] ss:$0 sm:$0xff] }
 0x210   :  { %9641 = vmatprep.subr.bf16.mxu0 %v13699_v2  ;;  %9653 = vmatprep.subr.bf16.mxu1 %v13699_v2 }
 0x211   :  { %2537 = vperm.xlu1 %10533, %v9005_v8   ;;  %2533 = vperm.xlu0 %10532, %v9004_v9   ;;  %v9017_v9 = vld [vmem:[%s13746_s1 + $0x3d] ss:$0 sm:$0xff] }
 0x213   :  { %9642 = vmatpush3.bf16.msra.mxu0 %v10562_v10  ;;  %9654 = vmatpush3.bf16.msra.mxu1 %v10563_v11  ;;  %v9016_v10 = vld [vmem:[%s13746_s1 + $0x3c] ss:$0 sm:$0xff] }
 0x214   :  { %9643 = vmatprep.subr.bf16.mxu0 %v13699_v2  ;;  %9655 = vmatprep.subr.bf16.mxu1 %v13699_v2 }
 0x215   :  { %2569 = vperm.xlu1 %10533, %v9013_v12   ;;  %2565 = vperm.xlu0 %10532, %v9012_v13   ;;  %v8970_v13 = vld [vmem:[%s13746_s1 + $0xe] ss:$0 sm:$0xff] }
 0x217   :  { %9644 = vmatpush3.bf16.msra.mxu0 %v10564_v14  ;;  %9656 = vmatpush3.bf16.msra.mxu1 %v10565_v16  ;;  %v8962_v14 = vld [vmem:[%s13746_s1 + $0x6] ss:$0 sm:$0xff] }
 0x218   :  { %9661 = vmatprep.subr.bf16.mxu0 %v13699_v2  ;;  %9673 = vmatprep.subr.bf16.mxu1 %v13699_v2 }
 0x219   :  { %2381 = vperm.xlu1 %10533, %v8966_v18   ;;  %2349 = vperm.xlu0 %10532, %v8958_v19   ;;  %v8963_v18 = vld [vmem:[%s13746_s1 + $0x7] ss:$0 sm:$0xff] }
 0x21a   :  { %9646 = vmatmul.mubr.msk.bf16.vlgmr.msra.gmra.mrb[12].mxu0 %vm803_vm1, %v705_v20  ;;  %9658 = vmatmul.mubr.msk.bf16.vlgmr.msra.gmra.mrb[12].mxu1 %vm803_vm1, %v706_v21  ;;  %v9024_v21 = vld [vmem:[%s13747_s18 + $0x4] ss:$0 sm:$0xff] }
 0x21b   :  { %9669 = vmatprep.mubr.msk.bf16.mxu0 %vm11427_vm0, %v13699_v2  ;;  %9681 = vmatprep.mubr.msk.bf16.mxu1 %vm11427_vm0, %v13699_v2 }
 0x21c   :  { %9662 = vmatpush3.bf16.msra.mxu0 %v10566_v46  ;;  %9674 = vmatpush3.bf16.msra.mxu1 %v10567_v47  ;;  %v9039_v46 = vld [vmem:[%s13750_s26 + $0x3] ss:$0 sm:$0xff] }
 0x21d   :  { %2353 = vperm.xlu1 %10533, %v8959_v22   ;;  %2821 = vperm.xlu0 %10532, %v9020_v23   ;;  %v8978_v22 = vld [vmem:[%s13746_s1 + $0x16] ss:$0 sm:$0xff] }
 0x21e   :  { %9663 = vmatprep.subr.bf16.mxu0 %v13699_v2  ;;  %9675 = vmatprep.subr.bf16.mxu1 %v13699_v2 }
 0x220   :  { %9664 = vmatpush3.bf16.msra.mxu0 %v10568_v50  ;;  %9676 = vmatpush3.bf16.msra.mxu1 %v10569_v51  ;;  %v9010_v50 = vld [vmem:[%s13746_s1 + $0x36] ss:$0 sm:$0xff] }
 0x221   :  { %2413 = vperm.xlu1 %10533, %v8974_v24   ;;  %2385 = vperm.xlu0 %10532, %v8967_v25   ;;  %v8986_v25 = vld [vmem:[%s13746_s1 + $0x1e] ss:$0 sm:$0xff] }
 0x222   :  { %9665 = vmatprep.subr.bf16.mxu0 %v13699_v2  ;;  %9677 = vmatprep.subr.bf16.mxu1 %v13699_v2 }
 0x224   :  { %9666 = vmatpush3.bf16.msra.mxu0 %v10570_v54  ;;  %9678 = vmatpush3.bf16.msra.mxu1 %v10571_v55  ;;  %v9018_v54 = vld [vmem:[%s13746_s1 + $0x3e] ss:$0 sm:$0xff] }
 0x225   :  { %2417 = vperm.xlu1 %10533, %v8975_v26   ;;  %2825 = vperm.xlu0 %10532, %v9021_v27   ;;  %v8979_v26 = vld [vmem:[%s13746_s1 + $0x17] ss:$0 sm:$0xff] }
 0x226   :  { %9667 = vmatprep.subr.bf16.mxu0 %v13699_v2  ;;  %9679 = vmatprep.subr.bf16.mxu1 %v13699_v2 }
 0x228   :  { %9668 = vmatpush3.bf16.msra.mxu0 %v10572_v58  ;;  %9680 = vmatpush3.bf16.msra.mxu1 %v10573_v59  ;;  %v9026_v58 = vld [vmem:[%s13747_s18 + $0x6] ss:$0 sm:$0xff] }
 0x229   :  { %2449 = vperm.xlu1 %10533, %v8983_v28   ;;  %2445 = vperm.xlu0 %10532, %v8982_v29   ;;  %v9030_v29 = vld [vmem:[%s13749_s30 + $0x2] ss:$0 sm:$0xff] }
 0x22a   :  { %9685 = vmatprep.subr.bf16.mxu0 %v13699_v2  ;;  %9697 = vmatprep.subr.bf16.mxu1 %v13699_v2 }
 0x22d   :  { %2481 = vperm.xlu1 %10533, %v8991_v30   ;;  %2477 = vperm.xlu0 %10532, %v8990_v31   ;;  %v9025_v30 = vld [vmem:[%s13747_s18 + $0x5] ss:$0 sm:$0xff] }
 0x231   :  { %2513 = vperm.xlu1 %10533, %v8999_v32   ;;  %2509 = vperm.xlu0 %10532, %v8998_v33   ;;  %v8994_v33 = vld [vmem:[%s13746_s1 + $0x26] ss:$0 sm:$0xff] }
 0x235   :  { %2545 = vperm.xlu1 %10533, %v9007_v34   ;;  %2541 = vperm.xlu0 %10532, %v9006_v35   ;;  %v8987_v34 = vld [vmem:[%s13746_s1 + $0x1f] ss:$0 sm:$0xff] }
 0x239   :  { %2577 = vperm.xlu1 %10533, %v9015_v36   ;;  %2573 = vperm.xlu0 %10532, %v9014_v37   ;;  %v9038_v37 = vld [vmem:[%s13750_s26 + $0x2] ss:$0 sm:$0xff] }
 0x23d   :  { %2389 = vperm.xlu1 %10533, %v8968_v38   ;;  %2357 = vperm.xlu0 %10532, %v8960_v39   ;;  %v9031_v38 = vld [vmem:[%s13749_s30 + $0x3] ss:$0 sm:$0xff] }
 0x241   :  { %2361 = vperm.xlu1 %10533, %v8961_v40   ;;  %2829 = vperm.xlu0 %10532, %v9022_v41   ;;  %v9002_v41 = vld [vmem:[%s13746_s1 + $0x2e] ss:$0 sm:$0xff] }
 0x245   :  { %2421 = vperm.xlu1 %10533, %v8976_v42   ;;  %2393 = vperm.xlu0 %10532, %v8969_v43   ;;  %v8995_v42 = vld [vmem:[%s13746_s1 + $0x27] ss:$0 sm:$0xff] }
 0x249   :  { %2425 = vperm.xlu1 %10533, %v8977_v44   ;;  %2833 = vperm.xlu0 %10532, %v9023_v45   ;;  %v9003_v45 = vld [vmem:[%s13746_s1 + $0x2f] ss:$0 sm:$0xff] }
 0x24d   :  { %2941 = vperm.xlu1 %10533, %v9028_v48   ;;  %2453 = vperm.xlu0 %10532, %v8984_v49   ;;  %v9011_v49 = vld [vmem:[%s13746_s1 + $0x37] ss:$0 sm:$0xff] }
 0x251   :  { %2485 = vperm.xlu1 %10533, %v8992_v52   ;;  %2457 = vperm.xlu0 %10532, %v8985_v53   ;;  %v9019_v53 = vld [vmem:[%s13746_s1 + $0x3f] ss:$0 sm:$0xff] }
 0x255   :  { %3021 = vperm.xlu1 %10533, %v9036_v56   ;;  %2945 = vperm.xlu0 %10532, %v9029_v57   ;;  %v9027_v57 = vld [vmem:[%s13747_s18 + $0x7] ss:$0 sm:$0xff] }
 0x258   :  { %v12006_v62 = vpop.permute.xlu1 %756  ;;  %v12008_v63 = vpop.permute.xlu0 %748 }
 0x259   :  { %2517 = vperm.xlu1 %10533, %v9000_v60   ;;  %2489 = vperm.xlu0 %10532, %v8993_v61   ;;  %v9033_v61 = vld [vmem:[%s13749_s30 + $0x5] ss:$0 sm:$0xff] }
 0x25c   :  { %v12012_v3 = vpop.permute.xlu1 %760  ;;  %v12014_v4 = vpop.permute.xlu0 %752 }
 0x25d   :  { %2521 = vperm.xlu1 %10533, %v9001_v0   ;;  %3025 = vperm.xlu0 %10532, %v9037_v1   ;;  %v9032_v0 = vld [vmem:[%s13749_s30 + $0x4] ss:$0 sm:$0xff] }
 0x260   :  { %v12018_v7 = vpop.permute.xlu1 %768  ;;  %v12020_v8 = vpop.permute.xlu0 %764 }
 0x261   :  { %2553 = vperm.xlu1 %10533, %v9009_v5   ;;  %2549 = vperm.xlu0 %10532, %v9008_v6   ;;  %v9041_v6 = vld [vmem:[%s13750_s26 + $0x5] ss:$0 sm:$0xff] }
 0x264   :  { %v12024_v11 = vpop.permute.xlu1 %776  ;;  %v12026_v12 = vpop.permute.xlu0 %772 }
 0x265   :  { %2585 = vperm.xlu1 %10533, %v9017_v9   ;;  %2581 = vperm.xlu0 %10532, %v9016_v10   ;;  %v9040_v9 = vld [vmem:[%s13750_s26 + $0x4] ss:$0 sm:$0xff] }
 0x268   :  { %v12030_v15 = vpop.permute.xlu1 %1409  ;;  %v12032_v16 = vpop.permute.xlu0 %1405 }
 0x269   :  { %2397 = vperm.xlu1 %10533, %v8970_v13   ;;  %2365 = vperm.xlu0 %10532, %v8962_v14   ;;  %v9035_v14 = vld [vmem:[%s13749_s30 + $0x7] ss:$0 sm:$0xff] }
 0x26c   :  { %v12036_v19 = vpop.permute.xlu1 %1417  ;;  %v12038_v20 = vpop.permute.xlu0 %1413 }
 0x26d   :  { %2401 = vperm.xlu1 %10533, %v8971_v17   ;;  %2369 = vperm.xlu0 %10532, %v8963_v18   ;;  %v9034_v17 = vld [vmem:[%s13749_s30 + $0x6] ss:$0 sm:$0xff] }
 0x270   :  { %v12042_v23 = vpop.permute.xlu1 %1425  ;;  %v12044_v24 = vpop.permute.xlu0 %1421 }
 0x271   :  { %2837 = vperm.xlu1 %10533, %v9024_v21   ;;  %2429 = vperm.xlu0 %10532, %v8978_v22   ;;  %v9043_v22 = vld [vmem:[%s13750_s26 + $0x7] ss:$0 sm:$0xff] }
 0x274   :  { %v12048_v27 = vpop.permute.xlu1 %1433  ;;  %v12050_v28 = vpop.permute.xlu0 %1429 }
 0x275   :  { %2461 = vperm.xlu1 %10533, %v8986_v25   ;;  %2433 = vperm.xlu0 %10532, %v8979_v26   ;;  %v9042_v25 = vld [vmem:[%s13750_s26 + $0x6] ss:$0 sm:$0xff] }
 0x278   :  { %v12054_v31 = vpop.permute.xlu1 %2373  ;;  %v12056_v32 = vpop.permute.xlu0 %2341 }
 0x279   :  { %2949 = vperm.xlu1 %10533, %v9030_v29   ;;  %2841 = vperm.xlu0 %10532, %v9025_v30   ;;  %v9045_v30 = vld [vmem:[%s13756_s4 + $0x1] ss:$0 sm:$0xff] }
 0x27c   :  { %v12060_v35 = vpop.permute.xlu1 %2377  ;;  %v12062_v36 = vpop.permute.xlu0 %2345 }
 0x27d   :  { %2493 = vperm.xlu1 %10533, %v8994_v33   ;;  %2465 = vperm.xlu0 %10532, %v8987_v34   ;;  %v9044_v33 = vld [vmem:[%s13756_s4] ss:$0 sm:$0xff] }
 0x280   :  { %v12066_v39 = vpop.permute.xlu1 %2409  ;;  %v12068_v40 = vpop.permute.xlu0 %2405 }
 0x281   :  { %3029 = vperm.xlu1 %10533, %v9038_v37   ;;  %2953 = vperm.xlu0 %10532, %v9031_v38   ;;  %v9047_v38 = vld [vmem:[%s13756_s4 + $0x3] ss:$0 sm:$0xff] }
 0x284   :  { %v12072_v43 = vpop.permute.xlu1 %2441  ;;  %v12074_v44 = vpop.permute.xlu0 %2437 }
 0x285   :  { %2525 = vperm.xlu1 %10533, %v9002_v41   ;;  %2497 = vperm.xlu0 %10532, %v8995_v42   ;;  %v9046_v41 = vld [vmem:[%s13756_s4 + $0x2] ss:$0 sm:$0xff] }
 0x288   :  { %v12078_v47 = vpop.permute.xlu1 %2473  ;;  %v12080_v48 = vpop.permute.xlu0 %2469 }
 0x289   :  { %2529 = vperm.xlu1 %10533, %v9003_v45   ;;  %3033 = vperm.xlu0 %10532, %v9039_v46   ;;  %v9049_v46 = vld [vmem:[%s13756_s4 + $0x5] ss:$0 sm:$0xff] }
 0x28c   :  { %v12084_v51 = vpop.permute.xlu1 %2505  ;;  %v12086_v52 = vpop.permute.xlu0 %2501 }
 0x28d   :  { %13751 = vst [vmem:[#allocation79_spill] sm:$0xff] %v12084_v51  ;;  %2561 = vperm.xlu1 %10533, %v9011_v49   ;;  %2557 = vperm.xlu0 %10532, %v9010_v50   ;;  %v9048_v49 = vld [vmem:[%s13756_s4 + $0x4] ss:$0 sm:$0xff] }
 0x290   :  { %v12090_v55 = vpop.permute.xlu1 %2537  ;;  %v12092_v56 = vpop.permute.xlu0 %2533 }
 0x291   :  { %13752 = vst [vmem:[#allocation80_spill] sm:$0xff] %v12090_v55  ;;  %13753 = vst [vmem:[#allocation81_spill] sm:$0xff] %v12092_v56  ;;  %2593 = vperm.xlu1 %10533, %v9019_v53   ;;  %2589 = vperm.xlu0 %10532, %v9018_v54   ;;  %v9051_v54 = vld [vmem:[%s13756_s4 + $0x7] ss:$0 sm:$0xff] }
 0x292   :  { %v10574_v56 = vld [vmem:[%s13748_s25 + $0x40] sm:$0xff]  }
 0x294   :  { %v12096_v59 = vpop.permute.xlu1 %2569  ;;  %v12098_v60 = vpop.permute.xlu0 %2565 }
 0x295   :  { %13754 = vst [vmem:[#allocation82_spill] sm:$0xff] %v12096_v59  ;;  %13755 = vst [vmem:[#allocation83_spill] sm:$0xff] %v12098_v60  ;;  %2849 = vperm.xlu1 %10533, %v9027_v57   ;;  %2845 = vperm.xlu0 %10532, %v9026_v58   ;;  %v9050_v57 = vld [vmem:[%s13756_s4 + $0x6] ss:$0 sm:$0xff] }
 0x298   :  { %v12102_v1 = vpop.permute.xlu1 %2381  ;;  %v12104_v5 = vpop.permute.xlu0 %2349 }
 0x299   :  { %2961 = vperm.xlu1 %10533, %v9033_v61   ;;  %2957 = vperm.xlu0 %10532, %v9032_v0   ;;  %v9093_v0 = vld [vmem:[%s13760_s6 + $0x1] ss:$0 sm:$0xff] }
 0x29c   :  { %v12108_v10 = vpop.permute.xlu1 %2353  ;;  %v12110_v13 = vpop.permute.xlu0 %2821 }
 0x29d   :  { %13757 = vst [vmem:[#allocation84_spill] sm:$0xff] %v12110_v13  ;;  %3041 = vperm.xlu1 %10533, %v9041_v6   ;;  %3037 = vperm.xlu0 %10532, %v9040_v9   ;;  %v9092_v6 = vld [vmem:[%s13760_s6] ss:$0 sm:$0xff] }
 0x2a0   :  { %v12114_v18 = vpop.permute.xlu1 %2413  ;;  %v12116_v21 = vpop.permute.xlu0 %2385 }
 0x2a1   :  { %2969 = vperm.xlu1 %10533, %v9035_v14   ;;  %2965 = vperm.xlu0 %10532, %v9034_v17   ;;  %v9095_v17 = vld [vmem:[%s13760_s6 + $0x3] ss:$0 sm:$0xff] }
 0x2a4   :  { %v12120_v26 = vpop.permute.xlu1 %2417  ;;  %v12122_v29 = vpop.permute.xlu0 %2825 }
 0x2a5   :  { %13758 = vst [vmem:[#allocation85_spill] sm:$0xff] %v12122_v29  ;;  %3049 = vperm.xlu1 %10533, %v9043_v22   ;;  %3045 = vperm.xlu0 %10532, %v9042_v25   ;;  %v9094_v22 = vld [vmem:[%s13760_s6 + $0x2] ss:$0 sm:$0xff] }
 0x2a8   :  { %v12126_v34 = vpop.permute.xlu1 %2449  ;;  %v12128_v37 = vpop.permute.xlu0 %2445 }
 0x2a9   :  { %3345 = vperm.xlu1 %10533, %v9045_v30   ;;  %3341 = vperm.xlu0 %10532, %v9044_v33  }
 0x2ac   :  { %v12132_v42 = vpop.permute.xlu1 %2481  ;;  %v12134_v45 = vpop.permute.xlu0 %2477 }
 0x2ad   :  { %13759 = vst [vmem:[#allocation86_spill] sm:$0xff] %v12132_v42  ;;  %3353 = vperm.xlu1 %10533, %v9047_v38   ;;  %3349 = vperm.xlu0 %10532, %v9046_v41  }
 0x2b0   :  { %v12138_v50 = vpop.permute.xlu1 %2513  ;;  %v12140_v53 = vpop.permute.xlu0 %2509 }
 0x2b1   :  { %13761 = vst [vmem:[#allocation87_spill] sm:$0xff] %v12138_v50  ;;  %13762 = vst [vmem:[#allocation88_spill] sm:$0xff] %v12140_v53  ;;  %3361 = vperm.xlu1 %10533, %v9049_v46   ;;  %3357 = vperm.xlu0 %10532, %v9048_v49   ;;  %v9097_v49 = vld [vmem:[%s13760_s6 + $0x5] ss:$0 sm:$0xff]  ;;  %v10857_v53 = vld [vmem:[%s13744_s20 + $0x8] sm:$0xff] }
 0x2b4   :  { %v12144_v58 = vpop.permute.xlu1 %2545  ;;  %v12146_v61 = vpop.permute.xlu0 %2541 }
 0x2b5   :  { %13763 = vst [vmem:[#allocation89_spill] sm:$0xff] %v12144_v58  ;;  %13764 = vst [vmem:[#allocation90_spill] sm:$0xff] %v12146_v61  ;;  %3369 = vperm.xlu1 %10533, %v9051_v54   ;;  %3365 = vperm.xlu0 %10532, %v9050_v57   ;;  %v9096_v54 = vld [vmem:[%s13760_s6 + $0x4] ss:$0 sm:$0xff]  ;;  %v9142_v58 = vld [vmem:[%s13767_s3 + $0x2] ss:$0 sm:$0xff] }
 0x2b8   :  { %v12150_v9 = vpop.permute.xlu1 %2577  ;;  %v12152_v14 = vpop.permute.xlu0 %2573 }
 0x2b9   :  { %13765 = vst [vmem:[#allocation91_spill] sm:$0xff] %v12150_v9  ;;  %13766 = vst [vmem:[#allocation92_spill] sm:$0xff] %v12152_v14  ;;  %4001 = vperm.xlu1 %10533, %v9093_v0   ;;  %3997 = vperm.xlu0 %10532, %v9092_v6   ;;  %v9150_v9 = vld [vmem:[%s13767_s3 + $0xa] ss:$0 sm:$0xff] }
 0x2bc   :  { %v12156_v25 = vpop.permute.xlu1 %2389  ;;  %v12158_v30 = vpop.permute.xlu0 %2357 }
 0x2bd   :  { %4009 = vperm.xlu1 %10533, %v9095_v17   ;;  %4005 = vperm.xlu0 %10532, %v9094_v22   ;;  %v841_v33 = vpop.f32.mrb[0].mxu0  ;;  %v908_v41 = vpop.f32.mrb[0].mxu1 }
 0x2be   :  { %v842_v38 = vadd.f32 %v841_v33, %v12008_v63  ;;  %v9575_v46 = vpop.f32.mrb[1].mxu0  ;;  %v909_v57 = vadd.f32 %v908_v41, %v12014_v4  ;;  %v9587_v0 = vpop.f32.mrb[1].mxu1  ;;  %v9098_v4 = vld [vmem:[%s13760_s6 + $0x6] ss:$0 sm:$0xff] }
 0x2bf   :  { %v844_v6 = vpop.f32.mrb[2].mxu0  ;;  %v911_v29 = vpop.f32.mrb[2].mxu1  ;;  %v9099_v46 = vld [vmem:[%s13760_s6 + $0x7] ss:$0 sm:$0xff]  ;;  %v9140_v0 = vld [vmem:[%s13767_s3] ss:$0 sm:$0xff] }
 0x2c0   :  { %v1324_v2 = vmul.f32 0.70710677, %v842_v38  ;;  %v12164_v13 = vpop.permute.xlu1 %2361  ;;  %v1325_v17 = vmul.f32 0.70710677, %v909_v57  ;;  %v12166_v22 = vpop.permute.xlu0 %2829  ;;  %v9141_v29 = vld [vmem:[%s13767_s3 + $0x1] ss:$0 sm:$0xff] }
 0x2c1   :  { %13768 = vst [vmem:[#allocation93_spill] sm:$0xff] %v12166_v22  ;;  %v9576_v63 = vpop.f32.mrb[3].mxu0  ;;  %4017 = vperm.xlu1 %10533, %v9097_v49   ;;  %4013 = vperm.xlu0 %10532, %v9096_v54   ;;  %v9588_v33 = vpop.f32.mrb[3].mxu1  ;;  %v9148_v49 = vld [vmem:[%s13767_s3 + $0x8] ss:$0 sm:$0xff]  ;;  %v1316_v22 = vmul.f32 0.5, %v842_v38 }
 0x2c2   :  { %10662 = verf.f32 %v1324_v2  ;;  %v9149_v63 = vld [vmem:[%s13767_s3 + $0x9] ss:$0 sm:$0xff]  ;;  %v1317_v14 = vmul.f32 0.5, %v909_v57 }
 0x2c3   :  { %10664 = verf.f32 %v1325_v17 }
 0x2c4   :  { %v12170_v41 = vpop.permute.xlu1 %2421  ;;  %v12174_v6 = vpop.permute.xlu0 %2393 }
 0x2c5   :  { %4025 = vperm.xlu1 %10533, %v9099_v46   ;;  %4021 = vperm.xlu0 %10532, %v9098_v4  }
 0x2c8   :  { %v12178_v2 = vpop.permute.xlu1 %2425  ;;  %v12180_v46 = vpop.permute.xlu0 %2833 }
 0x2c9   :  { %4937 = vperm.xlu1 %10533, %v9141_v29   ;;  %4933 = vperm.xlu0 %10532, %v9140_v0   ;;  %13769 = vst [vmem:[#allocation94_spill] sm:$0xff] %v12180_v46 }
 0x2cc   :  { %v10663_v54 = vpop.eup %10662 }
 0x2cd   :  { %v10665_v33 = vpop.eup %10664  ;;  %v1340_v17 = vadd.f32 1.0, %v10663_v54  ;;  %4969 = vperm.xlu1 %10533, %v9149_v63   ;;  %4965 = vperm.xlu0 %10532, %v9148_v49   ;;  %v975_v4 = vpop.f32.mrb[4].mxu0 }
 0x2ce   :  { %v1341_v59 = vadd.f32 1.0, %v10665_v33  ;;  %v976_v29 = vadd.f32 %v975_v4, %v12006_v62  ;;  %v1042_v0 = vpop.f32.mrb[4].mxu1  ;;  %v9599_v60 = vpop.f32.mrb[5].mxu0  ;;  %v10575_v62 = vld [vmem:[%s13748_s25 + $0x60] sm:$0xff]   ;;  %v10579_v4 = vld [vmem:[%s13748_s25 + $0x70] sm:$0xff]  }
 0x2cf   :  { %v1348_v61 = vmul.f32 %v1340_v17, %v1316_v22  ;;  %v1043_v55 = vadd.f32 %v1042_v0, %v12012_v3  ;;  %v9611_v38 = vpop.f32.mrb[5].mxu1  ;;  %v978_v54 = vpop.f32.mrb[6].mxu0  ;;  %v9157_v22 = vld [vmem:[%s13767_s3 + $0x11] ss:$0 sm:$0xff]  ;;  %v13771_v17 = vmov 0.0  }
 0x2d0   :  { %v1349_v46 = vmul.f32 %v1341_v59, %v1317_v14  ;;  %v1326_v63 = vmul.f32 0.70710677, %v976_v29  ;;  %v1045_v49 = vpop.f32.mrb[6].mxu1  ;;  %v9600_v33 = vpop.f32.mrb[7].mxu0  ;;  %v9156_v59 = vld [vmem:[%s13767_s3 + $0x10] ss:$0 sm:$0xff] }
 0x2d1   :  { %v1356_v50 = vpack.c.bf16 %v1348_v61, %v1348_v61  ;;  %v1327_v57 = vmul.f32 0.70710677, %v1043_v55  ;;  %4973 = vperm.xlu1 %10533, %v9150_v9   ;;  %4941 = vperm.xlu0 %10532, %v9142_v58   ;;  %v9612_v3 = vpop.f32.mrb[7].mxu1  ;;  %v12191_v14 = vpop.permute.xlu1 %2941  ;;  %v10576_v61 = vld [vmem:[%s13748_s25 + $0x48] sm:$0xff]   ;;  %v9164_v38 = vld [vmem:[%s13767_s3 + $0x18] ss:$0 sm:$0xff] }
 0x2d2   :  { %v1357_v60 = vpack.c.bf16 %v1349_v46, %v1349_v46  ;;  %10666 = verf.f32 %v1326_v63  ;;  %13770 = vst [vmem:[#allocation95_spill] sm:$0xff] %v12191_v14  ;;  %v12195_v58 = vpop.permute.xlu0 %2453  ;;  %v10577_v9 = vld [vmem:[%s13748_s25 + $0x68] sm:$0xff]   ;;  %v9158_v63 = vld [vmem:[%s13767_s3 + $0x12] ss:$0 sm:$0xff] }
 0x2d3   :  { %10668 = verf.f32 %v1327_v57  ;;  %9670 = vmatmul.mubr.msk.bf16.vlgmr.msra.gmra.mrb[16].mxu0 %vm803_vm1, %v1356_v50  ;;  %v9151_v46 = vld [vmem:[%s13767_s3 + $0xb] ss:$0 sm:$0xff]  ;;  %v9143_v50 = vld [vmem:[%s13767_s3 + $0x3] ss:$0 sm:$0xff]  ;;  %v10580_v57 = vld [vmem:[%s13748_s25 + $0x58] sm:$0xff]  }
 0x2d4   :  { %9682 = vmatmul.mubr.msk.bf16.vlgmr.msra.gmra.mrb[16].mxu1 %vm803_vm1, %v1357_v60  ;;  %9686 = vmatpush3.bf16.msra.mxu0 %v10574_v56  ;;  %v10578_v56 = vld [vmem:[%s13748_s25 + $0x50] sm:$0xff]  }
 0x2d5   :  { %9698 = vmatpush3.bf16.msra.mxu1 %v10575_v62  ;;  %5001 = vperm.xlu1 %10533, %v9157_v22   ;;  %v12208_v0 = vpop.permute.xlu1 %2485  ;;  %v1318_v62 = vmul.f32 0.5, %v976_v29  ;;  %v10581_v22 = vld [vmem:[%s13748_s25 + $0x78] sm:$0xff]  }
 0x2d6   :  { %4997 = vperm.xlu0 %10532, %v9156_v59   ;;  %9687 = vmatprep.subr.bf16.mxu0 %v13771_v17  ;;  %13772 = vst [vmem:[#allocation96_spill] sm:$0xff] %v12208_v0  ;;  %v12212_v54 = vpop.permute.xlu0 %2457  ;;  %v1319_v59 = vmul.f32 0.5, %v1043_v55  ;;  %v9165_v55 = vld [vmem:[%s13767_s3 + $0x19] ss:$0 sm:$0xff] }
 0x2d7   :  { %9699 = vmatprep.subr.bf16.mxu1 %v13771_v17  ;;  %9693 = vmatprep.mubr.msk.bf16.mxu0 %vm11427_vm0, %v13771_v17 }
 0x2d8   :  { %9688 = vmatpush3.bf16.msra.mxu0 %v10576_v61  ;;  %9705 = vmatprep.mubr.msk.bf16.mxu1 %vm11427_vm0, %v13771_v17 }
 0x2d9   :  { %9700 = vmatpush3.bf16.msra.mxu1 %v10577_v9  ;;  %4977 = vperm.xlu1 %10533, %v9151_v46  }
 0x2da   :  { %4945 = vperm.xlu0 %10532, %v9143_v50   ;;  %9689 = vmatprep.subr.bf16.mxu0 %v13771_v17 }
 0x2db   :  { %9701 = vmatprep.subr.bf16.mxu1 %v13771_v17 }
 0x2dc   :  { %v10667_v49 = vpop.eup %10666  ;;  %9690 = vmatpush3.bf16.msra.mxu0 %v10578_v56  ;;  %v9144_v56 = vld [vmem:[%s13767_s3 + $0x4] ss:$0 sm:$0xff] }
 0x2dd   :  { %v10669_v33 = vpop.eup %10668  ;;  %v1342_v60 = vadd.f32 1.0, %v10667_v49  ;;  %9702 = vmatpush3.bf16.msra.mxu1 %v10579_v4  ;;  %5029 = vperm.xlu1 %10533, %v9164_v38   ;;  %v1109_v3 = vpop.f32.mrb[8].mxu0 }
 0x2de   :  { %v1343_v61 = vadd.f32 1.0, %v10669_v33  ;;  %5005 = vperm.xlu0 %10532, %v9158_v63   ;;  %v12219_v9 = vadd.f32 %v1109_v3, %v12020_v8  ;;  %v1176_v46 = vpop.f32.mrb[8].mxu1  ;;  %v9623_v50 = vpop.f32.mrb[9].mxu0  ;;  %9691 = vmatprep.subr.bf16.mxu0 %v13771_v17  ;;  %v10582_v3 = vld [vmem:[%s13748_s25 + $0x80] sm:$0xff]  }
 0x2df   :  { %v1350_v14 = vmul.f32 %v1342_v60, %v1318_v62  ;;  %v12224_v29 = vadd.f32 %v1176_v46, %v12018_v7  ;;  %v9635_v4 = vpop.f32.mrb[9].mxu1  ;;  %v1112_v38 = vpop.f32.mrb[10].mxu0  ;;  %9703 = vmatprep.subr.bf16.mxu1 %v13771_v17  ;;  %v10583_v46 = vld [vmem:[%s13748_s25 + $0xa0] sm:$0xff]  }
 0x2e0   :  { %v1351_v63 = vmul.f32 %v1343_v61, %v1319_v59  ;;  %v12228_v49 = vpop.permute.xlu1 %3021  ;;  %v1328_v8 = vmul.f32 0.70710677, %v12219_v9  ;;  %v1179_v33 = vpop.f32.mrb[10].mxu1  ;;  %9692 = vmatpush3.bf16.msra.mxu0 %v10580_v57  ;;  %v9159_v57 = vld [vmem:[%s13767_s3 + $0x13] ss:$0 sm:$0xff] }
 0x2e1   :  { %13773 = vst [vmem:[#allocation97_spill] sm:$0xff] %v12228_v49  ;;  %v1358_v50 = vpack.c.bf16 %v1350_v14, %v1350_v14  ;;  %v12232_v62 = vpop.permute.xlu0 %2945  ;;  %v1329_v7 = vmul.f32 0.70710677, %v12224_v29  ;;  %v9624_v60 = vpop.f32.mrb[11].mxu0  ;;  %9704 = vmatpush3.bf16.msra.mxu1 %v10581_v22  ;;  %4949 = vperm.xlu1 %10533, %v9144_v56   ;;  %v9152_v14 = vld [vmem:[%s13767_s3 + $0xc] ss:$0 sm:$0xff] }
 0x2e2   :  { %13774 = vst [vmem:[#allocation98_spill] sm:$0xff] %v12232_v62  ;;  %v1359_v59 = vpack.c.bf16 %v1351_v63, %v1351_v63  ;;  %10670 = verf.f32 %v1328_v8  ;;  %v9636_v61 = vpop.f32.mrb[11].mxu1  ;;  %5033 = vperm.xlu0 %10532, %v9165_v55   ;;  %9709 = vmatprep.subr.bf16.mxu0 %v13771_v17  ;;  %v10584_v22 = vld [vmem:[%s13748_s25 + $0x88] sm:$0xff]   ;;  %v9172_v38 = vld [vmem:[%s13767_s3 + $0x20] ss:$0 sm:$0xff]  ;;  %v10586_v8 = vld [vmem:[%s13748_s25 + $0x90] sm:$0xff]  }
 0x2e3   :  { %10672 = verf.f32 %v1329_v7  ;;  %9694 = vmatmul.mubr.msk.bf16.vlgmr.msra.gmra.mrb[20].mxu0 %vm803_vm1, %v1358_v50  ;;  %9721 = vmatprep.subr.bf16.mxu1 %v13771_v17  ;;  %v10585_v56 = vld [vmem:[%s13748_s25 + $0xa8] sm:$0xff]   ;;  %v9166_v63 = vld [vmem:[%s13767_s3 + $0x1a] ss:$0 sm:$0xff]  ;;  %v10587_v33 = vld [vmem:[%s13748_s25 + $0xb0] sm:$0xff]  }
 0x2e4   :  { %9706 = vmatmul.mubr.msk.bf16.vlgmr.msra.gmra.mrb[20].mxu1 %vm803_vm1, %v1359_v59  ;;  %9710 = vmatpush3.bf16.msra.mxu0 %v10582_v3  ;;  %v12244_v4 = vpop.permute.xlu1 %2517  ;;  %v9145_v3 = vld [vmem:[%s13767_s3 + $0x5] ss:$0 sm:$0xff]  ;;  %v9173_v50 = vld [vmem:[%s13767_s3 + $0x21] ss:$0 sm:$0xff] }
 0x2e5   :  { %9722 = vmatpush3.bf16.msra.mxu1 %v10583_v46  ;;  %5009 = vperm.xlu1 %10533, %v9159_v57   ;;  %13775 = vst [vmem:[#allocation99_spill] sm:$0xff] %v12244_v4  ;;  %v12248_v55 = vpop.permute.xlu0 %2489  ;;  %v10588_v46 = vld [vmem:[%s13748_s25 + $0x98] sm:$0xff]   ;;  %v1320_v57 = vmul.f32 0.5, %v12219_v9 }
 0x2e6   :  { %4981 = vperm.xlu0 %10532, %v9152_v14   ;;  %9711 = vmatprep.subr.bf16.mxu0 %v13771_v17  ;;  %13776 = vst [vmem:[#allocation100_spill] sm:$0xff] %v12248_v55 }
 0x2e7   :  { %9723 = vmatprep.subr.bf16.mxu1 %v13771_v17  ;;  %9717 = vmatprep.mubr.msk.bf16.mxu0 %vm11427_vm0, %v13771_v17 }
 0x2e8   :  { %9712 = vmatpush3.bf16.msra.mxu0 %v10584_v22  ;;  %9729 = vmatprep.mubr.msk.bf16.mxu1 %vm11427_vm0, %v13771_v17  ;;  %v12262_v60 = vpop.permute.xlu1 %2521 }
 0x2e9   :  { %9724 = vmatpush3.bf16.msra.mxu1 %v10585_v56  ;;  %5061 = vperm.xlu1 %10533, %v9172_v38   ;;  %13777 = vst [vmem:[#allocation101_spill] sm:$0xff] %v12262_v60  ;;  %v12265_v61 = vpop.permute.xlu0 %3025  ;;  %v10589_v56 = vld [vmem:[%s13748_s25 + $0xb8] sm:$0xff]   ;;  %v1321_v38 = vmul.f32 0.5, %v12224_v29 }
 0x2ea   :  { %5037 = vperm.xlu0 %10532, %v9166_v63   ;;  %9713 = vmatprep.subr.bf16.mxu0 %v13771_v17  ;;  %13778 = vst [vmem:[#allocation102_spill] sm:$0xff] %v12265_v61  ;;  %v9160_v61 = vld [vmem:[%s13767_s3 + $0x14] ss:$0 sm:$0xff] }
 0x2eb   :  { %9725 = vmatprep.subr.bf16.mxu1 %v13771_v17 }
 0x2ec   :  { %v10671_v7 = vpop.eup %10670  ;;  %9714 = vmatpush3.bf16.msra.mxu0 %v10586_v8 }
 0x2ed   :  { %v10673_v59 = vpop.eup %10672  ;;  %v1344_v14 = vadd.f32 1.0, %v10671_v7  ;;  %9726 = vmatpush3.bf16.msra.mxu1 %v10587_v33  ;;  %4953 = vperm.xlu1 %10533, %v9145_v3   ;;  %v1243_v22 = vpop.f32.mrb[12].mxu0  ;;  %v9153_v7 = vld [vmem:[%s13767_s3 + $0xd] ss:$0 sm:$0xff] }
 0x2ee   :  { %v1345_v63 = vadd.f32 1.0, %v10673_v59  ;;  %5065 = vperm.xlu0 %10532, %v9173_v50   ;;  %v1244_v8 = vadd.f32 %v1243_v22, %v12026_v12  ;;  %v1310_v49 = vpop.f32.mrb[12].mxu1  ;;  %v9647_v62 = vpop.f32.mrb[13].mxu0  ;;  %9715 = vmatprep.subr.bf16.mxu0 %v13771_v17  ;;  %v10590_v12 = vld [vmem:[%s13748_s25 + $0xc0] sm:$0xff]  }
 0x2ef   :  { %v1352_v60 = vmul.f32 %v1344_v14, %v1320_v57  ;;  %v1311_v9 = vadd.f32 %v1310_v49, %v12024_v11  ;;  %v9659_v33 = vpop.f32.mrb[13].mxu1  ;;  %v1246_v3 = vpop.f32.mrb[14].mxu0  ;;  %9727 = vmatprep.subr.bf16.mxu1 %v13771_v17  ;;  %v10591_v57 = vld [vmem:[%s13748_s25 + $0xe0] sm:$0xff]  }
 0x2f0   :  { %v1353_v29 = vmul.f32 %v1345_v63, %v1321_v38  ;;  %v1330_v50 = vmul.f32 0.70710677, %v1244_v8  ;;  %v1313_v59 = vpop.f32.mrb[14].mxu1  ;;  %9716 = vmatpush3.bf16.msra.mxu0 %v10588_v46  ;;  %v9648_v55 = vpop.f32.mrb[15].mxu0  ;;  %v9174_v14 = vld [vmem:[%s13767_s3 + $0x22] ss:$0 sm:$0xff] }
 0x2f1   :  { %v1360_v62 = vpack.c.bf16 %v1352_v60, %v1352_v60  ;;  %v1331_v22 = vmul.f32 0.70710677, %v1311_v9  ;;  %9728 = vmatpush3.bf16.msra.mxu1 %v10589_v56  ;;  %5013 = vperm.xlu1 %10533, %v9160_v61   ;;  %v9660_v49 = vpop.f32.mrb[15].mxu1  ;;  %v9167_v55 = vld [vmem:[%s13767_s3 + $0x1b] ss:$0 sm:$0xff]  ;;  %v12283_v60 = vpop.permute.xlu0 %2549  ;;  %v10592_v46 = vld [vmem:[%s13748_s25 + $0xc8] sm:$0xff]  }
 0x2f2   :  { %v1361_v11 = vpack.c.bf16 %v1353_v29, %v1353_v29  ;;  %10674 = verf.f32 %v1330_v50  ;;  %4985 = vperm.xlu0 %10532, %v9153_v7   ;;  %9733 = vmatprep.subr.bf16.mxu0 %v13771_v17  ;;  %13779 = vst [vmem:[#allocation103_spill] sm:$0xff] %v12283_v60  ;;  %v12287_v61 = vpop.permute.xlu1 %2553  ;;  %v10593_v56 = vld [vmem:[%s13748_s25 + $0xe8] sm:$0xff]   ;;  %v10594_v33 = vld [vmem:[%s13748_s25 + $0xd0] sm:$0xff]   ;;  %v9146_v59 = vld [vmem:[%s13767_s3 + $0x6] ss:$0 sm:$0xff] }
 0x2f3   :  { %10676 = verf.f32 %v1331_v22  ;;  %9718 = vmatmul.mubr.msk.bf16.vlgmr.msra.gmra.mrb[24].mxu0 %vm803_vm1, %v1360_v62  ;;  %9745 = vmatprep.subr.bf16.mxu1 %v13771_v17  ;;  %13780 = vst [vmem:[#allocation104_spill] sm:$0xff] %v12287_v61  ;;  %v9181_v38 = vld [vmem:[%s13767_s3 + $0x29] ss:$0 sm:$0xff]  ;;  %v9180_v63 = vld [vmem:[%s13767_s3 + $0x28] ss:$0 sm:$0xff]  ;;  %v10595_v3 = vld [vmem:[%s13748_s25 + $0xf0] sm:$0xff]  }
 0x2f4   :  { %9730 = vmatmul.mubr.msk.bf16.vlgmr.msra.gmra.mrb[24].mxu1 %vm803_vm1, %v1361_v11  ;;  %9734 = vmatpush3.bf16.msra.mxu0 %v10590_v12  ;;  %v9154_v29 = vld [vmem:[%s13767_s3 + $0xe] ss:$0 sm:$0xff]  ;;  %v10596_v62 = vld [vmem:[%s13748_s25 + $0xd8] sm:$0xff]  }
 0x2f5   :  { %9746 = vmatpush3.bf16.msra.mxu1 %v10591_v57  ;;  %5069 = vperm.xlu1 %10533, %v9174_v14   ;;  %v12300_v7 = vpop.permute.xlu0 %2581  ;;  %v1322_v57 = vmul.f32 0.5, %v1244_v8  ;;  %v10597_v49 = vld [vmem:[%s13748_s25 + $0xf8] sm:$0xff]   ;;  %v1323_v14 = vmul.f32 0.5, %v1311_v9 }
 0x2f6   :  { %5041 = vperm.xlu0 %10532, %v9167_v55   ;;  %9735 = vmatprep.subr.bf16.mxu0 %v13771_v17  ;;  %13781 = vst [vmem:[#allocation105_spill] sm:$0xff] %v12300_v7  ;;  %v12304_v50 = vpop.permute.xlu1 %2585  ;;  %v9179_v7 = vld [vmem:[%s13767_s3 + $0x27] ss:$0 sm:$0xff] }
 0x2f7   :  { %9747 = vmatprep.subr.bf16.mxu1 %v13771_v17  ;;  %9741 = vmatprep.mubr.msk.bf16.mxu0 %vm11427_vm0, %v13771_v17  ;;  %13782 = vst [vmem:[#allocation106_spill] sm:$0xff] %v12304_v50  ;;  %v9178_v50 = vld [vmem:[%s13767_s3 + $0x26] ss:$0 sm:$0xff] }
 0x2f8   :  { %9736 = vmatpush3.bf16.msra.mxu0 %v10592_v46  ;;  %9753 = vmatprep.mubr.msk.bf16.mxu1 %vm11427_vm0, %v13771_v17  ;;  %v9168_v46 = vld [vmem:[%s13767_s3 + $0x1c] ss:$0 sm:$0xff] }
 0x2f9   :  { %9748 = vmatpush3.bf16.msra.mxu1 %v10593_v56  ;;  %5097 = vperm.xlu1 %10533, %v9181_v38   ;;  %v9161_v38 = vld [vmem:[%s13767_s3 + $0x15] ss:$0 sm:$0xff] }
 0x2fa   :  { %5093 = vperm.xlu0 %10532, %v9180_v63   ;;  %9737 = vmatprep.subr.bf16.mxu0 %v13771_v17  ;;  %v12314_v63 = vpop.permute.xlu0 %2365  ;;  %v12316_v8 = vpop.permute.xlu1 %2397 }
 0x2fb   :  { %9749 = vmatprep.subr.bf16.mxu1 %v13771_v17 }
 0x2fc   :  { %v10675_v12 = vpop.eup %10674  ;;  %9738 = vmatpush3.bf16.msra.mxu0 %v10594_v33 }
 0x2fd   :  { %v10677_v22 = vpop.eup %10676  ;;  %v1346_v11 = vadd.f32 1.0, %v10675_v12  ;;  %9750 = vmatpush3.bf16.msra.mxu1 %v10595_v3  ;;  %4989 = vperm.xlu1 %10533, %v9154_v29   ;;  %v9182_v29 = vld [vmem:[%s13767_s3 + $0x2a] ss:$0 sm:$0xff] }
 0x2fe   :  { %v1347_v55 = vadd.f32 1.0, %v10677_v22  ;;  %4957 = vperm.xlu0 %10532, %v9146_v59   ;;  %9739 = vmatprep.subr.bf16.mxu0 %v13771_v17  ;;  %v9175_v59 = vld [vmem:[%s13767_s3 + $0x23] ss:$0 sm:$0xff]  ;;  %v12328_v12 = vpop.permute.xlu0 %2369  ;;  %v12331_v22 = vpop.permute.xlu1 %2401 }
 0x2ff   :  { %v1354_v56 = vmul.f32 %v1346_v11, %v1322_v57  ;;  %9751 = vmatprep.subr.bf16.mxu1 %v13771_v17  ;;  %v9188_v57 = vld [vmem:[%s13767_s3 + $0x30] ss:$0 sm:$0xff]  ;;  %v9155_v11 = vld [vmem:[%s13767_s3 + $0xf] ss:$0 sm:$0xff] }
 0x300   :  { %v1355_v33 = vmul.f32 %v1347_v55, %v1323_v14  ;;  %9740 = vmatpush3.bf16.msra.mxu0 %v10596_v62  ;;  %v9189_v62 = vld [vmem:[%s13767_s3 + $0x31] ss:$0 sm:$0xff] }
 0x301   :  { %v1362_v3 = vpack.c.bf16 %v1354_v56, %v1354_v56  ;;  %9752 = vmatpush3.bf16.msra.mxu1 %v10597_v49  ;;  %5045 = vperm.xlu1 %10533, %v9168_v46   ;;  %v9147_v49 = vld [vmem:[%s13767_s3 + $0x7] ss:$0 sm:$0xff]  ;;  %v9169_v46 = vld [vmem:[%s13767_s3 + $0x1d] ss:$0 sm:$0xff]  ;;  %v9162_v56 = vld [vmem:[%s13767_s3 + $0x16] ss:$0 sm:$0xff] }
 0x302   :  { %v1363_v9 = vpack.c.bf16 %v1355_v33, %v1355_v33  ;;  %5017 = vperm.xlu0 %10532, %v9161_v38   ;;  %9757 = vmatprep.subr.bf16.mxu0 %v13771_v17  ;;  %v12336_v14 = vpop.permute.xlu0 %2429  ;;  %v12338_v55 = vpop.permute.xlu1 %2837  ;;  %v9183_v33 = vld [vmem:[%s13767_s3 + $0x2b] ss:$0 sm:$0xff] }
 0x303   :  { %9742 = vmatmul.mubr.msk.bf16.vlgmr.msra.gmra.mrb[28].mxu0 %vm803_vm1, %v1362_v3  ;;  %9769 = vmatprep.subr.bf16.mxu1 %v13771_v17  ;;  %13783 = vst [vmem:[#allocation107_spill] sm:$0xff] %v12338_v55 }
 0x304   :  { %9754 = vmatmul.mubr.msk.bf16.vlgmr.msra.gmra.mrb[28].mxu1 %vm803_vm1, %v1363_v9  ;;  %9765 = vmatprep.mubr.msk.bf16.mxu0 %vm11427_vm0, %v13771_v17  ;;  %v9176_v9 = vld [vmem:[%s13767_s3 + $0x24] ss:$0 sm:$0xff] }
 0x305   :  { %5101 = vperm.xlu1 %10533, %v9182_v29   ;;  %9777 = vmatprep.mubr.msk.bf16.mxu1 %vm11427_vm0, %v13771_v17  ;;  %v9196_v29 = vld [vmem:[%s13767_s3 + $0x38] ss:$0 sm:$0xff] }
 0x306   :  { %5073 = vperm.xlu0 %10532, %v9175_v59   ;;  %v12342_v38 = vpop.permute.xlu0 %2433  ;;  %v12345_v3 = vpop.permute.xlu1 %2461  ;;  %v9190_v59 = vld [vmem:[%s13767_s3 + $0x32] ss:$0 sm:$0xff] }
 0x309   :  { %5129 = vperm.xlu1 %10533, %v9189_v62  }
 0x30a   :  { %5125 = vperm.xlu0 %10532, %v9188_v57   ;;  %v12350_v62 = vpop.permute.xlu0 %2841  ;;  %v12352_v57 = vpop.permute.xlu1 %2949 }
 0x30b   :  { %13784 = vst [vmem:[#allocation108_spill] sm:$0xff] %v12350_v62  ;;  %13785 = vst [vmem:[#allocation109_spill] sm:$0xff] %v12352_v57  ;;  %v9191_v62 = vld [vmem:[%s13767_s3 + $0x33] ss:$0 sm:$0xff] }
 0x30d   :  { %4993 = vperm.xlu1 %10533, %v9155_v11   ;;  %v9163_v11 = vld [vmem:[%s13767_s3 + $0x17] ss:$0 sm:$0xff] }
 0x30e   :  { %4961 = vperm.xlu0 %10532, %v9147_v49   ;;  %v9197_v49 = vld [vmem:[%s13767_s3 + $0x39] ss:$0 sm:$0xff] }
 0x311   :  { %5049 = vperm.xlu1 %10533, %v9169_v46   ;;  %v12356_v46 = vpop.permute.xlu0 %2465 }
 0x312   :  { %5021 = vperm.xlu0 %10532, %v9162_v56   ;;  %v9177_v56 = vld [vmem:[%s13767_s3 + $0x25] ss:$0 sm:$0xff] }
 0x315   :  { %5105 = vperm.xlu1 %10533, %v9183_v33   ;;  %v12359_v33 = vpop.permute.xlu1 %2493 }
 0x316   :  { %5077 = vperm.xlu0 %10532, %v9176_v9   ;;  %13786 = vst [vmem:[#allocation110_spill] sm:$0xff] %v12359_v33  ;;  %v9170_v9 = vld [vmem:[%s13767_s3 + $0x1e] ss:$0 sm:$0xff] }
 0x319   :  { %5157 = vperm.xlu1 %10533, %v9196_v29   ;;  %v9184_v29 = vld [vmem:[%s13767_s3 + $0x2c] ss:$0 sm:$0xff]  ;;  %v12366_v57 = vpop.permute.xlu1 %3029 }
 0x31a   :  { %5133 = vperm.xlu0 %10532, %v9190_v59   ;;  %v12364_v59 = vpop.permute.xlu0 %2953  ;;  %13788 = vst [vmem:[#allocation112_spill] sm:$0xff] %v12366_v57 }
 0x31b   :  { %13787 = vst [vmem:[#allocation111_spill] sm:$0xff] %v12364_v59  ;;  %v9199_v59 = vld [vmem:[%s13767_s3 + $0x3b] ss:$0 sm:$0xff] }
 0x31d   :  { %5025 = vperm.xlu1 %10533, %v9163_v11   ;;  %v9171_v11 = vld [vmem:[%s13767_s3 + $0x1f] ss:$0 sm:$0xff] }
 0x31e   :  { %5161 = vperm.xlu0 %10532, %v9197_v49   ;;  %v9198_v49 = vld [vmem:[%s13767_s3 + $0x3a] ss:$0 sm:$0xff]  ;;  %v12370_v55 = vpop.permute.xlu0 %2497 }
 0x31f   :  { %13790 = vst [vmem:[#allocation113_spill] sm:$0xff] %v12370_v55 }
 0x321   :  { %5081 = vperm.xlu1 %10533, %v9177_v56   ;;  %v9185_v56 = vld [vmem:[%s13767_s3 + $0x2d] ss:$0 sm:$0xff] }
 0x322   :  { %5053 = vperm.xlu0 %10532, %v9170_v9   ;;  %v12373_v9 = vpop.permute.xlu1 %2525 }
 0x323   :  { %13791 = vst [vmem:[#allocation114_spill] sm:$0xff] %v12373_v9 }
 0x325   :  { %5137 = vperm.xlu1 %10533, %v9191_v62   ;;  %v9192_v62 = vld [vmem:[%s13767_s3 + $0x34] ss:$0 sm:$0xff] }
 0x326   :  { %5109 = vperm.xlu0 %10532, %v9184_v29   ;;  %v12378_v29 = vpop.permute.xlu0 %3033  ;;  %v12380_v57 = vpop.permute.xlu1 %2529 }
 0x327   :  { %13792 = vst [vmem:[#allocation115_spill] sm:$0xff] %v12378_v29  ;;  %13793 = vst [vmem:[#allocation116_spill] sm:$0xff] %v12380_v57  ;;  %v9200_v29 = vld [vmem:[%s13767_s3 + $0x3c] ss:$0 sm:$0xff] }
 0x329   :  { %5057 = vperm.xlu1 %10533, %v9171_v11   ;;  %v9205_v11 = vld [vmem:[%s13789_s12 + $0x1] ss:$0 sm:$0xff] }
 0x32a   :  { %5165 = vperm.xlu0 %10532, %v9198_v49   ;;  %v9204_v49 = vld [vmem:[%s13789_s12] ss:$0 sm:$0xff]  ;;  %v12384_v61 = vpop.permute.xlu0 %2557 }
 0x32b   :  { %13794 = vst [vmem:[#allocation117_spill] sm:$0xff] %v12384_v61  ;;  %v9194_v61 = vld [vmem:[%s13767_s3 + $0x36] ss:$0 sm:$0xff] }
 0x32d   :  { %5113 = vperm.xlu1 %10533, %v9185_v56   ;;  %v9186_v56 = vld [vmem:[%s13767_s3 + $0x2e] ss:$0 sm:$0xff] }
 0x32e   :  { %5085 = vperm.xlu0 %10532, %v9178_v50   ;;  %v12387_v50 = vpop.permute.xlu1 %2561 }
 0x32f   :  { %13795 = vst [vmem:[#allocation118_spill] sm:$0xff] %v12387_v50 }
 0x331   :  { %5169 = vperm.xlu1 %10533, %v9199_v59   ;;  %v9193_v59 = vld [vmem:[%s13767_s3 + $0x35] ss:$0 sm:$0xff] }
 0x332   :  { %5141 = vperm.xlu0 %10532, %v9192_v62   ;;  %v12392_v62 = vpop.permute.xlu0 %2589  ;;  %v12394_v60 = vpop.permute.xlu1 %2593 }
 0x333   :  { %13796 = vst [vmem:[#allocation119_spill] sm:$0xff] %v12392_v62  ;;  %13797 = vst [vmem:[#allocation120_spill] sm:$0xff] %v12394_v60  ;;  %v9195_v62 = vld [vmem:[%s13767_s3 + $0x37] ss:$0 sm:$0xff] }
 0x335   :  { %5417 = vperm.xlu1 %10533, %v9205_v11   ;;  %v9187_v11 = vld [vmem:[%s13767_s3 + $0x2f] ss:$0 sm:$0xff] }
 0x336   :  { %5413 = vperm.xlu0 %10532, %v9204_v49   ;;  %v9206_v49 = vld [vmem:[%s13789_s12 + $0x2] ss:$0 sm:$0xff]  ;;  %v12398_v50 = vpop.permute.xlu0 %2845 }
 0x337   :  { %13798 = vst [vmem:[#allocation121_spill] sm:$0xff] %v12398_v50  ;;  %v9203_v50 = vld [vmem:[%s13767_s3 + $0x3f] ss:$0 sm:$0xff] }
 0x339   :  { %5117 = vperm.xlu1 %10533, %v9186_v56   ;;  %v9201_v56 = vld [vmem:[%s13767_s3 + $0x3d] ss:$0 sm:$0xff] }
 0x33a   :  { %5089 = vperm.xlu0 %10532, %v9179_v7   ;;  %v12401_v7 = vpop.permute.xlu1 %2849 }
 0x33b   :  { %13799 = vst [vmem:[#allocation122_spill] sm:$0xff] %v12401_v7 }
 0x33d   :  { %5173 = vperm.xlu1 %10533, %v9200_v29   ;;  %v9207_v29 = vld [vmem:[%s13789_s12 + $0x3] ss:$0 sm:$0xff] }
 0x33e   :  { %5145 = vperm.xlu0 %10532, %v9193_v59   ;;  %v12406_v59 = vpop.permute.xlu0 %2957  ;;  %v12408_v60 = vpop.permute.xlu1 %2961 }
 0x33f   :  { %13800 = vst [vmem:[#allocation123_spill] sm:$0xff] %v12406_v59  ;;  %13801 = vst [vmem:[#allocation124_spill] sm:$0xff] %v12408_v60  ;;  %v9211_v59 = vld [vmem:[%s13789_s12 + $0x7] ss:$0 sm:$0xff] }
 0x341   :  { %5121 = vperm.xlu1 %10533, %v9187_v11   ;;  %v9208_v11 = vld [vmem:[%s13789_s12 + $0x4] ss:$0 sm:$0xff] }
 0x342   :  { %5421 = vperm.xlu0 %10532, %v9206_v49   ;;  %v9202_v49 = vld [vmem:[%s13767_s3 + $0x3e] ss:$0 sm:$0xff]  ;;  %v12412_v7 = vpop.permute.xlu0 %3037 }
 0x343   :  { %13803 = vst [vmem:[#allocation125_spill] sm:$0xff] %v12412_v7  ;;  %v9214_v7 = vld [vmem:[%s13802_s28 + $0x2] ss:$0 sm:$0xff] }
 0x345   :  { %5177 = vperm.xlu1 %10533, %v9201_v56   ;;  %v9209_v56 = vld [vmem:[%s13789_s12 + $0x5] ss:$0 sm:$0xff] }
 0x346   :  { %5149 = vperm.xlu0 %10532, %v9194_v61   ;;  %v12415_v61 = vpop.permute.xlu1 %3041 }
 0x347   :  { %13805 = vst [vmem:[#allocation126_spill] sm:$0xff] %v12415_v61 }
 0x349   :  { %5153 = vperm.xlu1 %10533, %v9195_v62   ;;  %v9210_v62 = vld [vmem:[%s13789_s12 + $0x6] ss:$0 sm:$0xff] }
 0x34a   :  { %5425 = vperm.xlu0 %10532, %v9207_v29   ;;  %v12420_v29 = vpop.permute.xlu0 %2965  ;;  %v12422_v60 = vpop.permute.xlu1 %2969 }
 0x34b   :  { %13806 = vst [vmem:[#allocation127_spill] sm:$0xff] %v12420_v29  ;;  %13807 = vst [vmem:[#allocation128_spill] sm:$0xff] %v12422_v60  ;;  %v9215_v29 = vld [vmem:[%s13802_s28 + $0x3] ss:$0 sm:$0xff] }
 0x34d   :  { %5429 = vperm.xlu1 %10533, %v9208_v11   ;;  %v9213_v11 = vld [vmem:[%s13802_s28 + $0x1] ss:$0 sm:$0xff] }
 0x34e   :  { %5181 = vperm.xlu0 %10532, %v9202_v49   ;;  %v9212_v49 = vld [vmem:[%s13802_s28] ss:$0 sm:$0xff]  ;;  %v12426_v61 = vpop.permute.xlu0 %3045 }
 0x34f   :  { %13809 = vst [vmem:[#allocation129_spill] sm:$0xff] %v12426_v61  ;;  %v9229_v61 = vld [vmem:[%s13808_s24 + $0x1] ss:$0 sm:$0xff] }
 0x351   :  { %5433 = vperm.xlu1 %10533, %v9209_v56   ;;  %v9220_v56 = vld [vmem:[%s13804_s27] ss:$0 sm:$0xff] }
 0x352   :  { %5185 = vperm.xlu0 %10532, %v9203_v50   ;;  %v12429_v50 = vpop.permute.xlu1 %3049 }
 0x353   :  { %13810 = vst [vmem:[#allocation130_spill] sm:$0xff] %v12429_v50 }
 0x355   :  { %5441 = vperm.xlu1 %10533, %v9211_v59   ;;  %v9221_v59 = vld [vmem:[%s13804_s27 + $0x1] ss:$0 sm:$0xff] }
 0x356   :  { %5437 = vperm.xlu0 %10532, %v9210_v62   ;;  %v12434_v62 = vpop.permute.xlu0 %3341  ;;  %v12436_v60 = vpop.permute.xlu1 %3345 }
 0x357   :  { %13811 = vst [vmem:[#allocation131_spill] sm:$0xff] %v12434_v62  ;;  %13812 = vst [vmem:[#allocation132_spill] sm:$0xff] %v12436_v60  ;;  %v9230_v62 = vld [vmem:[%s13808_s24 + $0x2] ss:$0 sm:$0xff] }
 0x359   :  { %5537 = vperm.xlu1 %10533, %v9213_v11   ;;  %v9228_v11 = vld [vmem:[%s13808_s24] ss:$0 sm:$0xff] }
 0x35a   :  { %5533 = vperm.xlu0 %10532, %v9212_v49   ;;  %v9222_v49 = vld [vmem:[%s13804_s27 + $0x2] ss:$0 sm:$0xff]  ;;  %v12440_v50 = vpop.permute.xlu0 %3349 }
 0x35b   :  { %13813 = vst [vmem:[#allocation133_spill] sm:$0xff] %v12440_v50  ;;  %v9231_v50 = vld [vmem:[%s13808_s24 + $0x3] ss:$0 sm:$0xff] }
 0x35d   :  { %5613 = vperm.xlu1 %10533, %v9220_v56   ;;  %v9216_v56 = vld [vmem:[%s13802_s28 + $0x4] ss:$0 sm:$0xff] }
 0x35e   :  { %5541 = vperm.xlu0 %10532, %v9214_v7   ;;  %v12443_v7 = vpop.permute.xlu1 %3353 }
 0x35f   :  { %13814 = vst [vmem:[#allocation134_spill] sm:$0xff] %v12443_v7 }
 0x361   :  { %5545 = vperm.xlu1 %10533, %v9215_v29   ;;  %v9223_v29 = vld [vmem:[%s13804_s27 + $0x3] ss:$0 sm:$0xff] }
 0x362   :  { %5617 = vperm.xlu0 %10532, %v9221_v59   ;;  %v12448_v59 = vpop.permute.xlu0 %3357  ;;  %v12450_v60 = vpop.permute.xlu1 %3361 }
 0x363   :  { %13815 = vst [vmem:[#allocation135_spill] sm:$0xff] %v12448_v59  ;;  %13816 = vst [vmem:[#allocation136_spill] sm:$0xff] %v12450_v60 }
 0x365   :  { %5702 = vperm.xlu1 %10533, %v9228_v11   ;;  %v9224_v11 = vld [vmem:[%s13804_s27 + $0x4] ss:$0 sm:$0xff] }
 0x366   :  { %5621 = vperm.xlu0 %10532, %v9222_v49   ;;  %v9217_v49 = vld [vmem:[%s13802_s28 + $0x5] ss:$0 sm:$0xff]  ;;  %v12454_v7 = vpop.permute.xlu0 %3365 }
 0x367   :  { %13817 = vst [vmem:[#allocation137_spill] sm:$0xff] %v12454_v7  ;;  %v10599_v7 = vld [vmem:[%s13818_s2 + $0x20] sm:$0xff]  }
 0x368   :  { %9770 = vmatpush3.bf16.msra.mxu1 %v10599_v7 }
 0x369   :  { %5549 = vperm.xlu1 %10533, %v9216_v56   ;;  %v12457_v56 = vpop.permute.xlu1 %3369  ;;  %9771 = vmatprep.subr.bf16.mxu1 %v13771_v17 }
 0x36a   :  { %5706 = vperm.xlu0 %10532, %v9229_v61   ;;  %v9218_v61 = vld [vmem:[%s13802_s28 + $0x6] ss:$0 sm:$0xff]  ;;  %13819 = vst [vmem:[#allocation138_spill] sm:$0xff] %v12457_v56  ;;  %v12462_v60 = vpop.permute.xlu0 %3997 }
 0x36b   :  { %13820 = vst [vmem:[#allocation139_spill] sm:$0xff] %v12462_v60  ;;  %v10598_v56 = vld [vmem:[%s13818_s2] sm:$0xff]  }
 0x36c   :  { %v9233_v60 = vld [vmem:[%s13808_s24 + $0x5] ss:$0 sm:$0xff]  ;;  %9758 = vmatpush3.bf16.msra.mxu0 %v10598_v56  ;;  %v10602_v56 = vld [vmem:[%s13818_s2 + $0x10] sm:$0xff]  }
 0x36d   :  { %5710 = vperm.xlu1 %10533, %v9230_v62   ;;  %v9232_v62 = vld [vmem:[%s13808_s24 + $0x4] ss:$0 sm:$0xff]  ;;  %v12464_v59 = vpop.permute.xlu1 %4001  ;;  %9759 = vmatprep.subr.bf16.mxu0 %v13771_v17 }
 0x36e   :  { %5625 = vperm.xlu0 %10532, %v9223_v29   ;;  %v9225_v29 = vld [vmem:[%s13804_s27 + $0x5] ss:$0 sm:$0xff]  ;;  %13821 = vst [vmem:[#allocation140_spill] sm:$0xff] %v12464_v59  ;;  %v9234_v59 = vld [vmem:[%s13808_s24 + $0x6] ss:$0 sm:$0xff] }
 0x371   :  { %5629 = vperm.xlu1 %10533, %v9224_v11   ;;  %v9226_v11 = vld [vmem:[%s13804_s27 + $0x6] ss:$0 sm:$0xff]  ;;  %v12473_v57 = vpop.permute.xlu1 %4009 }
 0x372   :  { %5553 = vperm.xlu0 %10532, %v9217_v49   ;;  %v9219_v49 = vld [vmem:[%s13802_s28 + $0x7] ss:$0 sm:$0xff]  ;;  %13823 = vst [vmem:[#allocation142_spill] sm:$0xff] %v12473_v57  ;;  %v9236_v57 = vld [vmem:[#allocation2] ss:$0 sm:$0xff] }
 0x375   :  { %5557 = vperm.xlu1 %10533, %v9218_v61   ;;  %v12470_v61 = vpop.permute.xlu0 %4005  ;;  %v12486_v7 = vpop.permute.xlu1 %4017 }
 0x376   :  { %5714 = vperm.xlu0 %10532, %v9231_v50   ;;  %13822 = vst [vmem:[#allocation141_spill] sm:$0xff] %v12470_v61  ;;  %v9227_v50 = vld [vmem:[%s13804_s27 + $0x7] ss:$0 sm:$0xff]  ;;  %13825 = vst [vmem:[#allocation144_spill] sm:$0xff] %v12486_v7 }
 0x379   :  { %5718 = vperm.xlu1 %10533, %v9232_v62   ;;  %v10600_v62 = vld [vmem:[%s13818_s2 + $0x8] sm:$0xff]  }
 0x37a   :  { %5633 = vperm.xlu0 %10532, %v9225_v29   ;;  %v10601_v29 = vld [vmem:[%s13818_s2 + $0x28] sm:$0xff]   ;;  %9760 = vmatpush3.bf16.msra.mxu0 %v10600_v62  ;;  %v10605_v62 = vld [vmem:[%s13818_s2 + $0x38] sm:$0xff]  }
 0x37b   :  { %9772 = vmatpush3.bf16.msra.mxu1 %v10601_v29  ;;  %9761 = vmatprep.subr.bf16.mxu0 %v13771_v17 }
 0x37c   :  { %9773 = vmatprep.subr.bf16.mxu1 %v13771_v17 }
 0x37d   :  { %5637 = vperm.xlu1 %10533, %v9226_v11   ;;  %v9235_v11 = vld [vmem:[%s13808_s24 + $0x7] ss:$0 sm:$0xff] }
 0x37e   :  { %5561 = vperm.xlu0 %10532, %v9219_v49   ;;  %v12482_v49 = vpop.permute.xlu0 %4013  ;;  %9762 = vmatpush3.bf16.msra.mxu0 %v10602_v56 }
 0x37f   :  { %13824 = vst [vmem:[#allocation143_spill] sm:$0xff] %v12482_v49  ;;  %9763 = vmatprep.subr.bf16.mxu0 %v13771_v17 }
 0x381   :  { %5641 = vperm.xlu1 %10533, %v9227_v50   ;;  %v10603_v50 = vld [vmem:[%s13818_s2 + $0x30] sm:$0xff]  }
 0x382   :  { %5722 = vperm.xlu0 %10532, %v9233_v60   ;;  %9774 = vmatpush3.bf16.msra.mxu1 %v10603_v50  ;;  %v10604_v60 = vld [vmem:[%s13818_s2 + $0x18] sm:$0xff]   ;;  %v12494_v29 = vpop.permute.xlu0 %4021 }
 0x383   :  { %9775 = vmatprep.subr.bf16.mxu1 %v13771_v17  ;;  %13826 = vst [vmem:[#allocation145_spill] sm:$0xff] %v12494_v29  ;;  %9764 = vmatpush3.bf16.msra.mxu0 %v10604_v60 }
 0x384   :  { %9781 = vmatprep.subr.bf16.mxu0 %v13771_v17 }
 0x385   :  { %5730 = vperm.xlu1 %10533, %v9235_v11  }
 0x386   :  { %5726 = vperm.xlu0 %10532, %v9234_v59   ;;  %9776 = vmatpush3.bf16.msra.mxu1 %v10605_v62 }
 0x387   :  { %9793 = vmatprep.subr.bf16.mxu1 %v13771_v17 }
 0x38a   :  { %5762 = vperm.xlu0 %10532, %v9236_v57  }
 0x3a6   :  { %v1497_v11 = vpop.f32.mrb[16].mxu0 }
 0x3a7   :  { %v1498_v59 = vadd.f32 %v1497_v11, %v12032_v16  ;;  %v1564_v56 = vpop.f32.mrb[16].mxu1  ;;  %v9671_v50 = vpop.f32.mrb[17].mxu0 }
 0x3a8   :  { %v1565_v7 = vadd.f32 %v1564_v56, %v12030_v15  ;;  %v9683_v49 = vpop.f32.mrb[17].mxu1  ;;  %v1500_v55 = vpop.f32.mrb[18].mxu0 }
 0x3a9   :  { %v1980_v61 = vmul.f32 0.70710677, %v1498_v59  ;;  %v1567_v33 = vpop.f32.mrb[18].mxu1  ;;  %v9672_v29 = vpop.f32.mrb[19].mxu0  ;;  %v1972_v17 = vmul.f32 0.5, %v1498_v59 }
 0x3aa   :  { %v1981_v9 = vmul.f32 0.70710677, %v1565_v7  ;;  %v9684_v57 = vpop.f32.mrb[19].mxu1  ;;  %v1973_v16 = vmul.f32 0.5, %v1565_v7 }
 0x3ab   :  { %10678 = verf.f32 %v1980_v61  ;;  %v10856_v57 = vld [vmem:[%s13744_s20] sm:$0xff] }
 0x3ac   :  { %10680 = verf.f32 %v1981_v9 }
 0x3b5   :  { %v10679_v60 = vpop.eup %10678 }
 0x3b6   :  { %v10681_v62 = vpop.eup %10680  ;;  %v1996_v4 = vadd.f32 1.0, %v10679_v60  ;;  %v1631_v0 = vpop.f32.mrb[20].mxu0 }
 0x3b7   :  { %v1997_v11 = vadd.f32 1.0, %v10681_v62  ;;  %v1632_v15 = vadd.f32 %v1631_v0, %v12038_v20  ;;  %v1698_v49 = vpop.f32.mrb[20].mxu1  ;;  %v9695_v56 = vpop.f32.mrb[21].mxu0 }
 0x3b8   :  { %v2004_v55 = vmul.f32 %v1996_v4, %v1972_v17  ;;  %v12502_v33 = vadd.f32 %v1698_v49, %v12036_v19  ;;  %v9707_v61 = vpop.f32.mrb[21].mxu1  ;;  %v1634_v50 = vpop.f32.mrb[22].mxu0 }
 0x3b9   :  { %v2005_v29 = vmul.f32 %v1997_v11, %v1973_v16  ;;  %v1982_v9 = vmul.f32 0.70710677, %v1632_v15  ;;  %v1701_v59 = vpop.f32.mrb[22].mxu1  ;;  %v9696_v60 = vpop.f32.mrb[23].mxu0 }
 0x3ba   :  { %v2012_v42 = vadd.f32 %v10856_v57, %v2004_v55  ;;  %v1983_v7 = vmul.f32 0.70710677, %v12502_v33  ;;  %v9708_v20 = vpop.f32.mrb[23].mxu1 }
 0x3bb   :  { %v2013_v51 = vadd.f32 %v10857_v53, %v2005_v29  ;;  %10682 = verf.f32 %v1982_v9 }
 0x3bc   :  { %v2596_v0 = vmul.f32 %v12056_v32, %v2012_v42  ;;  %v2597_v17 = vmul.f32 %v12062_v36, %v2012_v42  ;;  %v2598_v19 = vmul.f32 %v12104_v5, %v2012_v42  ;;  %v2599_v4 = vmul.f32 %v12108_v10, %v2012_v42 }
 0x3bd   :  { %v2600_v62 = vmul.f32 %v12158_v30, %v2012_v42  ;;  %v2601_v16 = vmul.f32 %v12164_v13, %v2012_v42  ;;  %v2602_v11 = vmul.f32 %v12314_v63, %v2012_v42  ;;  %v2603_v53 = vmul.f32 %v12328_v12, %v2012_v42 }
 0x3be   :  { %v2604_v49 = vmul.f32 %v12054_v31, %v2013_v51  ;;  %v2605_v56 = vmul.f32 %v12060_v35, %v2013_v51  ;;  %v2606_v32 = vmul.f32 %v12102_v1, %v2013_v51  ;;  %v2607_v36 = vmul.f32 %v12116_v21, %v2013_v51 }
 0x3bf   :  { %v2608_v5 = vmul.f32 %v12156_v25, %v2013_v51  ;;  %v2609_v10 = vmul.f32 %v12174_v6, %v2013_v51  ;;  %v2610_v30 = vmul.f32 %v12316_v8, %v2013_v51  ;;  %v2611_v13 = vmul.f32 %v12331_v22, %v2013_v51 }
 0x3c0   :  { %10684 = verf.f32 %v1983_v7  ;;  %v2660_v63 = vsel %vm803_vm1, %v2596_v0, 0.0  ;;  %v2661_v42 = vsel %vm803_vm1, %v2604_v49, 0.0  ;;  %v2675_v31 = vsel %vm803_vm1, %v2597_v17, 0.0 }
 0x3c1   :  { %v2662_v35 = vadd.f32 %v2661_v42, %v2660_v63  ;;  %v2676_v1 = vsel %vm803_vm1, %v2605_v56, 0.0  ;;  %v2690_v21 = vsel %vm803_vm1, %v2598_v19, 0.0  ;;  %v2691_v25 = vsel %vm803_vm1, %v2606_v32, 0.0  ;;  %v10858_v42 = vld [vmem:[%s13744_s20 + $0x10] sm:$0xff] }
 0x3c2   :  { %v2677_v12 = vadd.f32 %v2676_v1, %v2675_v31  ;;  %v2692_v6 = vadd.f32 %v2691_v25, %v2690_v21  ;;  %v2705_v8 = vsel %vm803_vm1, %v2599_v4, 0.0  ;;  %v2706_v51 = vsel %vm803_vm1, %v2607_v36, 0.0 }
 0x3c3   :  { %v2707_v22 = vadd.f32 %v2706_v51, %v2705_v8  ;;  %v2720_v55 = vsel %vm803_vm1, %v2600_v62, 0.0  ;;  %v2721_v61 = vsel %vm803_vm1, %v2608_v5, 0.0  ;;  %v2735_v29 = vsel %vm803_vm1, %v2601_v16, 0.0 }
 0x3c4   :  { %v2722_v9 = vadd.f32 %v2721_v61, %v2720_v55  ;;  %v2736_v50 = vsel %vm803_vm1, %v2609_v10, 0.0  ;;  %v2750_v57 = vsel %vm803_vm1, %v2602_v11, 0.0  ;;  %v2751_v59 = vsel %vm803_vm1, %v2610_v30, 0.0 }
 0x3c5   :  { %v10683_v60 = vpop.eup %10682  ;;  %v12537_v7 = vadd.f32 %v2736_v50, %v2735_v29  ;;  %v12539_v20 = vadd.f32 %v2751_v59, %v2750_v57  ;;  %v2765_v0 = vsel %vm803_vm1, %v2603_v53, 0.0  ;;  %v2766_v17 = vsel %vm803_vm1, %v2611_v13, 0.0 }
 0x3c6   :  { %v1974_v19 = vmul.f32 0.5, %v1632_v15  ;;  %v1998_v4 = vadd.f32 1.0, %v10683_v60  ;;  %v1765_v62 = vpop.f32.mrb[24].mxu0  ;;  %v12543_v16 = vadd.f32 %v2766_v17, %v2765_v0  ;;  %v1975_v13 = vmul.f32 0.5, %v12502_v33 }
 0x3c7   :  { %v1766_v49 = vadd.f32 %v1765_v62, %v12044_v24  ;;  %v1832_v11 = vpop.f32.mrb[24].mxu1  ;;  %v9719_v56 = vpop.f32.mrb[25].mxu0 }
 0x3c8   :  { %v2006_v32 = vmul.f32 %v1998_v4, %v1974_v19  ;;  %v1833_v36 = vadd.f32 %v1832_v11, %v12042_v23  ;;  %v9731_v5 = vpop.f32.mrb[25].mxu1  ;;  %v1768_v30 = vpop.f32.mrb[26].mxu0 }
 0x3c9   :  { %v1984_v10 = vmul.f32 0.70710677, %v1766_v49  ;;  %v1835_v31 = vpop.f32.mrb[26].mxu1  ;;  %v9720_v1 = vpop.f32.mrb[27].mxu0  ;;  %v1976_v25 = vmul.f32 0.5, %v1766_v49 }
 0x3ca   :  { %v10685_v63 = vpop.eup %10684  ;;  %v2014_v53 = vadd.f32 %v10858_v42, %v2006_v32  ;;  %v1985_v15 = vmul.f32 0.70710677, %v1833_v36  ;;  %v1977_v24 = vmul.f32 0.5, %v1833_v36  ;;  %v9732_v8 = vpop.f32.mrb[27].mxu1 }
 0x3cb   :  { %v1999_v21 = vadd.f32 1.0, %v10685_v63  ;;  %10686 = verf.f32 %v1984_v10 }
 0x3cc   :  { %10688 = verf.f32 %v1985_v15  ;;  %v2612_v23 = vmul.f32 %v12068_v40, %v2014_v53  ;;  %v2613_v51 = vmul.f32 %v12066_v39, %v2014_v53  ;;  %v2614_v55 = vmul.f32 %v12114_v18, %v2014_v53  ;;  %v10859_v40 = vld [vmem:[%s13744_s20 + $0x18] sm:$0xff] }
 0x3cd   :  { %v2007_v61 = vmul.f32 %v1999_v21, %v1975_v13  ;;  %v2615_v29 = vmul.f32 %v12120_v26, %v2014_v53  ;;  %v2616_v33 = vmul.f32 %v12170_v41, %v2014_v53  ;;  %v2617_v50 = vmul.f32 %v12178_v2, %v2014_v53 }
 0x3ce   :  { %v2663_v57 = vsel %vm803_vm1, %v2612_v23, 0.0  ;;  %v2678_v59 = vsel %vm803_vm1, %v2613_v51, 0.0  ;;  %v2693_v60 = vsel %vm803_vm1, %v2614_v55, 0.0  ;;  %v2618_v0 = vmul.f32 %v12336_v14, %v2014_v53 }
 0x3cf   :  { %v2015_v17 = vadd.f32 %v10859_v40, %v2007_v61  ;;  %v2664_v39 = vadd.f32 %v2663_v57, %v2662_v35  ;;  %v2679_v19 = vadd.f32 %v2678_v59, %v2677_v12  ;;  %v2694_v18 = vadd.f32 %v2693_v60, %v2692_v6 }
 0x3d0   :  { %v2708_v4 = vsel %vm803_vm1, %v2615_v29, 0.0  ;;  %v2723_v26 = vsel %vm803_vm1, %v2616_v33, 0.0  ;;  %v2738_v41 = vsel %vm803_vm1, %v2617_v50, 0.0  ;;  %v2753_v2 = vsel %vm803_vm1, %v2618_v0, 0.0 }
 0x3d1   :  { %v2620_v62 = vmul.f32 %v12074_v44, %v2015_v17  ;;  %v2621_v49 = vmul.f32 %v12072_v43, %v2015_v17  ;;  %v2622_v11 = vmul.f32 %v12128_v37, %v2015_v17  ;;  %v2623_v14 = vmul.f32 %v12126_v34, %v2015_v17 }
 0x3d2   :  { %v2709_v56 = vadd.f32 %v2708_v4, %v2707_v22  ;;  %v2624_v35 = vmul.f32 %v12195_v58, %v2015_v17  ;;  %v2724_v12 = vadd.f32 %v2723_v26, %v2722_v9  ;;  %v2625_v6 = vmul.f32 %v12212_v54, %v2015_v17 }
 0x3d3   :  { %v2665_v32 = vsel %vm803_vm1, %v2620_v62, 0.0  ;;  %v2680_v36 = vsel %vm803_vm1, %v2621_v49, 0.0  ;;  %v2695_v5 = vsel %vm803_vm1, %v2622_v11, 0.0  ;;  %v2710_v44 = vsel %vm803_vm1, %v2623_v14, 0.0  ;;  %v13828_v49 = vld [vmem:[#allocation88_spill] sm:$0xff]  ;;  %v13829_v11 = vld [vmem:[#allocation86_spill] sm:$0xff] }
 0x3d4   :  { %v2666_v10 = vadd.f32 %v2665_v32, %v2664_v39  ;;  %v2681_v43 = vadd.f32 %v2680_v36, %v2679_v19  ;;  %v2696_v30 = vadd.f32 %v2695_v5, %v2694_v18  ;;  %v2711_v37 = vadd.f32 %v2710_v44, %v2709_v56  ;;  %v10861_v19 = vld [vmem:[%s13744_s20 + $0x28] sm:$0xff] }
 0x3d5   :  { %v10687_v63 = vpop.eup %10686  ;;  %v2725_v34 = vsel %vm803_vm1, %v2624_v35, 0.0  ;;  %v2739_v58 = vadd.f32 %v2738_v41, %v12537_v7  ;;  %v2740_v22 = vsel %vm803_vm1, %v2625_v6, 0.0  ;;  %v2626_v54 = vmul.f32 %v12345_v3, %v2015_v17  ;;  %v13830_v6 = vld [vmem:[#allocation87_spill] sm:$0xff] }
 0x3d6   :  { %v10689_v9 = vpop.eup %10688  ;;  %v2000_v42 = vadd.f32 1.0, %v10687_v63  ;;  %v1899_v13 = vpop.f32.mrb[28].mxu0  ;;  %v12578_v15 = vadd.f32 %v2725_v34, %v2724_v12  ;;  %v2754_v31 = vadd.f32 %v2753_v2, %v12539_v20  ;;  %v2619_v1 = vmul.f32 %v12342_v38, %v2014_v53  ;;  %v13827_v2 = vld [vmem:[#allocation79_spill] sm:$0xff] }
 0x3d7   :  { %v2001_v21 = vadd.f32 1.0, %v10689_v9  ;;  %v1900_v8 = vadd.f32 %v1899_v13, %v12050_v28  ;;  %v1966_v23 = vpop.f32.mrb[28].mxu1  ;;  %v9743_v51 = vpop.f32.mrb[29].mxu0  ;;  %v2741_v7 = vadd.f32 %v2740_v22, %v2739_v58  ;;  %v2755_v55 = vsel %vm803_vm1, %v2626_v54, 0.0  ;;  %v10860_v28 = vld [vmem:[%s13744_s20 + $0x20] sm:$0xff]  ;;  %v13831_v54 = vld [vmem:[#allocation96_spill] sm:$0xff] }
 0x3d8   :  { %v2008_v61 = vmul.f32 %v2000_v42, %v1976_v25  ;;  %v1967_v3 = vadd.f32 %v1966_v23, %v12048_v27  ;;  %v9755_v29 = vpop.f32.mrb[29].mxu1  ;;  %v12585_v33 = vadd.f32 %v2755_v55, %v2754_v31  ;;  %v2627_v20 = vmul.f32 %v12356_v46, %v2015_v17  ;;  %v1902_v53 = vpop.f32.mrb[30].mxu0  ;;  %v13832_v13 = vld [vmem:[#allocation99_spill] sm:$0xff]  ;;  %v13833_v31 = vld [vmem:[#allocation100_spill] sm:$0xff]  ;;  %v13835_v23 = vld [vmem:[#allocation110_spill] sm:$0xff] }
 0x3d9   :  { %v2009_v50 = vmul.f32 %v2001_v21, %v1977_v24  ;;  %v1986_v38 = vmul.f32 0.70710677, %v1900_v8  ;;  %v2768_v57 = vsel %vm803_vm1, %v2619_v1, 0.0  ;;  %v1978_v60 = vmul.f32 0.5, %v1900_v8  ;;  %v1969_v40 = vpop.f32.mrb[30].mxu1  ;;  %v9744_v39 = vpop.f32.mrb[31].mxu0 }
 0x3da   :  { %v2016_v59 = vadd.f32 %v10860_v28, %v2008_v61  ;;  %v1987_v0 = vmul.f32 0.70710677, %v1967_v3  ;;  %v2769_v25 = vadd.f32 %v2768_v57, %v12543_v16  ;;  %v1979_v18 = vmul.f32 0.5, %v1967_v3  ;;  %v9756_v4 = vpop.f32.mrb[31].mxu1  ;;  %v13836_v55 = vld [vmem:[#allocation114_spill] sm:$0xff]  ;;  %v13837_v28 = vld [vmem:[#allocation113_spill] sm:$0xff] }
 0x3db   :  { %v2017_v27 = vadd.f32 %v10861_v19, %v2009_v50  ;;  %10690 = verf.f32 %v1986_v38  ;;  %v2770_v46 = vsel %vm803_vm1, %v2627_v20, 0.0  ;;  %v13838_v4 = vld [vmem:[#allocation116_spill] sm:$0xff] }
 0x3dc   :  { %10692 = verf.f32 %v1987_v0  ;;  %v2628_v24 = vmul.f32 %v12080_v48, %v2016_v59  ;;  %v2629_v17 = vmul.f32 %v12078_v47, %v2016_v59  ;;  %v2630_v26 = vmul.f32 %v12134_v45, %v2016_v59 }
 0x3dd   :  { %v2636_v41 = vmul.f32 %v12086_v52, %v2017_v27  ;;  %v2637_v62 = vmul.f32 %v13827_v2, %v2017_v27  ;;  %v2638_v16 = vmul.f32 %v13828_v49, %v2017_v27  ;;  %v2631_v14 = vmul.f32 %v13829_v11, %v2016_v59  ;;  %v10862_v11 = vld [vmem:[%s13744_s20 + $0x30] sm:$0xff] }
 0x3de   :  { %v2667_v56 = vsel %vm803_vm1, %v2628_v24, 0.0  ;;  %v2682_v35 = vsel %vm803_vm1, %v2629_v17, 0.0  ;;  %v2697_v12 = vsel %vm803_vm1, %v2630_v26, 0.0  ;;  %v2639_v48 = vmul.f32 %v13830_v6, %v2017_v27  ;;  %v13839_v6 = vld [vmem:[#allocation81_spill] sm:$0xff] }
 0x3df   :  { %v2668_v32 = vadd.f32 %v2667_v56, %v2666_v10  ;;  %v2669_v47 = vsel %vm803_vm1, %v2636_v41, 0.0  ;;  %v2683_v45 = vadd.f32 %v2682_v35, %v2681_v43  ;;  %v2684_v52 = vsel %vm803_vm1, %v2637_v62, 0.0  ;;  %v13834_v43 = vld [vmem:[#allocation101_spill] sm:$0xff] }
 0x3e0   :  { %v2698_v36 = vadd.f32 %v2697_v12, %v2696_v30  ;;  %v2699_v5 = vsel %vm803_vm1, %v2638_v16, 0.0  ;;  %v2712_v44 = vsel %vm803_vm1, %v2631_v14, 0.0  ;;  %v2714_v63 = vsel %vm803_vm1, %v2639_v48, 0.0  ;;  %v10863_v56 = vld [vmem:[%s13744_s20 + $0x38] sm:$0xff]  ;;  %v13840_v48 = vld [vmem:[#allocation80_spill] sm:$0xff]  ;;  %s13965_s20 = sld [smem:[#allocation76_spill]] }
 0x3e1   :  { %v2670_v34 = vadd.f32 %v2669_v47, %v2668_v32  ;;  %v2685_v58 = vadd.f32 %v2684_v52, %v2683_v45  ;;  %v2713_v22 = vadd.f32 %v2712_v44, %v2711_v37  ;;  %v2632_v9 = vmul.f32 %v13831_v54, %v2016_v59  ;;  %v13841_v32 = vld [vmem:[#allocation90_spill] sm:$0xff]  ;;  %v13843_v45 = vld [vmem:[#allocation83_spill] sm:$0xff] }
 0x3e2   :  { %v2700_v42 = vadd.f32 %v2699_v5, %v2698_v36  ;;  %v2640_v10 = vmul.f32 %v13832_v13, %v2017_v27  ;;  %v2633_v1 = vmul.f32 %v13833_v31, %v2016_v59  ;;  %v2641_v21 = vmul.f32 %v13834_v43, %v2017_v27  ;;  %v13844_v52 = vld [vmem:[#allocation82_spill] sm:$0xff]  ;;  %v13845_v36 = vld [vmem:[#allocation92_spill] sm:$0xff]  ;;  %v13846_v44 = vld [vmem:[#allocation91_spill] sm:$0xff] }
 0x3e3   :  { %v2715_v8 = vadd.f32 %v2714_v63, %v2713_v22  ;;  %v2727_v30 = vsel %vm803_vm1, %v2632_v9, 0.0  ;;  %v2634_v51 = vmul.f32 %v13835_v23, %v2016_v59  ;;  %v2642_v61 = vmul.f32 %v13836_v55, %v2017_v27 }
 0x3e4   :  { %v2728_v3 = vadd.f32 %v2727_v30, %v12578_v15  ;;  %v2729_v37 = vsel %vm803_vm1, %v2640_v10, 0.0  ;;  %v2742_v29 = vsel %vm803_vm1, %v2633_v1, 0.0  ;;  %v2744_v20 = vsel %vm803_vm1, %v2641_v21, 0.0 }
 0x3e5   :  { %v10691_v50 = vpop.eup %10690  ;;  %v2743_v38 = vadd.f32 %v2742_v29, %v2741_v7  ;;  %v2757_v53 = vsel %vm803_vm1, %v2634_v51, 0.0  ;;  %v2759_v57 = vsel %vm803_vm1, %v2642_v61, 0.0  ;;  %v2635_v0 = vmul.f32 %v13837_v28, %v2016_v59  ;;  %v13851_v28 = vld [vmem:[#allocation85_spill] sm:$0xff] }
 0x3e6   :  { %v10693_v40 = vpop.eup %10692  ;;  %v2002_v39 = vadd.f32 1.0, %v10691_v50  ;;  %v2730_v19 = vadd.f32 %v2729_v37, %v2728_v3  ;;  %v2758_v15 = vadd.f32 %v2757_v53, %v12585_v33  ;;  %v2643_v24 = vmul.f32 %v13838_v4, %v2017_v27  ;;  %v13847_v3 = vld [vmem:[#allocation103_spill] sm:$0xff]  ;;  %v13848_v50 = vld [vmem:[#allocation105_spill] sm:$0xff] }
 0x3e7   :  { %v2003_v17 = vadd.f32 1.0, %v10693_v40  ;;  %v2745_v26 = vadd.f32 %v2744_v20, %v2743_v38  ;;  %v2771_v41 = vadd.f32 %v2770_v46, %v2769_v25  ;;  %v2772_v7 = vsel %vm803_vm1, %v2635_v0, 0.0  ;;  %v13842_v25 = vld [vmem:[#allocation89_spill] sm:$0xff]  ;;  %v13852_v40 = vld [vmem:[#allocation106_spill] sm:$0xff] }
 0x3e8   :  { %v2010_v2 = vmul.f32 %v2002_v39, %v1978_v60  ;;  %v2760_v62 = vadd.f32 %v2759_v57, %v2758_v15  ;;  %v2774_v59 = vsel %vm803_vm1, %v2643_v24, 0.0  ;;  %v13850_v57 = vld [vmem:[#allocation84_spill] sm:$0xff] }
 0x3e9   :  { %v2011_v49 = vmul.f32 %v2003_v17, %v1979_v18  ;;  %v2773_v16 = vadd.f32 %v2772_v7, %v2771_v41  ;;  %v13853_v17 = vld [vmem:[#allocation93_spill] sm:$0xff]  ;;  %v13854_v7 = vld [vmem:[#allocation94_spill] sm:$0xff] }
 0x3ea   :  { %v2018_v14 = vadd.f32 %v10862_v11, %v2010_v2 }
 0x3eb   :  { %v2019_v35 = vadd.f32 %v10863_v56, %v2011_v49  ;;  %v2775_v12 = vadd.f32 %v2774_v59, %v2773_v16  ;;  %v13855_v56 = vld [vmem:[#allocation117_spill] sm:$0xff] }
 0x3ec   :  { %v2644_v33 = vmul.f32 %v13839_v6, %v2018_v14  ;;  %v2645_v27 = vmul.f32 %v13840_v48, %v2018_v14  ;;  %v2646_v47 = vmul.f32 %v13841_v32, %v2018_v14  ;;  %v2647_v46 = vmul.f32 %v13842_v25, %v2018_v14  ;;  %v13857_v48 = vld [vmem:[#allocation118_spill] sm:$0xff]  ;;  %v13858_v25 = vld [vmem:[#allocation120_spill] sm:$0xff] }
 0x3ed   :  { %v2652_v60 = vmul.f32 %v13843_v45, %v2019_v35  ;;  %v2653_v18 = vmul.f32 %v13844_v52, %v2019_v35  ;;  %v2654_v5 = vmul.f32 %v13845_v36, %v2019_v35  ;;  %v2655_v63 = vmul.f32 %v13846_v44, %v2019_v35 }
 0x3ee   :  { %v2671_v22 = vsel %vm803_vm1, %v2644_v33, 0.0  ;;  %v2686_v54 = vsel %vm803_vm1, %v2645_v27, 0.0  ;;  %v2701_v9 = vsel %vm803_vm1, %v2646_v47, 0.0  ;;  %v2716_v13 = vsel %vm803_vm1, %v2647_v46, 0.0  ;;  %v13856_v33 = vld [vmem:[#allocation119_spill] sm:$0xff] }
 0x3ef   :  { %v2672_v10 = vadd.f32 %v2671_v22, %v2670_v34  ;;  %v2673_v31 = vsel %vm803_vm1, %v2652_v60, 0.0  ;;  %v2687_v1 = vadd.f32 %v2686_v54, %v2685_v58  ;;  %v2688_v43 = vsel %vm803_vm1, %v2653_v18, 0.0  ;;  %v13849_v34 = vld [vmem:[#allocation104_spill] sm:$0xff] }
 0x3f0   :  { %v2702_v21 = vadd.f32 %v2701_v9, %v2700_v42  ;;  %v2703_v30 = vsel %vm803_vm1, %v2654_v5, 0.0  ;;  %v2717_v23 = vadd.f32 %v2716_v13, %v2715_v8  ;;  %v2718_v61 = vsel %vm803_vm1, %v2655_v63, 0.0 }
 0x3f1   :  { %v2674_v51 = vadd.f32 %v2673_v31, %v2672_v10  ;;  %v2689_v55 = vadd.f32 %v2688_v43, %v2687_v1  ;;  %v2648_v37 = vmul.f32 %v13847_v3, %v2018_v14  ;;  %v2656_v38 = vmul.f32 %v13848_v50, %v2019_v35  ;;  %v13863_v3 = vld [vmem:[#allocation97_spill] sm:$0xff]  ;;  %v10606_v50 = vld [vmem:[%s13818_s2 + $0x40] sm:$0xff]  }
 0x3f2   :  { %v2704_v29 = vadd.f32 %v2703_v30, %v2702_v21  ;;  %v2719_v20 = vadd.f32 %v2718_v61, %v2717_v23  ;;  %v2649_v53 = vmul.f32 %v13849_v34, %v2018_v14  ;;  %v2657_v8 = vmul.f32 %v13852_v40, %v2019_v35  ;;  %v13861_v21 = vld [vmem:[#allocation108_spill] sm:$0xff] }
 0x3f3   :  { %v2852_v58 = vadd.f32 %v13850_v57, %v2674_v51  ;;  %v2853_v0 = vadd.f32 %v13851_v28, %v2689_v55  ;;  %v2731_v42 = vsel %vm803_vm1, %v2648_v37, 0.0  ;;  %v2733_v49 = vsel %vm803_vm1, %v2656_v38, 0.0  ;;  %v13862_v51 = vld [vmem:[#allocation98_spill] sm:$0xff]  ;;  %v10608_v40 = vld [vmem:[%s13818_s2 + $0x48] sm:$0xff]  }
 0x3f4   :  { %v2732_v39 = vadd.f32 %v2731_v42, %v2730_v19  ;;  %v2746_v15 = vsel %vm803_vm1, %v2649_v53, 0.0  ;;  %v2854_v41 = vadd.f32 %v13853_v17, %v2704_v29  ;;  %v2855_v2 = vadd.f32 %v13854_v7, %v2719_v20  ;;  %v13864_v29 = vld [vmem:[#allocation102_spill] sm:$0xff]  ;;  %v10610_v17 = vld [vmem:[%s13818_s2 + $0x50] sm:$0xff]  }
 0x3f5   :  { %v2868_v4 = vmul.f32 0.70710677, %v2852_v58  ;;  %v2869_v24 = vmul.f32 0.70710677, %v2853_v0  ;;  %v2747_v11 = vadd.f32 %v2746_v15, %v2745_v26  ;;  %v2748_v59 = vsel %vm803_vm1, %v2657_v8, 0.0  ;;  %v10607_v53 = vld [vmem:[%s13818_s2 + $0x60] sm:$0xff]  }
 0x3f6   :  { %v2734_v16 = vadd.f32 %v2733_v49, %v2732_v39  ;;  %v2650_v6 = vmul.f32 %v13855_v56, %v2018_v14  ;;  %v2658_v19 = vmul.f32 %v13856_v33, %v2019_v35  ;;  %v2651_v27 = vmul.f32 %v13857_v48, %v2018_v14  ;;  %v10609_v15 = vld [vmem:[%s13818_s2 + $0x68] sm:$0xff]   ;;  %v13866_v7 = vld [vmem:[#allocation109_spill] sm:$0xff]  ;;  %v13870_v48 = vld [vmem:[#allocation122_spill] sm:$0xff] }
 0x3f7   :  { %10694 = verf.f32 %v2868_v4  ;;  %v2870_v32 = vmul.f32 0.70710677, %v2854_v41  ;;  %v2749_v47 = vadd.f32 %v2748_v59, %v2747_v11  ;;  %v2659_v46 = vmul.f32 %v13858_v25, %v2019_v35  ;;  %v13867_v49 = vld [vmem:[#allocation111_spill] sm:$0xff]  ;;  %v10612_v11 = vld [vmem:[%s13818_s2 + $0x58] sm:$0xff]   ;;  %v13869_v33 = vld [vmem:[#allocation112_spill] sm:$0xff] }
 0x3f8   :  { %10696 = verf.f32 %v2869_v24  ;;  %v2871_v45 = vmul.f32 0.70710677, %v2855_v2  ;;  %v2761_v60 = vsel %vm803_vm1, %v2650_v6, 0.0  ;;  %v2776_v52 = vsel %vm803_vm1, %v2651_v27, 0.0  ;;  %v13868_v59 = vld [vmem:[#allocation121_spill] sm:$0xff] }
 0x3f9   :  { %v2762_v18 = vadd.f32 %v2761_v60, %v2760_v62  ;;  %v2763_v26 = vsel %vm803_vm1, %v2658_v19, 0.0  ;;  %v2777_v36 = vadd.f32 %v2776_v52, %v2775_v12  ;;  %10698 = verf.f32 %v2870_v32  ;;  %v13859_v62 = vld [vmem:[#allocation107_spill] sm:$0xff]  ;;  %v10613_v6 = vld [vmem:[%s13818_s2 + $0x78] sm:$0xff]  }
 0x3fa   :  { %v2778_v44 = vsel %vm803_vm1, %v2659_v46, 0.0  ;;  %10700 = verf.f32 %v2871_v45  ;;  %v2860_v54 = vmul.f32 0.5, %v2852_v58  ;;  %v2861_v9 = vmul.f32 0.5, %v2853_v0  ;;  %v13860_v12 = vld [vmem:[#allocation95_spill] sm:$0xff] }
 0x3fb   :  { %v2764_v5 = vadd.f32 %v2763_v26, %v2762_v18  ;;  %v2779_v63 = vadd.f32 %v2778_v44, %v2777_v36  ;;  %v12666_v1 = vadd.f32 %v13859_v62, %v2734_v16  ;;  %v12670_v30 = vadd.f32 %v13861_v21, %v2749_v47  ;;  %v13871_v47 = vld [vmem:[#allocation115_spill] sm:$0xff]  ;;  %v10621_v21 = vld [vmem:[%s13818_s2 + $0xb8] sm:$0xff]  }
 0x3fc   :  { %v2862_v42 = vmul.f32 0.5, %v2854_v41  ;;  %v2863_v8 = vmul.f32 0.5, %v2855_v2  ;;  %v13865_v39 = vmov 0.0   ;;  %v10611_v41 = vld [vmem:[%s13818_s2 + $0x70] sm:$0xff]   ;;  %v10614_v45 = vld [vmem:[%s13818_s2 + $0x80] sm:$0xff]  }
 0x3fd   :  { %v2872_v38 = vmul.f32 0.70710677, %v12666_v1  ;;  %v2873_v58 = vmul.f32 0.70710677, %v12670_v30  ;;  %v12705_v56 = vadd.f32 %v13868_v59, %v2764_v5  ;;  %v12713_v27 = vadd.f32 %v13870_v48, %v2779_v63  ;;  %v10615_v18 = vld [vmem:[%s13818_s2 + $0xa0] sm:$0xff]   ;;  %v10630_v48 = vld [vmem:[#allocation8] sm:$0xff]  }
 0x3fe   :  { %v2864_v63 = vmul.f32 0.5, %v12666_v1  ;;  %v13873_v1 = vld [vmem:[#allocation124_spill] sm:$0xff]  ;;  %v13881_v59 = vld [vmem:[#allocation130_spill] sm:$0xff] }
 0x3ff   :  { %10702 = verf.f32 %v2872_v38  ;;  %v2874_v60 = vmul.f32 0.70710677, %v12705_v56  ;;  %v2875_v36 = vmul.f32 0.70710677, %v12713_v27  ;;  %v10623_v38 = vld [vmem:[%s13818_s2 + $0xe0] sm:$0xff]  }
 0x400   :  { %10704 = verf.f32 %v2873_v58  ;;  %v2866_v58 = vmul.f32 0.5, %v12705_v56 }
 0x401   :  { %v10695_v14 = vpop.eup %10694  ;;  %10706 = verf.f32 %v2874_v60  ;;  %v10636_v60 = vld [vmem:[#allocation8 + $0x18] sm:$0xff]  }
 0x402   :  { %v10697_v22 = vpop.eup %10696  ;;  %v2884_v35 = vadd.f32 1.0, %v10695_v14  ;;  %v10616_v14 = vld [vmem:[%s13818_s2 + $0x88] sm:$0xff]   ;;  %10708 = verf.f32 %v2875_v36 }
 0x403   :  { %v2885_v13 = vadd.f32 1.0, %v10697_v22  ;;  %v10699_v23 = vpop.eup %10698  ;;  %v2865_v22 = vmul.f32 0.5, %v12670_v30  ;;  %v13874_v30 = vld [vmem:[#allocation125_spill] sm:$0xff] }
 0x404   :  { %v2892_v10 = vmul.f32 %v2884_v35, %v2860_v54  ;;  %v10701_v61 = vpop.eup %10700  ;;  %v2886_v57 = vadd.f32 1.0, %v10699_v23  ;;  %v10617_v54 = vld [vmem:[%s13818_s2 + $0xa8] sm:$0xff]  }
 0x405   :  { %v2893_v31 = vmul.f32 %v2885_v13, %v2861_v9  ;;  %v2887_v0 = vadd.f32 1.0, %v10701_v61  ;;  %v10618_v13 = vld [vmem:[%s13818_s2 + $0x90] sm:$0xff]  }
 0x406   :  { %v2972_v43 = vmul.f32 %v13860_v12, %v2892_v10  ;;  %v2894_v4 = vmul.f32 %v2886_v57, %v2862_v42  ;;  %v10619_v10 = vld [vmem:[%s13818_s2 + $0xb0] sm:$0xff]   ;;  %v10625_v42 = vld [vmem:[%s13818_s2 + $0xe8] sm:$0xff]  }
 0x407   :  { %v2973_v55 = vmul.f32 %v13862_v51, %v2893_v31  ;;  %v2895_v24 = vmul.f32 %v2887_v0, %v2863_v8  ;;  %v13872_v31 = vld [vmem:[#allocation123_spill] sm:$0xff]  ;;  %v2867_v0 = vmul.f32 0.5, %v12713_v27  ;;  %v10631_v27 = vld [vmem:[#allocation8 + $0x20] sm:$0xff]  }
 0x408   :  { %v12674_v37 = vadd.f32 %v13863_v3, %v2972_v43  ;;  %v2974_v2 = vmul.f32 %v13866_v7, %v2894_v4  ;;  %v10620_v43 = vld [vmem:[%s13818_s2 + $0x98] sm:$0xff]   ;;  %v10627_v4 = vld [vmem:[%s13818_s2 + $0xf0] sm:$0xff]  }
 0x409   :  { %v12677_v20 = vadd.f32 %v13864_v29, %v2973_v55  ;;  %v2975_v16 = vmul.f32 %v13867_v49, %v2895_v24  ;;  %v10703_v32 = vpop.eup %10702  ;;  %v13875_v55 = vld [vmem:[#allocation126_spill] sm:$0xff]  ;;  %v13877_v24 = vld [vmem:[#allocation127_spill] sm:$0xff] }
 0x40a   :  { %v3292_v34 = vpack.c.bf16 %v12674_v37, %v12674_v37  ;;  %v12710_v19 = vadd.f32 %v13869_v33, %v2974_v2  ;;  %v10705_v46 = vpop.eup %10704  ;;  %v2888_v26 = vadd.f32 1.0, %v10703_v32  ;;  %v10622_v29 = vld [vmem:[%s13818_s2 + $0xc0] sm:$0xff]   ;;  %v10628_v2 = vld [vmem:[%s13818_s2 + $0xd8] sm:$0xff]  }
 0x40b   :  { %v3293_v28 = vpack.c.bf16 %v12677_v20, %v12677_v20  ;;  %v12717_v25 = vadd.f32 %v13871_v47, %v2975_v16  ;;  %v2889_v44 = vadd.f32 1.0, %v10705_v46  ;;  %v10707_v51 = vpop.eup %10706  ;;  %v10629_v49 = vld [vmem:[%s13818_s2 + $0xf8] sm:$0xff]   ;;  %v10634_v46 = vld [vmem:[#allocation8 + $0x10] sm:$0xff]  }
 0x40c   :  { %9766 = vmatmul.mubr.msk.bf16.vlgmr.msra.gmra.mrb[32].mxu0 %vm803_vm1, %v3292_v34  ;;  %v3294_v52 = vpack.c.bf16 %v12710_v19, %v12710_v19  ;;  %v2896_v35 = vmul.f32 %v2888_v26, %v2864_v63  ;;  %v10709_v3 = vpop.eup %10708  ;;  %v2890_v34 = vadd.f32 1.0, %v10707_v51  ;;  %v13879_v16 = vld [vmem:[#allocation129_spill] sm:$0xff]  ;;  %v13883_v26 = vld [vmem:[#allocation131_spill] sm:$0xff]  ;;  %v13884_v63 = vld [vmem:[#allocation132_spill] sm:$0xff] }
 0x40d   :  { %9778 = vmatmul.mubr.msk.bf16.vlgmr.msra.gmra.mrb[32].mxu1 %vm803_vm1, %v3293_v28  ;;  %9782 = vmatpush3.bf16.msra.mxu0 %v10606_v50  ;;  %v3295_v5 = vpack.c.bf16 %v12717_v25, %v12717_v25  ;;  %v2897_v9 = vmul.f32 %v2889_v44, %v2865_v22  ;;  %v2891_v57 = vadd.f32 1.0, %v10709_v3  ;;  %v10624_v28 = vld [vmem:[%s13818_s2 + $0xc8] sm:$0xff]   ;;  %v10632_v32 = vld [vmem:[#allocation8 + $0x8] sm:$0xff]  }
 0x40e   :  { %9794 = vmatpush3.bf16.msra.mxu1 %v10607_v53  ;;  %9783 = vmatprep.subr.bf16.mxu0 %v13865_v39  ;;  %v2976_v62 = vmul.f32 %v13872_v31, %v2896_v35  ;;  %v10633_v47 = vld [vmem:[#allocation8 + $0x28] sm:$0xff]  }
 0x40f   :  { %9795 = vmatprep.subr.bf16.mxu1 %v13865_v39  ;;  %9789 = vmatprep.mubr.msk.bf16.mxu0 %vm11427_vm0, %v13865_v39  ;;  %v2977_v12 = vmul.f32 %v13873_v1, %v2897_v9  ;;  %v2899_v8 = vmul.f32 %v2891_v57, %v2867_v0 }
 0x410   :  { %9801 = vmatprep.mubr.msk.bf16.mxu1 %vm11427_vm0, %v13865_v39  ;;  %v12751_v23 = vadd.f32 %v13874_v30, %v2976_v62 }
 0x411   :  { %9784 = vmatpush3.bf16.msra.mxu0 %v10608_v40  ;;  %v12755_v61 = vadd.f32 %v13875_v55, %v2977_v12  ;;  %v2898_v40 = vmul.f32 %v2890_v34, %v2866_v58  ;;  %v13885_v55 = vld [vmem:[#allocation133_spill] sm:$0xff]  ;;  %v13886_v34 = vld [vmem:[#allocation134_spill] sm:$0xff] }
 0x412   :  { %9796 = vmatpush3.bf16.msra.mxu1 %v10609_v15  ;;  %9785 = vmatprep.subr.bf16.mxu0 %v13865_v39  ;;  %v3296_v50 = vpack.c.bf16 %v12751_v23, %v12751_v23  ;;  %v10626_v15 = vld [vmem:[%s13818_s2 + $0xd0] sm:$0xff]  }
 0x413   :  { %9797 = vmatprep.subr.bf16.mxu1 %v13865_v39  ;;  %13876 = vst [vmem:[#allocation79_spill] sm:$0xff] %v12755_v61  ;;  %v3297_v53 = vpack.c.bf16 %v12755_v61, %v12755_v61 }
 0x415   :  { %9786 = vmatpush3.bf16.msra.mxu0 %v10610_v17  ;;  %v2978_v17 = vmul.f32 %v13877_v24, %v2898_v40 }
 0x416   :  { %9798 = vmatpush3.bf16.msra.mxu1 %v10611_v41  ;;  %9787 = vmatprep.subr.bf16.mxu0 %v13865_v39  ;;  %v13878_v41 = vld [vmem:[#allocation128_spill] sm:$0xff] }
 0x417   :  { %9799 = vmatprep.subr.bf16.mxu1 %v13865_v39  ;;  %v2979_v7 = vmul.f32 %v13878_v41, %v2899_v8  ;;  %v10638_v8 = vld [vmem:[#allocation8 + $0x40] sm:$0xff]  }
 0x419   :  { %9788 = vmatpush3.bf16.msra.mxu0 %v10612_v11  ;;  %v12787_v11 = vadd.f32 %v13879_v16, %v2978_v17  ;;  %v12791_v56 = vadd.f32 %v13881_v59, %v2979_v7  ;;  %v10639_v17 = vld [vmem:[#allocation8 + $0x60] sm:$0xff]   ;;  %v10640_v7 = vld [vmem:[#allocation8 + $0x48] sm:$0xff]   ;;  %v10643_v16 = vld [vmem:[#allocation8 + $0x70] sm:$0xff]  }
 0x41a   :  { %9800 = vmatpush3.bf16.msra.mxu1 %v10613_v6  ;;  %9805 = vmatprep.subr.bf16.mxu0 %v13865_v39 }
 0x41b   :  { %9817 = vmatprep.subr.bf16.mxu1 %v13865_v39  ;;  %13880 = vst [vmem:[#allocation88_spill] sm:$0xff] %v12787_v11  ;;  %13882 = vst [vmem:[#allocation86_spill] sm:$0xff] %v12791_v56  ;;  %v3298_v6 = vpack.c.bf16 %v12787_v11, %v12787_v11  ;;  %v3299_v33 = vpack.c.bf16 %v12791_v56, %v12791_v56  ;;  %v13915_v11 = vld [vmem:[#allocation140_spill] sm:$0xff] }
 0x41c   :  { %9790 = vmatmul.mubr.msk.bf16.vlgmr.msra.gmra.mrb[36].mxu0 %vm803_vm1, %v3294_v52  ;;  %v10637_v52 = vld [vmem:[#allocation8 + $0x38] sm:$0xff]  }
 0x41d   :  { %9802 = vmatmul.mubr.msk.bf16.vlgmr.msra.gmra.mrb[36].mxu1 %vm803_vm1, %v3295_v5  ;;  %9806 = vmatpush3.bf16.msra.mxu0 %v10614_v45  ;;  %v10635_v45 = vld [vmem:[#allocation8 + $0x30] sm:$0xff]  }
 0x41e   :  { %9818 = vmatpush3.bf16.msra.mxu1 %v10615_v18  ;;  %9807 = vmatprep.subr.bf16.mxu0 %v13865_v39 }
 0x41f   :  { %9819 = vmatprep.subr.bf16.mxu1 %v13865_v39  ;;  %9813 = vmatprep.mubr.msk.bf16.mxu0 %vm11427_vm0, %v13865_v39 }
 0x420   :  { %9825 = vmatprep.mubr.msk.bf16.mxu1 %vm11427_vm0, %v13865_v39 }
 0x421   :  { %9808 = vmatpush3.bf16.msra.mxu0 %v10616_v14 }
 0x422   :  { %9820 = vmatpush3.bf16.msra.mxu1 %v10617_v54  ;;  %9809 = vmatprep.subr.bf16.mxu0 %v13865_v39 }
 0x423   :  { %9821 = vmatprep.subr.bf16.mxu1 %v13865_v39 }
 0x425   :  { %9810 = vmatpush3.bf16.msra.mxu0 %v10618_v13 }
 0x426   :  { %9822 = vmatpush3.bf16.msra.mxu1 %v10619_v10  ;;  %9811 = vmatprep.subr.bf16.mxu0 %v13865_v39 }
 0x427   :  { %9823 = vmatprep.subr.bf16.mxu1 %v13865_v39 }
 0x429   :  { %9812 = vmatpush3.bf16.msra.mxu0 %v10620_v43 }
 0x42a   :  { %9824 = vmatpush3.bf16.msra.mxu1 %v10621_v21  ;;  %9829 = vmatprep.subr.bf16.mxu0 %v13865_v39 }
 0x42b   :  { %9841 = vmatprep.subr.bf16.mxu1 %v13865_v39 }
 0x42c   :  { %9814 = vmatmul.mubr.msk.bf16.vlgmr.msra.gmra.mrb[40].mxu0 %vm803_vm1, %v3296_v50 }
 0x42d   :  { %9826 = vmatmul.mubr.msk.bf16.vlgmr.msra.gmra.mrb[40].mxu1 %vm803_vm1, %v3297_v53  ;;  %9830 = vmatpush3.bf16.msra.mxu0 %v10622_v29 }
 0x42e   :  { %9842 = vmatpush3.bf16.msra.mxu1 %v10623_v38  ;;  %9831 = vmatprep.subr.bf16.mxu0 %v13865_v39 }
 0x42f   :  { %9843 = vmatprep.subr.bf16.mxu1 %v13865_v39  ;;  %9837 = vmatprep.mubr.msk.bf16.mxu0 %vm11427_vm0, %v13865_v39 }
 0x430   :  { %9849 = vmatprep.mubr.msk.bf16.mxu1 %vm11427_vm0, %v13865_v39 }
 0x431   :  { %9832 = vmatpush3.bf16.msra.mxu0 %v10624_v28 }
 0x432   :  { %9844 = vmatpush3.bf16.msra.mxu1 %v10625_v42  ;;  %9833 = vmatprep.subr.bf16.mxu0 %v13865_v39 }
 0x433   :  { %9845 = vmatprep.subr.bf16.mxu1 %v13865_v39 }
 0x435   :  { %9834 = vmatpush3.bf16.msra.mxu0 %v10626_v15 }
 0x436   :  { %9846 = vmatpush3.bf16.msra.mxu1 %v10627_v4  ;;  %9835 = vmatprep.subr.bf16.mxu0 %v13865_v39 }
 0x437   :  { %9847 = vmatprep.subr.bf16.mxu1 %v13865_v39 }
 0x439   :  { %9836 = vmatpush3.bf16.msra.mxu0 %v10628_v2  ;;  %v10641_v2 = vld [vmem:[#allocation8 + $0x68] sm:$0xff]  }
 0x43a   :  { %9848 = vmatpush3.bf16.msra.mxu1 %v10629_v49  ;;  %9853 = vmatprep.subr.bf16.mxu0 %v13865_v39  ;;  %v10642_v49 = vld [vmem:[#allocation8 + $0x50] sm:$0xff]  }
 0x43b   :  { %9865 = vmatprep.subr.bf16.mxu1 %v13865_v39 }
 0x43c   :  { %9838 = vmatmul.mubr.msk.bf16.vlgmr.msra.gmra.mrb[44].mxu0 %vm803_vm1, %v3298_v6  ;;  %v10644_v6 = vld [vmem:[#allocation8 + $0x58] sm:$0xff]  }
 0x43d   :  { %9850 = vmatmul.mubr.msk.bf16.vlgmr.msra.gmra.mrb[44].mxu1 %vm803_vm1, %v3299_v33  ;;  %9861 = vmatprep.mubr.msk.bf16.mxu0 %vm11427_vm0, %v13865_v39 }
 0x43e   :  { %9873 = vmatprep.mubr.msk.bf16.mxu1 %vm11427_vm0, %v13865_v39  ;;  %9854 = vmatpush3.bf16.msra.mxu0 %v10630_v48 }
 0x43f   :  { %9866 = vmatpush3.bf16.msra.mxu1 %v10631_v27  ;;  %9855 = vmatprep.subr.bf16.mxu0 %v13865_v39 }
 0x440   :  { %9867 = vmatprep.subr.bf16.mxu1 %v13865_v39 }
 0x442   :  { %9856 = vmatpush3.bf16.msra.mxu0 %v10632_v32 }
 0x443   :  { %9868 = vmatpush3.bf16.msra.mxu1 %v10633_v47  ;;  %9857 = vmatprep.subr.bf16.mxu0 %v13865_v39  ;;  %v10645_v47 = vld [vmem:[#allocation8 + $0x78] sm:$0xff]  }
 0x444   :  { %9869 = vmatprep.subr.bf16.mxu1 %v13865_v39 }
 0x446   :  { %9858 = vmatpush3.bf16.msra.mxu0 %v10634_v46 }
 0x447   :  { %9870 = vmatpush3.bf16.msra.mxu1 %v10635_v45  ;;  %9859 = vmatprep.subr.bf16.mxu0 %v13865_v39 }
 0x448   :  { %9871 = vmatprep.subr.bf16.mxu1 %v13865_v39 }
 0x44a   :  { %9860 = vmatpush3.bf16.msra.mxu0 %v10636_v60  ;;  %v13887_v60 = vld [vmem:[#allocation135_spill] sm:$0xff] }
 0x44b   :  { %9872 = vmatpush3.bf16.msra.mxu1 %v10637_v52  ;;  %9877 = vmatprep.subr.bf16.mxu0 %v13865_v39 }
 0x44c   :  { %9889 = vmatprep.subr.bf16.mxu1 %v13865_v39 }
 0x4df   :  { %v3433_v18 = vpop.f32.mrb[32].mxu0 }
 0x4e0   :  { %v3434_v36 = vadd.f32 %v3433_v18, %v13883_v26  ;;  %v3500_v5 = vpop.f32.mrb[32].mxu1  ;;  %v9767_v44 = vpop.f32.mrb[33].mxu0 }
 0x4e1   :  { %v3501_v14 = vadd.f32 %v3500_v5, %v13884_v63  ;;  %v9779_v22 = vpop.f32.mrb[33].mxu1  ;;  %v3436_v54 = vpop.f32.mrb[34].mxu0  ;;  %v13888_v5 = vld [vmem:[#allocation136_spill] sm:$0xff] }
 0x4e2   :  { %v3916_v35 = vmul.f32 0.70710677, %v3434_v36  ;;  %v3503_v9 = vpop.f32.mrb[34].mxu1  ;;  %v9768_v13 = vpop.f32.mrb[35].mxu0  ;;  %v3908_v12 = vmul.f32 0.5, %v3434_v36 }
 0x4e3   :  { %v3917_v10 = vmul.f32 0.70710677, %v3501_v14  ;;  %v9780_v31 = vpop.f32.mrb[35].mxu1  ;;  %v3909_v30 = vmul.f32 0.5, %v3501_v14  ;;  %v10646_v13 = vld [vmem:[#allocation8 + $0x80] sm:$0xff]  }
 0x4e4   :  { %10710 = verf.f32 %v3916_v35 }
 0x4e5   :  { %10712 = verf.f32 %v3917_v10 }
 0x4ee   :  { %v10711_v62 = vpop.eup %10710 }
 0x4ef   :  { %v10713_v1 = vpop.eup %10712  ;;  %v3932_v43 = vadd.f32 1.0, %v10711_v62  ;;  %v3567_v21 = vpop.f32.mrb[36].mxu0 }
 0x4f0   :  { %v3933_v51 = vadd.f32 1.0, %v10713_v1  ;;  %v3568_v3 = vadd.f32 %v3567_v21, %v13885_v55  ;;  %v3634_v29 = vpop.f32.mrb[36].mxu1  ;;  %v9791_v50 = vpop.f32.mrb[37].mxu0  ;;  %v10647_v1 = vld [vmem:[#allocation8 + $0xa0] sm:$0xff]   ;;  %v10649_v21 = vld [vmem:[#allocation8 + $0xa8] sm:$0xff]  }
 0x4f1   :  { %v3940_v38 = vmul.f32 %v3932_v43, %v3908_v12  ;;  %v3635_v53 = vadd.f32 %v3634_v29, %v13886_v34  ;;  %v9803_v57 = vpop.f32.mrb[37].mxu1  ;;  %v3570_v58 = vpop.f32.mrb[38].mxu0  ;;  %v10648_v43 = vld [vmem:[#allocation8 + $0x88] sm:$0xff]  }
 0x4f2   :  { %v3941_v28 = vmul.f32 %v3933_v51, %v3909_v30  ;;  %v3918_v0 = vmul.f32 0.70710677, %v3568_v3  ;;  %v3637_v42 = vpop.f32.mrb[38].mxu1  ;;  %v9792_v40 = vpop.f32.mrb[39].mxu0  ;;  %v3910_v48 = vmul.f32 0.5, %v3568_v3  ;;  %v10650_v30 = vld [vmem:[#allocation8 + $0x90] sm:$0xff]  }
 0x4f3   :  { %v3948_v15 = vpack.c.bf16 %v3940_v38, %v3940_v38  ;;  %v3919_v4 = vmul.f32 0.70710677, %v3635_v53  ;;  %v9804_v24 = vpop.f32.mrb[39].mxu1  ;;  %v3911_v46 = vmul.f32 0.5, %v3635_v53  ;;  %v10651_v51 = vld [vmem:[#allocation8 + $0xb0] sm:$0xff]   ;;  %v10652_v3 = vld [vmem:[#allocation8 + $0x98] sm:$0xff]  }
 0x4f4   :  { %v3949_v41 = vpack.c.bf16 %v3941_v28, %v3941_v28  ;;  %10714 = verf.f32 %v3918_v0  ;;  %v10653_v53 = vld [vmem:[#allocation8 + $0xb8] sm:$0xff]   ;;  %v13889_v28 = vld [vmem:[#allocation137_spill] sm:$0xff] }
 0x4f5   :  { %10716 = verf.f32 %v3919_v4  ;;  %9862 = vmatmul.mubr.msk.bf16.vlgmr.msra.gmra.mrb[48].mxu0 %vm803_vm1, %v3948_v15  ;;  %v13890_v15 = vld [vmem:[#allocation138_spill] sm:$0xff] }
 0x4f6   :  { %9874 = vmatmul.mubr.msk.bf16.vlgmr.msra.gmra.mrb[48].mxu1 %vm803_vm1, %v3949_v41  ;;  %9878 = vmatpush3.bf16.msra.mxu0 %v10638_v8 }
 0x4f7   :  { %9890 = vmatpush3.bf16.msra.mxu1 %v10639_v17  ;;  %9879 = vmatprep.subr.bf16.mxu0 %v13865_v39 }
 0x4f8   :  { %9891 = vmatprep.subr.bf16.mxu1 %v13865_v39  ;;  %9885 = vmatprep.mubr.msk.bf16.mxu0 %vm11427_vm0, %v13865_v39 }
 0x4f9   :  { %9897 = vmatprep.mubr.msk.bf16.mxu1 %vm11427_vm0, %v13865_v39 }
 0x4fa   :  { %9880 = vmatpush3.bf16.msra.mxu0 %v10640_v7 }
 0x4fb   :  { %9892 = vmatpush3.bf16.msra.mxu1 %v10641_v2  ;;  %9881 = vmatprep.subr.bf16.mxu0 %v13865_v39 }
 0x4fc   :  { %9893 = vmatprep.subr.bf16.mxu1 %v13865_v39 }
 0x4fe   :  { %v10715_v59 = vpop.eup %10714  ;;  %9882 = vmatpush3.bf16.msra.mxu0 %v10642_v49 }
 0x4ff   :  { %v10717_v33 = vpop.eup %10716  ;;  %v3934_v27 = vadd.f32 1.0, %v10715_v59  ;;  %9894 = vmatpush3.bf16.msra.mxu1 %v10643_v16  ;;  %v3701_v32 = vpop.f32.mrb[40].mxu0  ;;  %9883 = vmatprep.subr.bf16.mxu0 %v13865_v39  ;;  %v10654_v16 = vld [vmem:[#allocation8 + $0xc0] sm:$0xff]  }
 0x500   :  { %v3935_v45 = vadd.f32 1.0, %v10717_v33  ;;  %v3702_v52 = vadd.f32 %v3701_v32, %v13887_v60  ;;  %v3768_v18 = vpop.f32.mrb[40].mxu1  ;;  %v9815_v26 = vpop.f32.mrb[41].mxu0  ;;  %9895 = vmatprep.subr.bf16.mxu1 %v13865_v39  ;;  %v10656_v32 = vld [vmem:[#allocation8 + $0xc8] sm:$0xff]   ;;  %v10659_v60 = vld [vmem:[#allocation8 + $0xf0] sm:$0xff]  }
 0x501   :  { %v3942_v36 = vmul.f32 %v3934_v27, %v3910_v48  ;;  %v3769_v44 = vadd.f32 %v3768_v18, %v13888_v5  ;;  %v9827_v63 = vpop.f32.mrb[41].mxu1  ;;  %v3704_v14 = vpop.f32.mrb[42].mxu0  ;;  %v10655_v48 = vld [vmem:[#allocation8 + $0xe0] sm:$0xff]   ;;  %v10660_v26 = vld [vmem:[#allocation8 + $0xd8] sm:$0xff]  }
 0x502   :  { %v3943_v22 = vmul.f32 %v3935_v45, %v3911_v46  ;;  %v3920_v54 = vmul.f32 0.70710677, %v3702_v52  ;;  %v3771_v35 = vpop.f32.mrb[42].mxu1  ;;  %v9816_v9 = vpop.f32.mrb[43].mxu0  ;;  %9884 = vmatpush3.bf16.msra.mxu0 %v10644_v6  ;;  %v3912_v50 = vmul.f32 0.5, %v3702_v52  ;;  %v10658_v45 = vld [vmem:[#allocation8 + $0xd0] sm:$0xff]  }
 0x503   :  { %v3950_v10 = vpack.c.bf16 %v3942_v36, %v3942_v36  ;;  %v3921_v31 = vmul.f32 0.70710677, %v3769_v44  ;;  %v9828_v62 = vpop.f32.mrb[43].mxu1  ;;  %9896 = vmatpush3.bf16.msra.mxu1 %v10645_v47  ;;  %9901 = vmatprep.subr.bf16.mxu0 %v13865_v39  ;;  %v3913_v57 = vmul.f32 0.5, %v3769_v44  ;;  %v10657_v47 = vld [vmem:[#allocation8 + $0xe8] sm:$0xff]   ;;  %v12857_v46 = vpop.permute.xlu1 %4025  ;;  %v10661_v63 = vld [vmem:[#allocation8 + $0xf8] sm:$0xff]  }
 0x504   :  { %v3951_v12 = vpack.c.bf16 %v3943_v22, %v3943_v22  ;;  %10718 = verf.f32 %v3920_v54  ;;  %9913 = vmatprep.subr.bf16.mxu1 %v13865_v39  ;;  %v12861_v18 = vpop.permute.xlu0 %4933 }
 0x505   :  { %10720 = verf.f32 %v3921_v31  ;;  %9886 = vmatmul.mubr.msk.bf16.vlgmr.msra.gmra.mrb[52].mxu0 %vm803_vm1, %v3950_v10 }
 0x506   :  { %9898 = vmatmul.mubr.msk.bf16.vlgmr.msra.gmra.mrb[52].mxu1 %vm803_vm1, %v3951_v12  ;;  %9902 = vmatpush3.bf16.msra.mxu0 %v10646_v13 }
 0x507   :  { %9914 = vmatpush3.bf16.msra.mxu1 %v10647_v1  ;;  %9903 = vmatprep.subr.bf16.mxu0 %v13865_v39  ;;  %v12864_v14 = vpop.permute.xlu1 %4937 }
 0x508   :  { %9915 = vmatprep.subr.bf16.mxu1 %v13865_v39  ;;  %9909 = vmatprep.mubr.msk.bf16.mxu0 %vm11427_vm0, %v13865_v39  ;;  %v12867_v10 = vpop.permute.xlu0 %4965 }
 0x509   :  { %9921 = vmatprep.mubr.msk.bf16.mxu1 %vm11427_vm0, %v13865_v39 }
 0x50a   :  { %9904 = vmatpush3.bf16.msra.mxu0 %v10648_v43 }
 0x50b   :  { %9916 = vmatpush3.bf16.msra.mxu1 %v10649_v21  ;;  %9905 = vmatprep.subr.bf16.mxu0 %v13865_v39  ;;  %v12871_v62 = vpop.permute.xlu1 %4969 }
 0x50c   :  { %9917 = vmatprep.subr.bf16.mxu1 %v13865_v39  ;;  %v12877_v1 = vpop.permute.xlu0 %4941 }
 0x50e   :  { %v10719_v55 = vpop.eup %10718  ;;  %9906 = vmatpush3.bf16.msra.mxu0 %v10650_v30 }
 0x50f   :  { %v10721_v29 = vpop.eup %10720  ;;  %v3936_v38 = vadd.f32 1.0, %v10719_v55  ;;  %9918 = vmatpush3.bf16.msra.mxu1 %v10651_v51  ;;  %v3835_v34 = vpop.f32.mrb[44].mxu0  ;;  %9907 = vmatprep.subr.bf16.mxu0 %v13865_v39 }
 0x510   :  { %v3937_v58 = vadd.f32 1.0, %v10721_v29  ;;  %v3836_v0 = vadd.f32 %v3835_v34, %v13889_v28  ;;  %v3902_v42 = vpop.f32.mrb[44].mxu1  ;;  %v9839_v40 = vpop.f32.mrb[45].mxu0  ;;  %9919 = vmatprep.subr.bf16.mxu1 %v13865_v39 }
 0x511   :  { %v3944_v8 = vmul.f32 %v3936_v38, %v3912_v50  ;;  %v3903_v4 = vadd.f32 %v3902_v42, %v13890_v15  ;;  %v9851_v24 = vpop.f32.mrb[45].mxu1  ;;  %v3838_v17 = vpop.f32.mrb[46].mxu0 }
 0x512   :  { %v3945_v41 = vmul.f32 %v3937_v58, %v3913_v57  ;;  %v3922_v7 = vmul.f32 0.70710677, %v3836_v0  ;;  %v3905_v2 = vpop.f32.mrb[46].mxu1  ;;  %v9840_v49 = vpop.f32.mrb[47].mxu0  ;;  %9908 = vmatpush3.bf16.msra.mxu0 %v10652_v3  ;;  %v3914_v5 = vmul.f32 0.5, %v3836_v0 }
 0x513   :  { %v3952_v59 = vpack.c.bf16 %v3944_v8, %v3944_v8  ;;  %v3923_v6 = vmul.f32 0.70710677, %v3903_v4  ;;  %v9852_v33 = vpop.f32.mrb[47].mxu1  ;;  %9920 = vmatpush3.bf16.msra.mxu1 %v10653_v53  ;;  %9925 = vmatprep.subr.bf16.mxu0 %v13865_v39  ;;  %v3915_v22 = vmul.f32 0.5, %v3903_v4  ;;  %v12879_v12 = vpop.permute.xlu1 %4973 }
 0x514   :  { %v3953_v27 = vpack.c.bf16 %v3945_v41, %v3945_v41  ;;  %10722 = verf.f32 %v3922_v7  ;;  %9937 = vmatprep.subr.bf16.mxu1 %v13865_v39  ;;  %v12881_v43 = vpop.permute.xlu0 %4997 }
 0x515   :  { %10724 = verf.f32 %v3923_v6  ;;  %9910 = vmatmul.mubr.msk.bf16.vlgmr.msra.gmra.mrb[56].mxu0 %vm803_vm1, %v3952_v59 }
 0x516   :  { %9922 = vmatmul.mubr.msk.bf16.vlgmr.msra.gmra.mrb[56].mxu1 %vm803_vm1, %v3953_v27  ;;  %9926 = vmatpush3.bf16.msra.mxu0 %v10654_v16 }
 0x517   :  { %9938 = vmatpush3.bf16.msra.mxu1 %v10655_v48  ;;  %9927 = vmatprep.subr.bf16.mxu0 %v13865_v39  ;;  %v12883_v21 = vpop.permute.xlu1 %5001 }
 0x518   :  { %9939 = vmatprep.subr.bf16.mxu1 %v13865_v39  ;;  %9933 = vmatprep.mubr.msk.bf16.mxu0 %vm11427_vm0, %v13865_v39  ;;  %v12885_v30 = vpop.permute.xlu0 %4945 }
 0x519   :  { %9945 = vmatprep.mubr.msk.bf16.mxu1 %vm11427_vm0, %v13865_v39 }
 0x51a   :  { %9928 = vmatpush3.bf16.msra.mxu0 %v10656_v32 }
 0x51b   :  { %9940 = vmatpush3.bf16.msra.mxu1 %v10657_v47  ;;  %9929 = vmatprep.subr.bf16.mxu0 %v13865_v39  ;;  %v12887_v51 = vpop.permute.xlu1 %4977 }
 0x51c   :  { %9941 = vmatprep.subr.bf16.mxu1 %v13865_v39  ;;  %v12889_v55 = vpop.permute.xlu0 %5005 }
 0x51e   :  { %v10723_v52 = vpop.eup %10722  ;;  %9930 = vmatpush3.bf16.msra.mxu0 %v10658_v45 }
 0x51f   :  { %v10725_v36 = vpop.eup %10724  ;;  %v3938_v44 = vadd.f32 1.0, %v10723_v52  ;;  %9942 = vmatpush3.bf16.msra.mxu1 %v10659_v60  ;;  %9931 = vmatprep.subr.bf16.mxu0 %v13865_v39  ;;  %v12891_v3 = vpop.permute.xlu1 %5029 }
 0x520   :  { %v3939_v54 = vadd.f32 1.0, %v10725_v36  ;;  %9943 = vmatprep.subr.bf16.mxu1 %v13865_v39  ;;  %v12893_v29 = vpop.permute.xlu0 %5033 }
 0x521   :  { %v3946_v35 = vmul.f32 %v3938_v44, %v3914_v5 }
 0x522   :  { %v3947_v9 = vmul.f32 %v3939_v54, %v3915_v22  ;;  %9932 = vmatpush3.bf16.msra.mxu0 %v10660_v26 }
 0x523   :  { %v3954_v13 = vpack.c.bf16 %v3946_v35, %v3946_v35  ;;  %9944 = vmatpush3.bf16.msra.mxu1 %v10661_v63  ;;  %v12895_v50 = vpop.permute.xlu1 %4949 }
 0x524   :  { %v3955_v31 = vpack.c.bf16 %v3947_v9, %v3947_v9  ;;  %9954 = vmatprep.subr.mxu1 %v13865_v39  ;;  %v12897_v38 = vpop.permute.xlu0 %4981 }
 0x525   :  { %9934 = vmatmul.mubr.msk.bf16.vlgmr.msra.gmra.mrb[60].mxu0 %vm803_vm1, %v3954_v13 }
 0x526   :  { %9946 = vmatmul.mubr.msk.bf16.vlgmr.msra.gmra.mrb[60].mxu1 %vm803_vm1, %v3955_v31  ;;  %5910 = vmatprep.mubr.f32.mxu0 %v13865_v39 }
 0x527   :  { %9956 = vmatprep.mubr.msk.f32.mxu1 %vm11427_vm0, %v13865_v39  ;;  %v12899_v34 = vpop.permute.xlu1 %5009 }
 0x528   :  { %v12901_v53 = vpop.permute.xlu0 %5037 }
 0x52b   :  { %v12903_v57 = vpop.permute.xlu1 %5061 }
 0x52c   :  { %v12905_v58 = vpop.permute.xlu0 %5065 }
 0x52f   :  { %v12907_v28 = vpop.permute.xlu1 %4953 }
 0x530   :  { %v12909_v0 = vpop.permute.xlu0 %4985 }
 0x533   :  { %v12911_v42 = vpop.permute.xlu1 %5013 }
 0x534   :  { %v12913_v40 = vpop.permute.xlu0 %5041 }
 0x537   :  { %v12915_v8 = vpop.permute.xlu1 %5069 }
 0x538   :  { %v12917_v15 = vpop.permute.xlu0 %5093 }
 0x539   :  { %13891 = vst [vmem:[#allocation87_spill] sm:$0xff] %v12917_v15 }
 0x53b   :  { %v12919_v4 = vpop.permute.xlu1 %5097 }
 0x53c   :  { %13892 = vst [vmem:[#allocation96_spill] sm:$0xff] %v12919_v4  ;;  %v12921_v24 = vpop.permute.xlu0 %4957  ;;  %v13922_v4 = vld [vmem:[#allocation142_spill] sm:$0xff] }
 0x53f   :  { %v12923_v17 = vpop.permute.xlu1 %4989 }
 0x540   :  { %v12925_v41 = vpop.permute.xlu0 %5017 }
 0x543   :  { %v12927_v7 = vpop.permute.xlu1 %5045 }
 0x544   :  { %v12929_v2 = vpop.permute.xlu0 %5073 }
 0x545   :  { %13893 = vst [vmem:[#allocation99_spill] sm:$0xff] %v12929_v2 }
 0x547   :  { %v12931_v49 = vpop.permute.xlu1 %5101 }
 0x548   :  { %13894 = vst [vmem:[#allocation100_spill] sm:$0xff] %v12931_v49  ;;  %v12933_v16 = vpop.permute.xlu0 %5125 }
 0x549   :  { %13895 = vst [vmem:[#allocation101_spill] sm:$0xff] %v12933_v16 }
 0x54b   :  { %v12935_v59 = vpop.permute.xlu1 %5129 }
 0x54c   :  { %13896 = vst [vmem:[#allocation110_spill] sm:$0xff] %v12935_v59  ;;  %v12937_v6 = vpop.permute.xlu0 %4961 }
 0x54f   :  { %v12939_v33 = vpop.permute.xlu1 %4993 }
 0x550   :  { %v12941_v48 = vpop.permute.xlu0 %5021 }
 0x553   :  { %v12943_v27 = vpop.permute.xlu1 %5049 }
 0x554   :  { %v12945_v32 = vpop.permute.xlu0 %5077 }
 0x555   :  { %13897 = vst [vmem:[#allocation114_spill] sm:$0xff] %v12945_v32 }
 0x557   :  { %v12947_v47 = vpop.permute.xlu1 %5105 }
 0x558   :  { %13898 = vst [vmem:[#allocation113_spill] sm:$0xff] %v12947_v47  ;;  %v12949_v45 = vpop.permute.xlu0 %5133 }
 0x559   :  { %13899 = vst [vmem:[#allocation116_spill] sm:$0xff] %v12949_v45 }
 0x55b   :  { %v12951_v60 = vpop.permute.xlu1 %5157 }
 0x55c   :  { %13900 = vst [vmem:[#allocation81_spill] sm:$0xff] %v12951_v60  ;;  %v12953_v52 = vpop.permute.xlu0 %5161 }
 0x55d   :  { %13901 = vst [vmem:[#allocation80_spill] sm:$0xff] %v12953_v52 }
 0x55f   :  { %v12955_v26 = vpop.permute.xlu1 %5025 }
 0x560   :  { %v12957_v36 = vpop.permute.xlu0 %5053 }
 0x563   :  { %v12959_v5 = vpop.permute.xlu1 %5081 }
 0x564   :  { %13902 = vst [vmem:[#allocation90_spill] sm:$0xff] %v12959_v5  ;;  %v12961_v44 = vpop.permute.xlu0 %5109 }
 0x565   :  { %13903 = vst [vmem:[#allocation89_spill] sm:$0xff] %v12961_v44 }
 0x567   :  { %v12963_v63 = vpop.permute.xlu1 %5137 }
 0x568   :  { %13904 = vst [vmem:[#allocation83_spill] sm:$0xff] %v12963_v63  ;;  %v12965_v22 = vpop.permute.xlu0 %5165 }
 0x569   :  { %13905 = vst [vmem:[#allocation82_spill] sm:$0xff] %v12965_v22  ;;  %v13914_v22 = vld [vmem:[#allocation139_spill] sm:$0xff] }
 0x56b   :  { %v12967_v54 = vpop.permute.xlu1 %5057 }
 0x56c   :  { %v12969_v35 = vpop.permute.xlu0 %5085 }
 0x56d   :  { %13906 = vst [vmem:[#allocation92_spill] sm:$0xff] %v12969_v35 }
 0x56f   :  { %v12971_v9 = vpop.permute.xlu1 %5113 }
 0x570   :  { %13907 = vst [vmem:[#allocation91_spill] sm:$0xff] %v12971_v9  ;;  %v12973_v13 = vpop.permute.xlu0 %5141 }
 0x571   :  { %13908 = vst [vmem:[#allocation103_spill] sm:$0xff] %v12973_v13 }
 0x573   :  { %v12975_v31 = vpop.permute.xlu1 %5169 }
 0x574   :  { %13909 = vst [vmem:[#allocation105_spill] sm:$0xff] %v12975_v31  ;;  %v12977_v39 = vpop.permute.xlu0 %5413 }
 0x575   :  { %13910 = vst [vmem:[#allocation104_spill] sm:$0xff] %v12977_v39 }
 0x577   :  { %v12979_v52 = vpop.permute.xlu1 %5417 }
 0x578   :  { %13911 = vst [vmem:[#allocation84_spill] sm:$0xff] %v12979_v52  ;;  %v12981_v60 = vpop.permute.xlu0 %5089 }
 0x579   :  { %13912 = vst [vmem:[#allocation85_spill] sm:$0xff] %v12981_v60 }
 0x57b   :  { %v12983_v45 = vpop.permute.xlu1 %5117 }
 0x57c   :  { %13913 = vst [vmem:[#allocation106_spill] sm:$0xff] %v12983_v45  ;;  %v12987_v47 = vpop.permute.xlu0 %5145 }
 0x57d   :  { %13916 = vst [vmem:[#allocation93_spill] sm:$0xff] %v12987_v47  ;;  %v13921_v47 = vld [vmem:[#allocation141_spill] sm:$0xff] }
 0x57f   :  { %v12989_v60 = vpop.permute.xlu1 %5173 }
 0x580   :  { %13917 = vst [vmem:[#allocation94_spill] sm:$0xff] %v12989_v60  ;;  %v12991_v45 = vpop.permute.xlu0 %5421 }
 0x581   :  { %13918 = vst [vmem:[#allocation117_spill] sm:$0xff] %v12991_v45 }
 0x5c8   :  { %v4089_v63 = vpop.f32.mrb[48].mxu0 }
 0x5c9   :  { %v4090_v56 = vadd.f32 %v4089_v63, %v13914_v22  ;;  %v4156_v59 = vpop.f32.mrb[48].mxu1  ;;  %v9863_v16 = vpop.f32.mrb[49].mxu0 }
 0x5ca   :  { %v4157_v44 = vadd.f32 %v4156_v59, %v13915_v11  ;;  %v9875_v9 = vpop.f32.mrb[49].mxu1  ;;  %v4092_v35 = vpop.f32.mrb[50].mxu0 }
 0x5cb   :  { %v4572_v13 = vmul.f32 0.70710677, %v4090_v56  ;;  %v4159_v5 = vpop.f32.mrb[50].mxu1  ;;  %v9864_v31 = vpop.f32.mrb[51].mxu0  ;;  %v4564_v59 = vmul.f32 0.5, %v4090_v56 }
 0x5cc   :  { %v4573_v39 = vmul.f32 0.70710677, %v4157_v44  ;;  %v9876_v52 = vpop.f32.mrb[51].mxu1  ;;  %v12993_v63 = vpop.permute.xlu1 %5121  ;;  %v4565_v9 = vmul.f32 0.5, %v4157_v44 }
 0x5cd   :  { %10726 = verf.f32 %v4572_v13  ;;  %13919 = vst [vmem:[#allocation119_spill] sm:$0xff] %v12993_v63  ;;  %v12995_v11 = vpop.permute.xlu0 %5149 }
 0x5ce   :  { %10728 = verf.f32 %v4573_v39  ;;  %13920 = vst [vmem:[#allocation118_spill] sm:$0xff] %v12995_v11 }
 0x5d0   :  { %v13001_v11 = vpop.permute.xlu1 %5177 }
 0x5d7   :  { %v10727_v16 = vpop.eup %10726 }
 0x5d8   :  { %v10729_v22 = vpop.eup %10728  ;;  %v4588_v35 = vadd.f32 1.0, %v10727_v16  ;;  %v4223_v5 = vpop.f32.mrb[52].mxu0 }
 0x5d9   :  { %v4589_v31 = vadd.f32 1.0, %v10729_v22  ;;  %v4224_v49 = vadd.f32 %v4223_v5, %v13921_v47  ;;  %v4290_v52 = vpop.f32.mrb[52].mxu1  ;;  %v9887_v13 = vpop.f32.mrb[53].mxu0 }
 0x5da   :  { %v4596_v39 = vmul.f32 %v4588_v35, %v4564_v59  ;;  %v12999_v60 = vadd.f32 %v4290_v52, %v13922_v4  ;;  %v9899_v45 = vpop.f32.mrb[53].mxu1  ;;  %v4226_v15 = vpop.f32.mrb[54].mxu0 }
 0x5db   :  { %v4597_v63 = vmul.f32 %v4589_v31, %v4565_v9  ;;  %v4574_v32 = vmul.f32 0.70710677, %v4224_v49  ;;  %v4293_v61 = vpop.f32.mrb[54].mxu1  ;;  %v9888_v2 = vpop.f32.mrb[55].mxu0 }
 0x5dc   :  { %v4604_v56 = vadd.f32 %v4596_v39, %v12674_v37  ;;  %v9900_v44 = vpop.f32.mrb[55].mxu1  ;;  %v4575_v47 = vmul.f32 0.70710677, %v12999_v60 }
 0x5dd   :  { %v4605_v16 = vadd.f32 %v4597_v63, %v12677_v20  ;;  %10730 = verf.f32 %v4574_v32  ;;  %v13014_v20 = vpop.permute.xlu0 %5425  ;;  %v13024_v63 = vpop.permute.xlu1 %5153 }
 0x5de   :  { %v5188_v22 = vmul.f32 %v12861_v18, %v4604_v56  ;;  %v5189_v4 = vmul.f32 %v12864_v14, %v4604_v56  ;;  %v5190_v15 = vmul.f32 %v12877_v1, %v4604_v56  ;;  %v5191_v45 = vmul.f32 %v12885_v30, %v4604_v56 }
 0x5df   :  { %v5192_v61 = vmul.f32 %v12895_v50, %v4604_v56  ;;  %v5193_v2 = vmul.f32 %v12907_v28, %v4604_v56  ;;  %v5194_v37 = vmul.f32 %v12921_v24, %v4604_v56  ;;  %v5195_v59 = vmul.f32 %v12937_v6, %v4604_v56 }
 0x5e0   :  { %v5252_v32 = vsel %vm803_vm1, %v5188_v22, 0.0  ;;  %v5267_v18 = vsel %vm803_vm1, %v5189_v4, 0.0  ;;  %v5282_v14 = vsel %vm803_vm1, %v5190_v15, 0.0  ;;  %v5297_v1 = vsel %vm803_vm1, %v5191_v45, 0.0 }
 0x5e1   :  { %v5312_v30 = vsel %vm803_vm1, %v5192_v61, 0.0  ;;  %v5327_v50 = vsel %vm803_vm1, %v5193_v2, 0.0  ;;  %v5196_v28 = vmul.f32 %v12867_v10, %v4605_v16  ;;  %v5197_v24 = vmul.f32 %v12871_v62, %v4605_v16  ;;  %v13038_v22 = vpop.permute.xlu0 %5181  ;;  %v13044_v2 = vpop.permute.xlu1 %5429 }
 0x5e2   :  { %v5198_v6 = vmul.f32 %v12879_v12, %v4605_v16  ;;  %v5199_v35 = vmul.f32 %v12887_v51, %v4605_v16  ;;  %v5200_v5 = vmul.f32 %v12897_v38, %v4605_v16  ;;  %v5201_v9 = vmul.f32 %v12909_v0, %v4605_v16 }
 0x5e3   :  { %v5202_v31 = vmul.f32 %v12923_v17, %v4605_v16  ;;  %v5203_v52 = vmul.f32 %v12939_v33, %v4605_v16  ;;  %v5253_v13 = vsel %vm803_vm1, %v5196_v28, 0.0  ;;  %v5268_v10 = vsel %vm803_vm1, %v5197_v24, 0.0  ;;  %v13923_v24 = vld [vmem:[#allocation143_spill] sm:$0xff] }
 0x5e4   :  { %v5254_v39 = vadd.f32 %v5253_v13, %v5252_v32  ;;  %v5269_v62 = vadd.f32 %v5268_v10, %v5267_v18  ;;  %v5283_v56 = vsel %vm803_vm1, %v5198_v6, 0.0  ;;  %v5298_v12 = vsel %vm803_vm1, %v5199_v35, 0.0 }
 0x5e5   :  { %v5284_v44 = vadd.f32 %v5283_v56, %v5282_v14  ;;  %v5299_v51 = vadd.f32 %v5298_v12, %v5297_v1  ;;  %v5313_v38 = vsel %vm803_vm1, %v5200_v5, 0.0  ;;  %v5328_v0 = vsel %vm803_vm1, %v5201_v9, 0.0 }
 0x5e6   :  { %v5314_v17 = vadd.f32 %v5313_v38, %v5312_v30  ;;  %10732 = verf.f32 %v4575_v47  ;;  %v5329_v33 = vadd.f32 %v5328_v0, %v5327_v50  ;;  %v5342_v16 = vsel %vm803_vm1, %v5194_v37, 0.0  ;;  %v13924_v37 = vld [vmem:[#allocation144_spill] sm:$0xff] }
 0x5e7   :  { %v10731_v4 = vpop.eup %10730  ;;  %v5343_v15 = vsel %vm803_vm1, %v5202_v31, 0.0  ;;  %v5357_v45 = vsel %vm803_vm1, %v5195_v59, 0.0  ;;  %v5358_v61 = vsel %vm803_vm1, %v5203_v52, 0.0  ;;  %v4566_v32 = vmul.f32 0.5, %v4224_v49  ;;  %v13048_v52 = vpop.permute.xlu0 %5185 }
 0x5e8   :  { %v4590_v18 = vadd.f32 1.0, %v10731_v4  ;;  %v4357_v14 = vpop.f32.mrb[56].mxu0  ;;  %v5344_v1 = vadd.f32 %v5343_v15, %v5342_v16  ;;  %v5359_v28 = vadd.f32 %v5358_v61, %v5357_v45  ;;  %v4567_v12 = vmul.f32 0.5, %v12999_v60 }
 0x5e9   :  { %v4358_v30 = vadd.f32 %v4357_v14, %v13923_v24  ;;  %v4424_v47 = vpop.f32.mrb[56].mxu1  ;;  %v9911_v50 = vpop.f32.mrb[57].mxu0 }
 0x5ea   :  { %v4598_v6 = vmul.f32 %v4590_v18, %v4566_v32  ;;  %v4425_v35 = vadd.f32 %v4424_v47, %v13924_v37  ;;  %v9923_v5 = vpop.f32.mrb[57].mxu1  ;;  %v4360_v9 = vpop.f32.mrb[58].mxu0 }
 0x5eb   :  { %v4576_v31 = vmul.f32 0.70710677, %v4358_v30  ;;  %v4427_v59 = vpop.f32.mrb[58].mxu1  ;;  %v9912_v13 = vpop.f32.mrb[59].mxu0 }
 0x5ec   :  { %v4606_v49 = vadd.f32 %v4598_v6, %v12710_v19  ;;  %v4577_v10 = vmul.f32 0.70710677, %v4425_v35  ;;  %v9924_v56 = vpop.f32.mrb[59].mxu1  ;;  %v13059_v32 = vpop.permute.xlu1 %5433 }
 0x5ed   :  { %10734 = verf.f32 %v4576_v31  ;;  %v13065_v24 = vpop.permute.xlu0 %5437  ;;  %v4568_v56 = vmul.f32 0.5, %v4358_v30 }
 0x5ee   :  { %v5204_v38 = vmul.f32 %v12881_v43, %v4606_v49  ;;  %v5205_v0 = vmul.f32 %v12883_v21, %v4606_v49  ;;  %v5206_v16 = vmul.f32 %v12889_v55, %v4606_v49  ;;  %v5207_v4 = vmul.f32 %v12899_v34, %v4606_v49 }
 0x5ef   :  { %v5208_v15 = vmul.f32 %v12911_v42, %v4606_v49  ;;  %v5209_v45 = vmul.f32 %v12925_v41, %v4606_v49  ;;  %v5210_v61 = vmul.f32 %v12941_v48, %v4606_v49  ;;  %10736 = verf.f32 %v4577_v10 }
 0x5f0   :  { %v10733_v19 = vpop.eup %10732  ;;  %v5255_v60 = vsel %vm803_vm1, %v5204_v38, 0.0  ;;  %v5270_v43 = vsel %vm803_vm1, %v5205_v0, 0.0  ;;  %v5285_v21 = vsel %vm803_vm1, %v5206_v16, 0.0  ;;  %v5300_v55 = vsel %vm803_vm1, %v5207_v4, 0.0  ;;  %v13925_v38 = vld [vmem:[#allocation145_spill] sm:$0xff] }
 0x5f1   :  { %v5256_v18 = vadd.f32 %v5255_v60, %v5254_v39  ;;  %v5271_v34 = vadd.f32 %v5270_v43, %v5269_v62  ;;  %v5286_v14 = vadd.f32 %v5285_v21, %v5284_v44  ;;  %v5301_v42 = vadd.f32 %v5300_v55, %v5299_v51  ;;  %v13080_v51 = vpop.permute.xlu1 %5441  ;;  %v13083_v59 = vpop.permute.xlu0 %5533 }
 0x5f2   :  { %v5315_v41 = vsel %vm803_vm1, %v5208_v15, 0.0  ;;  %v4591_v48 = vadd.f32 1.0, %v10733_v19  ;;  %v5211_v47 = vmul.f32 %v12955_v26, %v4606_v49  ;;  %v5330_v50 = vsel %vm803_vm1, %v5209_v45, 0.0 }
 0x5f3   :  { %v13070_v6 = vadd.f32 %v5315_v41, %v5314_v17  ;;  %v13072_v37 = vadd.f32 %v5330_v50, %v5329_v33  ;;  %v5345_v5 = vsel %vm803_vm1, %v5210_v61, 0.0 }
 0x5f4   :  { %v4599_v9 = vmul.f32 %v4591_v48, %v4567_v12  ;;  %v13075_v39 = vadd.f32 %v5345_v5, %v5344_v1  ;;  %v5360_v62 = vsel %vm803_vm1, %v5211_v47, 0.0  ;;  %v4569_v12 = vmul.f32 0.5, %v4425_v35 }
 0x5f5   :  { %v13078_v44 = vadd.f32 %v5360_v62, %v5359_v28  ;;  %v13094_v43 = vpop.permute.xlu1 %5537 }
 0x5f6   :  { %v4607_v31 = vadd.f32 %v4599_v9, %v12717_v25 }
 0x5f7   :  { %v10735_v26 = vpop.eup %10734 }
 0x5f8   :  { %v5212_v17 = vmul.f32 %v12891_v3, %v4607_v31  ;;  %v5213_v33 = vmul.f32 %v12893_v29, %v4607_v31  ;;  %v5214_v13 = vmul.f32 %v12901_v53, %v4607_v31  ;;  %v5215_v1 = vmul.f32 %v12913_v40, %v4607_v31  ;;  %v4491_v49 = vpop.f32.mrb[60].mxu0 }
 0x5f9   :  { %v10737_v10 = vpop.eup %10736  ;;  %v4592_v28 = vadd.f32 1.0, %v10735_v26  ;;  %v4492_v0 = vadd.f32 %v4491_v49, %v13925_v38  ;;  %v4558_v16 = vpop.f32.mrb[60].mxu1  ;;  %v5216_v4 = vmul.f32 %v12927_v7, %v4607_v31  ;;  %v5217_v47 = vmul.f32 %v12943_v27, %v4607_v31  ;;  %v13926_v27 = vld [vmem:[#allocation99_spill] sm:$0xff]  ;;  %v13928_v49 = vld [vmem:[#allocation114_spill] sm:$0xff] }
 0x5fa   :  { %v9935_v25 = vpop.f32.mrb[61].mxu0  ;;  %v5257_v15 = vsel %vm803_vm1, %v5212_v17, 0.0  ;;  %v5272_v3 = vsel %vm803_vm1, %v5213_v33, 0.0  ;;  %v5287_v29 = vsel %vm803_vm1, %v5214_v13, 0.0  ;;  %v9947_v53 = vpop.f32.mrb[61].mxu1  ;;  %v5302_v21 = vsel %vm803_vm1, %v5215_v1, 0.0 }
 0x5fb   :  { %v4494_v45 = vpop.f32.mrb[62].mxu0  ;;  %v5258_v40 = vadd.f32 %v5257_v15, %v5256_v18  ;;  %v5273_v61 = vadd.f32 %v5272_v3, %v5271_v34  ;;  %v5288_v19 = vadd.f32 %v5287_v29, %v5286_v14  ;;  %v4600_v30 = vmul.f32 %v4592_v28, %v4568_v56  ;;  %v4561_v60 = vpop.f32.mrb[62].mxu1  ;;  %v13932_v25 = vld [vmem:[#allocation113_spill] sm:$0xff]  ;;  %v13933_v3 = vld [vmem:[#allocation90_spill] sm:$0xff]  ;;  %v13934_v53 = vld [vmem:[#allocation92_spill] sm:$0xff] }
 0x5fc   :  { %v9936_v35 = vpop.f32.mrb[63].mxu0  ;;  %v4593_v55 = vadd.f32 1.0, %v10737_v10  ;;  %v4578_v7 = vmul.f32 0.70710677, %v4492_v0  ;;  %v4559_v41 = vadd.f32 %v4558_v16, %v12857_v46  ;;  %v9948_v48 = vpop.f32.mrb[63].mxu1  ;;  %v4570_v5 = vmul.f32 0.5, %v4492_v0 }
 0x5fd   :  { %v4608_v50 = vadd.f32 %v4600_v30, %v12751_v23  ;;  %v5303_v18 = vadd.f32 %v5302_v21, %v5301_v42  ;;  %v5218_v9 = vmul.f32 %v12957_v36, %v4607_v31  ;;  %v5219_v46 = vmul.f32 %v12967_v54, %v4607_v31  ;;  %v13105_v33 = vpop.permute.xlu0 %5541  ;;  %v13927_v23 = vld [vmem:[#allocation79_spill] sm:$0xff]  ;;  %v13113_v56 = vpop.permute.xlu1 %5613  ;;  %v13931_v0 = vld [vmem:[#allocation100_spill] sm:$0xff]  ;;  %v13935_v35 = vld [vmem:[#allocation85_spill] sm:$0xff] }
 0x5fe   :  { %v4601_v34 = vmul.f32 %v4593_v55, %v4569_v12  ;;  %10738 = verf.f32 %v4578_v7  ;;  %v4579_v14 = vmul.f32 0.70710677, %v4559_v41  ;;  %v4571_v42 = vmul.f32 0.5, %v4559_v41  ;;  %v13929_v31 = vld [vmem:[#allocation87_spill] sm:$0xff]  ;;  %v13930_v12 = vld [vmem:[#allocation96_spill] sm:$0xff] }
 0x5ff   :  { %v5220_v62 = vmul.f32 %v12903_v57, %v4608_v50  ;;  %v5221_v26 = vmul.f32 %v12905_v58, %v4608_v50  ;;  %v5222_v17 = vmul.f32 %v12915_v8, %v4608_v50  ;;  %v5223_v13 = vmul.f32 %v13926_v27, %v4608_v50  ;;  %v13937_v55 = vld [vmem:[#allocation91_spill] sm:$0xff] }
 0x600   :  { %v4609_v1 = vadd.f32 %v4601_v34, %v13927_v23  ;;  %10740 = verf.f32 %v4579_v14  ;;  %v5224_v10 = vmul.f32 %v13928_v49, %v4608_v50  ;;  %v5225_v29 = vmul.f32 %v13933_v3, %v4608_v50 }
 0x601   :  { %v5259_v36 = vsel %vm803_vm1, %v5220_v62, 0.0  ;;  %v5274_v57 = vsel %vm803_vm1, %v5221_v26, 0.0  ;;  %v5289_v58 = vsel %vm803_vm1, %v5222_v17, 0.0  ;;  %v5226_v45 = vmul.f32 %v13934_v53, %v4608_v50  ;;  %v13130_v14 = vpop.permute.xlu0 %5617  ;;  %v13938_v62 = vld [vmem:[#allocation106_spill] sm:$0xff] }
 0x602   :  { %v5260_v8 = vadd.f32 %v5259_v36, %v5258_v40  ;;  %v5275_v54 = vadd.f32 %v5274_v57, %v5273_v61  ;;  %v5228_v28 = vmul.f32 %v13929_v31, %v4609_v1  ;;  %v5229_v38 = vmul.f32 %v13930_v12, %v4609_v1  ;;  %v13936_v40 = vld [vmem:[#allocation89_spill] sm:$0xff] }
 0x603   :  { %v5230_v16 = vmul.f32 %v13931_v0, %v4609_v1  ;;  %v5231_v15 = vmul.f32 %v13932_v25, %v4609_v1  ;;  %v5227_v21 = vmul.f32 %v13935_v35, %v4608_v50  ;;  %v5232_v61 = vmul.f32 %v13936_v40, %v4609_v1  ;;  %v13940_v35 = vld [vmem:[#allocation88_spill] sm:$0xff] }
 0x604   :  { %v5261_v30 = vsel %vm803_vm1, %v5228_v28, 0.0  ;;  %v5276_v60 = vsel %vm803_vm1, %v5229_v38, 0.0  ;;  %v5233_v7 = vmul.f32 %v13937_v55, %v4609_v1  ;;  %v5290_v34 = vadd.f32 %v5289_v58, %v5288_v19  ;;  %v13939_v19 = vld [vmem:[#allocation119_spill] sm:$0xff] }
 0x605   :  { %v13126_v41 = vadd.f32 %v5261_v30, %v5260_v8  ;;  %v13128_v48 = vadd.f32 %v5276_v60, %v5275_v54  ;;  %v5234_v26 = vmul.f32 %v13938_v62, %v4609_v1  ;;  %v5291_v17 = vsel %vm803_vm1, %v5230_v16, 0.0  ;;  %v13138_v54 = vpop.permute.xlu1 %5545  ;;  %v13149_v53 = vpop.permute.xlu0 %5621 }
 0x606   :  { %v5304_v27 = vsel %vm803_vm1, %v5223_v13, 0.0  ;;  %v5317_v23 = vsel %vm803_vm1, %v5216_v4, 0.0  ;;  %v5292_v50 = vadd.f32 %v5291_v17, %v5290_v34  ;;  %v5319_v57 = vsel %vm803_vm1, %v5224_v10, 0.0  ;;  %v13941_v34 = vld [vmem:[#allocation101_spill] sm:$0xff]  ;;  %v13942_v17 = vld [vmem:[#allocation110_spill] sm:$0xff] }
 0x607   :  { %v5305_v49 = vadd.f32 %v5304_v27, %v5303_v18  ;;  %v5318_v36 = vadd.f32 %v5317_v23, %v13070_v6  ;;  %v5235_v58 = vmul.f32 %v13939_v19, %v4609_v1  ;;  %v5306_v31 = vsel %vm803_vm1, %v5231_v15, 0.0  ;;  %v13943_v27 = vld [vmem:[#allocation86_spill] sm:$0xff]  ;;  %v13944_v23 = vld [vmem:[#allocation116_spill] sm:$0xff] }
 0x608   :  { %v10739_v8 = vpop.eup %10738  ;;  %v5332_v28 = vsel %vm803_vm1, %v5217_v47, 0.0  ;;  %v5334_v12 = vsel %vm803_vm1, %v5225_v29, 0.0  ;;  %v5321_v6 = vsel %vm803_vm1, %v5232_v61, 0.0  ;;  %v5347_v10 = vsel %vm803_vm1, %v5218_v9, 0.0 }
 0x609   :  { %v4594_v13 = vadd.f32 1.0, %v10739_v8  ;;  %v5307_v38 = vadd.f32 %v5306_v31, %v5305_v49  ;;  %v5320_v4 = vadd.f32 %v5319_v57, %v5318_v36  ;;  %v5333_v18 = vadd.f32 %v5332_v28, %v13072_v37  ;;  %v13156_v61 = vpop.permute.xlu1 %5702  ;;  %v13945_v49 = vld [vmem:[#allocation83_spill] sm:$0xff]  ;;  %v13947_v8 = vld [vmem:[#allocation93_spill] sm:$0xff] }
 0x60a   :  { %v10741_v0 = vpop.eup %10740  ;;  %v5349_v16 = vsel %vm803_vm1, %v5226_v45, 0.0  ;;  %v5362_v1 = vsel %vm803_vm1, %v5219_v46, 0.0  ;;  %v5336_v29 = vsel %vm803_vm1, %v5233_v7, 0.0  ;;  %v5348_v30 = vadd.f32 %v5347_v10, %v13075_v39  ;;  %v13948_v31 = vld [vmem:[#allocation81_spill] sm:$0xff] }
 0x60b   :  { %v4602_v25 = vmul.f32 %v4594_v13, %v4570_v5  ;;  %v4595_v15 = vadd.f32 1.0, %v10741_v0  ;;  %v5322_v3 = vadd.f32 %v5321_v6, %v5320_v4  ;;  %v5335_v47 = vadd.f32 %v5334_v12, %v5333_v18  ;;  %v13950_v13 = vld [vmem:[#allocation118_spill] sm:$0xff]  ;;  %v13171_v6 = vpop.permute.xlu0 %5706  ;;  %v13952_v10 = vld [vmem:[#allocation105_spill] sm:$0xff] }
 0x60c   :  { %v5363_v37 = vadd.f32 %v5362_v1, %v13078_v44  ;;  %v5364_v60 = vsel %vm803_vm1, %v5227_v21, 0.0  ;;  %v5350_v5 = vadd.f32 %v5349_v16, %v5348_v30  ;;  %v5351_v46 = vsel %vm803_vm1, %v5234_v26, 0.0  ;;  %v13949_v26 = vld [vmem:[#allocation80_spill] sm:$0xff]  ;;  %v13951_v18 = vld [vmem:[#allocation82_spill] sm:$0xff] }
 0x60d   :  { %v4610_v9 = vadd.f32 %v4602_v25, %v13940_v35  ;;  %v4603_v40 = vmul.f32 %v4595_v15, %v4571_v42  ;;  %v5337_v45 = vadd.f32 %v5336_v29, %v5335_v47  ;;  %v5366_v44 = vsel %vm803_vm1, %v5235_v58, 0.0  ;;  %v13946_v42 = vld [vmem:[#allocation103_spill] sm:$0xff]  ;;  %v13953_v1 = vld [vmem:[#allocation94_spill] sm:$0xff] }
 0x60e   :  { %v5365_v55 = vadd.f32 %v5364_v60, %v5363_v37  ;;  %v13181_v60 = vpop.permute.xlu1 %5549 }
 0x60f   :  { %v5236_v62 = vmul.f32 %v13941_v34, %v4610_v9  ;;  %v5237_v7 = vmul.f32 %v13942_v17, %v4610_v9  ;;  %v4611_v39 = vadd.f32 %v4603_v40, %v13943_v27  ;;  %v5238_v21 = vmul.f32 %v13944_v23, %v4610_v9 }
 0x610   :  { %v5239_v36 = vmul.f32 %v13945_v49, %v4610_v9  ;;  %v5240_v57 = vmul.f32 %v13946_v42, %v4610_v9  ;;  %v5241_v19 = vmul.f32 %v13947_v8, %v4610_v9  ;;  %v5242_v4 = vmul.f32 %v13950_v13, %v4610_v9  ;;  %v13193_v49 = vpop.permute.xlu0 %5625 }
 0x611   :  { %v5244_v28 = vmul.f32 %v13948_v31, %v4611_v39  ;;  %v5245_v12 = vmul.f32 %v13949_v26, %v4611_v39  ;;  %v5246_v0 = vmul.f32 %v13951_v18, %v4611_v39  ;;  %v5243_v58 = vmul.f32 %v13024_v63, %v4610_v9  ;;  %v13954_v18 = vld [vmem:[#allocation104_spill] sm:$0xff] }
 0x612   :  { %v5247_v16 = vmul.f32 %v13952_v10, %v4611_v39  ;;  %v5248_v25 = vmul.f32 %v13953_v1, %v4611_v39  ;;  %v5249_v15 = vmul.f32 %v13001_v11, %v4611_v39  ;;  %v5250_v47 = vmul.f32 %v13038_v22, %v4611_v39  ;;  %v13955_v10 = vld [vmem:[#allocation84_spill] sm:$0xff] }
 0x613   :  { %v5251_v29 = vmul.f32 %v13048_v52, %v4611_v39  ;;  %v5263_v30 = vsel %vm803_vm1, %v5236_v62, 0.0  ;;  %v5278_v37 = vsel %vm803_vm1, %v5237_v7, 0.0  ;;  %v5265_v63 = vsel %vm803_vm1, %v5244_v28, 0.0 }
 0x614   :  { %v5264_v35 = vadd.f32 %v5263_v30, %v13126_v41  ;;  %v5279_v9 = vadd.f32 %v5278_v37, %v13128_v48  ;;  %v5293_v40 = vsel %vm803_vm1, %v5238_v21, 0.0  ;;  %v5280_v11 = vsel %vm803_vm1, %v5245_v12, 0.0 }
 0x615   :  { %v5294_v34 = vadd.f32 %v5293_v40, %v5292_v50  ;;  %v5295_v22 = vsel %vm803_vm1, %v5246_v0, 0.0  ;;  %v5308_v52 = vsel %vm803_vm1, %v5239_v36, 0.0  ;;  %v5323_v27 = vsel %vm803_vm1, %v5240_v57, 0.0  ;;  %v13198_v57 = vpop.permute.xlu1 %5710 }
 0x616   :  { %v5266_v62 = vadd.f32 %v5265_v63, %v5264_v35  ;;  %v5281_v17 = vadd.f32 %v5280_v11, %v5279_v9  ;;  %v5309_v7 = vadd.f32 %v5308_v52, %v5307_v38  ;;  %v5310_v41 = vsel %vm803_vm1, %v5247_v16, 0.0 }
 0x617   :  { %v5296_v39 = vadd.f32 %v5295_v22, %v5294_v34  ;;  %v5324_v23 = vadd.f32 %v5323_v27, %v5322_v3  ;;  %v5338_v48 = vsel %vm803_vm1, %v5241_v19, 0.0  ;;  %v5325_v50 = vsel %vm803_vm1, %v5248_v25, 0.0  ;;  %v13208_v25 = vpop.permute.xlu0 %5553 }
 0x618   :  { %v5311_v21 = vadd.f32 %v5310_v41, %v5309_v7  ;;  %v5339_v42 = vadd.f32 %v5338_v48, %v5337_v45  ;;  %v5352_v8 = vadd.f32 %v5351_v46, %v5350_v5  ;;  %v5340_v36 = vsel %vm803_vm1, %v5249_v15, 0.0  ;;  %v13956_v5 = vld [vmem:[#allocation117_spill] sm:$0xff] }
 0x619   :  { %v5326_v31 = vadd.f32 %v5325_v50, %v5324_v23  ;;  %v5353_v38 = vsel %vm803_vm1, %v5242_v4, 0.0  ;;  %v5367_v28 = vadd.f32 %v5366_v44, %v5365_v55  ;;  %v5355_v3 = vsel %vm803_vm1, %v5250_v47, 0.0  ;;  %v13212_v35 = vpop.permute.xlu1 %5629 }
 0x61a   :  { %v5341_v26 = vadd.f32 %v5340_v36, %v5339_v42  ;;  %v5354_v12 = vadd.f32 %v5353_v38, %v5352_v8  ;;  %v5368_v19 = vsel %vm803_vm1, %v5243_v58, 0.0  ;;  %v5444_v0 = vadd.f32 %v13954_v18, %v5266_v62 }
 0x61b   :  { %v5369_v13 = vadd.f32 %v5368_v19, %v5367_v28  ;;  %v5445_v45 = vadd.f32 %v13955_v10, %v5281_v17  ;;  %v5446_v46 = vadd.f32 %v13956_v5, %v5296_v39  ;;  %v5370_v1 = vsel %vm803_vm1, %v5251_v29, 0.0 }
 0x61c   :  { %v5356_v16 = vadd.f32 %v5355_v3, %v5354_v12  ;;  %v5447_v55 = vadd.f32 %v13014_v20, %v5311_v21  ;;  %v5448_v4 = vadd.f32 %v13044_v2, %v5326_v31  ;;  %v5449_v15 = vadd.f32 %v13059_v32, %v5341_v26  ;;  %v13215_v2 = vpop.permute.xlu0 %5714 }
 0x61d   :  { %v5371_v44 = vadd.f32 %v5370_v1, %v5369_v13  ;;  %v5460_v47 = vmul.f32 0.70710677, %v5444_v0  ;;  %v5461_v30 = vmul.f32 0.70710677, %v5445_v45  ;;  %v5462_v37 = vmul.f32 0.70710677, %v5446_v46  ;;  %v5558_v32 = vpop.permute.xlu1 %5557 }
 0x61e   :  { %v5450_v58 = vadd.f32 %v13065_v24, %v5356_v16  ;;  %v5463_v9 = vmul.f32 0.70710677, %v5447_v55  ;;  %v5464_v29 = vmul.f32 0.70710677, %v5448_v4  ;;  %v5465_v20 = vmul.f32 0.70710677, %v5449_v15 }
 0x61f   :  { %v5451_v63 = vadd.f32 %v13080_v51, %v5371_v44  ;;  %10742 = verf.f32 %v5460_v47  ;;  %v5452_v52 = vmul.f32 0.5, %v5444_v0  ;;  %v5453_v7 = vmul.f32 0.5, %v5445_v45 }
 0x620   :  { %10744 = verf.f32 %v5461_v30  ;;  %v5466_v40 = vmul.f32 0.70710677, %v5450_v58  ;;  %v5634_v24 = vpop.permute.xlu0 %5633  ;;  %v5454_v41 = vmul.f32 0.5, %v5446_v46  ;;  %v5455_v23 = vmul.f32 0.5, %v5447_v55 }
 0x621   :  { %10746 = verf.f32 %v5462_v37  ;;  %v5467_v11 = vmul.f32 0.70710677, %v5451_v63  ;;  %v5719_v51 = vpop.permute.xlu1 %5718  ;;  %v5456_v42 = vmul.f32 0.5, %v5448_v4  ;;  %v5457_v8 = vmul.f32 0.5, %v5449_v15 }
 0x622   :  { %10748 = verf.f32 %v5463_v9  ;;  %v5458_v26 = vmul.f32 0.5, %v5450_v58  ;;  %v5459_v18 = vmul.f32 0.5, %v5451_v63 }
 0x623   :  { %10750 = verf.f32 %v5464_v29 }
 0x624   :  { %10752 = verf.f32 %v5465_v20  ;;  %v5562_v28 = vpop.permute.xlu0 %5561 }
 0x625   :  { %10754 = verf.f32 %v5466_v40  ;;  %v5638_v46 = vpop.permute.xlu1 %5637 }
 0x626   :  { %10756 = verf.f32 %v5467_v11 }
 0x628   :  { %v5723_v29 = vpop.permute.xlu0 %5722 }
 0x629   :  { %v10743_v34 = vpop.eup %10742 }
 0x62a   :  { %v10745_v22 = vpop.eup %10744  ;;  %v5476_v62 = vadd.f32 1.0, %v10743_v34  ;;  %v5642_v34 = vpop.permute.xlu1 %5641 }
 0x62b   :  { %v10747_v17 = vpop.eup %10746  ;;  %v5477_v27 = vadd.f32 1.0, %v10745_v22 }
 0x62c   :  { %v10749_v39 = vpop.eup %10748  ;;  %v5478_v48 = vadd.f32 1.0, %v10747_v17  ;;  %v5484_v21 = vmul.f32 %v5476_v62, %v5452_v52 }
 0x62d   :  { %v10751_v50 = vpop.eup %10750  ;;  %v5479_v31 = vadd.f32 1.0, %v10749_v39  ;;  %v5485_v36 = vmul.f32 %v5477_v27, %v5453_v7 }
 0x62e   :  { %v10753_v38 = vpop.eup %10752  ;;  %v5480_v12 = vadd.f32 1.0, %v10751_v50  ;;  %v5486_v3 = vmul.f32 %v5478_v48, %v5454_v41  ;;  %v5564_v19 = vmul.f32 %v13083_v59, %v5484_v21  ;;  %v5731_v27 = vpop.permute.xlu1 %5730 }
 0x62f   :  { %v10755_v13 = vpop.eup %10754  ;;  %v5481_v0 = vadd.f32 1.0, %v10753_v38  ;;  %v5487_v10 = vmul.f32 %v5479_v31, %v5455_v23  ;;  %v5565_v45 = vmul.f32 %v13094_v43, %v5485_v36 }
 0x630   :  { %v10757_v5 = vpop.eup %10756  ;;  %v5482_v16 = vadd.f32 1.0, %v10755_v13  ;;  %v5488_v1 = vmul.f32 %v5480_v12, %v5456_v42  ;;  %v5566_v55 = vmul.f32 %v13105_v33, %v5486_v3  ;;  %v5644_v44 = vadd.f32 %v13113_v56, %v5564_v19  ;;  %v5771_v13 = vld [vmem:[#allocation9 + $0x8] sm:$0xff] }
 0x631   :  { %v5483_v4 = vadd.f32 1.0, %v10757_v5  ;;  %v5489_v15 = vmul.f32 %v5481_v0, %v5457_v8  ;;  %v5567_v58 = vmul.f32 %v13138_v54, %v5487_v10  ;;  %v5645_v59 = vadd.f32 %v13130_v14, %v5565_v45  ;;  %v5766_v8 = vld [vmem:[#allocation3] sm:$0xff]  ;;  %v5770_v0 = vld [vmem:[#allocation9] sm:$0xff]  ;;  %v5775_v5 = vld [vmem:[#allocation9 + $0x28] sm:$0xff] }
 0x632   :  { %v5490_v47 = vmul.f32 %v5482_v16, %v5458_v26  ;;  %v5568_v30 = vmul.f32 %v13181_v60, %v5488_v1  ;;  %v5646_v37 = vadd.f32 %v13149_v53, %v5566_v55  ;;  %v5733_v43 = vmul.f32 %v13156_v61, %v5644_v44  ;;  %v5772_v45 = vld [vmem:[#allocation9 + $0x10] sm:$0xff]  ;;  %v5774_v55 = vld [vmem:[#allocation9 + $0x20] sm:$0xff] }
 0x633   :  { %v5491_v63 = vmul.f32 %v5483_v4, %v5459_v18  ;;  %v5569_v9 = vmul.f32 %v13208_v25, %v5489_v15  ;;  %v5647_v33 = vadd.f32 %v13193_v49, %v5567_v58  ;;  %v5734_v56 = vmul.f32 %v13171_v6, %v5645_v59  ;;  %v5773_v18 = vld [vmem:[#allocation9 + $0x18] sm:$0xff]  ;;  %v5776_v44 = vld [vmem:[#allocation9 + $0x30] sm:$0xff]  ;;  %v5779_v4 = vld [vmem:[#allocation9 + $0x48] sm:$0xff] }
 0x634   :  { %v5570_v20 = vmul.f32 %v5558_v32, %v5490_v47  ;;  %v5648_v54 = vadd.f32 %v13212_v35, %v5568_v30  ;;  %v5735_v14 = vmul.f32 %v13198_v57, %v5646_v37  ;;  %v5741_v40 = vsel %vm803_vm1, %v5733_v43, 0.0  ;;  %v5727_v57 = vpop.permute.xlu0 %5726  ;;  %v5781_v15 = vld [vmem:[#allocation9 + $0x58] sm:$0xff]  ;;  %v5778_v47 = vld [vmem:[#allocation9 + $0x40] sm:$0xff]  ;;  %v5780_v30 = vld [vmem:[#allocation9 + $0x50] sm:$0xff] }
 0x635   :  { %v5571_v60 = vmul.f32 %v5562_v28, %v5491_v63  ;;  %v5649_v11 = vadd.f32 %v5634_v24, %v5569_v9  ;;  %v5736_v53 = vmul.f32 %v13215_v2, %v5647_v33  ;;  %v5742_v61 = vsel %vm803_vm1, %v5734_v56, 0.0  ;;  %v5783_v37 = vld [vmem:[#allocation9 + $0x68] sm:$0xff]  ;;  %v5785_v43 = vld [vmem:[#allocation9 + $0x78] sm:$0xff]  ;;  %v5782_v33 = vld [vmem:[#allocation9 + $0x60] sm:$0xff] }
 0x636   :  { %v5743_v25 = vadd.f32 %v5742_v61, %v5741_v40  ;;  %v5650_v22 = vadd.f32 %v5638_v46, %v5570_v20  ;;  %v5737_v49 = vmul.f32 %v5719_v51, %v5648_v54  ;;  %v5744_v6 = vsel %vm803_vm1, %v5735_v14, 0.0  ;;  %v5777_v46 = vld [vmem:[#allocation9 + $0x38] sm:$0xff]  ;;  %v5784_v56 = vld [vmem:[#allocation9 + $0x70] sm:$0xff]  ;;  %v9238_v61 = vld [vmem:[%s13958_s10] ss:$0 sm:$0xff] }
 0x637   :  { %v5651_v32 = vadd.f32 %v5642_v34, %v5571_v60  ;;  %v5738_v62 = vmul.f32 %v5723_v29, %v5649_v11  ;;  %v5746_v35 = vsel %vm803_vm1, %v5736_v53, 0.0  ;;  %v10191_v10 = vpack.c.bf16 %v5773_v18, %v5771_v13  ;;  %v9237_v11 = vld [vmem:[%s13957_s17] ss:$0 sm:$0xff] }
 0x638   :  { %v5745_v52 = vadd.f32 %v5744_v6, %v5743_v25  ;;  %v5739_v7 = vmul.f32 %v5727_v57, %v5650_v22  ;;  %v5748_v24 = vsel %vm803_vm1, %v5737_v49, 0.0  ;;  %v5763_v42 = vpop.permute.xlu0 %5762  ;;  %v10193_v16 = vpack.c.bf16 %v5772_v45, %v5770_v0 }
 0x639   :  { %v5740_v39 = vmul.f32 %v5731_v27, %v5651_v32  ;;  %v5750_v41 = vsel %vm803_vm1, %v5738_v62, 0.0  ;;  %v10195_v1 = vpack.c.bf16 %v5777_v46, %v5775_v5  ;;  %10192 = vmatprep.subr.bf16.mxu0 %v10191_v10  ;;  %v10197_v58 = vpack.c.bf16 %v5776_v44, %v5774_v55 }
 0x63a   :  { %v5747_v17 = vadd.f32 %v5746_v35, %v5745_v52  ;;  %v5752_v51 = vsel %vm803_vm1, %v5739_v7, 0.0  ;;  %10194 = vmatpush1.bf16.msra.mxu0 %v10193_v16  ;;  %v10199_v59 = vpack.c.bf16 %v5781_v15, %v5779_v4  ;;  %v10201_v63 = vpack.c.bf16 %v5780_v30, %v5778_v47 }
 0x63b   :  { %v5754_v21 = vsel %vm803_vm1, %v5740_v39, 0.0  ;;  %10196 = vmatprep.subr.bf16.mxu0 %v10195_v1  ;;  %v10203_v9 = vpack.c.bf16 %v5785_v43, %v5783_v37  ;;  %v10205_v29 = vpack.c.bf16 %v5784_v56, %v5782_v33  ;;  %v13959_v20 = vmov 0.0  }
 0x63c   :  { %v5749_v2 = vadd.f32 %v5748_v24, %v5747_v17 }
 0x63e   :  { %v5751_v23 = vadd.f32 %v5750_v41, %v5749_v2  ;;  %10198 = vmatpush1.bf16.msra.mxu0 %v10197_v58 }
 0x63f   :  { %10200 = vmatprep.subr.bf16.mxu0 %v10199_v59 }
 0x640   :  { %v5753_v48 = vadd.f32 %v5752_v51, %v5751_v23 }
 0x642   :  { %v5755_v50 = vadd.f32 %v5754_v21, %v5753_v48  ;;  %10202 = vmatpush1.bf16.msra.mxu0 %v10201_v63 }
 0x643   :  { %10204 = vmatprep.subr.bf16.mxu0 %v10203_v9 }
 0x644   :  { %v5765_v31 = vadd.f32 %v5763_v42, %v5755_v50 }
 0x646   :  { %v13240_v36 = vadd.f32 %v5766_v8, %v5765_v31  ;;  %10206 = vmatpush1.bf16.msra.mxu0 %v10205_v29 }
 0x647   :  { %9949 = vmatprep.subr.mxu0 %v13959_v20 }
 0x648   :  { %v5815_v38 = vsel %vm803_vm1, %v13240_v36, 0.0 }
 0x649   :  { %5816 = vadd.xlane.f32.xlu1 %v5815_v38 }
 0x6d6   :  { %v5817_v28 = vpop.xlane.xlu1 %5816 }
 0x6d7   :  { %v5819_v26 = vmul.f32 0.015625, %v5817_v28 }
 0x6d9   :  { %v5820_v12 = vsub.f32 %v13240_v36, %v5819_v26 }
 0x6db   :  { %v5821_v3 = vmul.f32 %v5820_v12, %v5820_v12 }
 0x6dd   :  { %v5822_v19 = vsel %vm803_vm1, %v5821_v3, 0.0 }
 0x6de   :  { %5823 = vadd.xlane.f32.xlu0 %v5822_v19 }
 0x76b   :  { %v5824_v54 = vpop.xlane.xlu0 %5823 }
 0x76c   :  { %v5825_v14 = vmul.f32 0.015625, %v5824_v54 }
 0x76e   :  { %v5826_v40 = vadd.f32 1e-05, %v5825_v14 }
 0x770   :  { %10758 = vrsqrt.f32 %v5826_v40 }
 0x77a   :  { %v10759_v60 = vpop.eup %10758 }
 0x77b   :  { %v5828_v53 = vmul.f32 %v10759_v60, %v5820_v12 }
 0x77d   :  { %v5835_v34 = vmul.f32 %v9237_v11, %v5828_v53  ;;  %v5786_v53 = vld [vmem:[#allocation11] sm:$0xff] }
 0x77f   :  { %v5842_v25 = vadd.f32 %v9238_v61, %v5835_v34  ;;  %v5787_v61 = vld [vmem:[#allocation11 + $0x8] sm:$0xff]  ;;  %v5788_v34 = vld [vmem:[#allocation11 + $0x10] sm:$0xff] }
 0x781   :  { %9239 = vmatmul.mubr.msk.f32.vlgmr.msra.gmra.mrb[64].mxu0 %vm803_vm1, %v5842_v25  ;;  %v11433_v25 = vmov 0.0|0.0  }
 0x782   :  { %9951 = vmatprep.mubr.msk.f32.mxu0 %vm11427_vm0, %v13959_v20 }
 0x854   :  { %v5912_v22 = vpop.f32.mrb[64].mxu0 }
 0x855   :  { %5918 = vrot.lane.b32.xlu0 %v5912_v22, %s11414_s16  ;;  %v13253_v49 = vpop.f32.mrb[65].mxu0 }
 0x856   :  { %9955 = vmatpush3.msra.mxu1 %v13253_v49 }
 0x857   :  { %9959 = vmatprep.subr.mxu1 %v13959_v20 }
 0x859   :  { %6080 = vrot.lane.b32.xlu0 %v5912_v22, %s11428_s15 }
 0x85d   :  { %6248 = vrot.lane.b32.xlu0 %v5912_v22, %s11429_s7 }
 0x861   :  { %6413 = vrot.lane.b32.xlu0 %v5912_v22, %s11402_s13 }
 0x8c7   :  { %v5919_v6 = vpop.permute.xlu0 %5918 }
 0x8c8   :  { %9950 = vmatpush3.xpose.msk.msra.mxu0 %vm5920_vm2, %v5919_v6 }
 0x8c9   :  { %9964 = vmatprep.subr.mxu0 %v13959_v20 }
 0x8cb   :  { %9952 = vmatmul.mubr.msk.f32.vlgmr.msra.gmra.mrb[66].mxu0 %vm5920_vm2, %v5912_v22  ;;  %v6081_v39 = vpop.permute.xlu0 %6080 }
 0x8cc   :  { %9966 = vmatprep.mubr.msk.f32.mxu0 %vm11427_vm0, %v13959_v20 }
 0x8cf   :  { %v6249_v51 = vpop.permute.xlu0 %6248 }
 0x8d3   :  { %v6414_v21 = vpop.permute.xlu0 %6413 }
 0x99e   :  { %v5991_v52 = vpop.f32.mrb[66].mxu0 }
 0x99f   :  { %v9953_v32 = vpop.f32.mrb[67].mxu0  ;;  %v5996_v62 = vsel %vm5995_vm3, %v5991_v52, -inf }
 0x9a0   :  { %5997 = vmax.xlane.f32.xlu1 %v5996_v62  ;;  %v5791_v32 = vld [vmem:[#allocation11 + $0x28] sm:$0xff] }
 0x9b1   :  { %6082 = vrot.lane.b32.xlu1 %v5912_v22, %s11430_s0 }
 0xa2d   :  { %v5998_v35 = vpop.xlane.xlu1 %5997 }
 0xa2e   :  { %v5999_v57 = vsub.f32 %v5991_v52, %v5998_v35  ;;  %v5790_v52 = vld [vmem:[#allocation11 + $0x20] sm:$0xff]  ;;  %v5792_v35 = vld [vmem:[#allocation11 + $0x30] sm:$0xff] }
 0xa2f   :  { %v10214_v62 = vpack.c.bf16 %v5791_v32, %v5790_v52  ;;  %v9256_v52 = vld [vmem:[%s13963_s23] ss:$0 sm:$0xff] }
 0xa30   :  { %v6000_v17 = vmul.f32 1.442695, %v5999_v57  ;;  %v5793_v57 = vld [vmem:[#allocation11 + $0x38] sm:$0xff] }
 0xa31   :  { %v6083_v27 = vpop.permute.xlu1 %6082 }
 0xa32   :  { %10760 = vpow2.f32 %v6000_v17  ;;  %v10217_v17 = vpack.c.bf16 %v5793_v57, %v5792_v35 }
 0xa3c   :  { %v10761_v7 = vpop.eup %10760 }
 0xa3d   :  { %v6002_v24 = vsel %vm5995_vm3, %v10761_v7, 0.0 }
 0xa3e   :  { %6003 = vadd.xlane.f32.xlu1 %v6002_v24 }
 0xa4f   :  { %6246 = vrot.lane.b32.xlu1 %v5912_v22, %s11431_s5 }
 0xa53   :  { %6411 = vrot.lane.b32.xlu1 %v5912_v22, %s11432_s19  ;;  %v10208_v22 = vpack.c.bf16 %v5787_v61, %v5786_v53  ;;  %v5810_v53 = vld [vmem:[#allocation14 + $0x20] sm:$0xff]  ;;  %v5811_v61 = vld [vmem:[#allocation14 + $0x28] sm:$0xff] }
 0xacb   :  { %v6004_v2 = vpop.xlane.xlu1 %6003 }
 0xacc   :  { %10762 = vrcp.f32 %v6004_v2 }
 0xacf   :  { %v6247_v48 = vpop.permute.xlu1 %6246 }
 0xad3   :  { %v6412_v50 = vpop.permute.xlu1 %6411 }
 0xad6   :  { %v10763_v41 = vpop.eup %10762 }
 0xad7   :  { %v6006_v23 = vmul.f32 %v10763_v41, %v10761_v7 }
 0xad9   :  { %9957 = vmatmul.mubr.msk.f32.vlgmr.msra.gmra.mrb[64].mxu1 %vm5995_vm3, %v6006_v23 }
 0xada   :  { %9960 = vmatpush3.xpose.msk.msra.mxu1 %vm5920_vm2, %v6083_v27  ;;  %9961 = vmatprep.mubr.msk.f32.mxu1 %vm11427_vm0, %v13959_v20 }
 0xadb   :  { %9969 = vmatprep.subr.mxu1 %v13959_v20 }
 0xadd   :  { %9962 = vmatmul.mubr.msk.f32.vlgmr.msra.gmra.mrb[66].mxu1 %vm5920_vm2, %v6081_v39 }
 0xade   :  { %9970 = vmatpush3.xpose.msk.msra.mxu1 %vm5920_vm2, %v6249_v51  ;;  %9971 = vmatprep.mubr.msk.f32.mxu1 %vm11427_vm0, %v13959_v20 }
 0xadf   :  { %9979 = vmatprep.subr.mxu1 %v13959_v20 }
 0xae1   :  { %9972 = vmatmul.mubr.msk.f32.vlgmr.msra.gmra.mrb[68].mxu1 %vm5920_vm2, %v6247_v48 }
 0xae2   :  { %9980 = vmatpush3.xpose.msk.msra.mxu1 %vm5920_vm2, %v6414_v21  ;;  %9981 = vmatprep.mubr.msk.f32.mxu1 %vm11427_vm0, %v13959_v20 }
 0xae3   :  { %10207 = vmatprep.subr.bf16.mxu1 %v11433_v25 }
 0xae5   :  { %9982 = vmatmul.mubr.msk.f32.vlgmr.msra.gmra.mrb[70].mxu1 %vm5920_vm2, %v6412_v50 }
 0xae6   :  { %10005 = vmatprep.mubr.msk.f32.mxu1 %vm11427_vm0, %v13959_v20  ;;  %10209 = vmatpush3.bf16.msra.mxu1 %v10208_v22  ;;  %v5812_v22 = vld [vmem:[#allocation14 + $0x30] sm:$0xff] }
 0xae7   :  { %10210 = vmatprep.subr.bf16.mxu1 %v11433_v25 }
 0xbac   :  { %v13287_v42 = vpop.f32.mrb[64].mxu1 }
 0xbad   :  { %v9958_v8 = vpop.f32.mrb[65].mxu1 }
 0xbb0   :  { %v6154_v31 = vpop.f32.mrb[66].mxu1 }
 0xbb1   :  { %v9963_v38 = vpop.f32.mrb[67].mxu1  ;;  %v6158_v28 = vsel %vm5995_vm3, %v6154_v31, -inf }
 0xbb2   :  { %6159 = vmax.xlane.f32.xlu0 %v6158_v28 }
 0xbb4   :  { %v6320_v26 = vpop.f32.mrb[68].mxu1 }
 0xbb5   :  { %v9973_v12 = vpop.f32.mrb[69].mxu1  ;;  %v6324_v3 = vsel %vm5995_vm3, %v6320_v26, -inf }
 0xbb6   :  { %6325 = vmax.xlane.f32.xlu1 %v6324_v3 }
 0xbb8   :  { %v6485_v19 = vpop.f32.mrb[70].mxu1 }
 0xbb9   :  { %v9983_v13 = vpop.f32.mrb[71].mxu1  ;;  %v6489_v18 = vsel %vm5995_vm3, %v6485_v19, -inf }
 0xbba   :  { %6490 = vmax.xlane.f32.xlu0 %v6489_v18 }
 0xbc7   :  { %6170 = vrot.lane.b32.xlu1 %v13253_v49, %s11428_s15 }
 0xc3f   :  { %v6160_v0 = vpop.xlane.xlu0 %6159 }
 0xc40   :  { %v6161_v10 = vsub.f32 %v6154_v31, %v6160_v0  ;;  %v9253_v31 = vld [vmem:[%s13960_s22] ss:$0 sm:$0xff] }
 0xc42   :  { %v6162_v45 = vmul.f32 1.442695, %v6161_v10  ;;  %v5797_v10 = vld [vmem:[#allocation12] sm:$0xff] }
 0xc43   :  { %v6326_v5 = vpop.xlane.xlu1 %6325 }
 0xc44   :  { %10764 = vpow2.f32 %v6162_v45  ;;  %v6327_v46 = vsub.f32 %v6320_v26, %v6326_v5  ;;  %v5798_v45 = vld [vmem:[#allocation12 + $0x8] sm:$0xff]  ;;  %v5799_v5 = vld [vmem:[#allocation12 + $0x10] sm:$0xff] }
 0xc46   :  { %v6328_v16 = vmul.f32 1.442695, %v6327_v46  ;;  %v10220_v46 = vpack.c.bf16 %v5798_v45, %v5797_v10  ;;  %v6872_v10 = vld [vmem:[#allocation20 + $0x20] sm:$0xff]  ;;  %v6874_v45 = vld [vmem:[#allocation20 + $0x30] sm:$0xff] }
 0xc47   :  { %v6491_v1 = vpop.xlane.xlu0 %6490  ;;  %v6171_v55 = vpop.permute.xlu1 %6170 }
 0xc48   :  { %10766 = vpow2.f32 %v6328_v16  ;;  %v6492_v44 = vsub.f32 %v6485_v19, %v6491_v1  ;;  %9965 = vmatpush3.msra.mxu0 %v6171_v55  ;;  %v5801_v1 = vld [vmem:[#allocation12 + $0x20] sm:$0xff]  ;;  %v5802_v55 = vld [vmem:[#allocation12 + $0x28] sm:$0xff] }
 0xc49   :  { %9974 = vmatprep.subr.mxu0 %v13959_v20 }
 0xc4a   :  { %v6493_v4 = vmul.f32 1.442695, %v6492_v44  ;;  %v10226_v44 = vpack.c.bf16 %v5802_v55, %v5801_v1  ;;  %v6876_v1 = vld [vmem:[#allocation20 + $0x40] sm:$0xff]  ;;  %v6878_v55 = vld [vmem:[#allocation20 + $0x50] sm:$0xff] }
 0xc4c   :  { %10768 = vpow2.f32 %v6493_v4  ;;  %v5803_v4 = vld [vmem:[#allocation12 + $0x30] sm:$0xff] }
 0xc4e   :  { %v10765_v15 = vpop.eup %10764 }
 0xc4f   :  { %v6164_v58 = vsel %vm5995_vm3, %v10765_v15, 0.0 }
 0xc50   :  { %6165 = vadd.xlane.f32.xlu0 %v6164_v58 }
 0xc52   :  { %v10767_v59 = vpop.eup %10766 }
 0xc53   :  { %v6330_v47 = vsel %vm5995_vm3, %v10767_v59, 0.0 }
 0xc54   :  { %6331 = vadd.xlane.f32.xlu1 %v6330_v47 }
 0xc56   :  { %v10769_v30 = vpop.eup %10768 }
 0xc57   :  { %v6495_v37 = vsel %vm5995_vm3, %v10769_v30, 0.0 }
 0xc58   :  { %6496 = vadd.xlane.f32.xlu0 %v6495_v37 }
 0xc65   :  { %6500 = vrot.lane.b32.xlu1 %v13253_v49, %s11432_s19 }
 0xc6e   :  { %6335 = vrot.lane.b32.xlu0 %v13253_v49, %s11431_s5  ;;  %v5789_v49 = vld [vmem:[#allocation11 + $0x18] sm:$0xff] }
 0xc6f   :  { %v10211_v6 = vpack.c.bf16 %v5789_v49, %v5788_v34  ;;  %v10238_v34 = vpack.c.bf16 %v5811_v61, %v5810_v53  ;;  %v5813_v49 = vld [vmem:[#allocation14 + $0x38] sm:$0xff] }
 0xc71   :  { %10212 = vmatpush3.bf16.msra.mxu1 %v10211_v6  ;;  %v10241_v6 = vpack.c.bf16 %v5813_v49, %v5812_v22 }
 0xc72   :  { %10213 = vmatprep.subr.bf16.mxu1 %v11433_v25 }
 0xc75   :  { %10215 = vmatpush3.bf16.msra.mxu1 %v10214_v62 }
 0xc76   :  { %10216 = vmatprep.subr.bf16.mxu1 %v11433_v25 }
 0xc79   :  { %10218 = vmatpush3.bf16.msra.mxu1 %v10217_v17 }
 0xc7a   :  { %10231 = vmatprep.subr.bf16.mxu1 %v11433_v25 }
 0xcdd   :  { %v6166_v43 = vpop.xlane.xlu0 %6165 }
 0xcde   :  { %10770 = vrcp.f32 %v6166_v43  ;;  %v9254_v43 = vld [vmem:[%s13961_s9] ss:$0 sm:$0xff] }
 0xce1   :  { %v6332_v63 = vpop.xlane.xlu1 %6331 }
 0xce2   :  { %10772 = vrcp.f32 %v6332_v63 }
 0xce5   :  { %v6497_v9 = vpop.xlane.xlu0 %6496  ;;  %v6501_v40 = vpop.permute.xlu1 %6500 }
 0xce6   :  { %10774 = vrcp.f32 %v6497_v9  ;;  %v9255_v9 = vld [vmem:[%s13962_s14] ss:$0 sm:$0xff] }
 0xce8   :  { %v10771_v33 = vpop.eup %10770 }
 0xce9   :  { %v6168_v56 = vmul.f32 %v10771_v33, %v10765_v15  ;;  %v6336_v29 = vpop.permute.xlu0 %6335  ;;  %v5804_v15 = vld [vmem:[#allocation12 + $0x38] sm:$0xff] }
 0xcea   :  { %v10229_v58 = vpack.c.bf16 %v5804_v15, %v5803_v4  ;;  %v6883_v4 = vld [vmem:[#allocation20 + $0x78] sm:$0xff]  ;;  %v10253_v15 = vpack.c.bf16 %v6878_v55, %v6876_v1 }
 0xceb   :  { %9967 = vmatmul.mubr.msk.f32.vlgmr.msra.gmra.mrb[68].mxu0 %vm5995_vm3, %v6168_v56 }
 0xcec   :  { %v10773_v54 = vpop.eup %10772  ;;  %9975 = vmatpush3.msra.mxu0 %v6336_v29  ;;  %9976 = vmatprep.mubr.msk.f32.mxu0 %vm11427_vm0, %v13959_v20  ;;  %v5806_v29 = vld [vmem:[#allocation14] sm:$0xff] }
 0xced   :  { %v6334_v14 = vmul.f32 %v10773_v54, %v10767_v59  ;;  %9984 = vmatprep.subr.mxu0 %v13959_v20  ;;  %v5807_v54 = vld [vmem:[#allocation14 + $0x8] sm:$0xff] }
 0xcef   :  { %9977 = vmatmul.mubr.msk.f32.vlgmr.msra.gmra.mrb[70].mxu0 %vm5995_vm3, %v6334_v14  ;;  %v5808_v14 = vld [vmem:[#allocation14 + $0x10] sm:$0xff] }
 0xcf0   :  { %v10775_v60 = vpop.eup %10774  ;;  %9985 = vmatpush3.msra.mxu0 %v6501_v40  ;;  %9986 = vmatprep.mubr.msk.f32.mxu0 %vm11427_vm0, %v13959_v20  ;;  %v10232_v40 = vpack.c.bf16 %v5807_v54, %v5806_v29  ;;  %v9261_v29 = vld [vmem:[#allocation18] ss:$0 sm:$0xff] }
 0xcf1   :  { %v6499_v11 = vmul.f32 %v10775_v60, %v10769_v30  ;;  %10219 = vmatprep.subr.bf16.mxu0 %v11433_v25  ;;  %v5809_v60 = vld [vmem:[#allocation14 + $0x18] sm:$0xff] }
 0xcf3   :  { %9987 = vmatmul.mubr.msk.f32.vlgmr.msra.gmra.mrb[72].mxu0 %vm5995_vm3, %v6499_v11  ;;  %v10235_v11 = vpack.c.bf16 %v5809_v60, %v5808_v14 }
 0xcf4   :  { %10024 = vmatprep.mubr.msk.f32.mxu0 %vm11427_vm0, %v13959_v20  ;;  %10221 = vmatpush3.bf16.msra.mxu0 %v10220_v46  ;;  %v6879_v46 = vld [vmem:[#allocation20 + $0x58] sm:$0xff] }
 0xcf5   :  { %10222 = vmatprep.subr.bf16.mxu0 %v11433_v25 }
 0xdbe   :  { %v6242_v7 = vpop.f32.mrb[68].mxu0 }
 0xdbf   :  { %6577 = vrot.lane.b32.xlu1 %v6242_v7, %s11402_s13  ;;  %v9968_v24 = vpop.f32.mrb[69].mxu0 }
 0xdc2   :  { %v6407_v27 = vpop.f32.mrb[70].mxu0 }
 0xdc3   :  { %6581 = vrot.lane.b32.xlu0 %v6407_v27, %s11429_s7  ;;  %v9978_v2 = vpop.f32.mrb[71].mxu0 }
 0xdc4   :  { %v9259_v2 = vld [vmem:[#allocation15] ss:$0 sm:$0xff] }
 0xdc6   :  { %v6572_v39 = vpop.f32.mrb[72].mxu0 }
 0xdc7   :  { %6585 = vrot.lane.b32.xlu1 %v6572_v39, %s11430_s0  ;;  %v9988_v41 = vpop.f32.mrb[73].mxu0 }
 0xe31   :  { %v6578_v23 = vpop.permute.xlu1 %6577 }
 0xe32   :  { %v6588_v48 = vsel %vm5920_vm2, %v13287_v42, %v6578_v23 }
 0xe35   :  { %v6582_v51 = vpop.permute.xlu0 %6581 }
 0xe36   :  { %v6590_v21 = vsel %vm6589_vm4, %v6588_v48, %v6582_v51 }
 0xe39   :  { %v6586_v50 = vpop.permute.xlu1 %6585 }
 0xe3a   :  { %v6592_v8 = vsel %vm6591_vm5, %v6590_v21, %v6586_v50 }
 0xe3b   :  { %10006 = vmatmul.mubr.msk.f32.vlgmr.msra.gmra.mrb[72].mxu1 %vm803_vm1, %v6592_v8 }
 0xe3c   :  { %10043 = vmatprep.mubr.msk.f32.mxu1 %vm11427_vm0, %v13959_v20  ;;  %10233 = vmatpush3.bf16.msra.mxu1 %v10232_v40 }
 0xe3d   :  { %10234 = vmatprep.subr.bf16.mxu1 %v11433_v25 }
 0xe40   :  { %10236 = vmatpush3.bf16.msra.mxu1 %v10235_v11 }
 0xe41   :  { %10237 = vmatprep.subr.bf16.mxu1 %v11433_v25 }
 0xe44   :  { %10239 = vmatpush3.bf16.msra.mxu1 %v10238_v34 }
 0xe45   :  { %10240 = vmatprep.subr.bf16.mxu1 %v11433_v25 }
 0xe48   :  { %10242 = vmatpush3.bf16.msra.mxu1 %v10241_v6 }
 0xe49   :  { %10046 = vmatprep.subr.mxu1 %v13959_v20 }
 0xf0e   :  { %v6662_v38 = vpop.f32.mrb[72].mxu1 }
 0xf0f   :  { %v6666_v28 = vadd.f32 %v6662_v38, %v13240_v36  ;;  %v10007_v26 = vpop.f32.mrb[73].mxu1  ;;  %v5800_v36 = vld [vmem:[#allocation12 + $0x18] sm:$0xff] }
 0xf10   :  { %v10223_v16 = vpack.c.bf16 %v5800_v36, %v5799_v5  ;;  %v6871_v26 = vld [vmem:[#allocation20 + $0x18] sm:$0xff]  ;;  %v6877_v5 = vld [vmem:[#allocation20 + $0x48] sm:$0xff]  ;;  %v10249_v36 = vpack.c.bf16 %v6874_v45, %v6872_v10 }
 0xf11   :  { %v13330_v12 = vadd.f32 %v9253_v31, %v6666_v28  ;;  %v6869_v28 = vld [vmem:[#allocation20 + $0x8] sm:$0xff] }
 0xf12   :  { %10224 = vmatpush3.bf16.msra.mxu0 %v10223_v16  ;;  %v10251_v16 = vpack.c.bf16 %v6879_v46, %v6877_v5 }
 0xf13   :  { %v6674_v42 = vsel %vm803_vm1, %v13330_v12, 0.0  ;;  %10225 = vmatprep.subr.bf16.mxu0 %v11433_v25 }
 0xf14   :  { %6675 = vadd.xlane.f32.xlu0 %v6674_v42  ;;  %v6868_v42 = vld [vmem:[#allocation20] sm:$0xff] }
 0xf16   :  { %10227 = vmatpush3.bf16.msra.mxu0 %v10226_v44  ;;  %v6881_v44 = vld [vmem:[#allocation20 + $0x68] sm:$0xff] }
 0xf17   :  { %10228 = vmatprep.subr.bf16.mxu0 %v11433_v25 }
 0xf1a   :  { %10230 = vmatpush3.bf16.msra.mxu0 %v10229_v58  ;;  %v10255_v58 = vpack.c.bf16 %v6883_v4, %v6881_v44 }
 0xfa1   :  { %v6676_v3 = vpop.xlane.xlu0 %6675 }
 0xfa2   :  { %v6677_v19 = vmul.f32 0.015625, %v6676_v3  ;;  %v10243_v3 = vpack.c.bf16 %v6871_v26, %v6869_v28 }
 0xfa4   :  { %v6678_v13 = vsub.f32 %v13330_v12, %v6677_v19  ;;  %v6873_v19 = vld [vmem:[#allocation20 + $0x28] sm:$0xff]  ;;  %10244 = vmatprep.subr.bf16.mxu0 %v10243_v3 }
 0xfa6   :  { %v6679_v18 = vmul.f32 %v6678_v13, %v6678_v13 }
 0xfa8   :  { %v6680_v0 = vsel %vm803_vm1, %v6679_v18, 0.0 }
 0xfa9   :  { %6681 = vadd.xlane.f32.xlu1 %v6680_v0 }
0x1036   :  { %v6682_v59 = vpop.xlane.xlu1 %6681 }
0x1037   :  { %v6683_v47 = vmul.f32 0.015625, %v6682_v59  ;;  %v6880_v59 = vld [vmem:[#allocation20 + $0x60] sm:$0xff] }
0x1039   :  { %v6684_v30 = vadd.f32 1e-05, %v6683_v47  ;;  %v6882_v47 = vld [vmem:[#allocation20 + $0x70] sm:$0xff] }
0x103b   :  { %10776 = vrsqrt.f32 %v6684_v30  ;;  %v10257_v30 = vpack.c.bf16 %v6882_v47, %v6880_v59 }
0x1045   :  { %v10777_v37 = vpop.eup %10776 }
0x1046   :  { %v6686_v63 = vmul.f32 %v10777_v37, %v6678_v13  ;;  %v6875_v13 = vld [vmem:[#allocation20 + $0x38] sm:$0xff] }
0x1047   :  { %v10247_v0 = vpack.c.bf16 %v6875_v13, %v6873_v19 }
0x1048   :  { %v6693_v33 = vmul.f32 %v9254_v43, %v6686_v63 }
0x104a   :  { %v6700_v56 = vadd.f32 %v9255_v9, %v6693_v33  ;;  %v9260_v33 = vld [vmem:[#allocation17] ss:$0 sm:$0xff] }
0x104c   :  { %10025 = vmatmul.mubr.msk.f32.vlgmr.msra.gmra.mrb[74].mxu0 %vm803_vm1, %v6700_v56 }
0x104d   :  { %7007 = vmatprep.mubr.f32.mxu0 %v13959_v20 }
0x111f   :  { %v6776_v32 = vpop.f32.mrb[74].mxu0 }
0x1120   :  { %v6777_v62 = vadd.f32 %v9256_v52, %v6776_v32  ;;  %v10026_v35 = vpop.f32.mrb[75].mxu0 }
0x1122   :  { %v6781_v57 = vmul.f32 0.70710677, %v6777_v62  ;;  %v6780_v7 = vmul.f32 0.5, %v6777_v62 }
0x1124   :  { %10778 = verf.f32 %v6781_v57 }
0x112e   :  { %v10779_v17 = vpop.eup %10778 }
0x112f   :  { %v6783_v24 = vadd.f32 1.0, %v10779_v17 }
0x1131   :  { %v6784_v27 = vmul.f32 %v6783_v24, %v6780_v7 }
0x1133   :  { %10044 = vmatmul.mubr.msk.f32.vlgmr.msra.gmra.mrb[74].mxu1 %vm803_vm1, %v6784_v27 }
0x1134   :  { %10048 = vmatprep.mubr.msk.f32.mxu1 %vm11427_vm0, %v13959_v20 }
0x1206   :  { %v6854_v39 = vpop.f32.mrb[74].mxu1 }
0x1207   :  { %v6858_v41 = vadd.f32 %v6854_v39, %v13330_v12  ;;  %v10045_v23 = vpop.f32.mrb[75].mxu1  ;;  %v6870_v12 = vld [vmem:[#allocation20 + $0x10] sm:$0xff] }
0x1208   :  { %v10245_v18 = vpack.c.bf16 %v6870_v12, %v6868_v42 }
0x1209   :  { %v13352_v51 = vadd.f32 %v9259_v2, %v6858_v41 }
0x120a   :  { %10246 = vmatpush1.bf16.msra.mxu0 %v10245_v18 }
0x120b   :  { %v6913_v48 = vsel %vm803_vm1, %v13352_v51, 0.0  ;;  %10248 = vmatprep.subr.bf16.mxu0 %v10247_v0 }
0x120c   :  { %6914 = vadd.xlane.f32.xlu0 %v6913_v48 }
0x120e   :  { %10250 = vmatpush1.bf16.msra.mxu0 %v10249_v36 }
0x120f   :  { %10252 = vmatprep.subr.bf16.mxu0 %v10251_v16 }
0x1212   :  { %10254 = vmatpush1.bf16.msra.mxu0 %v10253_v15 }
0x1213   :  { %10256 = vmatprep.subr.bf16.mxu0 %v10255_v58 }
0x1216   :  { %10258 = vmatpush1.bf16.msra.mxu0 %v10257_v30 }
0x1217   :  { %10051 = vmatprep.subr.mxu0 %v13959_v20 }
0x1299   :  { %v6915_v21 = vpop.xlane.xlu0 %6914 }
0x129a   :  { %v6916_v50 = vmul.f32 0.015625, %v6915_v21 }
0x129c   :  { %v6917_v8 = vsub.f32 %v13352_v51, %v6916_v50 }
0x129e   :  { %v6918_v31 = vmul.f32 %v6917_v8, %v6917_v8 }
0x12a0   :  { %v6919_v38 = vsel %vm803_vm1, %v6918_v31, 0.0 }
0x12a1   :  { %6920 = vadd.xlane.f32.xlu0 %v6919_v38 }
0x132e   :  { %v6921_v37 = vpop.xlane.xlu0 %6920 }
0x132f   :  { %v6922_v43 = vmul.f32 0.015625, %v6921_v37 }
0x1331   :  { %v6923_v63 = vadd.f32 1e-05, %v6922_v43 }
0x1333   :  { %10780 = vrsqrt.f32 %v6923_v63 }
0x133d   :  { %v10781_v9 = vpop.eup %10780 }
0x133e   :  { %v6925_v56 = vmul.f32 %v10781_v9, %v6917_v8 }
0x1340   :  { %v6932_v54 = vmul.f32 %v9260_v33, %v6925_v56  ;;  %v6884_v33 = vld [vmem:[#allocation21] sm:$0xff]  ;;  %v6885_v56 = vld [vmem:[#allocation21 + $0x8] sm:$0xff] }
0x1342   :  { %v6939_v14 = vadd.f32 %v9261_v29, %v6932_v54  ;;  %v6886_v29 = vld [vmem:[#allocation21 + $0x10] sm:$0xff]  ;;  %v10260_v54 = vpack.c.bf16 %v6885_v56, %v6884_v33  ;;  %v6907_v33 = vld [vmem:[#allocation29 + $0x18] sm:$0xff] }
0x1343   :  { %v7959_v56 = vld [vmem:[#allocation6] sm:$0xff] }
0x1344   :  { %9262 = vmatmul.mubr.msk.f32.vlgmr.msra.gmra.mrb[76].mxu0 %vm803_vm1, %v6939_v14  ;;  %v6887_v14 = vld [vmem:[#allocation21 + $0x18] sm:$0xff] }
0x1345   :  { %10053 = vmatprep.mubr.msk.f32.mxu0 %vm11427_vm0, %v13959_v20 }
0x1417   :  { %v7009_v40 = vpop.f32.mrb[76].mxu0 }
0x1418   :  { %7177 = vrot.lane.b32.xlu0 %v7009_v40, %s11430_s0  ;;  %7015 = vrot.lane.b32.xlu1 %v7009_v40, %s11414_s16  ;;  %v13364_v60 = vpop.f32.mrb[77].mxu0 }
0x1419   :  { %10052 = vmatpush3.msra.mxu0 %v13364_v60 }
0x141a   :  { %10061 = vmatprep.subr.mxu0 %v13959_v20 }
0x141c   :  { %7341 = vrot.lane.b32.xlu0 %v7009_v40, %s11431_s5  ;;  %7175 = vrot.lane.b32.xlu1 %v7009_v40, %s11428_s15 }
0x1420   :  { %7506 = vrot.lane.b32.xlu0 %v7009_v40, %s11432_s19  ;;  %7343 = vrot.lane.b32.xlu1 %v7009_v40, %s11429_s7 }
0x1424   :  { %7508 = vrot.lane.b32.xlu1 %v7009_v40, %s11402_s13 }
0x148a   :  { %v7016_v11 = vpop.permute.xlu1 %7015  ;;  %v7178_v53 = vpop.permute.xlu0 %7177 }
0x148b   :  { %10047 = vmatpush3.xpose.msk.msra.mxu1 %vm5920_vm2, %v7016_v11  ;;  %v6888_v11 = vld [vmem:[#allocation21 + $0x20] sm:$0xff] }
0x148c   :  { %10056 = vmatprep.subr.mxu1 %v13959_v20 }
0x148e   :  { %10049 = vmatmul.mubr.msk.f32.vlgmr.msra.gmra.mrb[76].mxu1 %vm5920_vm2, %v7009_v40  ;;  %v7176_v61 = vpop.permute.xlu1 %7175  ;;  %v7342_v22 = vpop.permute.xlu0 %7341  ;;  %v10263_v40 = vpack.c.bf16 %v6887_v14, %v6886_v29  ;;  %v6908_v14 = vld [vmem:[#allocation29 + $0x20] sm:$0xff] }
0x148f   :  { %10057 = vmatpush3.xpose.msk.msra.mxu1 %vm5920_vm2, %v7178_v53  ;;  %10058 = vmatprep.mubr.msk.f32.mxu1 %vm11427_vm0, %v13959_v20  ;;  %v6889_v53 = vld [vmem:[#allocation21 + $0x28] sm:$0xff] }
0x1490   :  { %10066 = vmatprep.subr.mxu1 %v13959_v20 }
0x1492   :  { %10059 = vmatmul.mubr.msk.f32.vlgmr.msra.gmra.mrb[78].mxu1 %vm5920_vm2, %v7176_v61  ;;  %v7344_v34 = vpop.permute.xlu1 %7343  ;;  %v7507_v6 = vpop.permute.xlu0 %7506 }
0x1493   :  { %10067 = vmatpush3.xpose.msk.msra.mxu1 %vm5920_vm2, %v7344_v34  ;;  %10068 = vmatprep.mubr.msk.f32.mxu1 %vm11427_vm0, %v13959_v20  ;;  %v10266_v34 = vpack.c.bf16 %v6889_v53, %v6888_v11  ;;  %v6910_v11 = vld [vmem:[#allocation29 + $0x30] sm:$0xff]  ;;  %v6911_v53 = vld [vmem:[#allocation29 + $0x38] sm:$0xff] }
0x1494   :  { %10076 = vmatprep.subr.mxu1 %v13959_v20 }
0x1496   :  { %10069 = vmatmul.mubr.msk.f32.vlgmr.msra.gmra.mrb[80].mxu1 %vm5920_vm2, %v7342_v22  ;;  %v7509_v49 = vpop.permute.xlu1 %7508 }
0x1497   :  { %10077 = vmatpush3.xpose.msk.msra.mxu1 %vm5920_vm2, %v7509_v49  ;;  %10078 = vmatprep.mubr.msk.f32.mxu1 %vm11427_vm0, %v13959_v20  ;;  %v6890_v49 = vld [vmem:[#allocation21 + $0x30] sm:$0xff] }
0x1498   :  { %10259 = vmatprep.subr.bf16.mxu1 %v11433_v25 }
0x149a   :  { %10079 = vmatmul.mubr.msk.f32.vlgmr.msra.gmra.mrb[82].mxu1 %vm5920_vm2, %v7507_v6  ;;  %v6891_v6 = vld [vmem:[#allocation21 + $0x38] sm:$0xff] }
0x149b   :  { %10102 = vmatprep.mubr.msk.f32.mxu1 %vm11427_vm0, %v13959_v20  ;;  %10261 = vmatpush3.bf16.msra.mxu1 %v10260_v54  ;;  %v7960_v54 = vsel %vm5995_vm3, %v7959_v56, 0.0 }
0x149c   :  { %10262 = vmatprep.subr.bf16.mxu1 %v11433_v25 }
0x149f   :  { %10264 = vmatpush3.bf16.msra.mxu1 %v10263_v40  ;;  %v6909_v40 = vld [vmem:[#allocation29 + $0x28] sm:$0xff] }
0x14a0   :  { %10265 = vmatprep.subr.bf16.mxu1 %v11433_v25 }
0x14a3   :  { %10267 = vmatpush3.bf16.msra.mxu1 %v10266_v34  ;;  %v9279_v34 = vld [vmem:[#allocation27] ss:$0 sm:$0xff] }
0x14a4   :  { %10268 = vmatprep.subr.bf16.mxu1 %v11433_v25 }
0x1561   :  { %v7087_v52 = vpop.f32.mrb[76].mxu1 }
0x1562   :  { %v10050_v32 = vpop.f32.mrb[77].mxu1  ;;  %v7091_v62 = vsel %vm5995_vm3, %v7087_v52, -inf }
0x1563   :  { %7092 = vmax.xlane.f32.xlu1 %v7091_v62  ;;  %v10269_v32 = vpack.c.bf16 %v6891_v6, %v6890_v49 }
0x1565   :  { %v7249_v35 = vpop.f32.mrb[78].mxu1  ;;  %10270 = vmatpush3.bf16.msra.mxu1 %v10269_v32 }
0x1566   :  { %v10060_v57 = vpop.f32.mrb[79].mxu1  ;;  %v7253_v17 = vsel %vm5995_vm3, %v7249_v35, -inf  ;;  %10283 = vmatprep.subr.bf16.mxu1 %v11433_v25 }
0x1567   :  { %7254 = vmax.xlane.f32.xlu0 %v7253_v17 }
0x1569   :  { %v7415_v7 = vpop.f32.mrb[80].mxu1 }
0x156a   :  { %v10070_v24 = vpop.f32.mrb[81].mxu1  ;;  %v7419_v27 = vsel %vm5995_vm3, %v7415_v7, -inf }
0x156b   :  { %7420 = vmax.xlane.f32.xlu0 %v7419_v27 }
0x156d   :  { %v7580_v2 = vpop.f32.mrb[82].mxu1 }
0x156e   :  { %v10080_v39 = vpop.f32.mrb[83].mxu1  ;;  %v7584_v41 = vsel %vm5995_vm3, %v7580_v2, -inf }
0x156f   :  { %7585 = vmax.xlane.f32.xlu1 %v7584_v41 }
0x15f0   :  { %v7093_v23 = vpop.xlane.xlu1 %7092 }
0x15f1   :  { %v7094_v48 = vsub.f32 %v7087_v52, %v7093_v23  ;;  %v9276_v23 = vld [vmem:[#allocation23] ss:$0 sm:$0xff] }
0x15f3   :  { %v7095_v21 = vmul.f32 1.442695, %v7094_v48 }
0x15f4   :  { %v7255_v50 = vpop.xlane.xlu0 %7254 }
0x15f5   :  { %10782 = vpow2.f32 %v7095_v21  ;;  %v7256_v8 = vsub.f32 %v7249_v35, %v7255_v50 }
0x15f7   :  { %v7257_v31 = vmul.f32 1.442695, %v7256_v8 }
0x15f8   :  { %v7421_v38 = vpop.xlane.xlu0 %7420 }
0x15f9   :  { %10784 = vpow2.f32 %v7257_v31  ;;  %v7422_v28 = vsub.f32 %v7415_v7, %v7421_v38 }
0x15fb   :  { %v7423_v26 = vmul.f32 1.442695, %v7422_v28 }
0x15fc   :  { %v7586_v0 = vpop.xlane.xlu1 %7585 }
0x15fd   :  { %10786 = vpow2.f32 %v7423_v26  ;;  %v7587_v10 = vsub.f32 %v7580_v2, %v7586_v0 }
0x15ff   :  { %v10783_v42 = vpop.eup %10782  ;;  %v7588_v45 = vmul.f32 1.442695, %v7587_v10 }
0x1600   :  { %v7097_v3 = vsel %vm5995_vm3, %v10783_v42, 0.0 }
0x1601   :  { %7098 = vadd.xlane.f32.xlu0 %v7097_v3  ;;  %10788 = vpow2.f32 %v7588_v45 }
0x1603   :  { %v10785_v12 = vpop.eup %10784 }
0x1604   :  { %v7259_v19 = vsel %vm5995_vm3, %v10785_v12, 0.0 }
0x1605   :  { %7260 = vadd.xlane.f32.xlu1 %v7259_v19 }
0x1607   :  { %v10787_v13 = vpop.eup %10786 }
0x1608   :  { %v7425_v18 = vsel %vm5995_vm3, %v10787_v13, 0.0 }
0x1609   :  { %7426 = vadd.xlane.f32.xlu0 %v7425_v18 }
0x160b   :  { %v10789_v5 = vpop.eup %10788 }
0x160c   :  { %v7590_v46 = vsel %vm5995_vm3, %v10789_v5, 0.0 }
0x1616   :  { %7430 = vrot.lane.b32.xlu1 %v13364_v60, %s11431_s5 }
0x161f   :  { %7265 = vrot.lane.b32.xlu0 %v13364_v60, %s11428_s15 }
0x163a   :  { %7591 = vadd.xlane.f32.xlu1 %v7590_v46 }
0x164b   :  { %7595 = vrot.lane.b32.xlu1 %v13364_v60, %s11432_s19 }
0x168e   :  { %v7099_v36 = vpop.xlane.xlu0 %7098 }
0x168f   :  { %10790 = vrcp.f32 %v7099_v36 }
0x1692   :  { %v7261_v16 = vpop.xlane.xlu1 %7260 }
0x1693   :  { %10792 = vrcp.f32 %v7261_v16 }
0x1696   :  { %v7427_v1 = vpop.xlane.xlu0 %7426  ;;  %v7431_v59 = vpop.permute.xlu1 %7430 }
0x1697   :  { %10794 = vrcp.f32 %v7427_v1 }
0x1699   :  { %v10791_v55 = vpop.eup %10790 }
0x169a   :  { %v7101_v44 = vmul.f32 %v10791_v55, %v10783_v42  ;;  %v7266_v4 = vpop.permute.xlu0 %7265 }
0x169c   :  { %10054 = vmatmul.mubr.msk.f32.vlgmr.msra.gmra.mrb[78].mxu0 %vm5995_vm3, %v7101_v44 }
0x169d   :  { %v10793_v15 = vpop.eup %10792  ;;  %10062 = vmatpush3.msra.mxu0 %v7266_v4  ;;  %10063 = vmatprep.mubr.msk.f32.mxu0 %vm11427_vm0, %v13959_v20 }
0x169e   :  { %v7263_v58 = vmul.f32 %v10793_v15, %v10785_v12  ;;  %10071 = vmatprep.subr.mxu0 %v13959_v20  ;;  %v9277_v15 = vld [vmem:[#allocation24] ss:$0 sm:$0xff] }
0x16a0   :  { %10064 = vmatmul.mubr.msk.f32.vlgmr.msra.gmra.mrb[80].mxu0 %vm5995_vm3, %v7263_v58 }
0x16a1   :  { %v10795_v47 = vpop.eup %10794  ;;  %10072 = vmatpush3.msra.mxu0 %v7431_v59  ;;  %10073 = vmatprep.mubr.msk.f32.mxu0 %vm11427_vm0, %v13959_v20  ;;  %v9278_v59 = vld [vmem:[#allocation26] ss:$0 sm:$0xff] }
0x16a2   :  { %v7429_v30 = vmul.f32 %v10795_v47, %v10787_v13  ;;  %10081 = vmatprep.subr.mxu0 %v13959_v20 }
0x16a4   :  { %10074 = vmatmul.mubr.msk.f32.vlgmr.msra.gmra.mrb[82].mxu0 %vm5995_vm3, %v7429_v30 }
0x16a5   :  { %10083 = vmatprep.mubr.msk.f32.mxu0 %vm11427_vm0, %v13959_v20 }
0x16c7   :  { %v7592_v37 = vpop.xlane.xlu1 %7591 }
0x16c8   :  { %10796 = vrcp.f32 %v7592_v37  ;;  %v6904_v37 = vld [vmem:[#allocation29] sm:$0xff] }
0x16cb   :  { %v7596_v43 = vpop.permute.xlu1 %7595 }
0x16cc   :  { %10082 = vmatpush3.msra.mxu0 %v7596_v43  ;;  %v6905_v43 = vld [vmem:[#allocation29 + $0x8] sm:$0xff] }
0x16cd   :  { %10271 = vmatprep.subr.bf16.mxu0 %v11433_v25 }
0x16d2   :  { %v10797_v63 = vpop.eup %10796 }
0x16d3   :  { %v7594_v9 = vmul.f32 %v10797_v63, %v10789_v5  ;;  %v6906_v63 = vld [vmem:[#allocation29 + $0x10] sm:$0xff] }
0x16d4   :  { %v10287_v29 = vpack.c.bf16 %v6907_v33, %v6906_v63  ;;  %v8307_v33 = vld [vmem:[%s13966_s11 + $0x60] sm:$0xff] }
0x16d5   :  { %10084 = vmatmul.mubr.msk.f32.vlgmr.msra.gmra.mrb[84].mxu0 %vm5995_vm3, %v7594_v9  ;;  %v10284_v9 = vpack.c.bf16 %v6905_v43, %v6904_v37  ;;  %v8308_v37 = vld [vmem:[%s13966_s11 + $0x68] sm:$0xff]  ;;  %v8310_v43 = vld [vmem:[%s13966_s11 + $0x78] sm:$0xff] }
0x16d6   :  { %10121 = vmatprep.mubr.msk.f32.mxu0 %vm11427_vm0, %v13959_v20 }
0x176f   :  { %v7171_v60 = vpop.f32.mrb[78].mxu0 }
0x1770   :  { %v10055_v61 = vpop.f32.mrb[79].mxu0 }
0x1771   :  { %v10293_v61 = vpack.c.bf16 %v6911_v53, %v6910_v11 }
0x1773   :  { %v7337_v22 = vpop.f32.mrb[80].mxu0 }
0x1774   :  { %7672 = vrot.lane.b32.xlu0 %v7337_v22, %s11402_s13  ;;  %v10065_v52 = vpop.f32.mrb[81].mxu0  ;;  %s13964_s13 = sld [smem:[#allocation74_spill]] }
0x1777   :  { %v7502_v62 = vpop.f32.mrb[82].mxu0 }
0x1778   :  { %7676 = vrot.lane.b32.xlu1 %v7502_v62, %s11429_s7  ;;  %v10075_v35 = vpop.f32.mrb[83].mxu0 }
0x177a   :  { %v6896_v12 = vld [vmem:[%s13964_s13 + $0x8] sm:$0xff]  ;;  %v6897_v19 = vld [vmem:[%s13964_s13 + $0x10] sm:$0xff]  ;;  %v6898_v18 = vld [vmem:[%s13964_s13 + $0x18] sm:$0xff] }
0x177b   :  { %v10275_v0 = vpack.c.bf16 %v6898_v18, %v6897_v19  ;;  %v6899_v10 = vld [vmem:[%s13964_s13 + $0x20] sm:$0xff]  ;;  %v6900_v45 = vld [vmem:[%s13964_s13 + $0x28] sm:$0xff]  ;;  %v6901_v46 = vld [vmem:[%s13964_s13 + $0x30] sm:$0xff] }
0x177c   :  { %v10278_v5 = vpack.c.bf16 %v6900_v45, %v6899_v10  ;;  %v6902_v36 = vld [vmem:[%s13964_s13 + $0x38] sm:$0xff]  ;;  %v8296_v18 = vld [vmem:[%s13966_s11 + $0x8] sm:$0xff]  ;;  %v8295_v10 = vld [vmem:[%s13966_s11] sm:$0xff] }
0x177d   :  { %v10281_v16 = vpack.c.bf16 %v6902_v36, %v6901_v46  ;;  %v8300_v46 = vld [vmem:[%s13966_s11 + $0x28] sm:$0xff]  ;;  %v8302_v36 = vld [vmem:[%s13966_s11 + $0x38] sm:$0xff] }
0x17a8   :  { %v7667_v57 = vpop.f32.mrb[84].mxu0 }
0x17a9   :  { %7680 = vrot.lane.b32.xlu0 %v7667_v57, %s11430_s0  ;;  %v10085_v17 = vpop.f32.mrb[85].mxu0 }
0x17e6   :  { %v7673_v7 = vpop.permute.xlu0 %7672 }
0x17e7   :  { %v7683_v27 = vsel %vm5920_vm2, %v7171_v60, %v7673_v7  ;;  %v10290_v60 = vpack.c.bf16 %v6909_v40, %v6908_v14 }
0x17ea   :  { %v7677_v24 = vpop.permute.xlu1 %7676 }
0x17eb   :  { %v7684_v2 = vsel %vm6589_vm4, %v7683_v27, %v7677_v24  ;;  %v9282_v24 = vld [vmem:[%s13965_s20] ss:$0 sm:$0xff] }
0x181b   :  { %v7681_v39 = vpop.permute.xlu0 %7680 }
0x181c   :  { %v7685_v41 = vsel %vm6591_vm5, %v7684_v2, %v7681_v39  ;;  %v7965_v2 = vld [vmem:[#allocation30] sm:$0xff]  ;;  %v7966_v39 = vld [vmem:[#allocation30 + $0x8] sm:$0xff] }
0x181d   :  { %10103 = vmatmul.mubr.msk.f32.vlgmr.msra.gmra.mrb[84].mxu1 %vm803_vm1, %v7685_v41 }
0x181e   :  { %10140 = vmatprep.mubr.msk.f32.mxu1 %vm11427_vm0, %v13959_v20  ;;  %10285 = vmatpush3.bf16.msra.mxu1 %v10284_v9  ;;  %v13510_v9 = vpack.c.bf16 %v8310_v43, %v8308_v37 }
0x181f   :  { %10286 = vmatprep.subr.bf16.mxu1 %v11433_v25 }
0x1822   :  { %10288 = vmatpush3.bf16.msra.mxu1 %v10287_v29  ;;  %v8312_v29 = vld [vmem:[%s13966_s11 + $0x88] sm:$0xff] }
0x1823   :  { %10289 = vmatprep.subr.bf16.mxu1 %v11433_v25 }
0x1826   :  { %10291 = vmatpush3.bf16.msra.mxu1 %v10290_v60 }
0x1827   :  { %10292 = vmatprep.subr.bf16.mxu1 %v11433_v25 }
0x182a   :  { %10294 = vmatpush3.bf16.msra.mxu1 %v10293_v61 }
0x182b   :  { %10167 = vmatprep.subr.mxu1 %v13959_v20 }
0x18f0   :  { %v7755_v48 = vpop.f32.mrb[84].mxu1 }
0x18f1   :  { %v7759_v21 = vadd.f32 %v7755_v48, %v13352_v51  ;;  %v10104_v50 = vpop.f32.mrb[85].mxu1  ;;  %v6895_v51 = vld [vmem:[%s13964_s13] sm:$0xff] }
0x18f2   :  { %v10272_v13 = vpack.c.bf16 %v6896_v12, %v6895_v51  ;;  %v10296_v50 = vpack.c.bf16 %v7966_v39, %v7965_v2  ;;  %v7972_v51 = vld [vmem:[#allocation30 + $0x38] sm:$0xff]  ;;  %v8319_v2 = vld [vmem:[%s13966_s11 + $0xc0] sm:$0xff] }
0x18f3   :  { %v13436_v8 = vadd.f32 %v9276_v23, %v7759_v21  ;;  %v8321_v39 = vld [vmem:[%s13966_s11 + $0xd0] sm:$0xff] }
0x18f4   :  { %10273 = vmatpush3.bf16.msra.mxu0 %v10272_v13 }
0x18f5   :  { %v7767_v31 = vsel %vm803_vm1, %v13436_v8, 0.0  ;;  %10274 = vmatprep.subr.bf16.mxu0 %v11433_v25 }
0x18f6   :  { %7768 = vadd.xlane.f32.xlu1 %v7767_v31  ;;  %v7967_v31 = vld [vmem:[#allocation30 + $0x10] sm:$0xff] }
0x18f8   :  { %10276 = vmatpush3.bf16.msra.mxu0 %v10275_v0  ;;  %v8298_v0 = vld [vmem:[%s13966_s11 + $0x18] sm:$0xff] }
0x18f9   :  { %10277 = vmatprep.subr.bf16.mxu0 %v11433_v25  ;;  %v13482_v45 = vpack.c.bf16 %v8298_v0, %v8296_v18  ;;  %v8130_v18 = vld [vmem:[#allocation32 + $0x18] sm:$0xff] }
0x18fc   :  { %10279 = vmatpush3.bf16.msra.mxu0 %v10278_v5  ;;  %v8297_v5 = vld [vmem:[%s13966_s11 + $0x10] sm:$0xff] }
0x18fd   :  { %10280 = vmatprep.subr.bf16.mxu0 %v11433_v25 }
0x1900   :  { %10282 = vmatpush3.bf16.msra.mxu0 %v10281_v16  ;;  %v13487_v16 = vpack.c.bf16 %v8297_v5, %v8295_v10  ;;  %v8131_v10 = vld [vmem:[#allocation32 + $0x20] sm:$0xff]  ;;  %v8132_v5 = vld [vmem:[#allocation32 + $0x28] sm:$0xff] }
0x1901   :  { %10143 = vmatprep.subr.mxu0 %v13959_v20 }
0x1983   :  { %v7769_v38 = vpop.xlane.xlu1 %7768 }
0x1984   :  { %v7770_v28 = vmul.f32 0.015625, %v7769_v38  ;;  %v7968_v38 = vld [vmem:[#allocation30 + $0x18] sm:$0xff] }
0x1986   :  { %v7771_v26 = vsub.f32 %v13436_v8, %v7770_v28  ;;  %v10299_v28 = vpack.c.bf16 %v7968_v38, %v7967_v31  ;;  %v8323_v31 = vld [vmem:[%s13966_s11 + $0xe0] sm:$0xff]  ;;  %v8325_v38 = vld [vmem:[%s13966_s11 + $0xf0] sm:$0xff] }
0x1988   :  { %v7772_v42 = vmul.f32 %v7771_v26, %v7771_v26 }
0x198a   :  { %v7773_v3 = vsel %vm803_vm1, %v7772_v42, 0.0 }
0x198b   :  { %7774 = vadd.xlane.f32.xlu0 %v7773_v3  ;;  %v7971_v3 = vld [vmem:[#allocation30 + $0x30] sm:$0xff] }
0x198c   :  { %v10305_v12 = vpack.c.bf16 %v7972_v51, %v7971_v3  ;;  %v8128_v3 = vld [vmem:[#allocation32 + $0x8] sm:$0xff] }
0x198f   :  { %7961 = vadd.xlane.f32.xlu0 %v7960_v54  ;;  %v8314_v54 = vld [vmem:[%s13966_s11 + $0x98] sm:$0xff] }
0x1990   :  { %v13520_v40 = vpack.c.bf16 %v8314_v54, %v8312_v29 }
0x1a18   :  { %v7775_v1 = vpop.xlane.xlu0 %7774 }
0x1a19   :  { %v7776_v55 = vmul.f32 0.015625, %v7775_v1  ;;  %v13489_v1 = vpack.c.bf16 %v8302_v36, %v8300_v46  ;;  %v10314_v46 = vpack.c.bf16 %v8132_v5, %v8131_v10  ;;  %v8133_v36 = vld [vmem:[#allocation32 + $0x30] sm:$0xff] }
0x1a1b   :  { %v7777_v44 = vadd.f32 1e-05, %v7776_v55  ;;  %v8299_v55 = vld [vmem:[%s13966_s11 + $0x20] sm:$0xff] }
0x1a1c   :  { %v7962_v17 = vpop.xlane.xlu0 %7961 }
0x1a1d   :  { %10798 = vrsqrt.f32 %v7777_v44  ;;  %v8301_v44 = vld [vmem:[%s13966_s11 + $0x30] sm:$0xff] }
0x1a27   :  { %v10799_v4 = vpop.eup %10798 }
0x1a28   :  { %v7779_v58 = vmul.f32 %v10799_v4, %v7771_v26  ;;  %v7970_v26 = vld [vmem:[#allocation30 + $0x28] sm:$0xff] }
0x1a29   :  { %v8304_v4 = vld [vmem:[%s13966_s11 + $0x48] sm:$0xff] }
0x1a2a   :  { %v7786_v47 = vmul.f32 %v9277_v15, %v7779_v58  ;;  %v8306_v15 = vld [vmem:[%s13966_s11 + $0x58] sm:$0xff]  ;;  %v13497_v58 = vpack.c.bf16 %v8301_v44, %v8299_v55  ;;  %v8286_v44 = vlaneseq }
0x1a2c   :  { %v7793_v30 = vadd.f32 %v9278_v59, %v7786_v47  ;;  %v13500_v59 = vpack.c.bf16 %v8306_v15, %v8304_v4  ;;  %v8303_v47 = vld [vmem:[%s13966_s11 + $0x40] sm:$0xff]  ;;  %v13571_v4 = vshrl.u32 %v8286_v44, 7 }
0x1a2e   :  { %10122 = vmatmul.mubr.msk.f32.vlgmr.msra.gmra.mrb[86].mxu0 %vm803_vm1, %v7793_v30  ;;  %v8305_v30 = vld [vmem:[%s13966_s11 + $0x50] sm:$0xff]  ;;  %v8332_v15 = vsub.s32 0, %v13571_v4 }
0x1a2f   :  { %10145 = vmatprep.mubr.msk.f32.mxu0 %vm11427_vm0, %v13959_v20  ;;  %v13507_v63 = vpack.c.bf16 %v8305_v30, %v8303_v47  ;;  %v8327_v47 = vld [vmem:[%s11671_s29] sm:$0x3]  ;;  %v8336_v30 = vsub.s32 1, %v13571_v4  ;;  %s11434_s29 = smov [#allocation35]  }
0x1a30   :  { %v13578_v37 = vrot.slane %v8327_v47, %v8332_v15 }
0x1a31   :  { %v13582_v43 = vrot.slane %v8327_v47, %v8336_v30 }
0x1b01   :  { %v7869_v22 = vpop.f32.mrb[86].mxu0 }
0x1b02   :  { %v7870_v49 = vadd.f32 %v9279_v34, %v7869_v22  ;;  %v10123_v6 = vpop.f32.mrb[87].mxu0  ;;  %v8311_v22 = vld [vmem:[%s13966_s11 + $0x80] sm:$0xff] }
0x1b03   :  { %v8316_v6 = vld [vmem:[%s13966_s11 + $0xa8] sm:$0xff] }
0x1b04   :  { %v7874_v52 = vmul.f32 0.70710677, %v7870_v49  ;;  %v7873_v62 = vmul.f32 0.5, %v7870_v49  ;;  %v8313_v49 = vld [vmem:[%s13966_s11 + $0x90] sm:$0xff] }
0x1b06   :  { %10800 = verf.f32 %v7874_v52  ;;  %v13528_v52 = vpack.c.bf16 %v8313_v49, %v8311_v22  ;;  %v8534_v22 = vld [vmem:[#allocation33 + $0x8] sm:$0xff]  ;;  %v8536_v49 = vld [vmem:[#allocation33 + $0x18] sm:$0xff] }
0x1b07   :  { %10802 = vrcp.f32 %v7962_v17  ;;  %v8320_v17 = vld [vmem:[%s13966_s11 + $0xc8] sm:$0xff] }
0x1b10   :  { %v10801_v32 = vpop.eup %10800 }
0x1b11   :  { %v7876_v35 = vadd.f32 1.0, %v10801_v32  ;;  %v10803_v7 = vpop.eup %10802  ;;  %v8318_v32 = vld [vmem:[%s13966_s11 + $0xb8] sm:$0xff] }
0x1b12   :  { %v13467_v48 = vmul.f32 %v10803_v7, %v7959_v56  ;;  %v8309_v56 = vld [vmem:[%s13966_s11 + $0x70] sm:$0xff]  ;;  %v8322_v7 = vld [vmem:[%s13966_s11 + $0xd8] sm:$0xff] }
0x1b13   :  { %v7877_v57 = vmul.f32 %v7876_v35, %v7873_v62  ;;  %v13517_v14 = vpack.c.bf16 %v8309_v56, %v8307_v33  ;;  %v8315_v62 = vld [vmem:[%s13966_s11 + $0xa0] sm:$0xff]  ;;  %v8317_v35 = vld [vmem:[%s13966_s11 + $0xb0] sm:$0xff] }
0x1b15   :  { %10141 = vmatmul.mubr.msk.f32.vlgmr.msra.gmra.mrb[86].mxu1 %vm803_vm1, %v7877_v57  ;;  %v13533_v57 = vpack.c.bf16 %v8318_v32, %v8316_v6  ;;  %v8533_v6 = vld [vmem:[#allocation33] sm:$0xff]  ;;  %v8535_v32 = vld [vmem:[#allocation33 + $0x10] sm:$0xff] }
0x1b16   :  { %10169 = vmatprep.mubr.msk.f32.mxu1 %vm11427_vm0, %v13959_v20 }
0x1be8   :  { %v7947_v27 = vpop.f32.mrb[86].mxu1 }
0x1be9   :  { %v7951_v41 = vadd.f32 %v7947_v27, %v13436_v8  ;;  %v10142_v23 = vpop.f32.mrb[87].mxu1  ;;  %v7969_v8 = vld [vmem:[#allocation30 + $0x20] sm:$0xff]  ;;  %v13541_v27 = vpack.c.bf16 %v8322_v7, %v8320_v17 }
0x1bea   :  { %v10302_v42 = vpack.c.bf16 %v7970_v26, %v7969_v8  ;;  %v8326_v23 = vld [vmem:[%s13966_s11 + $0xf8] sm:$0xff] }
0x1beb   :  { %v7958_v21 = vadd.f32 %v9282_v24, %v7951_v41  ;;  %v13538_v24 = vpack.c.bf16 %v8317_v35, %v8315_v62  ;;  %v8324_v41 = vld [vmem:[%s13966_s11 + $0xe8] sm:$0xff]  ;;  %v8540_v35 = vld [vmem:[#allocation33 + $0x38] sm:$0xff]  ;;  %v8537_v7 = vld [vmem:[#allocation33 + $0x20] sm:$0xff] }
0x1bec   :  { %v8538_v62 = vld [vmem:[#allocation33 + $0x28] sm:$0xff] }
0x1bed   :  { %10144 = vmatpush3.msra.mxu0 %v7958_v21  ;;  %v13548_v21 = vpack.c.bf16 %v8321_v39, %v8319_v2  ;;  %v13617_v17 = vpack.c.bf16 %v8540_v35, %v8538_v62  ;;  %v8544_v2 = vld [vmem:[#allocation33 + $0x58] sm:$0xff] }
0x1bee   :  { %10146 = vmatmul.mubr.msk.f32.vlgmr.msra.gmra.mrb[88].mxu0 %vm5995_vm3, %v13467_v48  ;;  %10295 = vmatprep.subr.bf16.mxu0 %v11433_v25 }
0x1bef   :  { %10297 = vmatpush3.bf16.msra.mxu0 %v10296_v50  ;;  %10164 = vmatprep.mubr.msk.f32.mxu0 %vm11427_vm0, %v13959_v20  ;;  %v13551_v50 = vpack.c.bf16 %v8326_v23, %v8324_v41  ;;  %v8541_v23 = vld [vmem:[#allocation33 + $0x40] sm:$0xff] }
0x1bf0   :  { %10298 = vmatprep.subr.bf16.mxu0 %v11433_v25 }
0x1bf3   :  { %10300 = vmatpush3.bf16.msra.mxu0 %v10299_v28  ;;  %v13556_v28 = vpack.c.bf16 %v8325_v38, %v8323_v31  ;;  %v8548_v31 = vld [vmem:[#allocation33 + $0x78] sm:$0xff] }
0x1bf4   :  { %10301 = vmatprep.subr.bf16.mxu0 %v11433_v25 }
0x1bf7   :  { %10303 = vmatpush3.bf16.msra.mxu0 %v10302_v42  ;;  %v8127_v42 = vld [vmem:[#allocation32] sm:$0xff] }
0x1bf8   :  { %10304 = vmatprep.subr.bf16.mxu0 %v11433_v25 }
0x1bfb   :  { %10306 = vmatpush3.bf16.msra.mxu0 %v10305_v12 }
0x1bfc   :  { %10320 = vmatprep.subr.bf16.mxu0 %v13482_v45 }
0x1cc1   :  { %v8042_v19 = vpop.f32.mrb[88].mxu0 }
0x1cc2   :  { %v10147_v13 = vpop.f32.mrb[89].mxu0  ;;  %10165 = vmatmul.mubr.msk.f32.vlgmr.msra.gmra.mrb[90].mxu0 %vm803_vm1, %v8042_v19  ;;  %v10308_v19 = vpack.c.bf16 %v8128_v3, %v8127_v42  ;;  %v8550_v42 = vld [vmem:[#allocation33 + $0x88] sm:$0xff]  ;;  %v8552_v3 = vld [vmem:[#allocation33 + $0x98] sm:$0xff] }
0x1cc3   :  { %8404 = vmatprep.mubr.f32.mxu0 %v13959_v20  ;;  %10322 = vmatpush1.bf16.msra.mxu0 %v13487_v16  ;;  %v8129_v13 = vld [vmem:[#allocation32 + $0x10] sm:$0xff] }
0x1cc4   :  { %10324 = vmatprep.subr.bf16.mxu0 %v13489_v1  ;;  %v10311_v0 = vpack.c.bf16 %v8130_v18, %v8129_v13  ;;  %v8551_v13 = vld [vmem:[#allocation33 + $0x90] sm:$0xff]  ;;  %v8554_v18 = vld [vmem:[#allocation33 + $0xa8] sm:$0xff] }
0x1cc7   :  { %10326 = vmatpush1.bf16.msra.mxu0 %v13497_v58 }
0x1cc8   :  { %10328 = vmatprep.subr.bf16.mxu0 %v13500_v59 }
0x1ccb   :  { %10330 = vmatpush1.bf16.msra.mxu0 %v13507_v63 }
0x1ccc   :  { %10332 = vmatprep.subr.bf16.mxu0 %v13510_v9 }
0x1ccf   :  { %10334 = vmatpush1.bf16.msra.mxu0 %v13517_v14 }
0x1cd0   :  { %10336 = vmatprep.subr.bf16.mxu0 %v13520_v40 }
0x1cd3   :  { %10338 = vmatpush1.bf16.msra.mxu0 %v13528_v52 }
0x1cd4   :  { %10340 = vmatprep.subr.bf16.mxu0 %v13533_v57 }
0x1cd7   :  { %10342 = vmatpush1.bf16.msra.mxu0 %v13538_v24 }
0x1cd8   :  { %10344 = vmatprep.subr.bf16.mxu0 %v13541_v27 }
0x1cdb   :  { %10346 = vmatpush1.bf16.msra.mxu0 %v13548_v21 }
0x1cdc   :  { %10348 = vmatprep.subr.bf16.mxu0 %v13551_v50 }
0x1cdf   :  { %10350 = vmatpush1.bf16.msra.mxu0 %v13556_v28 }
0x1d95   :  { %v8115_v60 = vpop.f32.mrb[90].mxu0 }
0x1d96   :  { %v8119_v11 = vmax.f32 %v8115_v60, 0.0  ;;  %v10166_v53 = vpop.f32.mrb[91].mxu0 }
0x1d98   :  { %v8120_v61 = vmul.f32 %v8119_v11, %v8119_v11 }
0x1d9a   :  { %v8121_v34 = vsel %vm803_vm1, %v8120_v61, 0.0 }
0x1d9b   :  { %8122 = vadd.xlane.f32.xlu1 %v8121_v34 }
0x1e28   :  { %v8123_v8 = vpop.xlane.xlu1 %8122 }
0x1e29   :  { %v8124_v26 = vmax.f32 %v8123_v8, 1e-24  ;;  %v8545_v8 = vld [vmem:[#allocation33 + $0x60] sm:$0xff] }
0x1e2b   :  { %10804 = vrsqrt.f32 %v8124_v26  ;;  %v8547_v26 = vld [vmem:[#allocation33 + $0x70] sm:$0xff] }
0x1e35   :  { %v10805_v51 = vpop.eup %10804 }
0x1e36   :  { %v8126_v12 = vmul.f32 %v10805_v51, %v8119_v11  ;;  %v10397_v51 = vpack.c.bf16 %v8547_v26, %v8545_v8 }
0x1e38   :  { %10168 = vmatpush3.msra.mxu1 %v8126_v12  ;;  %9287 = vmatmul.mubr.msk.f32.vlgmr.msra.gmra.mrb[92].mxu0 %vm803_vm1, %v8126_v12  ;;  %v10399_v12 = vpack.c.bf16 %v8552_v3, %v8550_v42 }
0x1e39   :  { %10170 = vmatmul.mubr.msk.f32.vlgmr.msra.gmra.mrb[88].mxu1 %vm5995_vm3, %v13467_v48  ;;  %10307 = vmatprep.subr.bf16.mxu1 %v11433_v25  ;;  %v8134_v48 = vld [vmem:[#allocation32 + $0x38] sm:$0xff] }
0x1e3a   :  { %10309 = vmatpush3.bf16.msra.mxu1 %v10308_v19  ;;  %10188 = vmatprep.mubr.msk.f32.mxu1 %vm11427_vm0, %v13959_v20  ;;  %v10317_v55 = vpack.c.bf16 %v8134_v48, %v8133_v36  ;;  %v8549_v19 = vld [vmem:[#allocation33 + $0x80] sm:$0xff]  ;;  %v8555_v36 = vld [vmem:[#allocation33 + $0xb0] sm:$0xff]  ;;  %v8558_v48 = vld [vmem:[#allocation33 + $0xc8] sm:$0xff] }
0x1e3b   :  { %10310 = vmatprep.subr.bf16.mxu1 %v11433_v25  ;;  %8646 = vmatprep.mubr.f32.mxu0 %v13959_v20  ;;  %v10401_v10 = vpack.c.bf16 %v8551_v13, %v8549_v19 }
0x1e3e   :  { %10312 = vmatpush3.bf16.msra.mxu1 %v10311_v0  ;;  %v8556_v0 = vld [vmem:[#allocation33 + $0xb8] sm:$0xff] }
0x1e3f   :  { %10313 = vmatprep.subr.bf16.mxu1 %v11433_v25  ;;  %v10403_v5 = vpack.c.bf16 %v8556_v0, %v8554_v18 }
0x1e42   :  { %10315 = vmatpush3.bf16.msra.mxu1 %v10314_v46  ;;  %v8553_v46 = vld [vmem:[#allocation33 + $0xa0] sm:$0xff] }
0x1e43   :  { %10316 = vmatprep.subr.bf16.mxu1 %v11433_v25 }
0x1e46   :  { %10318 = vmatpush3.bf16.msra.mxu1 %v10317_v55  ;;  %v8560_v55 = vld [vmem:[#allocation33 + $0xd8] sm:$0xff] }
0x1e47   :  { %10352 = vmatprep.subr.bf16.mxu1 %v13482_v45  ;;  %v10407_v47 = vpack.c.bf16 %v8560_v55, %v8558_v48 }
0x1f0b   :  { %v8406_v25 = vpop.f32.mrb[92].mxu0 }
0x1f0c   :  { %v8407_v33 = vadd.f32 %v8406_v25, %v13578_v37  ;;  %v8201_v45 = vpop.f32.mrb[88].mxu1  ;;  %v8408_v56 = vpop.f32.mrb[93].mxu0  ;;  %v8557_v25 = vld [vmem:[#allocation33 + $0xc0] sm:$0xff] }
0x1f0d   :  { %v8409_v29 = vadd.f32 %v8408_v56, %v13582_v43  ;;  %v10171_v54 = vpop.f32.mrb[89].mxu1  ;;  %10189 = vmatmul.mubr.msk.f32.vlgmr.msra.gmra.mrb[90].mxu1 %vm803_vm1, %v8201_v45 }
0x1f0e   :  { %v9288_v60 = vmul.f32 -1.442695, %v8407_v33  ;;  %10354 = vmatpush1.bf16.msra.mxu1 %v13487_v16  ;;  %8501 = vmatprep.mubr.f32.mxu1 %v13959_v20  ;;  %v8559_v33 = vld [vmem:[#allocation33 + $0xd0] sm:$0xff] }
0x1f0f   :  { %v9289_v11 = vmul.f32 -1.442695, %v8409_v29  ;;  %10356 = vmatprep.subr.bf16.mxu1 %v13489_v1  ;;  %v8287_v1 = vand.u32 127, %v8286_v44  ;;  %v10405_v44 = vpack.c.bf16 %v8555_v36, %v8553_v46  ;;  %v10409_v45 = vpack.c.bf16 %v8559_v33, %v8557_v25 }
0x1f10   :  { %10806 = vpow2.f32 %v9288_v60 }
0x1f11   :  { %10808 = vpow2.f32 %v9289_v11 }
0x1f12   :  { %10358 = vmatpush1.bf16.msra.mxu1 %v13497_v58  ;;  %10810 = vtanh.f32 %v8409_v29  ;;  %v13598_v58 = vadd.s32 128, %v8287_v1  ;;  %v8564_v1 = vld [vmem:[#allocation33 + $0xf8] sm:$0xff] }
0x1f13   :  { %10360 = vmatprep.subr.bf16.mxu1 %v13500_v59 }
0x1f14   :  { %vm8292_vm6 = vcmp.lt.s32.totalorder %v13598_v58, 192 }
0x1f16   :  { %10362 = vmatpush1.bf16.msra.mxu1 %v13507_v63 }
0x1f17   :  { %10364 = vmatprep.subr.bf16.mxu1 %v13510_v9 }
0x1f1a   :  { %v10807_v53 = vpop.eup %10806  ;;  %10366 = vmatpush1.bf16.msra.mxu1 %v13517_v14 }
0x1f1b   :  { %v10809_v61 = vpop.eup %10808  ;;  %v8419_v16 = vadd.f32 1.0, %v10807_v53  ;;  %10368 = vmatprep.subr.bf16.mxu1 %v13520_v40 }
0x1f1c   :  { %v8420_v34 = vadd.f32 1.0, %v10809_v61  ;;  %v10811_v59 = vpop.eup %10810 }
0x1f1e   :  { %10812 = vrcp.f32 %v8420_v34  ;;  %10370 = vmatpush1.bf16.msra.mxu1 %v13528_v52  ;;  %v10383_v52 = vpack.c.bf16 %v8536_v49, %v8534_v22  ;;  %v8562_v34 = vld [vmem:[#allocation33 + $0xe8] sm:$0xff]  ;;  %v8563_v22 = vld [vmem:[#allocation33 + $0xf0] sm:$0xff] }
0x1f1f   :  { %10814 = vrcp.f32 %v8419_v16  ;;  %10372 = vmatprep.subr.bf16.mxu1 %v13533_v57  ;;  %v13615_v57 = vpack.c.bf16 %v8535_v32, %v8533_v6 }
0x1f20   :  { %10384 = vmatprep.subr.bf16.mxu0 %v10383_v52 }
0x1f21   :  { %10386 = vmatpush1.bf16.msra.mxu0 %v13615_v57 }
0x1f22   :  { %10374 = vmatpush1.bf16.msra.mxu1 %v13538_v24  ;;  %v8539_v24 = vld [vmem:[#allocation33 + $0x30] sm:$0xff]  ;;  %10388 = vmatprep.subr.bf16.mxu0 %v13617_v17 }
0x1f23   :  { %10376 = vmatprep.subr.bf16.mxu1 %v13541_v27  ;;  %v8542_v27 = vld [vmem:[#allocation33 + $0x48] sm:$0xff]  ;;  %v13620_v39 = vpack.c.bf16 %v8539_v24, %v8537_v7 }
0x1f24   :  { %v13623_v41 = vpack.c.bf16 %v8544_v2, %v8542_v27 }
0x1f25   :  { %10390 = vmatpush1.bf16.msra.mxu0 %v13620_v39 }
0x1f26   :  { %10378 = vmatpush1.bf16.msra.mxu1 %v13548_v21  ;;  %v8543_v21 = vld [vmem:[#allocation33 + $0x50] sm:$0xff]  ;;  %10392 = vmatprep.subr.bf16.mxu0 %v13623_v41 }
0x1f27   :  { %10380 = vmatprep.subr.bf16.mxu1 %v13551_v50  ;;  %v8546_v50 = vld [vmem:[#allocation33 + $0x68] sm:$0xff]  ;;  %v13626_v38 = vpack.c.bf16 %v8543_v21, %v8541_v23 }
0x1f28   :  { %v10813_v63 = vpop.eup %10812 }
0x1f29   :  { %v13605_v9 = vpop.eup %10814  ;;  %v13609_v14 = vsel %vm8292_vm6, %v10811_v59, %v10813_v63  ;;  %10394 = vmatpush1.bf16.msra.mxu0 %v13626_v38  ;;  %v8561_v59 = vld [vmem:[#allocation33 + $0xe0] sm:$0xff] }
0x1f2a   :  { %v8428_v40 = vmul.f32 %v13605_v9, %v13609_v14  ;;  %10382 = vmatpush1.bf16.msra.mxu1 %v13556_v28  ;;  %v13629_v28 = vpack.c.bf16 %v8548_v31, %v8546_v50  ;;  %v8427_v61 = vmul.f32 0.0, %v13605_v9  ;;  %v10413_v49 = vpack.c.bf16 %v8563_v22, %v8561_v59 }
0x1f2b   :  { %10416 = vmatprep.subr.bf16.mxu1 %v10383_v52 }
0x1f2c   :  { %8430 = vrot.lane.b32.xlu1 %v8428_v40, %s11414_s16  ;;  %10396 = vmatprep.subr.bf16.mxu0 %v13629_v28  ;;  %v10411_v40 = vpack.c.bf16 %v8564_v1, %v8562_v34 }
0x1f2d   :  { %10398 = vmatpush1.bf16.msra.mxu0 %v10397_v51 }
0x1f2e   :  { %10400 = vmatprep.subr.bf16.mxu0 %v10399_v12 }
0x1f31   :  { %10402 = vmatpush1.bf16.msra.mxu0 %v10401_v10 }
0x1f32   :  { %10404 = vmatprep.subr.bf16.mxu0 %v10403_v5 }
0x1f35   :  { %10406 = vmatpush1.bf16.msra.mxu0 %v10405_v44 }
0x1f36   :  { %10408 = vmatprep.subr.bf16.mxu0 %v10407_v47 }
0x1f39   :  { %10410 = vmatpush1.bf16.msra.mxu0 %v10409_v45 }
0x1f3a   :  { %10412 = vmatprep.subr.bf16.mxu0 %v10411_v40 }
0x1f3d   :  { %10414 = vmatpush1.bf16.msra.mxu0 %v10413_v49 }
0x1f9e   :  { %v8431_v53 = vpop.permute.xlu1 %8430 }
0x1f9f   :  { %v13635_v16 = vadd.f32 %v8431_v53, %v8427_v61 }
0x1fa1   :  { %10816 = vtanh.f32 %v13635_v16 }
0x1fab   :  { %v10817_v63 = vpop.eup %10816 }
0x1fac   :  { %v8435_v6 = vmul.f32 %v10817_v63, %v13609_v14 }
0x1fe0   :  { %v8274_v56 = vpop.f32.mrb[90].mxu1 }
0x1fe1   :  { %v8278_v29 = vmax.f32 %v8274_v56, 0.0  ;;  %v10190_v54 = vpop.f32.mrb[91].mxu1 }
0x1fe3   :  { %v8279_v60 = vmul.f32 %v8278_v29, %v8278_v29 }
0x1fe5   :  { %v8280_v11 = vsel %vm803_vm1, %v8279_v60, 0.0 }
0x1fe6   :  { %8281 = vadd.xlane.f32.xlu0 %v8280_v11 }
0x1ffc   :  { %8567 = vrot.lane.b32.xlu0 %v8435_v6, %s11414_s16 }
0x2073   :  { %v8282_v52 = vpop.xlane.xlu0 %8281 }
0x2074   :  { %v8283_v32 = vmax.f32 %v8282_v52, 1e-24 }
0x2076   :  { %10818 = vrsqrt.f32 %v8283_v32 }
0x2077   :  { %v8568_v9 = vpop.permute.xlu0 %8567 }
0x2078   :  { %9292 = vmatmul.mubr.msk.f32.vlgmr.msra.gmra.mrb[94].mxu0 %vm803_vm1, %v8568_v9 }
0x2080   :  { %v10819_v62 = vpop.eup %10818 }
0x2081   :  { %v8285_v35 = vmul.f32 %v10819_v62, %v8278_v29 }
0x2083   :  { %v8436_v7 = vsel %vm803_vm1, %v8285_v35, %v8435_v6 }
0x2084   :  { %8502 = vmatmul.mubr.f32.vlgmr.msra.gmra.mrb[92].mxu1 %v8436_v7 }
0x2085   :  { %10418 = vmatpush1.bf16.msra.mxu1 %v13615_v57  ;;  %8747 = vmatprep.mubr.f32.mxu1 %v13959_v20  ;;  %v8565_v20 = vld [vmem:[%s11681_s8] sm:$0x3]  ;;  %s8792_s8 = sshll.u32 %s11434_s29, 4  ;;  %s8793_s8 = int_to_ptr.vmem [resolvable:$true] %s8792_s8 }
0x2086   :  { %10420 = vmatprep.subr.bf16.mxu1 %v13617_v17  ;;  %v8579_v17 = vrot.slane %v8565_v20, %v8336_v30  ;;  %v8575_v27 = vrot.slane %v8565_v20, %v8332_v15  ;;  %s11304_s1 = scalar_lea.vmem %s8793_s8, 128  ;;  %p11309_p7 = scmp.lt.s32.totalorder %s8793_s8, %s8793_s8 }
0x2087   :  { %p11305_p6 = scmp.ne.s32.totalorder %s8793_s8, %s11304_s1  ;;  %p11310_p8 = scmp.lt.s32.totalorder %s11304_s1, %s11304_s1 }
0x2089   :  { %10422 = vmatpush1.bf16.msra.mxu1 %v13620_v39  ;;  %p11311_p9 = por %p11310_p8, %p11309_p7 }
0x208a   :  { %10424 = vmatprep.subr.bf16.mxu1 %v13623_v41 }
0x208b   :  { %p11312_p10 = pnand %p11311_p9, %p11305_p6 }
0x208d   :  { %10426 = vmatpush1.bf16.msra.mxu1 %v13626_v38 }
0x208e   :  { %10428 = vmatprep.subr.bf16.mxu1 %v13629_v28 }
0x2091   :  { %10430 = vmatpush1.bf16.msra.mxu1 %v10397_v51 }
0x2092   :  { %10432 = vmatprep.subr.bf16.mxu1 %v10399_v12 }
0x2095   :  { %10434 = vmatpush1.bf16.msra.mxu1 %v10401_v10 }
0x2096   :  { %10436 = vmatprep.subr.bf16.mxu1 %v10403_v5 }
0x2099   :  { %10438 = vmatpush1.bf16.msra.mxu1 %v10405_v44 }
0x209a   :  { %10440 = vmatprep.subr.bf16.mxu1 %v10407_v47 }
0x209d   :  { %10442 = vmatpush1.bf16.msra.mxu1 %v10409_v45 }
0x209e   :  { %10444 = vmatprep.subr.bf16.mxu1 %v10411_v40 }
0x20a1   :  { %10446 = vmatpush1.bf16.msra.mxu1 %v10413_v49 }
0x214b   :  { %v8648_v14 = vpop.f32.mrb[94].mxu0 }
0x214c   :  { %v8650_v57 = vpop.f32.mrb[95].mxu0  ;;  %v8649_v41 = vadd.f32 %v8648_v14, %v8575_v27 }
0x214d   :  { %v8651_v24 = vadd.f32 %v8650_v57, %v8579_v17 }
0x214e   :  { %v9293_v28 = vmul.f32 -1.442695, %v8649_v41 }
0x214f   :  { %v9294_v2 = vmul.f32 -1.442695, %v8651_v24 }
0x2151   :  { %10820 = vpow2.f32 %v9294_v2 }
0x2157   :  { %v8503_v39 = vpop.f32.mrb[92].mxu1 }
0x2158   :  { %v8504_v23 = vadd.f32 %v8503_v39, %v13578_v37  ;;  %v8505_v21 = vpop.f32.mrb[93].mxu1 }
0x2159   :  { %v8506_v50 = vadd.f32 %v8505_v21, %v13582_v43 }
0x215a   :  { %v9290_v31 = vmul.f32 -1.442695, %v8504_v23 }
0x215b   :  { %v9291_v38 = vmul.f32 -1.442695, %v8506_v50  ;;  %v10821_v30 = vpop.eup %10820 }
0x215c   :  { %10822 = vpow2.f32 %v9290_v31  ;;  %v8662_v26 = vadd.f32 1.0, %v10821_v30 }
0x215d   :  { %10824 = vpow2.f32 %v9291_v38 }
0x215e   :  { %10826 = vpow2.f32 %v9293_v28 }
0x215f   :  { %10828 = vtanh.f32 %v8506_v50 }
0x2160   :  { %10830 = vrcp.f32 %v8662_v26 }
0x2166   :  { %v10823_v8 = vpop.eup %10822 }
0x2167   :  { %v10825_v4 = vpop.eup %10824  ;;  %v8516_v15 = vadd.f32 1.0, %v10823_v8 }
0x2168   :  { %v10827_v42 = vpop.eup %10826  ;;  %v8517_v3 = vadd.f32 1.0, %v10825_v4 }
0x2169   :  { %v8661_v37 = vadd.f32 1.0, %v10827_v42  ;;  %v10829_v43 = vpop.eup %10828 }
0x216a   :  { %10832 = vrcp.f32 %v8517_v3  ;;  %v10831_v51 = vpop.eup %10830 }
0x216b   :  { %10834 = vrcp.f32 %v8516_v15 }
0x216c   :  { %10836 = vtanh.f32 %v8651_v24 }
0x216d   :  { %10838 = vrcp.f32 %v8661_v37 }
0x2174   :  { %v10833_v12 = vpop.eup %10832 }
0x2175   :  { %v10835_v19 = vpop.eup %10834  ;;  %v8523_v13 = vsel %vm8292_vm6, %v10829_v43, %v10833_v12 }
0x2176   :  { %v10837_v18 = vpop.eup %10836  ;;  %v8525_v0 = vmul.f32 %v10835_v19, %v8523_v13  ;;  %v8524_v36 = vmul.f32 %v10835_v19, %v13635_v16 }
0x2177   :  { %v8668_v10 = vsel %vm8292_vm6, %v10837_v18, %v10831_v51  ;;  %v10839_v5 = vpop.eup %10838 }
0x2178   :  { %8527 = vrot.lane.b32.xlu1 %v8525_v0, %s11414_s16  ;;  %v8670_v46 = vmul.f32 %v10839_v5, %v8668_v10  ;;  %v8669_v33 = vmul.f32 0.0, %v10839_v5 }
0x217c   :  { %8672 = vrot.lane.b32.xlu1 %v8670_v46, %s11414_s16 }
0x21ea   :  { %v8528_v48 = vpop.permute.xlu1 %8527 }
0x21eb   :  { %v8530_v55 = vadd.f32 %v8528_v48, %v8524_v36 }
0x21ed   :  { %10840 = vtanh.f32 %v8530_v55 }
0x21ee   :  { %v8673_v25 = vpop.permute.xlu1 %8672 }
0x21ef   :  { %v8675_v45 = vadd.f32 %v8673_v25, %v8669_v33 }
0x21f1   :  { %10842 = vtanh.f32 %v8675_v45 }
0x21f7   :  { %v10841_v44 = vpop.eup %10840 }
0x21f8   :  { %v8532_v47 = vmul.f32 %v10841_v44, %v8523_v13 }
0x21fa   :  { %8679 = vrot.lane.b32.xlu0 %v8532_v47, %s11414_s16 }
0x21fb   :  { %v10843_v56 = vpop.eup %10842 }
0x21fc   :  { %v8677_v29 = vmul.f32 %v10843_v56, %v8668_v10 }
0x226c   :  { %v8680_v54 = vpop.permute.xlu0 %8679 }
0x226d   :  { %v8682_v60 = vsel %vm803_vm1, %v8680_v54, %v8677_v29 }
0x226e   :  { %8748 = vmatmul.mubr.f32.vlgmr.msra.gmra.mrb[94].mxu1 %v8682_v60 }
0x2341   :  { %v8749_v11 = vpop.f32.mrb[94].mxu1 }
0x2342   :  { %v8750_v53 = vadd.f32 %v8749_v11, %v8575_v27  ;;  %v8751_v61 = vpop.f32.mrb[95].mxu1 }
0x2343   :  { %v8752_v16 = vadd.f32 %v8751_v61, %v8579_v17 }
0x2344   :  { %v9295_v34 = vmul.f32 -1.442695, %v8750_v53 }
0x2345   :  { %v9296_v1 = vmul.f32 -1.442695, %v8752_v16 }
0x2346   :  { %10844 = vpow2.f32 %v9295_v34 }
0x2347   :  { %10846 = vpow2.f32 %v9296_v1 }
0x2348   :  { %10848 = vtanh.f32 %v8752_v16 }
0x2350   :  { %v10845_v59 = vpop.eup %10844 }
0x2351   :  { %v10847_v63 = vpop.eup %10846  ;;  %v8762_v40 = vadd.f32 1.0, %v10845_v59 }
0x2352   :  { %v8763_v22 = vadd.f32 1.0, %v10847_v63  ;;  %v10849_v49 = vpop.eup %10848 }
0x2354   :  { %10850 = vrcp.f32 %v8763_v22 }
0x2355   :  { %10852 = vrcp.f32 %v8762_v40 }
0x235e   :  { %v10851_v6 = vpop.eup %10850 }
0x235f   :  { %v10853_v52 = vpop.eup %10852  ;;  %v8769_v32 = vsel %vm8292_vm6, %v10849_v49, %v10851_v6 }
0x2360   :  { %v8771_v9 = vmul.f32 %v10853_v52, %v8769_v32  ;;  %v8770_v62 = vmul.f32 %v10853_v52, %v8675_v45 }
0x2362   :  { %8773 = vrot.lane.b32.xlu1 %v8771_v9, %s11414_s16 }
0x23d4   :  { %v8774_v35 = vpop.permute.xlu1 %8773 }
0x23d5   :  { %v8776_v7 = vadd.f32 %v8774_v35, %v8770_v62 }
0x23d7   :  { %10854 = vtanh.f32 %v8776_v7 }
0x23e1   :  { %v10855_v20 = vpop.eup %10854 }
0x23e2   :  { %v8778_v14 = vmul.f32 %v10855_v20, %v8769_v32 }
0x23e4   :  { %v8779_v57 = vadd.f32 %v8778_v14, %v8677_v29 }
0x23e6   :  { %v8780_v17 = vmul.f32 0.5, %v8779_v57 }
0x23e8   :  { %8782 = vrot.lane.b32.xlu0 %v8780_v17, %s11414_s16 }
0x245a   :  { %v8783_v24 = vpop.permute.xlu0 %8782 }
0x245b   :  { %8785 = vst.msk [vmem:[#allocation35] sm:$0xff] %vm803_vm1, %v8783_v24 }
0x245c   :  { %11315 = shalt.err (!%p11312_p10)
}
0x245d   :  { %s11316_s18 = scalar_lea.hbm %s11686_s21, 128 }
0x245e   :  { %p11317_p11 = scmp.ne.s32.totalorder %s11686_s21, %s11316_s18  ;;  %p11320_p12 = scmp.lt.u32.totalorder %s11316_s18, %s11686_s21 }
0x2460   :  { %p11322_p13 = pnand %p11320_p12, %p11317_p11 }
0x2462   :  { %11325 = shalt.err (!%p11322_p13)
}
0x2463   :  { %8795 = dma.vmem_to_hbm [thread:$0]  %s8793_s8, 128, %s11686_s21, [#allocation5]  }
0x2464   :  { %11348 = dma.done.wait [#allocation5], 128  }
0x2465   :  { %11349 = vsyncadd [#allocation5], 4294967168 }
0x2466   :  { %8799 = vsyncpa [#allocation4], 1 }
0x2467   :  { %8800 = vsyncpa [#allocation7], 1 }
0x2468   :  { %8801 = vsyncpa [#allocation10], 1 }
0x2469   :  { %8802 = vsyncpa [#allocation13], 1 }
0x246a   :  { %8803 = vsyncpa [#allocation16], 1 }
0x246b   :  { %8804 = vsyncpa [#allocation19], 1 }
0x246c   :  { %8805 = vsyncpa [#allocation22], 1 }
0x246d   :  { %8806 = vsyncpa [#allocation25], 1 }
0x246e   :  { %8807 = vsyncpa [#allocation28], 1 }
0x246f   :  { %8808 = vsyncpa [#allocation31], 1 }
0x2470   :  { %8809 = vsyncpa [#allocation34], 1 }
0x2471   :  { %8810 = vsyncpa [#allocation5], 1 }

</bundles_post_ra>
